<compile_context>
chip_gen: v6e
topology: v6e:2x2x1
jax: 0.10.0
libtpu: 0.0.40
codegen_flags: <defaults>
</compile_context>

<pallas_src>
import jax
import jax.numpy as jnp
from jax.experimental import pallas as pl
from jax.experimental.pallas import tpu as pltpu

# ----------------------------- model config ---------------------------------
B = 8          # batch
T = 8          # n_steps
F = 16         # n_features
H = 32         # rnn_hidden_size
TB = T * B
LAMBDA_MSE = 1.0
HINT_RATE = 0.7
DROPOUT_RATE = 0.0  # TODO(synk): dropout_rate > 0 not implemented (PyPOTS default is 0.0 -> identity)

_VMEM = pltpu.MemorySpace.VMEM
_SMEM = pltpu.MemorySpace.SMEM


# --------------------------- weight-slab layout -------------------------------
def _slab_layout():
    """Static layout of every weight/bias inside one packed f32 slab."""
    entries = []
    for d in ("f", "b"):
        entries += [
            ("Whh_hist_" + d, H, 4 * H + F),   # [Whh | Whist] fused (gates | history reg)
            ("Wihc_" + d, F, 4 * H),
            ("Wihm_" + d, F, 4 * H),
            ("Wdh_" + d, F, H),
            ("Wcg_" + d, F, F),
            ("Wcm_" + d, F, F),
            ("Wfeat_" + d, F, F),              # zero-diag enforced at init
            ("bdh_" + d, 1, H),
            ("wdx_" + d, 1, F),
            ("bdx_" + d, 1, F),
            ("bhist_" + d, 1, F),
            ("bfeat_" + d, 1, F),
            ("bcomb_" + d, 1, F),
            ("blstm_" + d, 1, 4 * H),
        ]
    entries += [
        ("Wgi_f", 2 * F, 3 * H), ("Whf", H, 3 * H), ("bif", 1, 3 * H), ("bhf", 1, 3 * H),
        ("Wgi_b", 2 * F, 3 * H), ("Whb", H, 3 * H), ("bib", 1, 3 * H), ("bhb", 1, 3 * H),
        ("Wro", 2 * H, F), ("bro", 1, F),
    ]
    offs, r = {}, 0
    for name, rows, cols in entries:
        offs[name] = (r, rows, cols)
        r += ((rows + 7) // 8) * 8             # keep every block sublane-aligned
    width = max(c for _, _, c in entries)      # = 144
    return offs, r, width


_OFF, _SLAB_ROWS, _SLAB_COLS = _slab_layout()


def pack_slab(wd):
    slab = jnp.zeros((_SLAB_ROWS, _SLAB_COLS), jnp.float32)
    for name, (r0, rows, cols) in _OFF.items():
        slab = slab.at[r0:r0 + rows, :cols].set(wd[name].reshape(rows, cols))
    return slab


# ------------------------------ fused kernel ----------------------------------
def usgan_kernel(data_ref, slab_ref,
                 imputed_ref, recon_ref, frec_ref, brec_ref, logits_ref, loss_ref):
    # data: (5, T*B, F) time-major forward order: [X, mask, delta_fwd, delta_bwd, hint]
    x = data_ref[0]
    m = data_ref[1]
    d_f = data_ref[2]
    d_b = data_ref[3]
    hint = data_ref[4]
    numel = float(TB * F)

    def w(name):
        r0, rows, cols = _OFF[name]
        return slab_ref[r0:r0 + rows, 0:cols]

    # ------------- generator: batched (non-recurrent) precompute per direction -------------
    def precompute(delta, suf):
        gamma_h = jnp.exp(-jnp.maximum(
            jnp.dot(delta, w("Wdh_" + suf), preferred_element_type=jnp.float32)
            + w("bdh_" + suf), 0.0))                                             # (TB, H)
        gamma_x = jnp.exp(-jnp.maximum(delta * w("wdx_" + suf) + w("bdx_" + suf), 0.0))
        beta = jax.nn.sigmoid(
            jnp.dot(gamma_x, w("Wcg_" + suf), preferred_element_type=jnp.float32)
            + jnp.dot(m, w("Wcm_" + suf), preferred_element_type=jnp.float32)
            + w("bcomb_" + suf))                                                 # (TB, F)
        gm = (jnp.dot(m, w("Wihm_" + suf), preferred_element_type=jnp.float32)
              + w("blstm_" + suf))                                               # (TB, 4H)
        return gamma_h, beta, gm

    gh_f, beta_f, gm_f = precompute(d_f, "f")
    gh_b, beta_b, gm_b = precompute(d_b, "b")

    # recurrent weights loaded exactly once (hoisted)
    Wrec_f = (w("Whh_hist_f"), w("Wfeat_f"), w("Wihc_f"), w("bhist_f"), w("bfeat_f"))
    Wrec_b = (w("Whh_hist_b"), w("Wfeat_b"), w("Wihc_b"), w("bhist_b"), w("bfeat_b"))

    def rits_step(t, h, c, gh_all, beta_all, gm_all, wrec):
        Whh_hist, Wfeat, Wihc, bhist, bfeat = wrec
        r0, r1 = t * B, (t + 1) * B
        xt, mt = x[r0:r1], m[r0:r1]
        h = h * gh_all[r0:r1]
        hx = jnp.dot(h, Whh_hist, preferred_element_type=jnp.float32)  # (B, 4H+F)
        gates_h = hx[:, :4 * H]
        x_h = hx[:, 4 * H:] + bhist
        x_c = mt * xt + (1.0 - mt) * x_h
        z_h = jnp.dot(x_c, Wfeat, preferred_element_type=jnp.float32) + bfeat
        beta = beta_all[r0:r1]
        c_h = beta * z_h + (1.0 - beta) * x_h
        c_c = mt * xt + (1.0 - mt) * c_h
        gates = (jnp.dot(c_c, Wihc, preferred_element_type=jnp.float32)
                 + gates_h + gm_all[r0:r1])
        i_g = jax.nn.sigmoid(gates[:, 0 * H:1 * H])
        f_g = jax.nn.sigmoid(gates[:, 1 * H:2 * H])
        g_g = jnp.tanh(gates[:, 2 * H:3 * H])
        o_g = jax.nn.sigmoid(gates[:, 3 * H:4 * H])
        c = f_g * c + i_g * g_g
        h = o_g * jnp.tanh(c)
        return h, c, c_h, c_c

    hf = jnp.zeros((B, H), jnp.float32); cf = jnp.zeros((B, H), jnp.float32)
    hb = jnp.zeros((B, H), jnp.float32); cb = jnp.zeros((B, H), jnp.float32)
    rec_f = [None] * T; imp_f = [None] * T
    rec_b = [None] * T; imp_b = [None] * T
    # fully-unrolled; forward (time s) and backward (time T-1-s) chains interleaved
    for s in range(T):
        tb_ = T - 1 - s
        hf, cf, ch, cc = rits_step(s, hf, cf, gh_f, beta_f, gm_f, Wrec_f)
        rec_f[s], imp_f[s] = ch, cc
        hb, cb, ch, cc = rits_step(tb_, hb, cb, gh_b, beta_b, gm_b, Wrec_b)
        rec_b[tb_], imp_b[tb_] = ch, cc

    rec_f_seq = jnp.concatenate(rec_f, axis=0)     # (TB, F), forward time order
    rec_b_seq = jnp.concatenate(rec_b, axis=0)
    imp_f_seq = jnp.concatenate(imp_f, axis=0)
    imp_b_seq = jnp.concatenate(imp_b, axis=0)

    imputed = 0.5 * (imp_f_seq + imp_b_seq)
    recon = 0.5 * (rec_f_seq + rec_b_seq)

    # ----------------------------- discriminator (bi-GRU) -----------------------------
    h_disc = hint * m + (1.0 - hint) * 0.5
    disc_in = jnp.concatenate([imputed, h_disc], axis=1)            # (TB, 2F)
    gi_f = jnp.dot(disc_in, w("Wgi_f"), preferred_element_type=jnp.float32) + w("bif")
    gi_b = jnp.dot(disc_in, w("Wgi_b"), preferred_element_type=jnp.float32) + w("bib")
    Whf_v, bhf_v = w("Whf"), w("bhf")
    Whb_v, bhb_v = w("Whb"), w("bhb")

    def gru_step(gi, h, Whh, bh):
        gh = jnp.dot(h, Whh, preferred_element_type=jnp.float32) + bh
        r = jax.nn.sigmoid(gi[:, :H] + gh[:, :H])
        z = jax.nn.sigmoid(gi[:, H:2 * H] + gh[:, H:2 * H])
        n = jnp.tanh(gi[:, 2 * H:] + r * gh[:, 2 * H:])
        return (1.0 - z) * n + z * h

    hfd = jnp.zeros((B, H), jnp.float32)
    hbd = jnp.zeros((B, H), jnp.float32)
    outs_f = [None] * T; outs_b = [None] * T
    for s in range(T):
        tb_ = T - 1 - s
        hfd = gru_step(gi_f[s * B:(s + 1) * B], hfd, Whf_v, bhf_v)
        outs_f[s] = hfd
        hbd = gru_step(gi_b[tb_ * B:(tb_ + 1) * B], hbd, Whb_v, bhb_v)
        outs_b[tb_] = hbd

    h_cat = jnp.concatenate([jnp.concatenate(outs_f, axis=0),
                             jnp.concatenate(outs_b, axis=0)], axis=1)   # (TB, 2H)
    logits = jnp.dot(h_cat, w("Wro"), preferred_element_type=jnp.float32) + w("bro")

    # ----------------------------------- losses -----------------------------------
    bce = (jnp.maximum(logits, 0.0) - logits * m
           + jnp.log(1.0 + jnp.exp(-jnp.abs(logits))))       # stable BCE-with-logits
    l_D = jnp.sum(bce) / numel                                # reduction='mean'
    l_G = -jnp.sum((1.0 - m) * bce) / numel                   # weight=(1-mask), mean, negated

    diff = x - recon
    mse_masked = jnp.sum(diff * diff * m) / (jnp.sum(m) + 1e-12)   # calc_mse(X, recon, mask)
    dfb = rec_f_seq - rec_b_seq
    mse_fb = jnp.sum(dfb * dfb) / numel                            # calc_mse(f_recon, b_recon)
    consistency = jnp.sum(jnp.abs(imp_f_seq - imp_b_seq)) / numel * 0.1
    gen_loss = l_G + LAMBDA_MSE * (mse_masked + 0.1 * mse_fb)

    loss_ref[0] = consistency
    loss_ref[1] = l_D
    loss_ref[2] = l_G
    loss_ref[3] = mse_masked
    loss_ref[4] = mse_fb
    loss_ref[5] = gen_loss
    loss_ref[6] = jnp.float32(0.0)
    loss_ref[7] = jnp.float32(0.0)

    # ----------------------- each output ref written exactly once -----------------------
    imputed_ref[...] = imputed
    recon_ref[...] = recon
    frec_ref[...] = rec_f_seq
    brec_ref[...] = rec_b_seq
    logits_ref[...] = logits


def _usgan_pallas(data, slab):
    vmem = pl.BlockSpec(memory_space=_VMEM)
    smem = pl.BlockSpec(memory_space=_SMEM)
    flat = jax.ShapeDtypeStruct((TB, F), jnp.float32)
    return pl.pallas_call(
        usgan_kernel,
        out_shape=(flat, flat, flat, flat, flat,
                   jax.ShapeDtypeStruct((8,), jnp.float32)),
        in_specs=[vmem, vmem],
        out_specs=(vmem, vmem, vmem, vmem, vmem, smem),
    )(data, slab)


# ------------------------------ wrapper (layout + PRNG) ------------------------------
def _parse_deltas(mask_btf):
    """PyPOTS parse_delta for both directions, emitted in forward time order, flat (TB,F)."""
    zeros = jnp.zeros((B, F), jnp.float32)
    d_f = [zeros]
    for t in range(1, T):
        d_f.append(1.0 + (1.0 - mask_btf[:, t - 1, :]) * d_f[-1])
    d_b = [None] * T
    d_b[T - 1] = zeros
    for t in range(T - 2, -1, -1):
        d_b[t] = 1.0 + (1.0 - mask_btf[:, t + 1, :]) * d_b[t + 1]

    def flat(lst):
        return jnp.stack(lst, axis=0).reshape(TB, F)
    return flat(d_f), flat(d_b)


def usgan_forward(X, mask, hint_key, slab, training_object="generator", training=True):
    assert training_object in ("generator", "discriminator")

    # wrapper-side layout plumbing (time-major flat) + delta parsing + hint sampling
    x_flat = jnp.transpose(X, (1, 0, 2)).reshape(TB, F)
    m_flat = jnp.transpose(mask, (1, 0, 2)).reshape(TB, F)
    d_f, d_b = _parse_deltas(mask)
    hint = (jax.random.uniform(hint_key, (TB, F)) < HINT_RATE).astype(jnp.float32)
    data = jnp.stack([x_flat, m_flat, d_f, d_b, hint], axis=0)      # (5, TB, F)

    imputed, recon, frec, brec, logits, losses = _usgan_pallas(data, slab)

    def to_btf(flat):
        return jnp.transpose(flat.reshape(T, B, F), (1, 0, 2))

    results = {
        "imputed_data": to_btf(imputed),
        "reconstructed_data": to_btf(recon),
        "f_reconstructed_data": to_btf(frec),
        "b_reconstructed_data": to_btf(brec),
        "consistency_loss": losses[0],
    }
    if training:
        results["discrimination"] = to_btf(logits)
        if training_object == "discriminator":
            results["discrimination_loss"] = losses[1]
        else:
            results["generation_loss"] = losses[5]
    return results


# ------------------------------ parameter init --------------------------------
def init_params(key):
    keys = iter(jax.random.split(key, 64))

    def w_(shape, scale=0.1):
        return (scale * jax.random.normal(next(keys), shape)).astype(jnp.float32)

    wd = {}
    off_diag = 1.0 - jnp.eye(F, dtype=jnp.float32)
    for d in ("f", "b"):
        Whh = w_((H, 4 * H))
        Whist = w_((H, F))
        wd["Whh_hist_" + d] = jnp.concatenate([Whh, Whist], axis=1)   # [gates | history]
        wd["Wihc_" + d] = w_((F, 4 * H))
        wd["Wihm_" + d] = w_((F, 4 * H))
        wd["Wdh_" + d] = w_((F, H))
        wd["Wcg_" + d] = w_((F, F))
        wd["Wcm_" + d] = w_((F, F))
        wd["Wfeat_" + d] = w_((F, F)) * off_diag          # zero-diag feature regression
        wd["bdh_" + d] = w_((1, H))
        wd["wdx_" + d] = w_((1, F))
        wd["bdx_" + d] = w_((1, F))
        wd["bhist_" + d] = w_((1, F))
        wd["bfeat_" + d] = w_((1, F))
        wd["bcomb_" + d] = w_((1, F))
        wd["blstm_" + d] = w_((1, 4 * H))                 # b_ih + b_hh folded

    # discriminator: bidirectional GRU over cat([imputed, hint-masked mask]) + read-out
    wd["Wgi_f"] = jnp.concatenate([w_((F, 3 * H)), w_((F, 3 * H))], axis=0)   # (2F, 3H)
    wd["Whf"] = w_((H, 3 * H)); wd["bif"] = w_((1, 3 * H)); wd["bhf"] = w_((1, 3 * H))
    wd["Wgi_b"] = jnp.concatenate([w_((F, 3 * H)), w_((F, 3 * H))], axis=0)
    wd["Whb"] = w_((H, 3 * H)); wd["bib"] = w_((1, 3 * H)); wd["bhb"] = w_((1, 3 * H))
    wd["Wro"] = jnp.concatenate([w_((H, F)), w_((H, F))], axis=0)             # (2H, F)
    wd["bro"] = w_((1, F))
    return pack_slab(wd)


# ----------------------------------- main -------------------------------------
if __name__ == "__main__":
    key = jax.random.PRNGKey(0)
    k_param, k_x, k_mask, k_hint_g, k_hint_d = jax.random.split(key, 5)
    slab = init_params(k_param)

    X = jax.random.normal(k_x, (B, T, F), jnp.float32)
    mask = (jax.random.uniform(k_mask, (B, T, F)) > 0.3).astype(jnp.float32)
    X = X * mask  # missing entries zeroed, as in the PyPOTS preprocessing

    fwd = jax.jit(usgan_forward, static_argnames=("training_object", "training"))

    res_gen = fwd(X, mask, k_hint_g, slab, training_object="generator", training=True)
    res_dis = fwd(X, mask, k_hint_d, slab, training_object="discriminator", training=True)

    jax.block_until_ready(res_gen["imputed_data"])
    jax.block_until_ready(res_gen["generation_loss"])
    jax.block_until_ready(res_dis["discrimination_loss"])
    print("KERNEL_OK")
</pallas_src>

<mosaic_0001>
module attributes {stable_mosaic.version = 11 : i64} {
  func.func @usgan_kernel(%arg0: memref<5x64x16xf32, #tpu.memory_space<vmem>>, %arg1: memref<600x144xf32, #tpu.memory_space<vmem>>, %arg2: memref<64x16xf32, #tpu.memory_space<vmem>>, %arg3: memref<64x16xf32, #tpu.memory_space<vmem>>, %arg4: memref<64x16xf32, #tpu.memory_space<vmem>>, %arg5: memref<64x16xf32, #tpu.memory_space<vmem>>, %arg6: memref<64x16xf32, #tpu.memory_space<vmem>>, %arg7: memref<8xf32, #tpu.memory_space<smem>>) attributes {dimension_semantics = [], scalar_prefetch = 0 : i64, scratch_operands = 0 : i64, tpu.core_type = #tpu.core_type<tc>} {
    %c0 = arith.constant 0 : index
    %c0_0 = arith.constant 0 : index
    %c0_1 = arith.constant 0 : index
    %0 = vector.load %arg0[%c0, %c0_0, %c0_1] : memref<5x64x16xf32, #tpu.memory_space<vmem>>, vector<1x64x16xf32>
    %1 = vector.shape_cast %0 : vector<1x64x16xf32> to vector<64x16xf32>
    %c1 = arith.constant 1 : index
    %c0_2 = arith.constant 0 : index
    %c0_3 = arith.constant 0 : index
    %2 = vector.load %arg0[%c1, %c0_2, %c0_3] : memref<5x64x16xf32, #tpu.memory_space<vmem>>, vector<1x64x16xf32>
    %3 = vector.shape_cast %2 : vector<1x64x16xf32> to vector<64x16xf32>
    %c2 = arith.constant 2 : index
    %c0_4 = arith.constant 0 : index
    %c0_5 = arith.constant 0 : index
    %4 = vector.load %arg0[%c2, %c0_4, %c0_5] : memref<5x64x16xf32, #tpu.memory_space<vmem>>, vector<1x64x16xf32>
    %5 = vector.shape_cast %4 : vector<1x64x16xf32> to vector<64x16xf32>
    %c3 = arith.constant 3 : index
    %c0_6 = arith.constant 0 : index
    %c0_7 = arith.constant 0 : index
    %6 = vector.load %arg0[%c3, %c0_6, %c0_7] : memref<5x64x16xf32, #tpu.memory_space<vmem>>, vector<1x64x16xf32>
    %7 = vector.shape_cast %6 : vector<1x64x16xf32> to vector<64x16xf32>
    %c4 = arith.constant 4 : index
    %c0_8 = arith.constant 0 : index
    %c0_9 = arith.constant 0 : index
    %8 = vector.load %arg0[%c4, %c0_8, %c0_9] : memref<5x64x16xf32, #tpu.memory_space<vmem>>, vector<1x64x16xf32>
    %9 = vector.shape_cast %8 : vector<1x64x16xf32> to vector<64x16xf32>
    %c64 = arith.constant 64 : index
    %c0_10 = arith.constant 0 : index
    %10 = vector.load %arg1[%c64, %c0_10] : memref<600x144xf32, #tpu.memory_space<vmem>>, vector<16x32xf32>
    %cst = arith.constant dense<0.000000e+00> : vector<64x32xf32>
    %11 = tpu.matmul %5, %10, %cst {dimension_numbers = #tpu.dot_dimension_numbers<[1], [0], [0], [1], [0, 0, 1, 1], [], []>} : vector<64x16xf32>, vector<16x32xf32>, vector<64x32xf32> -> vector<64x32xf32>
    %c128 = arith.constant 128 : index
    %c0_11 = arith.constant 0 : index
    %12 = vector.load %arg1[%c128, %c0_11] : memref<600x144xf32, #tpu.memory_space<vmem>>, vector<1x32xf32>
    %13 = vector.broadcast %12 : vector<1x32xf32> to vector<64x32xf32>
    %14 = arith.addf %11, %13 : vector<64x32xf32>
    %cst_12 = arith.constant 0.000000e+00 : f32
    %15 = vector.broadcast %cst_12 : f32 to vector<64x32xf32>
    %16 = arith.maximumf %14, %15 : vector<64x32xf32>
    %cst_13 = arith.constant 0.000000e+00 : f32
    %17 = vector.broadcast %cst_13 : f32 to vector<64x32xf32>
    %18 = arith.subf %17, %16 : vector<64x32xf32>
    %19 = math.exp %18 : vector<64x32xf32>
    %c136 = arith.constant 136 : index
    %c0_14 = arith.constant 0 : index
    %20 = vector.load %arg1[%c136, %c0_14] : memref<600x144xf32, #tpu.memory_space<vmem>>, vector<1x16xf32>
    %21 = vector.broadcast %20 : vector<1x16xf32> to vector<64x16xf32>
    %22 = arith.mulf %5, %21 : vector<64x16xf32>
    %c144 = arith.constant 144 : index
    %c0_15 = arith.constant 0 : index
    %23 = vector.load %arg1[%c144, %c0_15] : memref<600x144xf32, #tpu.memory_space<vmem>>, vector<1x16xf32>
    %24 = vector.broadcast %23 : vector<1x16xf32> to vector<64x16xf32>
    %25 = arith.addf %22, %24 : vector<64x16xf32>
    %cst_16 = arith.constant 0.000000e+00 : f32
    %26 = vector.broadcast %cst_16 : f32 to vector<64x16xf32>
    %27 = arith.maximumf %25, %26 : vector<64x16xf32>
    %cst_17 = arith.constant 0.000000e+00 : f32
    %28 = vector.broadcast %cst_17 : f32 to vector<64x16xf32>
    %29 = arith.subf %28, %27 : vector<64x16xf32>
    %30 = math.exp %29 : vector<64x16xf32>
    %c80 = arith.constant 80 : index
    %c0_18 = arith.constant 0 : index
    %31 = vector.load %arg1[%c80, %c0_18] : memref<600x144xf32, #tpu.memory_space<vmem>>, vector<16x16xf32>
    %cst_19 = arith.constant dense<0.000000e+00> : vector<64x16xf32>
    %32 = tpu.matmul %30, %31, %cst_19 {dimension_numbers = #tpu.dot_dimension_numbers<[1], [0], [0], [1], [0, 0, 1, 1], [], []>} : vector<64x16xf32>, vector<16x16xf32>, vector<64x16xf32> -> vector<64x16xf32>
    %c96 = arith.constant 96 : index
    %c0_20 = arith.constant 0 : index
    %33 = vector.load %arg1[%c96, %c0_20] : memref<600x144xf32, #tpu.memory_space<vmem>>, vector<16x16xf32>
    %cst_21 = arith.constant dense<0.000000e+00> : vector<64x16xf32>
    %34 = tpu.matmul %3, %33, %cst_21 {dimension_numbers = #tpu.dot_dimension_numbers<[1], [0], [0], [1], [0, 0, 1, 1], [], []>} : vector<64x16xf32>, vector<16x16xf32>, vector<64x16xf32> -> vector<64x16xf32>
    %35 = arith.addf %32, %34 : vector<64x16xf32>
    %c168 = arith.constant 168 : index
    %c0_22 = arith.constant 0 : index
    %36 = vector.load %arg1[%c168, %c0_22] : memref<600x144xf32, #tpu.memory_space<vmem>>, vector<1x16xf32>
    %37 = vector.broadcast %36 : vector<1x16xf32> to vector<64x16xf32>
    %38 = arith.addf %35, %37 : vector<64x16xf32>
    %39 = arith.negf %38 : vector<64x16xf32>
    %40 = math.exp %39 : vector<64x16xf32>
    %cst_23 = arith.constant 1.000000e+00 : f32
    %41 = vector.broadcast %cst_23 : f32 to vector<64x16xf32>
    %42 = arith.addf %41, %40 : vector<64x16xf32>
    %43 = arith.divf %41, %42 : vector<64x16xf32>
    %c48 = arith.constant 48 : index
    %c0_24 = arith.constant 0 : index
    %44 = vector.load %arg1[%c48, %c0_24] : memref<600x144xf32, #tpu.memory_space<vmem>>, vector<16x128xf32>
    %cst_25 = arith.constant dense<0.000000e+00> : vector<64x128xf32>
    %45 = tpu.matmul %3, %44, %cst_25 {dimension_numbers = #tpu.dot_dimension_numbers<[1], [0], [0], [1], [0, 0, 1, 1], [], []>} : vector<64x16xf32>, vector<16x128xf32>, vector<64x128xf32> -> vector<64x128xf32>
    %c176 = arith.constant 176 : index
    %c0_26 = arith.constant 0 : index
    %46 = vector.load %arg1[%c176, %c0_26] : memref<600x144xf32, #tpu.memory_space<vmem>>, vector<1x128xf32>
    %47 = vector.broadcast %46 : vector<1x128xf32> to vector<64x128xf32>
    %48 = arith.addf %45, %47 : vector<64x128xf32>
    %c248 = arith.constant 248 : index
    %c0_27 = arith.constant 0 : index
    %49 = vector.load %arg1[%c248, %c0_27] : memref<600x144xf32, #tpu.memory_space<vmem>>, vector<16x32xf32>
    %cst_28 = arith.constant dense<0.000000e+00> : vector<64x32xf32>
    %50 = tpu.matmul %7, %49, %cst_28 {dimension_numbers = #tpu.dot_dimension_numbers<[1], [0], [0], [1], [0, 0, 1, 1], [], []>} : vector<64x16xf32>, vector<16x32xf32>, vector<64x32xf32> -> vector<64x32xf32>
    %c312 = arith.constant 312 : index
    %c0_29 = arith.constant 0 : index
    %51 = vector.load %arg1[%c312, %c0_29] : memref<600x144xf32, #tpu.memory_space<vmem>>, vector<1x32xf32>
    %52 = vector.broadcast %51 : vector<1x32xf32> to vector<64x32xf32>
    %53 = arith.addf %50, %52 : vector<64x32xf32>
    %cst_30 = arith.constant 0.000000e+00 : f32
    %54 = vector.broadcast %cst_30 : f32 to vector<64x32xf32>
    %55 = arith.maximumf %53, %54 : vector<64x32xf32>
    %cst_31 = arith.constant 0.000000e+00 : f32
    %56 = vector.broadcast %cst_31 : f32 to vector<64x32xf32>
    %57 = arith.subf %56, %55 : vector<64x32xf32>
    %58 = math.exp %57 : vector<64x32xf32>
    %c320 = arith.constant 320 : index
    %c0_32 = arith.constant 0 : index
    %59 = vector.load %arg1[%c320, %c0_32] : memref<600x144xf32, #tpu.memory_space<vmem>>, vector<1x16xf32>
    %60 = vector.broadcast %59 : vector<1x16xf32> to vector<64x16xf32>
    %61 = arith.mulf %7, %60 : vector<64x16xf32>
    %c328 = arith.constant 328 : index
    %c0_33 = arith.constant 0 : index
    %62 = vector.load %arg1[%c328, %c0_33] : memref<600x144xf32, #tpu.memory_space<vmem>>, vector<1x16xf32>
    %63 = vector.broadcast %62 : vector<1x16xf32> to vector<64x16xf32>
    %64 = arith.addf %61, %63 : vector<64x16xf32>
    %cst_34 = arith.constant 0.000000e+00 : f32
    %65 = vector.broadcast %cst_34 : f32 to vector<64x16xf32>
    %66 = arith.maximumf %64, %65 : vector<64x16xf32>
    %cst_35 = arith.constant 0.000000e+00 : f32
    %67 = vector.broadcast %cst_35 : f32 to vector<64x16xf32>
    %68 = arith.subf %67, %66 : vector<64x16xf32>
    %69 = math.exp %68 : vector<64x16xf32>
    %c264 = arith.constant 264 : index
    %c0_36 = arith.constant 0 : index
    %70 = vector.load %arg1[%c264, %c0_36] : memref<600x144xf32, #tpu.memory_space<vmem>>, vector<16x16xf32>
    %cst_37 = arith.constant dense<0.000000e+00> : vector<64x16xf32>
    %71 = tpu.matmul %69, %70, %cst_37 {dimension_numbers = #tpu.dot_dimension_numbers<[1], [0], [0], [1], [0, 0, 1, 1], [], []>} : vector<64x16xf32>, vector<16x16xf32>, vector<64x16xf32> -> vector<64x16xf32>
    %c280 = arith.constant 280 : index
    %c0_38 = arith.constant 0 : index
    %72 = vector.load %arg1[%c280, %c0_38] : memref<600x144xf32, #tpu.memory_space<vmem>>, vector<16x16xf32>
    %cst_39 = arith.constant dense<0.000000e+00> : vector<64x16xf32>
    %73 = tpu.matmul %3, %72, %cst_39 {dimension_numbers = #tpu.dot_dimension_numbers<[1], [0], [0], [1], [0, 0, 1, 1], [], []>} : vector<64x16xf32>, vector<16x16xf32>, vector<64x16xf32> -> vector<64x16xf32>
    %74 = arith.addf %71, %73 : vector<64x16xf32>
    %c352 = arith.constant 352 : index
    %c0_40 = arith.constant 0 : index
    %75 = vector.load %arg1[%c352, %c0_40] : memref<600x144xf32, #tpu.memory_space<vmem>>, vector<1x16xf32>
    %76 = vector.broadcast %75 : vector<1x16xf32> to vector<64x16xf32>
    %77 = arith.addf %74, %76 : vector<64x16xf32>
    %78 = arith.negf %77 : vector<64x16xf32>
    %79 = math.exp %78 : vector<64x16xf32>
    %cst_41 = arith.constant 1.000000e+00 : f32
    %80 = vector.broadcast %cst_41 : f32 to vector<64x16xf32>
    %81 = arith.addf %80, %79 : vector<64x16xf32>
    %82 = arith.divf %80, %81 : vector<64x16xf32>
    %c232 = arith.constant 232 : index
    %c0_42 = arith.constant 0 : index
    %83 = vector.load %arg1[%c232, %c0_42] : memref<600x144xf32, #tpu.memory_space<vmem>>, vector<16x128xf32>
    %cst_43 = arith.constant dense<0.000000e+00> : vector<64x128xf32>
    %84 = tpu.matmul %3, %83, %cst_43 {dimension_numbers = #tpu.dot_dimension_numbers<[1], [0], [0], [1], [0, 0, 1, 1], [], []>} : vector<64x16xf32>, vector<16x128xf32>, vector<64x128xf32> -> vector<64x128xf32>
    %c360 = arith.constant 360 : index
    %c0_44 = arith.constant 0 : index
    %85 = vector.load %arg1[%c360, %c0_44] : memref<600x144xf32, #tpu.memory_space<vmem>>, vector<1x128xf32>
    %86 = vector.broadcast %85 : vector<1x128xf32> to vector<64x128xf32>
    %87 = arith.addf %84, %86 : vector<64x128xf32>
    %c0_45 = arith.constant 0 : index
    %c0_46 = arith.constant 0 : index
    %88 = vector.load %arg1[%c0_45, %c0_46] : memref<600x144xf32, #tpu.memory_space<vmem>>, vector<32x144xf32>
    %c112 = arith.constant 112 : index
    %c0_47 = arith.constant 0 : index
    %89 = vector.load %arg1[%c112, %c0_47] : memref<600x144xf32, #tpu.memory_space<vmem>>, vector<16x16xf32>
    %c32 = arith.constant 32 : index
    %c0_48 = arith.constant 0 : index
    %90 = vector.load %arg1[%c32, %c0_48] : memref<600x144xf32, #tpu.memory_space<vmem>>, vector<16x128xf32>
    %c152 = arith.constant 152 : index
    %c0_49 = arith.constant 0 : index
    %91 = vector.load %arg1[%c152, %c0_49] : memref<600x144xf32, #tpu.memory_space<vmem>>, vector<1x16xf32>
    %c160 = arith.constant 160 : index
    %c0_50 = arith.constant 0 : index
    %92 = vector.load %arg1[%c160, %c0_50] : memref<600x144xf32, #tpu.memory_space<vmem>>, vector<1x16xf32>
    %c184 = arith.constant 184 : index
    %c0_51 = arith.constant 0 : index
    %93 = vector.load %arg1[%c184, %c0_51] : memref<600x144xf32, #tpu.memory_space<vmem>>, vector<32x144xf32>
    %c296 = arith.constant 296 : index
    %c0_52 = arith.constant 0 : index
    %94 = vector.load %arg1[%c296, %c0_52] : memref<600x144xf32, #tpu.memory_space<vmem>>, vector<16x16xf32>
    %c216 = arith.constant 216 : index
    %c0_53 = arith.constant 0 : index
    %95 = vector.load %arg1[%c216, %c0_53] : memref<600x144xf32, #tpu.memory_space<vmem>>, vector<16x128xf32>
    %c336 = arith.constant 336 : index
    %c0_54 = arith.constant 0 : index
    %96 = vector.load %arg1[%c336, %c0_54] : memref<600x144xf32, #tpu.memory_space<vmem>>, vector<1x16xf32>
    %c344 = arith.constant 344 : index
    %c0_55 = arith.constant 0 : index
    %97 = vector.load %arg1[%c344, %c0_55] : memref<600x144xf32, #tpu.memory_space<vmem>>, vector<1x16xf32>
    %cst_56 = arith.constant 0.000000e+00 : f32
    %98 = vector.broadcast %cst_56 : f32 to vector<8x32xf32>
    %cst_57 = arith.constant 0.000000e+00 : f32
    %99 = vector.broadcast %cst_57 : f32 to vector<8x32xf32>
    %cst_58 = arith.constant 0.000000e+00 : f32
    %100 = vector.broadcast %cst_58 : f32 to vector<8x32xf32>
    %cst_59 = arith.constant 0.000000e+00 : f32
    %101 = vector.broadcast %cst_59 : f32 to vector<8x32xf32>
    %102 = vector.extract_strided_slice %1 {offsets = [0, 0], sizes = [8, 16], strides = [1, 1]} : vector<64x16xf32> to vector<8x16xf32>
    %103 = vector.extract_strided_slice %3 {offsets = [0, 0], sizes = [8, 16], strides = [1, 1]} : vector<64x16xf32> to vector<8x16xf32>
    %104 = vector.extract_strided_slice %19 {offsets = [0, 0], sizes = [8, 32], strides = [1, 1]} : vector<64x32xf32> to vector<8x32xf32>
    %105 = arith.mulf %98, %104 : vector<8x32xf32>
    %cst_60 = arith.constant dense<0.000000e+00> : vector<8x144xf32>
    %106 = tpu.matmul %105, %88, %cst_60 {dimension_numbers = #tpu.dot_dimension_numbers<[1], [0], [0], [1], [0, 0, 1, 1], [], []>} : vector<8x32xf32>, vector<32x144xf32>, vector<8x144xf32> -> vector<8x144xf32>
    %107 = vector.extract_strided_slice %106 {offsets = [0, 0], sizes = [8, 128], strides = [1, 1]} : vector<8x144xf32> to vector<8x128xf32>
    %108 = vector.extract_strided_slice %106 {offsets = [0, 128], sizes = [8, 16], strides = [1, 1]} : vector<8x144xf32> to vector<8x16xf32>
    %109 = vector.broadcast %91 : vector<1x16xf32> to vector<8x16xf32>
    %110 = arith.addf %108, %109 : vector<8x16xf32>
    %111 = arith.mulf %103, %102 : vector<8x16xf32>
    %cst_61 = arith.constant 1.000000e+00 : f32
    %112 = vector.broadcast %cst_61 : f32 to vector<8x16xf32>
    %113 = arith.subf %112, %103 : vector<8x16xf32>
    %114 = arith.mulf %113, %110 : vector<8x16xf32>
    %115 = arith.addf %111, %114 : vector<8x16xf32>
    %cst_62 = arith.constant dense<0.000000e+00> : vector<8x16xf32>
    %116 = tpu.matmul %115, %89, %cst_62 {dimension_numbers = #tpu.dot_dimension_numbers<[1], [0], [0], [1], [0, 0, 1, 1], [], []>} : vector<8x16xf32>, vector<16x16xf32>, vector<8x16xf32> -> vector<8x16xf32>
    %117 = vector.broadcast %92 : vector<1x16xf32> to vector<8x16xf32>
    %118 = arith.addf %116, %117 : vector<8x16xf32>
    %119 = vector.extract_strided_slice %43 {offsets = [0, 0], sizes = [8, 16], strides = [1, 1]} : vector<64x16xf32> to vector<8x16xf32>
    %120 = arith.mulf %119, %118 : vector<8x16xf32>
    %cst_63 = arith.constant 1.000000e+00 : f32
    %121 = vector.broadcast %cst_63 : f32 to vector<8x16xf32>
    %122 = arith.subf %121, %119 : vector<8x16xf32>
    %123 = arith.mulf %122, %110 : vector<8x16xf32>
    %124 = arith.addf %120, %123 : vector<8x16xf32>
    %125 = arith.mulf %103, %102 : vector<8x16xf32>
    %cst_64 = arith.constant 1.000000e+00 : f32
    %126 = vector.broadcast %cst_64 : f32 to vector<8x16xf32>
    %127 = arith.subf %126, %103 : vector<8x16xf32>
    %128 = arith.mulf %127, %124 : vector<8x16xf32>
    %129 = arith.addf %125, %128 : vector<8x16xf32>
    %cst_65 = arith.constant dense<0.000000e+00> : vector<8x128xf32>
    %130 = tpu.matmul %129, %90, %cst_65 {dimension_numbers = #tpu.dot_dimension_numbers<[1], [0], [0], [1], [0, 0, 1, 1], [], []>} : vector<8x16xf32>, vector<16x128xf32>, vector<8x128xf32> -> vector<8x128xf32>
    %131 = arith.addf %130, %107 : vector<8x128xf32>
    %132 = vector.extract_strided_slice %48 {offsets = [0, 0], sizes = [8, 128], strides = [1, 1]} : vector<64x128xf32> to vector<8x128xf32>
    %133 = arith.addf %131, %132 : vector<8x128xf32>
    %134 = vector.extract_strided_slice %133 {offsets = [0, 0], sizes = [8, 32], strides = [1, 1]} : vector<8x128xf32> to vector<8x32xf32>
    %135 = arith.negf %134 : vector<8x32xf32>
    %136 = math.exp %135 : vector<8x32xf32>
    %cst_66 = arith.constant 1.000000e+00 : f32
    %137 = vector.broadcast %cst_66 : f32 to vector<8x32xf32>
    %138 = arith.addf %137, %136 : vector<8x32xf32>
    %139 = arith.divf %137, %138 : vector<8x32xf32>
    %140 = vector.extract_strided_slice %133 {offsets = [0, 32], sizes = [8, 32], strides = [1, 1]} : vector<8x128xf32> to vector<8x32xf32>
    %141 = arith.negf %140 : vector<8x32xf32>
    %142 = math.exp %141 : vector<8x32xf32>
    %cst_67 = arith.constant 1.000000e+00 : f32
    %143 = vector.broadcast %cst_67 : f32 to vector<8x32xf32>
    %144 = arith.addf %143, %142 : vector<8x32xf32>
    %145 = arith.divf %143, %144 : vector<8x32xf32>
    %146 = vector.extract_strided_slice %133 {offsets = [0, 64], sizes = [8, 32], strides = [1, 1]} : vector<8x128xf32> to vector<8x32xf32>
    %147 = math.tanh %146 : vector<8x32xf32>
    %148 = vector.extract_strided_slice %133 {offsets = [0, 96], sizes = [8, 32], strides = [1, 1]} : vector<8x128xf32> to vector<8x32xf32>
    %149 = arith.negf %148 : vector<8x32xf32>
    %150 = math.exp %149 : vector<8x32xf32>
    %cst_68 = arith.constant 1.000000e+00 : f32
    %151 = vector.broadcast %cst_68 : f32 to vector<8x32xf32>
    %152 = arith.addf %151, %150 : vector<8x32xf32>
    %153 = arith.divf %151, %152 : vector<8x32xf32>
    %154 = arith.mulf %145, %99 : vector<8x32xf32>
    %155 = arith.mulf %139, %147 : vector<8x32xf32>
    %156 = arith.addf %154, %155 : vector<8x32xf32>
    %157 = math.tanh %156 : vector<8x32xf32>
    %158 = arith.mulf %153, %157 : vector<8x32xf32>
    %159 = vector.extract_strided_slice %1 {offsets = [56, 0], sizes = [8, 16], strides = [1, 1]} : vector<64x16xf32> to vector<8x16xf32>
    %160 = vector.extract_strided_slice %3 {offsets = [56, 0], sizes = [8, 16], strides = [1, 1]} : vector<64x16xf32> to vector<8x16xf32>
    %161 = vector.extract_strided_slice %58 {offsets = [56, 0], sizes = [8, 32], strides = [1, 1]} : vector<64x32xf32> to vector<8x32xf32>
    %162 = arith.mulf %100, %161 : vector<8x32xf32>
    %cst_69 = arith.constant dense<0.000000e+00> : vector<8x144xf32>
    %163 = tpu.matmul %162, %93, %cst_69 {dimension_numbers = #tpu.dot_dimension_numbers<[1], [0], [0], [1], [0, 0, 1, 1], [], []>} : vector<8x32xf32>, vector<32x144xf32>, vector<8x144xf32> -> vector<8x144xf32>
    %164 = vector.extract_strided_slice %163 {offsets = [0, 0], sizes = [8, 128], strides = [1, 1]} : vector<8x144xf32> to vector<8x128xf32>
    %165 = vector.extract_strided_slice %163 {offsets = [0, 128], sizes = [8, 16], strides = [1, 1]} : vector<8x144xf32> to vector<8x16xf32>
    %166 = vector.broadcast %96 : vector<1x16xf32> to vector<8x16xf32>
    %167 = arith.addf %165, %166 : vector<8x16xf32>
    %168 = arith.mulf %160, %159 : vector<8x16xf32>
    %cst_70 = arith.constant 1.000000e+00 : f32
    %169 = vector.broadcast %cst_70 : f32 to vector<8x16xf32>
    %170 = arith.subf %169, %160 : vector<8x16xf32>
    %171 = arith.mulf %170, %167 : vector<8x16xf32>
    %172 = arith.addf %168, %171 : vector<8x16xf32>
    %cst_71 = arith.constant dense<0.000000e+00> : vector<8x16xf32>
    %173 = tpu.matmul %172, %94, %cst_71 {dimension_numbers = #tpu.dot_dimension_numbers<[1], [0], [0], [1], [0, 0, 1, 1], [], []>} : vector<8x16xf32>, vector<16x16xf32>, vector<8x16xf32> -> vector<8x16xf32>
    %174 = vector.broadcast %97 : vector<1x16xf32> to vector<8x16xf32>
    %175 = arith.addf %173, %174 : vector<8x16xf32>
    %176 = vector.extract_strided_slice %82 {offsets = [56, 0], sizes = [8, 16], strides = [1, 1]} : vector<64x16xf32> to vector<8x16xf32>
    %177 = arith.mulf %176, %175 : vector<8x16xf32>
    %cst_72 = arith.constant 1.000000e+00 : f32
    %178 = vector.broadcast %cst_72 : f32 to vector<8x16xf32>
    %179 = arith.subf %178, %176 : vector<8x16xf32>
    %180 = arith.mulf %179, %167 : vector<8x16xf32>
    %181 = arith.addf %177, %180 : vector<8x16xf32>
    %182 = arith.mulf %160, %159 : vector<8x16xf32>
    %cst_73 = arith.constant 1.000000e+00 : f32
    %183 = vector.broadcast %cst_73 : f32 to vector<8x16xf32>
    %184 = arith.subf %183, %160 : vector<8x16xf32>
    %185 = arith.mulf %184, %181 : vector<8x16xf32>
    %186 = arith.addf %182, %185 : vector<8x16xf32>
    %cst_74 = arith.constant dense<0.000000e+00> : vector<8x128xf32>
    %187 = tpu.matmul %186, %95, %cst_74 {dimension_numbers = #tpu.dot_dimension_numbers<[1], [0], [0], [1], [0, 0, 1, 1], [], []>} : vector<8x16xf32>, vector<16x128xf32>, vector<8x128xf32> -> vector<8x128xf32>
    %188 = arith.addf %187, %164 : vector<8x128xf32>
    %189 = vector.extract_strided_slice %87 {offsets = [56, 0], sizes = [8, 128], strides = [1, 1]} : vector<64x128xf32> to vector<8x128xf32>
    %190 = arith.addf %188, %189 : vector<8x128xf32>
    %191 = vector.extract_strided_slice %190 {offsets = [0, 0], sizes = [8, 32], strides = [1, 1]} : vector<8x128xf32> to vector<8x32xf32>
    %192 = arith.negf %191 : vector<8x32xf32>
    %193 = math.exp %192 : vector<8x32xf32>
    %cst_75 = arith.constant 1.000000e+00 : f32
    %194 = vector.broadcast %cst_75 : f32 to vector<8x32xf32>
    %195 = arith.addf %194, %193 : vector<8x32xf32>
    %196 = arith.divf %194, %195 : vector<8x32xf32>
    %197 = vector.extract_strided_slice %190 {offsets = [0, 32], sizes = [8, 32], strides = [1, 1]} : vector<8x128xf32> to vector<8x32xf32>
    %198 = arith.negf %197 : vector<8x32xf32>
    %199 = math.exp %198 : vector<8x32xf32>
    %cst_76 = arith.constant 1.000000e+00 : f32
    %200 = vector.broadcast %cst_76 : f32 to vector<8x32xf32>
    %201 = arith.addf %200, %199 : vector<8x32xf32>
    %202 = arith.divf %200, %201 : vector<8x32xf32>
    %203 = vector.extract_strided_slice %190 {offsets = [0, 64], sizes = [8, 32], strides = [1, 1]} : vector<8x128xf32> to vector<8x32xf32>
    %204 = math.tanh %203 : vector<8x32xf32>
    %205 = vector.extract_strided_slice %190 {offsets = [0, 96], sizes = [8, 32], strides = [1, 1]} : vector<8x128xf32> to vector<8x32xf32>
    %206 = arith.negf %205 : vector<8x32xf32>
    %207 = math.exp %206 : vector<8x32xf32>
    %cst_77 = arith.constant 1.000000e+00 : f32
    %208 = vector.broadcast %cst_77 : f32 to vector<8x32xf32>
    %209 = arith.addf %208, %207 : vector<8x32xf32>
    %210 = arith.divf %208, %209 : vector<8x32xf32>
    %211 = arith.mulf %202, %101 : vector<8x32xf32>
    %212 = arith.mulf %196, %204 : vector<8x32xf32>
    %213 = arith.addf %211, %212 : vector<8x32xf32>
    %214 = math.tanh %213 : vector<8x32xf32>
    %215 = arith.mulf %210, %214 : vector<8x32xf32>
    %216 = vector.extract_strided_slice %1 {offsets = [8, 0], sizes = [8, 16], strides = [1, 1]} : vector<64x16xf32> to vector<8x16xf32>
    %217 = vector.extract_strided_slice %3 {offsets = [8, 0], sizes = [8, 16], strides = [1, 1]} : vector<64x16xf32> to vector<8x16xf32>
    %218 = vector.extract_strided_slice %19 {offsets = [8, 0], sizes = [8, 32], strides = [1, 1]} : vector<64x32xf32> to vector<8x32xf32>
    %219 = arith.mulf %158, %218 : vector<8x32xf32>
    %cst_78 = arith.constant dense<0.000000e+00> : vector<8x144xf32>
    %220 = tpu.matmul %219, %88, %cst_78 {dimension_numbers = #tpu.dot_dimension_numbers<[1], [0], [0], [1], [0, 0, 1, 1], [], []>} : vector<8x32xf32>, vector<32x144xf32>, vector<8x144xf32> -> vector<8x144xf32>
    %221 = vector.extract_strided_slice %220 {offsets = [0, 0], sizes = [8, 128], strides = [1, 1]} : vector<8x144xf32> to vector<8x128xf32>
    %222 = vector.extract_strided_slice %220 {offsets = [0, 128], sizes = [8, 16], strides = [1, 1]} : vector<8x144xf32> to vector<8x16xf32>
    %223 = vector.broadcast %91 : vector<1x16xf32> to vector<8x16xf32>
    %224 = arith.addf %222, %223 : vector<8x16xf32>
    %225 = arith.mulf %217, %216 : vector<8x16xf32>
    %cst_79 = arith.constant 1.000000e+00 : f32
    %226 = vector.broadcast %cst_79 : f32 to vector<8x16xf32>
    %227 = arith.subf %226, %217 : vector<8x16xf32>
    %228 = arith.mulf %227, %224 : vector<8x16xf32>
    %229 = arith.addf %225, %228 : vector<8x16xf32>
    %cst_80 = arith.constant dense<0.000000e+00> : vector<8x16xf32>
    %230 = tpu.matmul %229, %89, %cst_80 {dimension_numbers = #tpu.dot_dimension_numbers<[1], [0], [0], [1], [0, 0, 1, 1], [], []>} : vector<8x16xf32>, vector<16x16xf32>, vector<8x16xf32> -> vector<8x16xf32>
    %231 = vector.broadcast %92 : vector<1x16xf32> to vector<8x16xf32>
    %232 = arith.addf %230, %231 : vector<8x16xf32>
    %233 = vector.extract_strided_slice %43 {offsets = [8, 0], sizes = [8, 16], strides = [1, 1]} : vector<64x16xf32> to vector<8x16xf32>
    %234 = arith.mulf %233, %232 : vector<8x16xf32>
    %cst_81 = arith.constant 1.000000e+00 : f32
    %235 = vector.broadcast %cst_81 : f32 to vector<8x16xf32>
    %236 = arith.subf %235, %233 : vector<8x16xf32>
    %237 = arith.mulf %236, %224 : vector<8x16xf32>
    %238 = arith.addf %234, %237 : vector<8x16xf32>
    %239 = arith.mulf %217, %216 : vector<8x16xf32>
    %cst_82 = arith.constant 1.000000e+00 : f32
    %240 = vector.broadcast %cst_82 : f32 to vector<8x16xf32>
    %241 = arith.subf %240, %217 : vector<8x16xf32>
    %242 = arith.mulf %241, %238 : vector<8x16xf32>
    %243 = arith.addf %239, %242 : vector<8x16xf32>
    %cst_83 = arith.constant dense<0.000000e+00> : vector<8x128xf32>
    %244 = tpu.matmul %243, %90, %cst_83 {dimension_numbers = #tpu.dot_dimension_numbers<[1], [0], [0], [1], [0, 0, 1, 1], [], []>} : vector<8x16xf32>, vector<16x128xf32>, vector<8x128xf32> -> vector<8x128xf32>
    %245 = arith.addf %244, %221 : vector<8x128xf32>
    %246 = vector.extract_strided_slice %48 {offsets = [8, 0], sizes = [8, 128], strides = [1, 1]} : vector<64x128xf32> to vector<8x128xf32>
    %247 = arith.addf %245, %246 : vector<8x128xf32>
    %248 = vector.extract_strided_slice %247 {offsets = [0, 0], sizes = [8, 32], strides = [1, 1]} : vector<8x128xf32> to vector<8x32xf32>
    %249 = arith.negf %248 : vector<8x32xf32>
    %250 = math.exp %249 : vector<8x32xf32>
    %cst_84 = arith.constant 1.000000e+00 : f32
    %251 = vector.broadcast %cst_84 : f32 to vector<8x32xf32>
    %252 = arith.addf %251, %250 : vector<8x32xf32>
    %253 = arith.divf %251, %252 : vector<8x32xf32>
    %254 = vector.extract_strided_slice %247 {offsets = [0, 32], sizes = [8, 32], strides = [1, 1]} : vector<8x128xf32> to vector<8x32xf32>
    %255 = arith.negf %254 : vector<8x32xf32>
    %256 = math.exp %255 : vector<8x32xf32>
    %cst_85 = arith.constant 1.000000e+00 : f32
    %257 = vector.broadcast %cst_85 : f32 to vector<8x32xf32>
    %258 = arith.addf %257, %256 : vector<8x32xf32>
    %259 = arith.divf %257, %258 : vector<8x32xf32>
    %260 = vector.extract_strided_slice %247 {offsets = [0, 64], sizes = [8, 32], strides = [1, 1]} : vector<8x128xf32> to vector<8x32xf32>
    %261 = math.tanh %260 : vector<8x32xf32>
    %262 = vector.extract_strided_slice %247 {offsets = [0, 96], sizes = [8, 32], strides = [1, 1]} : vector<8x128xf32> to vector<8x32xf32>
    %263 = arith.negf %262 : vector<8x32xf32>
    %264 = math.exp %263 : vector<8x32xf32>
    %cst_86 = arith.constant 1.000000e+00 : f32
    %265 = vector.broadcast %cst_86 : f32 to vector<8x32xf32>
    %266 = arith.addf %265, %264 : vector<8x32xf32>
    %267 = arith.divf %265, %266 : vector<8x32xf32>
    %268 = arith.mulf %259, %156 : vector<8x32xf32>
    %269 = arith.mulf %253, %261 : vector<8x32xf32>
    %270 = arith.addf %268, %269 : vector<8x32xf32>
    %271 = math.tanh %270 : vector<8x32xf32>
    %272 = arith.mulf %267, %271 : vector<8x32xf32>
    %273 = vector.extract_strided_slice %1 {offsets = [48, 0], sizes = [8, 16], strides = [1, 1]} : vector<64x16xf32> to vector<8x16xf32>
    %274 = vector.extract_strided_slice %3 {offsets = [48, 0], sizes = [8, 16], strides = [1, 1]} : vector<64x16xf32> to vector<8x16xf32>
    %275 = vector.extract_strided_slice %58 {offsets = [48, 0], sizes = [8, 32], strides = [1, 1]} : vector<64x32xf32> to vector<8x32xf32>
    %276 = arith.mulf %215, %275 : vector<8x32xf32>
    %cst_87 = arith.constant dense<0.000000e+00> : vector<8x144xf32>
    %277 = tpu.matmul %276, %93, %cst_87 {dimension_numbers = #tpu.dot_dimension_numbers<[1], [0], [0], [1], [0, 0, 1, 1], [], []>} : vector<8x32xf32>, vector<32x144xf32>, vector<8x144xf32> -> vector<8x144xf32>
    %278 = vector.extract_strided_slice %277 {offsets = [0, 0], sizes = [8, 128], strides = [1, 1]} : vector<8x144xf32> to vector<8x128xf32>
    %279 = vector.extract_strided_slice %277 {offsets = [0, 128], sizes = [8, 16], strides = [1, 1]} : vector<8x144xf32> to vector<8x16xf32>
    %280 = vector.broadcast %96 : vector<1x16xf32> to vector<8x16xf32>
    %281 = arith.addf %279, %280 : vector<8x16xf32>
    %282 = arith.mulf %274, %273 : vector<8x16xf32>
    %cst_88 = arith.constant 1.000000e+00 : f32
    %283 = vector.broadcast %cst_88 : f32 to vector<8x16xf32>
    %284 = arith.subf %283, %274 : vector<8x16xf32>
    %285 = arith.mulf %284, %281 : vector<8x16xf32>
    %286 = arith.addf %282, %285 : vector<8x16xf32>
    %cst_89 = arith.constant dense<0.000000e+00> : vector<8x16xf32>
    %287 = tpu.matmul %286, %94, %cst_89 {dimension_numbers = #tpu.dot_dimension_numbers<[1], [0], [0], [1], [0, 0, 1, 1], [], []>} : vector<8x16xf32>, vector<16x16xf32>, vector<8x16xf32> -> vector<8x16xf32>
    %288 = vector.broadcast %97 : vector<1x16xf32> to vector<8x16xf32>
    %289 = arith.addf %287, %288 : vector<8x16xf32>
    %290 = vector.extract_strided_slice %82 {offsets = [48, 0], sizes = [8, 16], strides = [1, 1]} : vector<64x16xf32> to vector<8x16xf32>
    %291 = arith.mulf %290, %289 : vector<8x16xf32>
    %cst_90 = arith.constant 1.000000e+00 : f32
    %292 = vector.broadcast %cst_90 : f32 to vector<8x16xf32>
    %293 = arith.subf %292, %290 : vector<8x16xf32>
    %294 = arith.mulf %293, %281 : vector<8x16xf32>
    %295 = arith.addf %291, %294 : vector<8x16xf32>
    %296 = arith.mulf %274, %273 : vector<8x16xf32>
    %cst_91 = arith.constant 1.000000e+00 : f32
    %297 = vector.broadcast %cst_91 : f32 to vector<8x16xf32>
    %298 = arith.subf %297, %274 : vector<8x16xf32>
    %299 = arith.mulf %298, %295 : vector<8x16xf32>
    %300 = arith.addf %296, %299 : vector<8x16xf32>
    %cst_92 = arith.constant dense<0.000000e+00> : vector<8x128xf32>
    %301 = tpu.matmul %300, %95, %cst_92 {dimension_numbers = #tpu.dot_dimension_numbers<[1], [0], [0], [1], [0, 0, 1, 1], [], []>} : vector<8x16xf32>, vector<16x128xf32>, vector<8x128xf32> -> vector<8x128xf32>
    %302 = arith.addf %301, %278 : vector<8x128xf32>
    %303 = vector.extract_strided_slice %87 {offsets = [48, 0], sizes = [8, 128], strides = [1, 1]} : vector<64x128xf32> to vector<8x128xf32>
    %304 = arith.addf %302, %303 : vector<8x128xf32>
    %305 = vector.extract_strided_slice %304 {offsets = [0, 0], sizes = [8, 32], strides = [1, 1]} : vector<8x128xf32> to vector<8x32xf32>
    %306 = arith.negf %305 : vector<8x32xf32>
    %307 = math.exp %306 : vector<8x32xf32>
    %cst_93 = arith.constant 1.000000e+00 : f32
    %308 = vector.broadcast %cst_93 : f32 to vector<8x32xf32>
    %309 = arith.addf %308, %307 : vector<8x32xf32>
    %310 = arith.divf %308, %309 : vector<8x32xf32>
    %311 = vector.extract_strided_slice %304 {offsets = [0, 32], sizes = [8, 32], strides = [1, 1]} : vector<8x128xf32> to vector<8x32xf32>
    %312 = arith.negf %311 : vector<8x32xf32>
    %313 = math.exp %312 : vector<8x32xf32>
    %cst_94 = arith.constant 1.000000e+00 : f32
    %314 = vector.broadcast %cst_94 : f32 to vector<8x32xf32>
    %315 = arith.addf %314, %313 : vector<8x32xf32>
    %316 = arith.divf %314, %315 : vector<8x32xf32>
    %317 = vector.extract_strided_slice %304 {offsets = [0, 64], sizes = [8, 32], strides = [1, 1]} : vector<8x128xf32> to vector<8x32xf32>
    %318 = math.tanh %317 : vector<8x32xf32>
    %319 = vector.extract_strided_slice %304 {offsets = [0, 96], sizes = [8, 32], strides = [1, 1]} : vector<8x128xf32> to vector<8x32xf32>
    %320 = arith.negf %319 : vector<8x32xf32>
    %321 = math.exp %320 : vector<8x32xf32>
    %cst_95 = arith.constant 1.000000e+00 : f32
    %322 = vector.broadcast %cst_95 : f32 to vector<8x32xf32>
    %323 = arith.addf %322, %321 : vector<8x32xf32>
    %324 = arith.divf %322, %323 : vector<8x32xf32>
    %325 = arith.mulf %316, %213 : vector<8x32xf32>
    %326 = arith.mulf %310, %318 : vector<8x32xf32>
    %327 = arith.addf %325, %326 : vector<8x32xf32>
    %328 = math.tanh %327 : vector<8x32xf32>
    %329 = arith.mulf %324, %328 : vector<8x32xf32>
    %330 = vector.extract_strided_slice %1 {offsets = [16, 0], sizes = [8, 16], strides = [1, 1]} : vector<64x16xf32> to vector<8x16xf32>
    %331 = vector.extract_strided_slice %3 {offsets = [16, 0], sizes = [8, 16], strides = [1, 1]} : vector<64x16xf32> to vector<8x16xf32>
    %332 = vector.extract_strided_slice %19 {offsets = [16, 0], sizes = [8, 32], strides = [1, 1]} : vector<64x32xf32> to vector<8x32xf32>
    %333 = arith.mulf %272, %332 : vector<8x32xf32>
    %cst_96 = arith.constant dense<0.000000e+00> : vector<8x144xf32>
    %334 = tpu.matmul %333, %88, %cst_96 {dimension_numbers = #tpu.dot_dimension_numbers<[1], [0], [0], [1], [0, 0, 1, 1], [], []>} : vector<8x32xf32>, vector<32x144xf32>, vector<8x144xf32> -> vector<8x144xf32>
    %335 = vector.extract_strided_slice %334 {offsets = [0, 0], sizes = [8, 128], strides = [1, 1]} : vector<8x144xf32> to vector<8x128xf32>
    %336 = vector.extract_strided_slice %334 {offsets = [0, 128], sizes = [8, 16], strides = [1, 1]} : vector<8x144xf32> to vector<8x16xf32>
    %337 = vector.broadcast %91 : vector<1x16xf32> to vector<8x16xf32>
    %338 = arith.addf %336, %337 : vector<8x16xf32>
    %339 = arith.mulf %331, %330 : vector<8x16xf32>
    %cst_97 = arith.constant 1.000000e+00 : f32
    %340 = vector.broadcast %cst_97 : f32 to vector<8x16xf32>
    %341 = arith.subf %340, %331 : vector<8x16xf32>
    %342 = arith.mulf %341, %338 : vector<8x16xf32>
    %343 = arith.addf %339, %342 : vector<8x16xf32>
    %cst_98 = arith.constant dense<0.000000e+00> : vector<8x16xf32>
    %344 = tpu.matmul %343, %89, %cst_98 {dimension_numbers = #tpu.dot_dimension_numbers<[1], [0], [0], [1], [0, 0, 1, 1], [], []>} : vector<8x16xf32>, vector<16x16xf32>, vector<8x16xf32> -> vector<8x16xf32>
    %345 = vector.broadcast %92 : vector<1x16xf32> to vector<8x16xf32>
    %346 = arith.addf %344, %345 : vector<8x16xf32>
    %347 = vector.extract_strided_slice %43 {offsets = [16, 0], sizes = [8, 16], strides = [1, 1]} : vector<64x16xf32> to vector<8x16xf32>
    %348 = arith.mulf %347, %346 : vector<8x16xf32>
    %cst_99 = arith.constant 1.000000e+00 : f32
    %349 = vector.broadcast %cst_99 : f32 to vector<8x16xf32>
    %350 = arith.subf %349, %347 : vector<8x16xf32>
    %351 = arith.mulf %350, %338 : vector<8x16xf32>
    %352 = arith.addf %348, %351 : vector<8x16xf32>
    %353 = arith.mulf %331, %330 : vector<8x16xf32>
    %cst_100 = arith.constant 1.000000e+00 : f32
    %354 = vector.broadcast %cst_100 : f32 to vector<8x16xf32>
    %355 = arith.subf %354, %331 : vector<8x16xf32>
    %356 = arith.mulf %355, %352 : vector<8x16xf32>
    %357 = arith.addf %353, %356 : vector<8x16xf32>
    %cst_101 = arith.constant dense<0.000000e+00> : vector<8x128xf32>
    %358 = tpu.matmul %357, %90, %cst_101 {dimension_numbers = #tpu.dot_dimension_numbers<[1], [0], [0], [1], [0, 0, 1, 1], [], []>} : vector<8x16xf32>, vector<16x128xf32>, vector<8x128xf32> -> vector<8x128xf32>
    %359 = arith.addf %358, %335 : vector<8x128xf32>
    %360 = vector.extract_strided_slice %48 {offsets = [16, 0], sizes = [8, 128], strides = [1, 1]} : vector<64x128xf32> to vector<8x128xf32>
    %361 = arith.addf %359, %360 : vector<8x128xf32>
    %362 = vector.extract_strided_slice %361 {offsets = [0, 0], sizes = [8, 32], strides = [1, 1]} : vector<8x128xf32> to vector<8x32xf32>
    %363 = arith.negf %362 : vector<8x32xf32>
    %364 = math.exp %363 : vector<8x32xf32>
    %cst_102 = arith.constant 1.000000e+00 : f32
    %365 = vector.broadcast %cst_102 : f32 to vector<8x32xf32>
    %366 = arith.addf %365, %364 : vector<8x32xf32>
    %367 = arith.divf %365, %366 : vector<8x32xf32>
    %368 = vector.extract_strided_slice %361 {offsets = [0, 32], sizes = [8, 32], strides = [1, 1]} : vector<8x128xf32> to vector<8x32xf32>
    %369 = arith.negf %368 : vector<8x32xf32>
    %370 = math.exp %369 : vector<8x32xf32>
    %cst_103 = arith.constant 1.000000e+00 : f32
    %371 = vector.broadcast %cst_103 : f32 to vector<8x32xf32>
    %372 = arith.addf %371, %370 : vector<8x32xf32>
    %373 = arith.divf %371, %372 : vector<8x32xf32>
    %374 = vector.extract_strided_slice %361 {offsets = [0, 64], sizes = [8, 32], strides = [1, 1]} : vector<8x128xf32> to vector<8x32xf32>
    %375 = math.tanh %374 : vector<8x32xf32>
    %376 = vector.extract_strided_slice %361 {offsets = [0, 96], sizes = [8, 32], strides = [1, 1]} : vector<8x128xf32> to vector<8x32xf32>
    %377 = arith.negf %376 : vector<8x32xf32>
    %378 = math.exp %377 : vector<8x32xf32>
    %cst_104 = arith.constant 1.000000e+00 : f32
    %379 = vector.broadcast %cst_104 : f32 to vector<8x32xf32>
    %380 = arith.addf %379, %378 : vector<8x32xf32>
    %381 = arith.divf %379, %380 : vector<8x32xf32>
    %382 = arith.mulf %373, %270 : vector<8x32xf32>
    %383 = arith.mulf %367, %375 : vector<8x32xf32>
    %384 = arith.addf %382, %383 : vector<8x32xf32>
    %385 = math.tanh %384 : vector<8x32xf32>
    %386 = arith.mulf %381, %385 : vector<8x32xf32>
    %387 = vector.extract_strided_slice %1 {offsets = [40, 0], sizes = [8, 16], strides = [1, 1]} : vector<64x16xf32> to vector<8x16xf32>
    %388 = vector.extract_strided_slice %3 {offsets = [40, 0], sizes = [8, 16], strides = [1, 1]} : vector<64x16xf32> to vector<8x16xf32>
    %389 = vector.extract_strided_slice %58 {offsets = [40, 0], sizes = [8, 32], strides = [1, 1]} : vector<64x32xf32> to vector<8x32xf32>
    %390 = arith.mulf %329, %389 : vector<8x32xf32>
    %cst_105 = arith.constant dense<0.000000e+00> : vector<8x144xf32>
    %391 = tpu.matmul %390, %93, %cst_105 {dimension_numbers = #tpu.dot_dimension_numbers<[1], [0], [0], [1], [0, 0, 1, 1], [], []>} : vector<8x32xf32>, vector<32x144xf32>, vector<8x144xf32> -> vector<8x144xf32>
    %392 = vector.extract_strided_slice %391 {offsets = [0, 0], sizes = [8, 128], strides = [1, 1]} : vector<8x144xf32> to vector<8x128xf32>
    %393 = vector.extract_strided_slice %391 {offsets = [0, 128], sizes = [8, 16], strides = [1, 1]} : vector<8x144xf32> to vector<8x16xf32>
    %394 = vector.broadcast %96 : vector<1x16xf32> to vector<8x16xf32>
    %395 = arith.addf %393, %394 : vector<8x16xf32>
    %396 = arith.mulf %388, %387 : vector<8x16xf32>
    %cst_106 = arith.constant 1.000000e+00 : f32
    %397 = vector.broadcast %cst_106 : f32 to vector<8x16xf32>
    %398 = arith.subf %397, %388 : vector<8x16xf32>
    %399 = arith.mulf %398, %395 : vector<8x16xf32>
    %400 = arith.addf %396, %399 : vector<8x16xf32>
    %cst_107 = arith.constant dense<0.000000e+00> : vector<8x16xf32>
    %401 = tpu.matmul %400, %94, %cst_107 {dimension_numbers = #tpu.dot_dimension_numbers<[1], [0], [0], [1], [0, 0, 1, 1], [], []>} : vector<8x16xf32>, vector<16x16xf32>, vector<8x16xf32> -> vector<8x16xf32>
    %402 = vector.broadcast %97 : vector<1x16xf32> to vector<8x16xf32>
    %403 = arith.addf %401, %402 : vector<8x16xf32>
    %404 = vector.extract_strided_slice %82 {offsets = [40, 0], sizes = [8, 16], strides = [1, 1]} : vector<64x16xf32> to vector<8x16xf32>
    %405 = arith.mulf %404, %403 : vector<8x16xf32>
    %cst_108 = arith.constant 1.000000e+00 : f32
    %406 = vector.broadcast %cst_108 : f32 to vector<8x16xf32>
    %407 = arith.subf %406, %404 : vector<8x16xf32>
    %408 = arith.mulf %407, %395 : vector<8x16xf32>
    %409 = arith.addf %405, %408 : vector<8x16xf32>
    %410 = arith.mulf %388, %387 : vector<8x16xf32>
    %cst_109 = arith.constant 1.000000e+00 : f32
    %411 = vector.broadcast %cst_109 : f32 to vector<8x16xf32>
    %412 = arith.subf %411, %388 : vector<8x16xf32>
    %413 = arith.mulf %412, %409 : vector<8x16xf32>
    %414 = arith.addf %410, %413 : vector<8x16xf32>
    %cst_110 = arith.constant dense<0.000000e+00> : vector<8x128xf32>
    %415 = tpu.matmul %414, %95, %cst_110 {dimension_numbers = #tpu.dot_dimension_numbers<[1], [0], [0], [1], [0, 0, 1, 1], [], []>} : vector<8x16xf32>, vector<16x128xf32>, vector<8x128xf32> -> vector<8x128xf32>
    %416 = arith.addf %415, %392 : vector<8x128xf32>
    %417 = vector.extract_strided_slice %87 {offsets = [40, 0], sizes = [8, 128], strides = [1, 1]} : vector<64x128xf32> to vector<8x128xf32>
    %418 = arith.addf %416, %417 : vector<8x128xf32>
    %419 = vector.extract_strided_slice %418 {offsets = [0, 0], sizes = [8, 32], strides = [1, 1]} : vector<8x128xf32> to vector<8x32xf32>
    %420 = arith.negf %419 : vector<8x32xf32>
    %421 = math.exp %420 : vector<8x32xf32>
    %cst_111 = arith.constant 1.000000e+00 : f32
    %422 = vector.broadcast %cst_111 : f32 to vector<8x32xf32>
    %423 = arith.addf %422, %421 : vector<8x32xf32>
    %424 = arith.divf %422, %423 : vector<8x32xf32>
    %425 = vector.extract_strided_slice %418 {offsets = [0, 32], sizes = [8, 32], strides = [1, 1]} : vector<8x128xf32> to vector<8x32xf32>
    %426 = arith.negf %425 : vector<8x32xf32>
    %427 = math.exp %426 : vector<8x32xf32>
    %cst_112 = arith.constant 1.000000e+00 : f32
    %428 = vector.broadcast %cst_112 : f32 to vector<8x32xf32>
    %429 = arith.addf %428, %427 : vector<8x32xf32>
    %430 = arith.divf %428, %429 : vector<8x32xf32>
    %431 = vector.extract_strided_slice %418 {offsets = [0, 64], sizes = [8, 32], strides = [1, 1]} : vector<8x128xf32> to vector<8x32xf32>
    %432 = math.tanh %431 : vector<8x32xf32>
    %433 = vector.extract_strided_slice %418 {offsets = [0, 96], sizes = [8, 32], strides = [1, 1]} : vector<8x128xf32> to vector<8x32xf32>
    %434 = arith.negf %433 : vector<8x32xf32>
    %435 = math.exp %434 : vector<8x32xf32>
    %cst_113 = arith.constant 1.000000e+00 : f32
    %436 = vector.broadcast %cst_113 : f32 to vector<8x32xf32>
    %437 = arith.addf %436, %435 : vector<8x32xf32>
    %438 = arith.divf %436, %437 : vector<8x32xf32>
    %439 = arith.mulf %430, %327 : vector<8x32xf32>
    %440 = arith.mulf %424, %432 : vector<8x32xf32>
    %441 = arith.addf %439, %440 : vector<8x32xf32>
    %442 = math.tanh %441 : vector<8x32xf32>
    %443 = arith.mulf %438, %442 : vector<8x32xf32>
    %444 = vector.extract_strided_slice %1 {offsets = [24, 0], sizes = [8, 16], strides = [1, 1]} : vector<64x16xf32> to vector<8x16xf32>
    %445 = vector.extract_strided_slice %3 {offsets = [24, 0], sizes = [8, 16], strides = [1, 1]} : vector<64x16xf32> to vector<8x16xf32>
    %446 = vector.extract_strided_slice %19 {offsets = [24, 0], sizes = [8, 32], strides = [1, 1]} : vector<64x32xf32> to vector<8x32xf32>
    %447 = arith.mulf %386, %446 : vector<8x32xf32>
    %cst_114 = arith.constant dense<0.000000e+00> : vector<8x144xf32>
    %448 = tpu.matmul %447, %88, %cst_114 {dimension_numbers = #tpu.dot_dimension_numbers<[1], [0], [0], [1], [0, 0, 1, 1], [], []>} : vector<8x32xf32>, vector<32x144xf32>, vector<8x144xf32> -> vector<8x144xf32>
    %449 = vector.extract_strided_slice %448 {offsets = [0, 0], sizes = [8, 128], strides = [1, 1]} : vector<8x144xf32> to vector<8x128xf32>
    %450 = vector.extract_strided_slice %448 {offsets = [0, 128], sizes = [8, 16], strides = [1, 1]} : vector<8x144xf32> to vector<8x16xf32>
    %451 = vector.broadcast %91 : vector<1x16xf32> to vector<8x16xf32>
    %452 = arith.addf %450, %451 : vector<8x16xf32>
    %453 = arith.mulf %445, %444 : vector<8x16xf32>
    %cst_115 = arith.constant 1.000000e+00 : f32
    %454 = vector.broadcast %cst_115 : f32 to vector<8x16xf32>
    %455 = arith.subf %454, %445 : vector<8x16xf32>
    %456 = arith.mulf %455, %452 : vector<8x16xf32>
    %457 = arith.addf %453, %456 : vector<8x16xf32>
    %cst_116 = arith.constant dense<0.000000e+00> : vector<8x16xf32>
    %458 = tpu.matmul %457, %89, %cst_116 {dimension_numbers = #tpu.dot_dimension_numbers<[1], [0], [0], [1], [0, 0, 1, 1], [], []>} : vector<8x16xf32>, vector<16x16xf32>, vector<8x16xf32> -> vector<8x16xf32>
    %459 = vector.broadcast %92 : vector<1x16xf32> to vector<8x16xf32>
    %460 = arith.addf %458, %459 : vector<8x16xf32>
    %461 = vector.extract_strided_slice %43 {offsets = [24, 0], sizes = [8, 16], strides = [1, 1]} : vector<64x16xf32> to vector<8x16xf32>
    %462 = arith.mulf %461, %460 : vector<8x16xf32>
    %cst_117 = arith.constant 1.000000e+00 : f32
    %463 = vector.broadcast %cst_117 : f32 to vector<8x16xf32>
    %464 = arith.subf %463, %461 : vector<8x16xf32>
    %465 = arith.mulf %464, %452 : vector<8x16xf32>
    %466 = arith.addf %462, %465 : vector<8x16xf32>
    %467 = arith.mulf %445, %444 : vector<8x16xf32>
    %cst_118 = arith.constant 1.000000e+00 : f32
    %468 = vector.broadcast %cst_118 : f32 to vector<8x16xf32>
    %469 = arith.subf %468, %445 : vector<8x16xf32>
    %470 = arith.mulf %469, %466 : vector<8x16xf32>
    %471 = arith.addf %467, %470 : vector<8x16xf32>
    %cst_119 = arith.constant dense<0.000000e+00> : vector<8x128xf32>
    %472 = tpu.matmul %471, %90, %cst_119 {dimension_numbers = #tpu.dot_dimension_numbers<[1], [0], [0], [1], [0, 0, 1, 1], [], []>} : vector<8x16xf32>, vector<16x128xf32>, vector<8x128xf32> -> vector<8x128xf32>
    %473 = arith.addf %472, %449 : vector<8x128xf32>
    %474 = vector.extract_strided_slice %48 {offsets = [24, 0], sizes = [8, 128], strides = [1, 1]} : vector<64x128xf32> to vector<8x128xf32>
    %475 = arith.addf %473, %474 : vector<8x128xf32>
    %476 = vector.extract_strided_slice %475 {offsets = [0, 0], sizes = [8, 32], strides = [1, 1]} : vector<8x128xf32> to vector<8x32xf32>
    %477 = arith.negf %476 : vector<8x32xf32>
    %478 = math.exp %477 : vector<8x32xf32>
    %cst_120 = arith.constant 1.000000e+00 : f32
    %479 = vector.broadcast %cst_120 : f32 to vector<8x32xf32>
    %480 = arith.addf %479, %478 : vector<8x32xf32>
    %481 = arith.divf %479, %480 : vector<8x32xf32>
    %482 = vector.extract_strided_slice %475 {offsets = [0, 32], sizes = [8, 32], strides = [1, 1]} : vector<8x128xf32> to vector<8x32xf32>
    %483 = arith.negf %482 : vector<8x32xf32>
    %484 = math.exp %483 : vector<8x32xf32>
    %cst_121 = arith.constant 1.000000e+00 : f32
    %485 = vector.broadcast %cst_121 : f32 to vector<8x32xf32>
    %486 = arith.addf %485, %484 : vector<8x32xf32>
    %487 = arith.divf %485, %486 : vector<8x32xf32>
    %488 = vector.extract_strided_slice %475 {offsets = [0, 64], sizes = [8, 32], strides = [1, 1]} : vector<8x128xf32> to vector<8x32xf32>
    %489 = math.tanh %488 : vector<8x32xf32>
    %490 = vector.extract_strided_slice %475 {offsets = [0, 96], sizes = [8, 32], strides = [1, 1]} : vector<8x128xf32> to vector<8x32xf32>
    %491 = arith.negf %490 : vector<8x32xf32>
    %492 = math.exp %491 : vector<8x32xf32>
    %cst_122 = arith.constant 1.000000e+00 : f32
    %493 = vector.broadcast %cst_122 : f32 to vector<8x32xf32>
    %494 = arith.addf %493, %492 : vector<8x32xf32>
    %495 = arith.divf %493, %494 : vector<8x32xf32>
    %496 = arith.mulf %487, %384 : vector<8x32xf32>
    %497 = arith.mulf %481, %489 : vector<8x32xf32>
    %498 = arith.addf %496, %497 : vector<8x32xf32>
    %499 = math.tanh %498 : vector<8x32xf32>
    %500 = arith.mulf %495, %499 : vector<8x32xf32>
    %501 = vector.extract_strided_slice %1 {offsets = [32, 0], sizes = [8, 16], strides = [1, 1]} : vector<64x16xf32> to vector<8x16xf32>
    %502 = vector.extract_strided_slice %3 {offsets = [32, 0], sizes = [8, 16], strides = [1, 1]} : vector<64x16xf32> to vector<8x16xf32>
    %503 = vector.extract_strided_slice %58 {offsets = [32, 0], sizes = [8, 32], strides = [1, 1]} : vector<64x32xf32> to vector<8x32xf32>
    %504 = arith.mulf %443, %503 : vector<8x32xf32>
    %cst_123 = arith.constant dense<0.000000e+00> : vector<8x144xf32>
    %505 = tpu.matmul %504, %93, %cst_123 {dimension_numbers = #tpu.dot_dimension_numbers<[1], [0], [0], [1], [0, 0, 1, 1], [], []>} : vector<8x32xf32>, vector<32x144xf32>, vector<8x144xf32> -> vector<8x144xf32>
    %506 = vector.extract_strided_slice %505 {offsets = [0, 0], sizes = [8, 128], strides = [1, 1]} : vector<8x144xf32> to vector<8x128xf32>
    %507 = vector.extract_strided_slice %505 {offsets = [0, 128], sizes = [8, 16], strides = [1, 1]} : vector<8x144xf32> to vector<8x16xf32>
    %508 = vector.broadcast %96 : vector<1x16xf32> to vector<8x16xf32>
    %509 = arith.addf %507, %508 : vector<8x16xf32>
    %510 = arith.mulf %502, %501 : vector<8x16xf32>
    %cst_124 = arith.constant 1.000000e+00 : f32
    %511 = vector.broadcast %cst_124 : f32 to vector<8x16xf32>
    %512 = arith.subf %511, %502 : vector<8x16xf32>
    %513 = arith.mulf %512, %509 : vector<8x16xf32>
    %514 = arith.addf %510, %513 : vector<8x16xf32>
    %cst_125 = arith.constant dense<0.000000e+00> : vector<8x16xf32>
    %515 = tpu.matmul %514, %94, %cst_125 {dimension_numbers = #tpu.dot_dimension_numbers<[1], [0], [0], [1], [0, 0, 1, 1], [], []>} : vector<8x16xf32>, vector<16x16xf32>, vector<8x16xf32> -> vector<8x16xf32>
    %516 = vector.broadcast %97 : vector<1x16xf32> to vector<8x16xf32>
    %517 = arith.addf %515, %516 : vector<8x16xf32>
    %518 = vector.extract_strided_slice %82 {offsets = [32, 0], sizes = [8, 16], strides = [1, 1]} : vector<64x16xf32> to vector<8x16xf32>
    %519 = arith.mulf %518, %517 : vector<8x16xf32>
    %cst_126 = arith.constant 1.000000e+00 : f32
    %520 = vector.broadcast %cst_126 : f32 to vector<8x16xf32>
    %521 = arith.subf %520, %518 : vector<8x16xf32>
    %522 = arith.mulf %521, %509 : vector<8x16xf32>
    %523 = arith.addf %519, %522 : vector<8x16xf32>
    %524 = arith.mulf %502, %501 : vector<8x16xf32>
    %cst_127 = arith.constant 1.000000e+00 : f32
    %525 = vector.broadcast %cst_127 : f32 to vector<8x16xf32>
    %526 = arith.subf %525, %502 : vector<8x16xf32>
    %527 = arith.mulf %526, %523 : vector<8x16xf32>
    %528 = arith.addf %524, %527 : vector<8x16xf32>
    %cst_128 = arith.constant dense<0.000000e+00> : vector<8x128xf32>
    %529 = tpu.matmul %528, %95, %cst_128 {dimension_numbers = #tpu.dot_dimension_numbers<[1], [0], [0], [1], [0, 0, 1, 1], [], []>} : vector<8x16xf32>, vector<16x128xf32>, vector<8x128xf32> -> vector<8x128xf32>
    %530 = arith.addf %529, %506 : vector<8x128xf32>
    %531 = vector.extract_strided_slice %87 {offsets = [32, 0], sizes = [8, 128], strides = [1, 1]} : vector<64x128xf32> to vector<8x128xf32>
    %532 = arith.addf %530, %531 : vector<8x128xf32>
    %533 = vector.extract_strided_slice %532 {offsets = [0, 0], sizes = [8, 32], strides = [1, 1]} : vector<8x128xf32> to vector<8x32xf32>
    %534 = arith.negf %533 : vector<8x32xf32>
    %535 = math.exp %534 : vector<8x32xf32>
    %cst_129 = arith.constant 1.000000e+00 : f32
    %536 = vector.broadcast %cst_129 : f32 to vector<8x32xf32>
    %537 = arith.addf %536, %535 : vector<8x32xf32>
    %538 = arith.divf %536, %537 : vector<8x32xf32>
    %539 = vector.extract_strided_slice %532 {offsets = [0, 32], sizes = [8, 32], strides = [1, 1]} : vector<8x128xf32> to vector<8x32xf32>
    %540 = arith.negf %539 : vector<8x32xf32>
    %541 = math.exp %540 : vector<8x32xf32>
    %cst_130 = arith.constant 1.000000e+00 : f32
    %542 = vector.broadcast %cst_130 : f32 to vector<8x32xf32>
    %543 = arith.addf %542, %541 : vector<8x32xf32>
    %544 = arith.divf %542, %543 : vector<8x32xf32>
    %545 = vector.extract_strided_slice %532 {offsets = [0, 64], sizes = [8, 32], strides = [1, 1]} : vector<8x128xf32> to vector<8x32xf32>
    %546 = math.tanh %545 : vector<8x32xf32>
    %547 = vector.extract_strided_slice %532 {offsets = [0, 96], sizes = [8, 32], strides = [1, 1]} : vector<8x128xf32> to vector<8x32xf32>
    %548 = arith.negf %547 : vector<8x32xf32>
    %549 = math.exp %548 : vector<8x32xf32>
    %cst_131 = arith.constant 1.000000e+00 : f32
    %550 = vector.broadcast %cst_131 : f32 to vector<8x32xf32>
    %551 = arith.addf %550, %549 : vector<8x32xf32>
    %552 = arith.divf %550, %551 : vector<8x32xf32>
    %553 = arith.mulf %544, %441 : vector<8x32xf32>
    %554 = arith.mulf %538, %546 : vector<8x32xf32>
    %555 = arith.addf %553, %554 : vector<8x32xf32>
    %556 = math.tanh %555 : vector<8x32xf32>
    %557 = arith.mulf %552, %556 : vector<8x32xf32>
    %558 = vector.extract_strided_slice %1 {offsets = [32, 0], sizes = [8, 16], strides = [1, 1]} : vector<64x16xf32> to vector<8x16xf32>
    %559 = vector.extract_strided_slice %3 {offsets = [32, 0], sizes = [8, 16], strides = [1, 1]} : vector<64x16xf32> to vector<8x16xf32>
    %560 = vector.extract_strided_slice %19 {offsets = [32, 0], sizes = [8, 32], strides = [1, 1]} : vector<64x32xf32> to vector<8x32xf32>
    %561 = arith.mulf %500, %560 : vector<8x32xf32>
    %cst_132 = arith.constant dense<0.000000e+00> : vector<8x144xf32>
    %562 = tpu.matmul %561, %88, %cst_132 {dimension_numbers = #tpu.dot_dimension_numbers<[1], [0], [0], [1], [0, 0, 1, 1], [], []>} : vector<8x32xf32>, vector<32x144xf32>, vector<8x144xf32> -> vector<8x144xf32>
    %563 = vector.extract_strided_slice %562 {offsets = [0, 0], sizes = [8, 128], strides = [1, 1]} : vector<8x144xf32> to vector<8x128xf32>
    %564 = vector.extract_strided_slice %562 {offsets = [0, 128], sizes = [8, 16], strides = [1, 1]} : vector<8x144xf32> to vector<8x16xf32>
    %565 = vector.broadcast %91 : vector<1x16xf32> to vector<8x16xf32>
    %566 = arith.addf %564, %565 : vector<8x16xf32>
    %567 = arith.mulf %559, %558 : vector<8x16xf32>
    %cst_133 = arith.constant 1.000000e+00 : f32
    %568 = vector.broadcast %cst_133 : f32 to vector<8x16xf32>
    %569 = arith.subf %568, %559 : vector<8x16xf32>
    %570 = arith.mulf %569, %566 : vector<8x16xf32>
    %571 = arith.addf %567, %570 : vector<8x16xf32>
    %cst_134 = arith.constant dense<0.000000e+00> : vector<8x16xf32>
    %572 = tpu.matmul %571, %89, %cst_134 {dimension_numbers = #tpu.dot_dimension_numbers<[1], [0], [0], [1], [0, 0, 1, 1], [], []>} : vector<8x16xf32>, vector<16x16xf32>, vector<8x16xf32> -> vector<8x16xf32>
    %573 = vector.broadcast %92 : vector<1x16xf32> to vector<8x16xf32>
    %574 = arith.addf %572, %573 : vector<8x16xf32>
    %575 = vector.extract_strided_slice %43 {offsets = [32, 0], sizes = [8, 16], strides = [1, 1]} : vector<64x16xf32> to vector<8x16xf32>
    %576 = arith.mulf %575, %574 : vector<8x16xf32>
    %cst_135 = arith.constant 1.000000e+00 : f32
    %577 = vector.broadcast %cst_135 : f32 to vector<8x16xf32>
    %578 = arith.subf %577, %575 : vector<8x16xf32>
    %579 = arith.mulf %578, %566 : vector<8x16xf32>
    %580 = arith.addf %576, %579 : vector<8x16xf32>
    %581 = arith.mulf %559, %558 : vector<8x16xf32>
    %cst_136 = arith.constant 1.000000e+00 : f32
    %582 = vector.broadcast %cst_136 : f32 to vector<8x16xf32>
    %583 = arith.subf %582, %559 : vector<8x16xf32>
    %584 = arith.mulf %583, %580 : vector<8x16xf32>
    %585 = arith.addf %581, %584 : vector<8x16xf32>
    %cst_137 = arith.constant dense<0.000000e+00> : vector<8x128xf32>
    %586 = tpu.matmul %585, %90, %cst_137 {dimension_numbers = #tpu.dot_dimension_numbers<[1], [0], [0], [1], [0, 0, 1, 1], [], []>} : vector<8x16xf32>, vector<16x128xf32>, vector<8x128xf32> -> vector<8x128xf32>
    %587 = arith.addf %586, %563 : vector<8x128xf32>
    %588 = vector.extract_strided_slice %48 {offsets = [32, 0], sizes = [8, 128], strides = [1, 1]} : vector<64x128xf32> to vector<8x128xf32>
    %589 = arith.addf %587, %588 : vector<8x128xf32>
    %590 = vector.extract_strided_slice %589 {offsets = [0, 0], sizes = [8, 32], strides = [1, 1]} : vector<8x128xf32> to vector<8x32xf32>
    %591 = arith.negf %590 : vector<8x32xf32>
    %592 = math.exp %591 : vector<8x32xf32>
    %cst_138 = arith.constant 1.000000e+00 : f32
    %593 = vector.broadcast %cst_138 : f32 to vector<8x32xf32>
    %594 = arith.addf %593, %592 : vector<8x32xf32>
    %595 = arith.divf %593, %594 : vector<8x32xf32>
    %596 = vector.extract_strided_slice %589 {offsets = [0, 32], sizes = [8, 32], strides = [1, 1]} : vector<8x128xf32> to vector<8x32xf32>
    %597 = arith.negf %596 : vector<8x32xf32>
    %598 = math.exp %597 : vector<8x32xf32>
    %cst_139 = arith.constant 1.000000e+00 : f32
    %599 = vector.broadcast %cst_139 : f32 to vector<8x32xf32>
    %600 = arith.addf %599, %598 : vector<8x32xf32>
    %601 = arith.divf %599, %600 : vector<8x32xf32>
    %602 = vector.extract_strided_slice %589 {offsets = [0, 64], sizes = [8, 32], strides = [1, 1]} : vector<8x128xf32> to vector<8x32xf32>
    %603 = math.tanh %602 : vector<8x32xf32>
    %604 = vector.extract_strided_slice %589 {offsets = [0, 96], sizes = [8, 32], strides = [1, 1]} : vector<8x128xf32> to vector<8x32xf32>
    %605 = arith.negf %604 : vector<8x32xf32>
    %606 = math.exp %605 : vector<8x32xf32>
    %cst_140 = arith.constant 1.000000e+00 : f32
    %607 = vector.broadcast %cst_140 : f32 to vector<8x32xf32>
    %608 = arith.addf %607, %606 : vector<8x32xf32>
    %609 = arith.divf %607, %608 : vector<8x32xf32>
    %610 = arith.mulf %601, %498 : vector<8x32xf32>
    %611 = arith.mulf %595, %603 : vector<8x32xf32>
    %612 = arith.addf %610, %611 : vector<8x32xf32>
    %613 = math.tanh %612 : vector<8x32xf32>
    %614 = arith.mulf %609, %613 : vector<8x32xf32>
    %615 = vector.extract_strided_slice %1 {offsets = [24, 0], sizes = [8, 16], strides = [1, 1]} : vector<64x16xf32> to vector<8x16xf32>
    %616 = vector.extract_strided_slice %3 {offsets = [24, 0], sizes = [8, 16], strides = [1, 1]} : vector<64x16xf32> to vector<8x16xf32>
    %617 = vector.extract_strided_slice %58 {offsets = [24, 0], sizes = [8, 32], strides = [1, 1]} : vector<64x32xf32> to vector<8x32xf32>
    %618 = arith.mulf %557, %617 : vector<8x32xf32>
    %cst_141 = arith.constant dense<0.000000e+00> : vector<8x144xf32>
    %619 = tpu.matmul %618, %93, %cst_141 {dimension_numbers = #tpu.dot_dimension_numbers<[1], [0], [0], [1], [0, 0, 1, 1], [], []>} : vector<8x32xf32>, vector<32x144xf32>, vector<8x144xf32> -> vector<8x144xf32>
    %620 = vector.extract_strided_slice %619 {offsets = [0, 0], sizes = [8, 128], strides = [1, 1]} : vector<8x144xf32> to vector<8x128xf32>
    %621 = vector.extract_strided_slice %619 {offsets = [0, 128], sizes = [8, 16], strides = [1, 1]} : vector<8x144xf32> to vector<8x16xf32>
    %622 = vector.broadcast %96 : vector<1x16xf32> to vector<8x16xf32>
    %623 = arith.addf %621, %622 : vector<8x16xf32>
    %624 = arith.mulf %616, %615 : vector<8x16xf32>
    %cst_142 = arith.constant 1.000000e+00 : f32
    %625 = vector.broadcast %cst_142 : f32 to vector<8x16xf32>
    %626 = arith.subf %625, %616 : vector<8x16xf32>
    %627 = arith.mulf %626, %623 : vector<8x16xf32>
    %628 = arith.addf %624, %627 : vector<8x16xf32>
    %cst_143 = arith.constant dense<0.000000e+00> : vector<8x16xf32>
    %629 = tpu.matmul %628, %94, %cst_143 {dimension_numbers = #tpu.dot_dimension_numbers<[1], [0], [0], [1], [0, 0, 1, 1], [], []>} : vector<8x16xf32>, vector<16x16xf32>, vector<8x16xf32> -> vector<8x16xf32>
    %630 = vector.broadcast %97 : vector<1x16xf32> to vector<8x16xf32>
    %631 = arith.addf %629, %630 : vector<8x16xf32>
    %632 = vector.extract_strided_slice %82 {offsets = [24, 0], sizes = [8, 16], strides = [1, 1]} : vector<64x16xf32> to vector<8x16xf32>
    %633 = arith.mulf %632, %631 : vector<8x16xf32>
    %cst_144 = arith.constant 1.000000e+00 : f32
    %634 = vector.broadcast %cst_144 : f32 to vector<8x16xf32>
    %635 = arith.subf %634, %632 : vector<8x16xf32>
    %636 = arith.mulf %635, %623 : vector<8x16xf32>
    %637 = arith.addf %633, %636 : vector<8x16xf32>
    %638 = arith.mulf %616, %615 : vector<8x16xf32>
    %cst_145 = arith.constant 1.000000e+00 : f32
    %639 = vector.broadcast %cst_145 : f32 to vector<8x16xf32>
    %640 = arith.subf %639, %616 : vector<8x16xf32>
    %641 = arith.mulf %640, %637 : vector<8x16xf32>
    %642 = arith.addf %638, %641 : vector<8x16xf32>
    %cst_146 = arith.constant dense<0.000000e+00> : vector<8x128xf32>
    %643 = tpu.matmul %642, %95, %cst_146 {dimension_numbers = #tpu.dot_dimension_numbers<[1], [0], [0], [1], [0, 0, 1, 1], [], []>} : vector<8x16xf32>, vector<16x128xf32>, vector<8x128xf32> -> vector<8x128xf32>
    %644 = arith.addf %643, %620 : vector<8x128xf32>
    %645 = vector.extract_strided_slice %87 {offsets = [24, 0], sizes = [8, 128], strides = [1, 1]} : vector<64x128xf32> to vector<8x128xf32>
    %646 = arith.addf %644, %645 : vector<8x128xf32>
    %647 = vector.extract_strided_slice %646 {offsets = [0, 0], sizes = [8, 32], strides = [1, 1]} : vector<8x128xf32> to vector<8x32xf32>
    %648 = arith.negf %647 : vector<8x32xf32>
    %649 = math.exp %648 : vector<8x32xf32>
    %cst_147 = arith.constant 1.000000e+00 : f32
    %650 = vector.broadcast %cst_147 : f32 to vector<8x32xf32>
    %651 = arith.addf %650, %649 : vector<8x32xf32>
    %652 = arith.divf %650, %651 : vector<8x32xf32>
    %653 = vector.extract_strided_slice %646 {offsets = [0, 32], sizes = [8, 32], strides = [1, 1]} : vector<8x128xf32> to vector<8x32xf32>
    %654 = arith.negf %653 : vector<8x32xf32>
    %655 = math.exp %654 : vector<8x32xf32>
    %cst_148 = arith.constant 1.000000e+00 : f32
    %656 = vector.broadcast %cst_148 : f32 to vector<8x32xf32>
    %657 = arith.addf %656, %655 : vector<8x32xf32>
    %658 = arith.divf %656, %657 : vector<8x32xf32>
    %659 = vector.extract_strided_slice %646 {offsets = [0, 64], sizes = [8, 32], strides = [1, 1]} : vector<8x128xf32> to vector<8x32xf32>
    %660 = math.tanh %659 : vector<8x32xf32>
    %661 = vector.extract_strided_slice %646 {offsets = [0, 96], sizes = [8, 32], strides = [1, 1]} : vector<8x128xf32> to vector<8x32xf32>
    %662 = arith.negf %661 : vector<8x32xf32>
    %663 = math.exp %662 : vector<8x32xf32>
    %cst_149 = arith.constant 1.000000e+00 : f32
    %664 = vector.broadcast %cst_149 : f32 to vector<8x32xf32>
    %665 = arith.addf %664, %663 : vector<8x32xf32>
    %666 = arith.divf %664, %665 : vector<8x32xf32>
    %667 = arith.mulf %658, %555 : vector<8x32xf32>
    %668 = arith.mulf %652, %660 : vector<8x32xf32>
    %669 = arith.addf %667, %668 : vector<8x32xf32>
    %670 = math.tanh %669 : vector<8x32xf32>
    %671 = arith.mulf %666, %670 : vector<8x32xf32>
    %672 = vector.extract_strided_slice %1 {offsets = [40, 0], sizes = [8, 16], strides = [1, 1]} : vector<64x16xf32> to vector<8x16xf32>
    %673 = vector.extract_strided_slice %3 {offsets = [40, 0], sizes = [8, 16], strides = [1, 1]} : vector<64x16xf32> to vector<8x16xf32>
    %674 = vector.extract_strided_slice %19 {offsets = [40, 0], sizes = [8, 32], strides = [1, 1]} : vector<64x32xf32> to vector<8x32xf32>
    %675 = arith.mulf %614, %674 : vector<8x32xf32>
    %cst_150 = arith.constant dense<0.000000e+00> : vector<8x144xf32>
    %676 = tpu.matmul %675, %88, %cst_150 {dimension_numbers = #tpu.dot_dimension_numbers<[1], [0], [0], [1], [0, 0, 1, 1], [], []>} : vector<8x32xf32>, vector<32x144xf32>, vector<8x144xf32> -> vector<8x144xf32>
    %677 = vector.extract_strided_slice %676 {offsets = [0, 0], sizes = [8, 128], strides = [1, 1]} : vector<8x144xf32> to vector<8x128xf32>
    %678 = vector.extract_strided_slice %676 {offsets = [0, 128], sizes = [8, 16], strides = [1, 1]} : vector<8x144xf32> to vector<8x16xf32>
    %679 = vector.broadcast %91 : vector<1x16xf32> to vector<8x16xf32>
    %680 = arith.addf %678, %679 : vector<8x16xf32>
    %681 = arith.mulf %673, %672 : vector<8x16xf32>
    %cst_151 = arith.constant 1.000000e+00 : f32
    %682 = vector.broadcast %cst_151 : f32 to vector<8x16xf32>
    %683 = arith.subf %682, %673 : vector<8x16xf32>
    %684 = arith.mulf %683, %680 : vector<8x16xf32>
    %685 = arith.addf %681, %684 : vector<8x16xf32>
    %cst_152 = arith.constant dense<0.000000e+00> : vector<8x16xf32>
    %686 = tpu.matmul %685, %89, %cst_152 {dimension_numbers = #tpu.dot_dimension_numbers<[1], [0], [0], [1], [0, 0, 1, 1], [], []>} : vector<8x16xf32>, vector<16x16xf32>, vector<8x16xf32> -> vector<8x16xf32>
    %687 = vector.broadcast %92 : vector<1x16xf32> to vector<8x16xf32>
    %688 = arith.addf %686, %687 : vector<8x16xf32>
    %689 = vector.extract_strided_slice %43 {offsets = [40, 0], sizes = [8, 16], strides = [1, 1]} : vector<64x16xf32> to vector<8x16xf32>
    %690 = arith.mulf %689, %688 : vector<8x16xf32>
    %cst_153 = arith.constant 1.000000e+00 : f32
    %691 = vector.broadcast %cst_153 : f32 to vector<8x16xf32>
    %692 = arith.subf %691, %689 : vector<8x16xf32>
    %693 = arith.mulf %692, %680 : vector<8x16xf32>
    %694 = arith.addf %690, %693 : vector<8x16xf32>
    %695 = arith.mulf %673, %672 : vector<8x16xf32>
    %cst_154 = arith.constant 1.000000e+00 : f32
    %696 = vector.broadcast %cst_154 : f32 to vector<8x16xf32>
    %697 = arith.subf %696, %673 : vector<8x16xf32>
    %698 = arith.mulf %697, %694 : vector<8x16xf32>
    %699 = arith.addf %695, %698 : vector<8x16xf32>
    %cst_155 = arith.constant dense<0.000000e+00> : vector<8x128xf32>
    %700 = tpu.matmul %699, %90, %cst_155 {dimension_numbers = #tpu.dot_dimension_numbers<[1], [0], [0], [1], [0, 0, 1, 1], [], []>} : vector<8x16xf32>, vector<16x128xf32>, vector<8x128xf32> -> vector<8x128xf32>
    %701 = arith.addf %700, %677 : vector<8x128xf32>
    %702 = vector.extract_strided_slice %48 {offsets = [40, 0], sizes = [8, 128], strides = [1, 1]} : vector<64x128xf32> to vector<8x128xf32>
    %703 = arith.addf %701, %702 : vector<8x128xf32>
    %704 = vector.extract_strided_slice %703 {offsets = [0, 0], sizes = [8, 32], strides = [1, 1]} : vector<8x128xf32> to vector<8x32xf32>
    %705 = arith.negf %704 : vector<8x32xf32>
    %706 = math.exp %705 : vector<8x32xf32>
    %cst_156 = arith.constant 1.000000e+00 : f32
    %707 = vector.broadcast %cst_156 : f32 to vector<8x32xf32>
    %708 = arith.addf %707, %706 : vector<8x32xf32>
    %709 = arith.divf %707, %708 : vector<8x32xf32>
    %710 = vector.extract_strided_slice %703 {offsets = [0, 32], sizes = [8, 32], strides = [1, 1]} : vector<8x128xf32> to vector<8x32xf32>
    %711 = arith.negf %710 : vector<8x32xf32>
    %712 = math.exp %711 : vector<8x32xf32>
    %cst_157 = arith.constant 1.000000e+00 : f32
    %713 = vector.broadcast %cst_157 : f32 to vector<8x32xf32>
    %714 = arith.addf %713, %712 : vector<8x32xf32>
    %715 = arith.divf %713, %714 : vector<8x32xf32>
    %716 = vector.extract_strided_slice %703 {offsets = [0, 64], sizes = [8, 32], strides = [1, 1]} : vector<8x128xf32> to vector<8x32xf32>
    %717 = math.tanh %716 : vector<8x32xf32>
    %718 = vector.extract_strided_slice %703 {offsets = [0, 96], sizes = [8, 32], strides = [1, 1]} : vector<8x128xf32> to vector<8x32xf32>
    %719 = arith.negf %718 : vector<8x32xf32>
    %720 = math.exp %719 : vector<8x32xf32>
    %cst_158 = arith.constant 1.000000e+00 : f32
    %721 = vector.broadcast %cst_158 : f32 to vector<8x32xf32>
    %722 = arith.addf %721, %720 : vector<8x32xf32>
    %723 = arith.divf %721, %722 : vector<8x32xf32>
    %724 = arith.mulf %715, %612 : vector<8x32xf32>
    %725 = arith.mulf %709, %717 : vector<8x32xf32>
    %726 = arith.addf %724, %725 : vector<8x32xf32>
    %727 = math.tanh %726 : vector<8x32xf32>
    %728 = arith.mulf %723, %727 : vector<8x32xf32>
    %729 = vector.extract_strided_slice %1 {offsets = [16, 0], sizes = [8, 16], strides = [1, 1]} : vector<64x16xf32> to vector<8x16xf32>
    %730 = vector.extract_strided_slice %3 {offsets = [16, 0], sizes = [8, 16], strides = [1, 1]} : vector<64x16xf32> to vector<8x16xf32>
    %731 = vector.extract_strided_slice %58 {offsets = [16, 0], sizes = [8, 32], strides = [1, 1]} : vector<64x32xf32> to vector<8x32xf32>
    %732 = arith.mulf %671, %731 : vector<8x32xf32>
    %cst_159 = arith.constant dense<0.000000e+00> : vector<8x144xf32>
    %733 = tpu.matmul %732, %93, %cst_159 {dimension_numbers = #tpu.dot_dimension_numbers<[1], [0], [0], [1], [0, 0, 1, 1], [], []>} : vector<8x32xf32>, vector<32x144xf32>, vector<8x144xf32> -> vector<8x144xf32>
    %734 = vector.extract_strided_slice %733 {offsets = [0, 0], sizes = [8, 128], strides = [1, 1]} : vector<8x144xf32> to vector<8x128xf32>
    %735 = vector.extract_strided_slice %733 {offsets = [0, 128], sizes = [8, 16], strides = [1, 1]} : vector<8x144xf32> to vector<8x16xf32>
    %736 = vector.broadcast %96 : vector<1x16xf32> to vector<8x16xf32>
    %737 = arith.addf %735, %736 : vector<8x16xf32>
    %738 = arith.mulf %730, %729 : vector<8x16xf32>
    %cst_160 = arith.constant 1.000000e+00 : f32
    %739 = vector.broadcast %cst_160 : f32 to vector<8x16xf32>
    %740 = arith.subf %739, %730 : vector<8x16xf32>
    %741 = arith.mulf %740, %737 : vector<8x16xf32>
    %742 = arith.addf %738, %741 : vector<8x16xf32>
    %cst_161 = arith.constant dense<0.000000e+00> : vector<8x16xf32>
    %743 = tpu.matmul %742, %94, %cst_161 {dimension_numbers = #tpu.dot_dimension_numbers<[1], [0], [0], [1], [0, 0, 1, 1], [], []>} : vector<8x16xf32>, vector<16x16xf32>, vector<8x16xf32> -> vector<8x16xf32>
    %744 = vector.broadcast %97 : vector<1x16xf32> to vector<8x16xf32>
    %745 = arith.addf %743, %744 : vector<8x16xf32>
    %746 = vector.extract_strided_slice %82 {offsets = [16, 0], sizes = [8, 16], strides = [1, 1]} : vector<64x16xf32> to vector<8x16xf32>
    %747 = arith.mulf %746, %745 : vector<8x16xf32>
    %cst_162 = arith.constant 1.000000e+00 : f32
    %748 = vector.broadcast %cst_162 : f32 to vector<8x16xf32>
    %749 = arith.subf %748, %746 : vector<8x16xf32>
    %750 = arith.mulf %749, %737 : vector<8x16xf32>
    %751 = arith.addf %747, %750 : vector<8x16xf32>
    %752 = arith.mulf %730, %729 : vector<8x16xf32>
    %cst_163 = arith.constant 1.000000e+00 : f32
    %753 = vector.broadcast %cst_163 : f32 to vector<8x16xf32>
    %754 = arith.subf %753, %730 : vector<8x16xf32>
    %755 = arith.mulf %754, %751 : vector<8x16xf32>
    %756 = arith.addf %752, %755 : vector<8x16xf32>
    %cst_164 = arith.constant dense<0.000000e+00> : vector<8x128xf32>
    %757 = tpu.matmul %756, %95, %cst_164 {dimension_numbers = #tpu.dot_dimension_numbers<[1], [0], [0], [1], [0, 0, 1, 1], [], []>} : vector<8x16xf32>, vector<16x128xf32>, vector<8x128xf32> -> vector<8x128xf32>
    %758 = arith.addf %757, %734 : vector<8x128xf32>
    %759 = vector.extract_strided_slice %87 {offsets = [16, 0], sizes = [8, 128], strides = [1, 1]} : vector<64x128xf32> to vector<8x128xf32>
    %760 = arith.addf %758, %759 : vector<8x128xf32>
    %761 = vector.extract_strided_slice %760 {offsets = [0, 0], sizes = [8, 32], strides = [1, 1]} : vector<8x128xf32> to vector<8x32xf32>
    %762 = arith.negf %761 : vector<8x32xf32>
    %763 = math.exp %762 : vector<8x32xf32>
    %cst_165 = arith.constant 1.000000e+00 : f32
    %764 = vector.broadcast %cst_165 : f32 to vector<8x32xf32>
    %765 = arith.addf %764, %763 : vector<8x32xf32>
    %766 = arith.divf %764, %765 : vector<8x32xf32>
    %767 = vector.extract_strided_slice %760 {offsets = [0, 32], sizes = [8, 32], strides = [1, 1]} : vector<8x128xf32> to vector<8x32xf32>
    %768 = arith.negf %767 : vector<8x32xf32>
    %769 = math.exp %768 : vector<8x32xf32>
    %cst_166 = arith.constant 1.000000e+00 : f32
    %770 = vector.broadcast %cst_166 : f32 to vector<8x32xf32>
    %771 = arith.addf %770, %769 : vector<8x32xf32>
    %772 = arith.divf %770, %771 : vector<8x32xf32>
    %773 = vector.extract_strided_slice %760 {offsets = [0, 64], sizes = [8, 32], strides = [1, 1]} : vector<8x128xf32> to vector<8x32xf32>
    %774 = math.tanh %773 : vector<8x32xf32>
    %775 = vector.extract_strided_slice %760 {offsets = [0, 96], sizes = [8, 32], strides = [1, 1]} : vector<8x128xf32> to vector<8x32xf32>
    %776 = arith.negf %775 : vector<8x32xf32>
    %777 = math.exp %776 : vector<8x32xf32>
    %cst_167 = arith.constant 1.000000e+00 : f32
    %778 = vector.broadcast %cst_167 : f32 to vector<8x32xf32>
    %779 = arith.addf %778, %777 : vector<8x32xf32>
    %780 = arith.divf %778, %779 : vector<8x32xf32>
    %781 = arith.mulf %772, %669 : vector<8x32xf32>
    %782 = arith.mulf %766, %774 : vector<8x32xf32>
    %783 = arith.addf %781, %782 : vector<8x32xf32>
    %784 = math.tanh %783 : vector<8x32xf32>
    %785 = arith.mulf %780, %784 : vector<8x32xf32>
    %786 = vector.extract_strided_slice %1 {offsets = [48, 0], sizes = [8, 16], strides = [1, 1]} : vector<64x16xf32> to vector<8x16xf32>
    %787 = vector.extract_strided_slice %3 {offsets = [48, 0], sizes = [8, 16], strides = [1, 1]} : vector<64x16xf32> to vector<8x16xf32>
    %788 = vector.extract_strided_slice %19 {offsets = [48, 0], sizes = [8, 32], strides = [1, 1]} : vector<64x32xf32> to vector<8x32xf32>
    %789 = arith.mulf %728, %788 : vector<8x32xf32>
    %cst_168 = arith.constant dense<0.000000e+00> : vector<8x144xf32>
    %790 = tpu.matmul %789, %88, %cst_168 {dimension_numbers = #tpu.dot_dimension_numbers<[1], [0], [0], [1], [0, 0, 1, 1], [], []>} : vector<8x32xf32>, vector<32x144xf32>, vector<8x144xf32> -> vector<8x144xf32>
    %791 = vector.extract_strided_slice %790 {offsets = [0, 0], sizes = [8, 128], strides = [1, 1]} : vector<8x144xf32> to vector<8x128xf32>
    %792 = vector.extract_strided_slice %790 {offsets = [0, 128], sizes = [8, 16], strides = [1, 1]} : vector<8x144xf32> to vector<8x16xf32>
    %793 = vector.broadcast %91 : vector<1x16xf32> to vector<8x16xf32>
    %794 = arith.addf %792, %793 : vector<8x16xf32>
    %795 = arith.mulf %787, %786 : vector<8x16xf32>
    %cst_169 = arith.constant 1.000000e+00 : f32
    %796 = vector.broadcast %cst_169 : f32 to vector<8x16xf32>
    %797 = arith.subf %796, %787 : vector<8x16xf32>
    %798 = arith.mulf %797, %794 : vector<8x16xf32>
    %799 = arith.addf %795, %798 : vector<8x16xf32>
    %cst_170 = arith.constant dense<0.000000e+00> : vector<8x16xf32>
    %800 = tpu.matmul %799, %89, %cst_170 {dimension_numbers = #tpu.dot_dimension_numbers<[1], [0], [0], [1], [0, 0, 1, 1], [], []>} : vector<8x16xf32>, vector<16x16xf32>, vector<8x16xf32> -> vector<8x16xf32>
    %801 = vector.broadcast %92 : vector<1x16xf32> to vector<8x16xf32>
    %802 = arith.addf %800, %801 : vector<8x16xf32>
    %803 = vector.extract_strided_slice %43 {offsets = [48, 0], sizes = [8, 16], strides = [1, 1]} : vector<64x16xf32> to vector<8x16xf32>
    %804 = arith.mulf %803, %802 : vector<8x16xf32>
    %cst_171 = arith.constant 1.000000e+00 : f32
    %805 = vector.broadcast %cst_171 : f32 to vector<8x16xf32>
    %806 = arith.subf %805, %803 : vector<8x16xf32>
    %807 = arith.mulf %806, %794 : vector<8x16xf32>
    %808 = arith.addf %804, %807 : vector<8x16xf32>
    %809 = arith.mulf %787, %786 : vector<8x16xf32>
    %cst_172 = arith.constant 1.000000e+00 : f32
    %810 = vector.broadcast %cst_172 : f32 to vector<8x16xf32>
    %811 = arith.subf %810, %787 : vector<8x16xf32>
    %812 = arith.mulf %811, %808 : vector<8x16xf32>
    %813 = arith.addf %809, %812 : vector<8x16xf32>
    %cst_173 = arith.constant dense<0.000000e+00> : vector<8x128xf32>
    %814 = tpu.matmul %813, %90, %cst_173 {dimension_numbers = #tpu.dot_dimension_numbers<[1], [0], [0], [1], [0, 0, 1, 1], [], []>} : vector<8x16xf32>, vector<16x128xf32>, vector<8x128xf32> -> vector<8x128xf32>
    %815 = arith.addf %814, %791 : vector<8x128xf32>
    %816 = vector.extract_strided_slice %48 {offsets = [48, 0], sizes = [8, 128], strides = [1, 1]} : vector<64x128xf32> to vector<8x128xf32>
    %817 = arith.addf %815, %816 : vector<8x128xf32>
    %818 = vector.extract_strided_slice %817 {offsets = [0, 0], sizes = [8, 32], strides = [1, 1]} : vector<8x128xf32> to vector<8x32xf32>
    %819 = arith.negf %818 : vector<8x32xf32>
    %820 = math.exp %819 : vector<8x32xf32>
    %cst_174 = arith.constant 1.000000e+00 : f32
    %821 = vector.broadcast %cst_174 : f32 to vector<8x32xf32>
    %822 = arith.addf %821, %820 : vector<8x32xf32>
    %823 = arith.divf %821, %822 : vector<8x32xf32>
    %824 = vector.extract_strided_slice %817 {offsets = [0, 32], sizes = [8, 32], strides = [1, 1]} : vector<8x128xf32> to vector<8x32xf32>
    %825 = arith.negf %824 : vector<8x32xf32>
    %826 = math.exp %825 : vector<8x32xf32>
    %cst_175 = arith.constant 1.000000e+00 : f32
    %827 = vector.broadcast %cst_175 : f32 to vector<8x32xf32>
    %828 = arith.addf %827, %826 : vector<8x32xf32>
    %829 = arith.divf %827, %828 : vector<8x32xf32>
    %830 = vector.extract_strided_slice %817 {offsets = [0, 64], sizes = [8, 32], strides = [1, 1]} : vector<8x128xf32> to vector<8x32xf32>
    %831 = math.tanh %830 : vector<8x32xf32>
    %832 = vector.extract_strided_slice %817 {offsets = [0, 96], sizes = [8, 32], strides = [1, 1]} : vector<8x128xf32> to vector<8x32xf32>
    %833 = arith.negf %832 : vector<8x32xf32>
    %834 = math.exp %833 : vector<8x32xf32>
    %cst_176 = arith.constant 1.000000e+00 : f32
    %835 = vector.broadcast %cst_176 : f32 to vector<8x32xf32>
    %836 = arith.addf %835, %834 : vector<8x32xf32>
    %837 = arith.divf %835, %836 : vector<8x32xf32>
    %838 = arith.mulf %829, %726 : vector<8x32xf32>
    %839 = arith.mulf %823, %831 : vector<8x32xf32>
    %840 = arith.addf %838, %839 : vector<8x32xf32>
    %841 = math.tanh %840 : vector<8x32xf32>
    %842 = arith.mulf %837, %841 : vector<8x32xf32>
    %843 = vector.extract_strided_slice %1 {offsets = [8, 0], sizes = [8, 16], strides = [1, 1]} : vector<64x16xf32> to vector<8x16xf32>
    %844 = vector.extract_strided_slice %3 {offsets = [8, 0], sizes = [8, 16], strides = [1, 1]} : vector<64x16xf32> to vector<8x16xf32>
    %845 = vector.extract_strided_slice %58 {offsets = [8, 0], sizes = [8, 32], strides = [1, 1]} : vector<64x32xf32> to vector<8x32xf32>
    %846 = arith.mulf %785, %845 : vector<8x32xf32>
    %cst_177 = arith.constant dense<0.000000e+00> : vector<8x144xf32>
    %847 = tpu.matmul %846, %93, %cst_177 {dimension_numbers = #tpu.dot_dimension_numbers<[1], [0], [0], [1], [0, 0, 1, 1], [], []>} : vector<8x32xf32>, vector<32x144xf32>, vector<8x144xf32> -> vector<8x144xf32>
    %848 = vector.extract_strided_slice %847 {offsets = [0, 0], sizes = [8, 128], strides = [1, 1]} : vector<8x144xf32> to vector<8x128xf32>
    %849 = vector.extract_strided_slice %847 {offsets = [0, 128], sizes = [8, 16], strides = [1, 1]} : vector<8x144xf32> to vector<8x16xf32>
    %850 = vector.broadcast %96 : vector<1x16xf32> to vector<8x16xf32>
    %851 = arith.addf %849, %850 : vector<8x16xf32>
    %852 = arith.mulf %844, %843 : vector<8x16xf32>
    %cst_178 = arith.constant 1.000000e+00 : f32
    %853 = vector.broadcast %cst_178 : f32 to vector<8x16xf32>
    %854 = arith.subf %853, %844 : vector<8x16xf32>
    %855 = arith.mulf %854, %851 : vector<8x16xf32>
    %856 = arith.addf %852, %855 : vector<8x16xf32>
    %cst_179 = arith.constant dense<0.000000e+00> : vector<8x16xf32>
    %857 = tpu.matmul %856, %94, %cst_179 {dimension_numbers = #tpu.dot_dimension_numbers<[1], [0], [0], [1], [0, 0, 1, 1], [], []>} : vector<8x16xf32>, vector<16x16xf32>, vector<8x16xf32> -> vector<8x16xf32>
    %858 = vector.broadcast %97 : vector<1x16xf32> to vector<8x16xf32>
    %859 = arith.addf %857, %858 : vector<8x16xf32>
    %860 = vector.extract_strided_slice %82 {offsets = [8, 0], sizes = [8, 16], strides = [1, 1]} : vector<64x16xf32> to vector<8x16xf32>
    %861 = arith.mulf %860, %859 : vector<8x16xf32>
    %cst_180 = arith.constant 1.000000e+00 : f32
    %862 = vector.broadcast %cst_180 : f32 to vector<8x16xf32>
    %863 = arith.subf %862, %860 : vector<8x16xf32>
    %864 = arith.mulf %863, %851 : vector<8x16xf32>
    %865 = arith.addf %861, %864 : vector<8x16xf32>
    %866 = arith.mulf %844, %843 : vector<8x16xf32>
    %cst_181 = arith.constant 1.000000e+00 : f32
    %867 = vector.broadcast %cst_181 : f32 to vector<8x16xf32>
    %868 = arith.subf %867, %844 : vector<8x16xf32>
    %869 = arith.mulf %868, %865 : vector<8x16xf32>
    %870 = arith.addf %866, %869 : vector<8x16xf32>
    %cst_182 = arith.constant dense<0.000000e+00> : vector<8x128xf32>
    %871 = tpu.matmul %870, %95, %cst_182 {dimension_numbers = #tpu.dot_dimension_numbers<[1], [0], [0], [1], [0, 0, 1, 1], [], []>} : vector<8x16xf32>, vector<16x128xf32>, vector<8x128xf32> -> vector<8x128xf32>
    %872 = arith.addf %871, %848 : vector<8x128xf32>
    %873 = vector.extract_strided_slice %87 {offsets = [8, 0], sizes = [8, 128], strides = [1, 1]} : vector<64x128xf32> to vector<8x128xf32>
    %874 = arith.addf %872, %873 : vector<8x128xf32>
    %875 = vector.extract_strided_slice %874 {offsets = [0, 0], sizes = [8, 32], strides = [1, 1]} : vector<8x128xf32> to vector<8x32xf32>
    %876 = arith.negf %875 : vector<8x32xf32>
    %877 = math.exp %876 : vector<8x32xf32>
    %cst_183 = arith.constant 1.000000e+00 : f32
    %878 = vector.broadcast %cst_183 : f32 to vector<8x32xf32>
    %879 = arith.addf %878, %877 : vector<8x32xf32>
    %880 = arith.divf %878, %879 : vector<8x32xf32>
    %881 = vector.extract_strided_slice %874 {offsets = [0, 32], sizes = [8, 32], strides = [1, 1]} : vector<8x128xf32> to vector<8x32xf32>
    %882 = arith.negf %881 : vector<8x32xf32>
    %883 = math.exp %882 : vector<8x32xf32>
    %cst_184 = arith.constant 1.000000e+00 : f32
    %884 = vector.broadcast %cst_184 : f32 to vector<8x32xf32>
    %885 = arith.addf %884, %883 : vector<8x32xf32>
    %886 = arith.divf %884, %885 : vector<8x32xf32>
    %887 = vector.extract_strided_slice %874 {offsets = [0, 64], sizes = [8, 32], strides = [1, 1]} : vector<8x128xf32> to vector<8x32xf32>
    %888 = math.tanh %887 : vector<8x32xf32>
    %889 = vector.extract_strided_slice %874 {offsets = [0, 96], sizes = [8, 32], strides = [1, 1]} : vector<8x128xf32> to vector<8x32xf32>
    %890 = arith.negf %889 : vector<8x32xf32>
    %891 = math.exp %890 : vector<8x32xf32>
    %cst_185 = arith.constant 1.000000e+00 : f32
    %892 = vector.broadcast %cst_185 : f32 to vector<8x32xf32>
    %893 = arith.addf %892, %891 : vector<8x32xf32>
    %894 = arith.divf %892, %893 : vector<8x32xf32>
    %895 = arith.mulf %886, %783 : vector<8x32xf32>
    %896 = arith.mulf %880, %888 : vector<8x32xf32>
    %897 = arith.addf %895, %896 : vector<8x32xf32>
    %898 = math.tanh %897 : vector<8x32xf32>
    %899 = arith.mulf %894, %898 : vector<8x32xf32>
    %900 = vector.extract_strided_slice %1 {offsets = [56, 0], sizes = [8, 16], strides = [1, 1]} : vector<64x16xf32> to vector<8x16xf32>
    %901 = vector.extract_strided_slice %3 {offsets = [56, 0], sizes = [8, 16], strides = [1, 1]} : vector<64x16xf32> to vector<8x16xf32>
    %902 = vector.extract_strided_slice %19 {offsets = [56, 0], sizes = [8, 32], strides = [1, 1]} : vector<64x32xf32> to vector<8x32xf32>
    %903 = arith.mulf %842, %902 : vector<8x32xf32>
    %cst_186 = arith.constant dense<0.000000e+00> : vector<8x144xf32>
    %904 = tpu.matmul %903, %88, %cst_186 {dimension_numbers = #tpu.dot_dimension_numbers<[1], [0], [0], [1], [0, 0, 1, 1], [], []>} : vector<8x32xf32>, vector<32x144xf32>, vector<8x144xf32> -> vector<8x144xf32>
    %905 = vector.extract_strided_slice %904 {offsets = [0, 128], sizes = [8, 16], strides = [1, 1]} : vector<8x144xf32> to vector<8x16xf32>
    %906 = vector.broadcast %91 : vector<1x16xf32> to vector<8x16xf32>
    %907 = arith.addf %905, %906 : vector<8x16xf32>
    %908 = arith.mulf %901, %900 : vector<8x16xf32>
    %cst_187 = arith.constant 1.000000e+00 : f32
    %909 = vector.broadcast %cst_187 : f32 to vector<8x16xf32>
    %910 = arith.subf %909, %901 : vector<8x16xf32>
    %911 = arith.mulf %910, %907 : vector<8x16xf32>
    %912 = arith.addf %908, %911 : vector<8x16xf32>
    %cst_188 = arith.constant dense<0.000000e+00> : vector<8x16xf32>
    %913 = tpu.matmul %912, %89, %cst_188 {dimension_numbers = #tpu.dot_dimension_numbers<[1], [0], [0], [1], [0, 0, 1, 1], [], []>} : vector<8x16xf32>, vector<16x16xf32>, vector<8x16xf32> -> vector<8x16xf32>
    %914 = vector.broadcast %92 : vector<1x16xf32> to vector<8x16xf32>
    %915 = arith.addf %913, %914 : vector<8x16xf32>
    %916 = vector.extract_strided_slice %43 {offsets = [56, 0], sizes = [8, 16], strides = [1, 1]} : vector<64x16xf32> to vector<8x16xf32>
    %917 = arith.mulf %916, %915 : vector<8x16xf32>
    %cst_189 = arith.constant 1.000000e+00 : f32
    %918 = vector.broadcast %cst_189 : f32 to vector<8x16xf32>
    %919 = arith.subf %918, %916 : vector<8x16xf32>
    %920 = arith.mulf %919, %907 : vector<8x16xf32>
    %921 = arith.addf %917, %920 : vector<8x16xf32>
    %922 = arith.mulf %901, %900 : vector<8x16xf32>
    %cst_190 = arith.constant 1.000000e+00 : f32
    %923 = vector.broadcast %cst_190 : f32 to vector<8x16xf32>
    %924 = arith.subf %923, %901 : vector<8x16xf32>
    %925 = arith.mulf %924, %921 : vector<8x16xf32>
    %926 = arith.addf %922, %925 : vector<8x16xf32>
    %927 = vector.extract_strided_slice %1 {offsets = [0, 0], sizes = [8, 16], strides = [1, 1]} : vector<64x16xf32> to vector<8x16xf32>
    %928 = vector.extract_strided_slice %3 {offsets = [0, 0], sizes = [8, 16], strides = [1, 1]} : vector<64x16xf32> to vector<8x16xf32>
    %929 = vector.extract_strided_slice %58 {offsets = [0, 0], sizes = [8, 32], strides = [1, 1]} : vector<64x32xf32> to vector<8x32xf32>
    %930 = arith.mulf %899, %929 : vector<8x32xf32>
    %cst_191 = arith.constant dense<0.000000e+00> : vector<8x144xf32>
    %931 = tpu.matmul %930, %93, %cst_191 {dimension_numbers = #tpu.dot_dimension_numbers<[1], [0], [0], [1], [0, 0, 1, 1], [], []>} : vector<8x32xf32>, vector<32x144xf32>, vector<8x144xf32> -> vector<8x144xf32>
    %932 = vector.extract_strided_slice %931 {offsets = [0, 128], sizes = [8, 16], strides = [1, 1]} : vector<8x144xf32> to vector<8x16xf32>
    %933 = vector.broadcast %96 : vector<1x16xf32> to vector<8x16xf32>
    %934 = arith.addf %932, %933 : vector<8x16xf32>
    %935 = arith.mulf %928, %927 : vector<8x16xf32>
    %cst_192 = arith.constant 1.000000e+00 : f32
    %936 = vector.broadcast %cst_192 : f32 to vector<8x16xf32>
    %937 = arith.subf %936, %928 : vector<8x16xf32>
    %938 = arith.mulf %937, %934 : vector<8x16xf32>
    %939 = arith.addf %935, %938 : vector<8x16xf32>
    %cst_193 = arith.constant dense<0.000000e+00> : vector<8x16xf32>
    %940 = tpu.matmul %939, %94, %cst_193 {dimension_numbers = #tpu.dot_dimension_numbers<[1], [0], [0], [1], [0, 0, 1, 1], [], []>} : vector<8x16xf32>, vector<16x16xf32>, vector<8x16xf32> -> vector<8x16xf32>
    %941 = vector.broadcast %97 : vector<1x16xf32> to vector<8x16xf32>
    %942 = arith.addf %940, %941 : vector<8x16xf32>
    %943 = vector.extract_strided_slice %82 {offsets = [0, 0], sizes = [8, 16], strides = [1, 1]} : vector<64x16xf32> to vector<8x16xf32>
    %944 = arith.mulf %943, %942 : vector<8x16xf32>
    %cst_194 = arith.constant 1.000000e+00 : f32
    %945 = vector.broadcast %cst_194 : f32 to vector<8x16xf32>
    %946 = arith.subf %945, %943 : vector<8x16xf32>
    %947 = arith.mulf %946, %934 : vector<8x16xf32>
    %948 = arith.addf %944, %947 : vector<8x16xf32>
    %949 = arith.mulf %928, %927 : vector<8x16xf32>
    %cst_195 = arith.constant 1.000000e+00 : f32
    %950 = vector.broadcast %cst_195 : f32 to vector<8x16xf32>
    %951 = arith.subf %950, %928 : vector<8x16xf32>
    %952 = arith.mulf %951, %948 : vector<8x16xf32>
    %953 = arith.addf %949, %952 : vector<8x16xf32>
    %954 = tpu.concatenate %124, %238, %352, %466, %580, %694, %808, %921 in 0 : vector<8x16xf32>, vector<8x16xf32>, vector<8x16xf32>, vector<8x16xf32>, vector<8x16xf32>, vector<8x16xf32>, vector<8x16xf32>, vector<8x16xf32> -> vector<64x16xf32>
    %955 = tpu.concatenate %948, %865, %751, %637, %523, %409, %295, %181 in 0 : vector<8x16xf32>, vector<8x16xf32>, vector<8x16xf32>, vector<8x16xf32>, vector<8x16xf32>, vector<8x16xf32>, vector<8x16xf32>, vector<8x16xf32> -> vector<64x16xf32>
    %956 = tpu.concatenate %129, %243, %357, %471, %585, %699, %813, %926 in 0 : vector<8x16xf32>, vector<8x16xf32>, vector<8x16xf32>, vector<8x16xf32>, vector<8x16xf32>, vector<8x16xf32>, vector<8x16xf32>, vector<8x16xf32> -> vector<64x16xf32>
    %957 = tpu.concatenate %953, %870, %756, %642, %528, %414, %300, %186 in 0 : vector<8x16xf32>, vector<8x16xf32>, vector<8x16xf32>, vector<8x16xf32>, vector<8x16xf32>, vector<8x16xf32>, vector<8x16xf32>, vector<8x16xf32> -> vector<64x16xf32>
    %958 = arith.addf %956, %957 : vector<64x16xf32>
    %cst_196 = arith.constant 5.000000e-01 : f32
    %959 = vector.broadcast %cst_196 : f32 to vector<64x16xf32>
    %960 = arith.mulf %959, %958 : vector<64x16xf32>
    %961 = arith.addf %954, %955 : vector<64x16xf32>
    %cst_197 = arith.constant 5.000000e-01 : f32
    %962 = vector.broadcast %cst_197 : f32 to vector<64x16xf32>
    %963 = arith.mulf %962, %961 : vector<64x16xf32>
    %964 = arith.mulf %9, %3 : vector<64x16xf32>
    %cst_198 = arith.constant 1.000000e+00 : f32
    %965 = vector.broadcast %cst_198 : f32 to vector<64x16xf32>
    %966 = arith.subf %965, %9 : vector<64x16xf32>
    %cst_199 = arith.constant 5.000000e-01 : f32
    %967 = vector.broadcast %cst_199 : f32 to vector<64x16xf32>
    %968 = arith.mulf %966, %967 : vector<64x16xf32>
    %969 = arith.addf %964, %968 : vector<64x16xf32>
    %970 = tpu.concatenate %960, %969 in 1 : vector<64x16xf32>, vector<64x16xf32> -> vector<64x32xf32>
    %c368 = arith.constant 368 : index
    %c0_200 = arith.constant 0 : index
    %971 = vector.load %arg1[%c368, %c0_200] : memref<600x144xf32, #tpu.memory_space<vmem>>, vector<32x96xf32>
    %cst_201 = arith.constant dense<0.000000e+00> : vector<64x96xf32>
    %972 = tpu.matmul %970, %971, %cst_201 {dimension_numbers = #tpu.dot_dimension_numbers<[1], [0], [0], [1], [0, 0, 1, 1], [], []>} : vector<64x32xf32>, vector<32x96xf32>, vector<64x96xf32> -> vector<64x96xf32>
    %c432 = arith.constant 432 : index
    %c0_202 = arith.constant 0 : index
    %973 = vector.load %arg1[%c432, %c0_202] : memref<600x144xf32, #tpu.memory_space<vmem>>, vector<1x96xf32>
    %974 = vector.broadcast %973 : vector<1x96xf32> to vector<64x96xf32>
    %975 = arith.addf %972, %974 : vector<64x96xf32>
    %c448 = arith.constant 448 : index
    %c0_203 = arith.constant 0 : index
    %976 = vector.load %arg1[%c448, %c0_203] : memref<600x144xf32, #tpu.memory_space<vmem>>, vector<32x96xf32>
    %cst_204 = arith.constant dense<0.000000e+00> : vector<64x96xf32>
    %977 = tpu.matmul %970, %976, %cst_204 {dimension_numbers = #tpu.dot_dimension_numbers<[1], [0], [0], [1], [0, 0, 1, 1], [], []>} : vector<64x32xf32>, vector<32x96xf32>, vector<64x96xf32> -> vector<64x96xf32>
    %c512 = arith.constant 512 : index
    %c0_205 = arith.constant 0 : index
    %978 = vector.load %arg1[%c512, %c0_205] : memref<600x144xf32, #tpu.memory_space<vmem>>, vector<1x96xf32>
    %979 = vector.broadcast %978 : vector<1x96xf32> to vector<64x96xf32>
    %980 = arith.addf %977, %979 : vector<64x96xf32>
    %c400 = arith.constant 400 : index
    %c0_206 = arith.constant 0 : index
    %981 = vector.load %arg1[%c400, %c0_206] : memref<600x144xf32, #tpu.memory_space<vmem>>, vector<32x96xf32>
    %c440 = arith.constant 440 : index
    %c0_207 = arith.constant 0 : index
    %982 = vector.load %arg1[%c440, %c0_207] : memref<600x144xf32, #tpu.memory_space<vmem>>, vector<1x96xf32>
    %c480 = arith.constant 480 : index
    %c0_208 = arith.constant 0 : index
    %983 = vector.load %arg1[%c480, %c0_208] : memref<600x144xf32, #tpu.memory_space<vmem>>, vector<32x96xf32>
    %c520 = arith.constant 520 : index
    %c0_209 = arith.constant 0 : index
    %984 = vector.load %arg1[%c520, %c0_209] : memref<600x144xf32, #tpu.memory_space<vmem>>, vector<1x96xf32>
    %cst_210 = arith.constant 0.000000e+00 : f32
    %985 = vector.broadcast %cst_210 : f32 to vector<8x32xf32>
    %cst_211 = arith.constant 0.000000e+00 : f32
    %986 = vector.broadcast %cst_211 : f32 to vector<8x32xf32>
    %987 = vector.extract_strided_slice %975 {offsets = [0, 0], sizes = [8, 96], strides = [1, 1]} : vector<64x96xf32> to vector<8x96xf32>
    %cst_212 = arith.constant dense<0.000000e+00> : vector<8x96xf32>
    %988 = tpu.matmul %985, %981, %cst_212 {dimension_numbers = #tpu.dot_dimension_numbers<[1], [0], [0], [1], [0, 0, 1, 1], [], []>} : vector<8x32xf32>, vector<32x96xf32>, vector<8x96xf32> -> vector<8x96xf32>
    %989 = vector.broadcast %982 : vector<1x96xf32> to vector<8x96xf32>
    %990 = arith.addf %988, %989 : vector<8x96xf32>
    %991 = vector.extract_strided_slice %987 {offsets = [0, 0], sizes = [8, 32], strides = [1, 1]} : vector<8x96xf32> to vector<8x32xf32>
    %992 = vector.extract_strided_slice %990 {offsets = [0, 0], sizes = [8, 32], strides = [1, 1]} : vector<8x96xf32> to vector<8x32xf32>
    %993 = arith.addf %991, %992 : vector<8x32xf32>
    %994 = arith.negf %993 : vector<8x32xf32>
    %995 = math.exp %994 : vector<8x32xf32>
    %cst_213 = arith.constant 1.000000e+00 : f32
    %996 = vector.broadcast %cst_213 : f32 to vector<8x32xf32>
    %997 = arith.addf %996, %995 : vector<8x32xf32>
    %998 = arith.divf %996, %997 : vector<8x32xf32>
    %999 = vector.extract_strided_slice %987 {offsets = [0, 32], sizes = [8, 32], strides = [1, 1]} : vector<8x96xf32> to vector<8x32xf32>
    %1000 = vector.extract_strided_slice %990 {offsets = [0, 32], sizes = [8, 32], strides = [1, 1]} : vector<8x96xf32> to vector<8x32xf32>
    %1001 = arith.addf %999, %1000 : vector<8x32xf32>
    %1002 = arith.negf %1001 : vector<8x32xf32>
    %1003 = math.exp %1002 : vector<8x32xf32>
    %cst_214 = arith.constant 1.000000e+00 : f32
    %1004 = vector.broadcast %cst_214 : f32 to vector<8x32xf32>
    %1005 = arith.addf %1004, %1003 : vector<8x32xf32>
    %1006 = arith.divf %1004, %1005 : vector<8x32xf32>
    %1007 = vector.extract_strided_slice %987 {offsets = [0, 64], sizes = [8, 32], strides = [1, 1]} : vector<8x96xf32> to vector<8x32xf32>
    %1008 = vector.extract_strided_slice %990 {offsets = [0, 64], sizes = [8, 32], strides = [1, 1]} : vector<8x96xf32> to vector<8x32xf32>
    %1009 = arith.mulf %998, %1008 : vector<8x32xf32>
    %1010 = arith.addf %1007, %1009 : vector<8x32xf32>
    %1011 = math.tanh %1010 : vector<8x32xf32>
    %cst_215 = arith.constant 1.000000e+00 : f32
    %1012 = vector.broadcast %cst_215 : f32 to vector<8x32xf32>
    %1013 = arith.subf %1012, %1006 : vector<8x32xf32>
    %1014 = arith.mulf %1013, %1011 : vector<8x32xf32>
    %1015 = arith.mulf %1006, %985 : vector<8x32xf32>
    %1016 = arith.addf %1014, %1015 : vector<8x32xf32>
    %1017 = vector.extract_strided_slice %980 {offsets = [56, 0], sizes = [8, 96], strides = [1, 1]} : vector<64x96xf32> to vector<8x96xf32>
    %cst_216 = arith.constant dense<0.000000e+00> : vector<8x96xf32>
    %1018 = tpu.matmul %986, %983, %cst_216 {dimension_numbers = #tpu.dot_dimension_numbers<[1], [0], [0], [1], [0, 0, 1, 1], [], []>} : vector<8x32xf32>, vector<32x96xf32>, vector<8x96xf32> -> vector<8x96xf32>
    %1019 = vector.broadcast %984 : vector<1x96xf32> to vector<8x96xf32>
    %1020 = arith.addf %1018, %1019 : vector<8x96xf32>
    %1021 = vector.extract_strided_slice %1017 {offsets = [0, 0], sizes = [8, 32], strides = [1, 1]} : vector<8x96xf32> to vector<8x32xf32>
    %1022 = vector.extract_strided_slice %1020 {offsets = [0, 0], sizes = [8, 32], strides = [1, 1]} : vector<8x96xf32> to vector<8x32xf32>
    %1023 = arith.addf %1021, %1022 : vector<8x32xf32>
    %1024 = arith.negf %1023 : vector<8x32xf32>
    %1025 = math.exp %1024 : vector<8x32xf32>
    %cst_217 = arith.constant 1.000000e+00 : f32
    %1026 = vector.broadcast %cst_217 : f32 to vector<8x32xf32>
    %1027 = arith.addf %1026, %1025 : vector<8x32xf32>
    %1028 = arith.divf %1026, %1027 : vector<8x32xf32>
    %1029 = vector.extract_strided_slice %1017 {offsets = [0, 32], sizes = [8, 32], strides = [1, 1]} : vector<8x96xf32> to vector<8x32xf32>
    %1030 = vector.extract_strided_slice %1020 {offsets = [0, 32], sizes = [8, 32], strides = [1, 1]} : vector<8x96xf32> to vector<8x32xf32>
    %1031 = arith.addf %1029, %1030 : vector<8x32xf32>
    %1032 = arith.negf %1031 : vector<8x32xf32>
    %1033 = math.exp %1032 : vector<8x32xf32>
    %cst_218 = arith.constant 1.000000e+00 : f32
    %1034 = vector.broadcast %cst_218 : f32 to vector<8x32xf32>
    %1035 = arith.addf %1034, %1033 : vector<8x32xf32>
    %1036 = arith.divf %1034, %1035 : vector<8x32xf32>
    %1037 = vector.extract_strided_slice %1017 {offsets = [0, 64], sizes = [8, 32], strides = [1, 1]} : vector<8x96xf32> to vector<8x32xf32>
    %1038 = vector.extract_strided_slice %1020 {offsets = [0, 64], sizes = [8, 32], strides = [1, 1]} : vector<8x96xf32> to vector<8x32xf32>
    %1039 = arith.mulf %1028, %1038 : vector<8x32xf32>
    %1040 = arith.addf %1037, %1039 : vector<8x32xf32>
    %1041 = math.tanh %1040 : vector<8x32xf32>
    %cst_219 = arith.constant 1.000000e+00 : f32
    %1042 = vector.broadcast %cst_219 : f32 to vector<8x32xf32>
    %1043 = arith.subf %1042, %1036 : vector<8x32xf32>
    %1044 = arith.mulf %1043, %1041 : vector<8x32xf32>
    %1045 = arith.mulf %1036, %986 : vector<8x32xf32>
    %1046 = arith.addf %1044, %1045 : vector<8x32xf32>
    %1047 = vector.extract_strided_slice %975 {offsets = [8, 0], sizes = [8, 96], strides = [1, 1]} : vector<64x96xf32> to vector<8x96xf32>
    %cst_220 = arith.constant dense<0.000000e+00> : vector<8x96xf32>
    %1048 = tpu.matmul %1016, %981, %cst_220 {dimension_numbers = #tpu.dot_dimension_numbers<[1], [0], [0], [1], [0, 0, 1, 1], [], []>} : vector<8x32xf32>, vector<32x96xf32>, vector<8x96xf32> -> vector<8x96xf32>
    %1049 = vector.broadcast %982 : vector<1x96xf32> to vector<8x96xf32>
    %1050 = arith.addf %1048, %1049 : vector<8x96xf32>
    %1051 = vector.extract_strided_slice %1047 {offsets = [0, 0], sizes = [8, 32], strides = [1, 1]} : vector<8x96xf32> to vector<8x32xf32>
    %1052 = vector.extract_strided_slice %1050 {offsets = [0, 0], sizes = [8, 32], strides = [1, 1]} : vector<8x96xf32> to vector<8x32xf32>
    %1053 = arith.addf %1051, %1052 : vector<8x32xf32>
    %1054 = arith.negf %1053 : vector<8x32xf32>
    %1055 = math.exp %1054 : vector<8x32xf32>
    %cst_221 = arith.constant 1.000000e+00 : f32
    %1056 = vector.broadcast %cst_221 : f32 to vector<8x32xf32>
    %1057 = arith.addf %1056, %1055 : vector<8x32xf32>
    %1058 = arith.divf %1056, %1057 : vector<8x32xf32>
    %1059 = vector.extract_strided_slice %1047 {offsets = [0, 32], sizes = [8, 32], strides = [1, 1]} : vector<8x96xf32> to vector<8x32xf32>
    %1060 = vector.extract_strided_slice %1050 {offsets = [0, 32], sizes = [8, 32], strides = [1, 1]} : vector<8x96xf32> to vector<8x32xf32>
    %1061 = arith.addf %1059, %1060 : vector<8x32xf32>
    %1062 = arith.negf %1061 : vector<8x32xf32>
    %1063 = math.exp %1062 : vector<8x32xf32>
    %cst_222 = arith.constant 1.000000e+00 : f32
    %1064 = vector.broadcast %cst_222 : f32 to vector<8x32xf32>
    %1065 = arith.addf %1064, %1063 : vector<8x32xf32>
    %1066 = arith.divf %1064, %1065 : vector<8x32xf32>
    %1067 = vector.extract_strided_slice %1047 {offsets = [0, 64], sizes = [8, 32], strides = [1, 1]} : vector<8x96xf32> to vector<8x32xf32>
    %1068 = vector.extract_strided_slice %1050 {offsets = [0, 64], sizes = [8, 32], strides = [1, 1]} : vector<8x96xf32> to vector<8x32xf32>
    %1069 = arith.mulf %1058, %1068 : vector<8x32xf32>
    %1070 = arith.addf %1067, %1069 : vector<8x32xf32>
    %1071 = math.tanh %1070 : vector<8x32xf32>
    %cst_223 = arith.constant 1.000000e+00 : f32
    %1072 = vector.broadcast %cst_223 : f32 to vector<8x32xf32>
    %1073 = arith.subf %1072, %1066 : vector<8x32xf32>
    %1074 = arith.mulf %1073, %1071 : vector<8x32xf32>
    %1075 = arith.mulf %1066, %1016 : vector<8x32xf32>
    %1076 = arith.addf %1074, %1075 : vector<8x32xf32>
    %1077 = vector.extract_strided_slice %980 {offsets = [48, 0], sizes = [8, 96], strides = [1, 1]} : vector<64x96xf32> to vector<8x96xf32>
    %cst_224 = arith.constant dense<0.000000e+00> : vector<8x96xf32>
    %1078 = tpu.matmul %1046, %983, %cst_224 {dimension_numbers = #tpu.dot_dimension_numbers<[1], [0], [0], [1], [0, 0, 1, 1], [], []>} : vector<8x32xf32>, vector<32x96xf32>, vector<8x96xf32> -> vector<8x96xf32>
    %1079 = vector.broadcast %984 : vector<1x96xf32> to vector<8x96xf32>
    %1080 = arith.addf %1078, %1079 : vector<8x96xf32>
    %1081 = vector.extract_strided_slice %1077 {offsets = [0, 0], sizes = [8, 32], strides = [1, 1]} : vector<8x96xf32> to vector<8x32xf32>
    %1082 = vector.extract_strided_slice %1080 {offsets = [0, 0], sizes = [8, 32], strides = [1, 1]} : vector<8x96xf32> to vector<8x32xf32>
    %1083 = arith.addf %1081, %1082 : vector<8x32xf32>
    %1084 = arith.negf %1083 : vector<8x32xf32>
    %1085 = math.exp %1084 : vector<8x32xf32>
    %cst_225 = arith.constant 1.000000e+00 : f32
    %1086 = vector.broadcast %cst_225 : f32 to vector<8x32xf32>
    %1087 = arith.addf %1086, %1085 : vector<8x32xf32>
    %1088 = arith.divf %1086, %1087 : vector<8x32xf32>
    %1089 = vector.extract_strided_slice %1077 {offsets = [0, 32], sizes = [8, 32], strides = [1, 1]} : vector<8x96xf32> to vector<8x32xf32>
    %1090 = vector.extract_strided_slice %1080 {offsets = [0, 32], sizes = [8, 32], strides = [1, 1]} : vector<8x96xf32> to vector<8x32xf32>
    %1091 = arith.addf %1089, %1090 : vector<8x32xf32>
    %1092 = arith.negf %1091 : vector<8x32xf32>
    %1093 = math.exp %1092 : vector<8x32xf32>
    %cst_226 = arith.constant 1.000000e+00 : f32
    %1094 = vector.broadcast %cst_226 : f32 to vector<8x32xf32>
    %1095 = arith.addf %1094, %1093 : vector<8x32xf32>
    %1096 = arith.divf %1094, %1095 : vector<8x32xf32>
    %1097 = vector.extract_strided_slice %1077 {offsets = [0, 64], sizes = [8, 32], strides = [1, 1]} : vector<8x96xf32> to vector<8x32xf32>
    %1098 = vector.extract_strided_slice %1080 {offsets = [0, 64], sizes = [8, 32], strides = [1, 1]} : vector<8x96xf32> to vector<8x32xf32>
    %1099 = arith.mulf %1088, %1098 : vector<8x32xf32>
    %1100 = arith.addf %1097, %1099 : vector<8x32xf32>
    %1101 = math.tanh %1100 : vector<8x32xf32>
    %cst_227 = arith.constant 1.000000e+00 : f32
    %1102 = vector.broadcast %cst_227 : f32 to vector<8x32xf32>
    %1103 = arith.subf %1102, %1096 : vector<8x32xf32>
    %1104 = arith.mulf %1103, %1101 : vector<8x32xf32>
    %1105 = arith.mulf %1096, %1046 : vector<8x32xf32>
    %1106 = arith.addf %1104, %1105 : vector<8x32xf32>
    %1107 = vector.extract_strided_slice %975 {offsets = [16, 0], sizes = [8, 96], strides = [1, 1]} : vector<64x96xf32> to vector<8x96xf32>
    %cst_228 = arith.constant dense<0.000000e+00> : vector<8x96xf32>
    %1108 = tpu.matmul %1076, %981, %cst_228 {dimension_numbers = #tpu.dot_dimension_numbers<[1], [0], [0], [1], [0, 0, 1, 1], [], []>} : vector<8x32xf32>, vector<32x96xf32>, vector<8x96xf32> -> vector<8x96xf32>
    %1109 = vector.broadcast %982 : vector<1x96xf32> to vector<8x96xf32>
    %1110 = arith.addf %1108, %1109 : vector<8x96xf32>
    %1111 = vector.extract_strided_slice %1107 {offsets = [0, 0], sizes = [8, 32], strides = [1, 1]} : vector<8x96xf32> to vector<8x32xf32>
    %1112 = vector.extract_strided_slice %1110 {offsets = [0, 0], sizes = [8, 32], strides = [1, 1]} : vector<8x96xf32> to vector<8x32xf32>
    %1113 = arith.addf %1111, %1112 : vector<8x32xf32>
    %1114 = arith.negf %1113 : vector<8x32xf32>
    %1115 = math.exp %1114 : vector<8x32xf32>
    %cst_229 = arith.constant 1.000000e+00 : f32
    %1116 = vector.broadcast %cst_229 : f32 to vector<8x32xf32>
    %1117 = arith.addf %1116, %1115 : vector<8x32xf32>
    %1118 = arith.divf %1116, %1117 : vector<8x32xf32>
    %1119 = vector.extract_strided_slice %1107 {offsets = [0, 32], sizes = [8, 32], strides = [1, 1]} : vector<8x96xf32> to vector<8x32xf32>
    %1120 = vector.extract_strided_slice %1110 {offsets = [0, 32], sizes = [8, 32], strides = [1, 1]} : vector<8x96xf32> to vector<8x32xf32>
    %1121 = arith.addf %1119, %1120 : vector<8x32xf32>
    %1122 = arith.negf %1121 : vector<8x32xf32>
    %1123 = math.exp %1122 : vector<8x32xf32>
    %cst_230 = arith.constant 1.000000e+00 : f32
    %1124 = vector.broadcast %cst_230 : f32 to vector<8x32xf32>
    %1125 = arith.addf %1124, %1123 : vector<8x32xf32>
    %1126 = arith.divf %1124, %1125 : vector<8x32xf32>
    %1127 = vector.extract_strided_slice %1107 {offsets = [0, 64], sizes = [8, 32], strides = [1, 1]} : vector<8x96xf32> to vector<8x32xf32>
    %1128 = vector.extract_strided_slice %1110 {offsets = [0, 64], sizes = [8, 32], strides = [1, 1]} : vector<8x96xf32> to vector<8x32xf32>
    %1129 = arith.mulf %1118, %1128 : vector<8x32xf32>
    %1130 = arith.addf %1127, %1129 : vector<8x32xf32>
    %1131 = math.tanh %1130 : vector<8x32xf32>
    %cst_231 = arith.constant 1.000000e+00 : f32
    %1132 = vector.broadcast %cst_231 : f32 to vector<8x32xf32>
    %1133 = arith.subf %1132, %1126 : vector<8x32xf32>
    %1134 = arith.mulf %1133, %1131 : vector<8x32xf32>
    %1135 = arith.mulf %1126, %1076 : vector<8x32xf32>
    %1136 = arith.addf %1134, %1135 : vector<8x32xf32>
    %1137 = vector.extract_strided_slice %980 {offsets = [40, 0], sizes = [8, 96], strides = [1, 1]} : vector<64x96xf32> to vector<8x96xf32>
    %cst_232 = arith.constant dense<0.000000e+00> : vector<8x96xf32>
    %1138 = tpu.matmul %1106, %983, %cst_232 {dimension_numbers = #tpu.dot_dimension_numbers<[1], [0], [0], [1], [0, 0, 1, 1], [], []>} : vector<8x32xf32>, vector<32x96xf32>, vector<8x96xf32> -> vector<8x96xf32>
    %1139 = vector.broadcast %984 : vector<1x96xf32> to vector<8x96xf32>
    %1140 = arith.addf %1138, %1139 : vector<8x96xf32>
    %1141 = vector.extract_strided_slice %1137 {offsets = [0, 0], sizes = [8, 32], strides = [1, 1]} : vector<8x96xf32> to vector<8x32xf32>
    %1142 = vector.extract_strided_slice %1140 {offsets = [0, 0], sizes = [8, 32], strides = [1, 1]} : vector<8x96xf32> to vector<8x32xf32>
    %1143 = arith.addf %1141, %1142 : vector<8x32xf32>
    %1144 = arith.negf %1143 : vector<8x32xf32>
    %1145 = math.exp %1144 : vector<8x32xf32>
    %cst_233 = arith.constant 1.000000e+00 : f32
    %1146 = vector.broadcast %cst_233 : f32 to vector<8x32xf32>
    %1147 = arith.addf %1146, %1145 : vector<8x32xf32>
    %1148 = arith.divf %1146, %1147 : vector<8x32xf32>
    %1149 = vector.extract_strided_slice %1137 {offsets = [0, 32], sizes = [8, 32], strides = [1, 1]} : vector<8x96xf32> to vector<8x32xf32>
    %1150 = vector.extract_strided_slice %1140 {offsets = [0, 32], sizes = [8, 32], strides = [1, 1]} : vector<8x96xf32> to vector<8x32xf32>
    %1151 = arith.addf %1149, %1150 : vector<8x32xf32>
    %1152 = arith.negf %1151 : vector<8x32xf32>
    %1153 = math.exp %1152 : vector<8x32xf32>
    %cst_234 = arith.constant 1.000000e+00 : f32
    %1154 = vector.broadcast %cst_234 : f32 to vector<8x32xf32>
    %1155 = arith.addf %1154, %1153 : vector<8x32xf32>
    %1156 = arith.divf %1154, %1155 : vector<8x32xf32>
    %1157 = vector.extract_strided_slice %1137 {offsets = [0, 64], sizes = [8, 32], strides = [1, 1]} : vector<8x96xf32> to vector<8x32xf32>
    %1158 = vector.extract_strided_slice %1140 {offsets = [0, 64], sizes = [8, 32], strides = [1, 1]} : vector<8x96xf32> to vector<8x32xf32>
    %1159 = arith.mulf %1148, %1158 : vector<8x32xf32>
    %1160 = arith.addf %1157, %1159 : vector<8x32xf32>
    %1161 = math.tanh %1160 : vector<8x32xf32>
    %cst_235 = arith.constant 1.000000e+00 : f32
    %1162 = vector.broadcast %cst_235 : f32 to vector<8x32xf32>
    %1163 = arith.subf %1162, %1156 : vector<8x32xf32>
    %1164 = arith.mulf %1163, %1161 : vector<8x32xf32>
    %1165 = arith.mulf %1156, %1106 : vector<8x32xf32>
    %1166 = arith.addf %1164, %1165 : vector<8x32xf32>
    %1167 = vector.extract_strided_slice %975 {offsets = [24, 0], sizes = [8, 96], strides = [1, 1]} : vector<64x96xf32> to vector<8x96xf32>
    %cst_236 = arith.constant dense<0.000000e+00> : vector<8x96xf32>
    %1168 = tpu.matmul %1136, %981, %cst_236 {dimension_numbers = #tpu.dot_dimension_numbers<[1], [0], [0], [1], [0, 0, 1, 1], [], []>} : vector<8x32xf32>, vector<32x96xf32>, vector<8x96xf32> -> vector<8x96xf32>
    %1169 = vector.broadcast %982 : vector<1x96xf32> to vector<8x96xf32>
    %1170 = arith.addf %1168, %1169 : vector<8x96xf32>
    %1171 = vector.extract_strided_slice %1167 {offsets = [0, 0], sizes = [8, 32], strides = [1, 1]} : vector<8x96xf32> to vector<8x32xf32>
    %1172 = vector.extract_strided_slice %1170 {offsets = [0, 0], sizes = [8, 32], strides = [1, 1]} : vector<8x96xf32> to vector<8x32xf32>
    %1173 = arith.addf %1171, %1172 : vector<8x32xf32>
    %1174 = arith.negf %1173 : vector<8x32xf32>
    %1175 = math.exp %1174 : vector<8x32xf32>
    %cst_237 = arith.constant 1.000000e+00 : f32
    %1176 = vector.broadcast %cst_237 : f32 to vector<8x32xf32>
    %1177 = arith.addf %1176, %1175 : vector<8x32xf32>
    %1178 = arith.divf %1176, %1177 : vector<8x32xf32>
    %1179 = vector.extract_strided_slice %1167 {offsets = [0, 32], sizes = [8, 32], strides = [1, 1]} : vector<8x96xf32> to vector<8x32xf32>
    %1180 = vector.extract_strided_slice %1170 {offsets = [0, 32], sizes = [8, 32], strides = [1, 1]} : vector<8x96xf32> to vector<8x32xf32>
    %1181 = arith.addf %1179, %1180 : vector<8x32xf32>
    %1182 = arith.negf %1181 : vector<8x32xf32>
    %1183 = math.exp %1182 : vector<8x32xf32>
    %cst_238 = arith.constant 1.000000e+00 : f32
    %1184 = vector.broadcast %cst_238 : f32 to vector<8x32xf32>
    %1185 = arith.addf %1184, %1183 : vector<8x32xf32>
    %1186 = arith.divf %1184, %1185 : vector<8x32xf32>
    %1187 = vector.extract_strided_slice %1167 {offsets = [0, 64], sizes = [8, 32], strides = [1, 1]} : vector<8x96xf32> to vector<8x32xf32>
    %1188 = vector.extract_strided_slice %1170 {offsets = [0, 64], sizes = [8, 32], strides = [1, 1]} : vector<8x96xf32> to vector<8x32xf32>
    %1189 = arith.mulf %1178, %1188 : vector<8x32xf32>
    %1190 = arith.addf %1187, %1189 : vector<8x32xf32>
    %1191 = math.tanh %1190 : vector<8x32xf32>
    %cst_239 = arith.constant 1.000000e+00 : f32
    %1192 = vector.broadcast %cst_239 : f32 to vector<8x32xf32>
    %1193 = arith.subf %1192, %1186 : vector<8x32xf32>
    %1194 = arith.mulf %1193, %1191 : vector<8x32xf32>
    %1195 = arith.mulf %1186, %1136 : vector<8x32xf32>
    %1196 = arith.addf %1194, %1195 : vector<8x32xf32>
    %1197 = vector.extract_strided_slice %980 {offsets = [32, 0], sizes = [8, 96], strides = [1, 1]} : vector<64x96xf32> to vector<8x96xf32>
    %cst_240 = arith.constant dense<0.000000e+00> : vector<8x96xf32>
    %1198 = tpu.matmul %1166, %983, %cst_240 {dimension_numbers = #tpu.dot_dimension_numbers<[1], [0], [0], [1], [0, 0, 1, 1], [], []>} : vector<8x32xf32>, vector<32x96xf32>, vector<8x96xf32> -> vector<8x96xf32>
    %1199 = vector.broadcast %984 : vector<1x96xf32> to vector<8x96xf32>
    %1200 = arith.addf %1198, %1199 : vector<8x96xf32>
    %1201 = vector.extract_strided_slice %1197 {offsets = [0, 0], sizes = [8, 32], strides = [1, 1]} : vector<8x96xf32> to vector<8x32xf32>
    %1202 = vector.extract_strided_slice %1200 {offsets = [0, 0], sizes = [8, 32], strides = [1, 1]} : vector<8x96xf32> to vector<8x32xf32>
    %1203 = arith.addf %1201, %1202 : vector<8x32xf32>
    %1204 = arith.negf %1203 : vector<8x32xf32>
    %1205 = math.exp %1204 : vector<8x32xf32>
    %cst_241 = arith.constant 1.000000e+00 : f32
    %1206 = vector.broadcast %cst_241 : f32 to vector<8x32xf32>
    %1207 = arith.addf %1206, %1205 : vector<8x32xf32>
    %1208 = arith.divf %1206, %1207 : vector<8x32xf32>
    %1209 = vector.extract_strided_slice %1197 {offsets = [0, 32], sizes = [8, 32], strides = [1, 1]} : vector<8x96xf32> to vector<8x32xf32>
    %1210 = vector.extract_strided_slice %1200 {offsets = [0, 32], sizes = [8, 32], strides = [1, 1]} : vector<8x96xf32> to vector<8x32xf32>
    %1211 = arith.addf %1209, %1210 : vector<8x32xf32>
    %1212 = arith.negf %1211 : vector<8x32xf32>
    %1213 = math.exp %1212 : vector<8x32xf32>
    %cst_242 = arith.constant 1.000000e+00 : f32
    %1214 = vector.broadcast %cst_242 : f32 to vector<8x32xf32>
    %1215 = arith.addf %1214, %1213 : vector<8x32xf32>
    %1216 = arith.divf %1214, %1215 : vector<8x32xf32>
    %1217 = vector.extract_strided_slice %1197 {offsets = [0, 64], sizes = [8, 32], strides = [1, 1]} : vector<8x96xf32> to vector<8x32xf32>
    %1218 = vector.extract_strided_slice %1200 {offsets = [0, 64], sizes = [8, 32], strides = [1, 1]} : vector<8x96xf32> to vector<8x32xf32>
    %1219 = arith.mulf %1208, %1218 : vector<8x32xf32>
    %1220 = arith.addf %1217, %1219 : vector<8x32xf32>
    %1221 = math.tanh %1220 : vector<8x32xf32>
    %cst_243 = arith.constant 1.000000e+00 : f32
    %1222 = vector.broadcast %cst_243 : f32 to vector<8x32xf32>
    %1223 = arith.subf %1222, %1216 : vector<8x32xf32>
    %1224 = arith.mulf %1223, %1221 : vector<8x32xf32>
    %1225 = arith.mulf %1216, %1166 : vector<8x32xf32>
    %1226 = arith.addf %1224, %1225 : vector<8x32xf32>
    %1227 = vector.extract_strided_slice %975 {offsets = [32, 0], sizes = [8, 96], strides = [1, 1]} : vector<64x96xf32> to vector<8x96xf32>
    %cst_244 = arith.constant dense<0.000000e+00> : vector<8x96xf32>
    %1228 = tpu.matmul %1196, %981, %cst_244 {dimension_numbers = #tpu.dot_dimension_numbers<[1], [0], [0], [1], [0, 0, 1, 1], [], []>} : vector<8x32xf32>, vector<32x96xf32>, vector<8x96xf32> -> vector<8x96xf32>
    %1229 = vector.broadcast %982 : vector<1x96xf32> to vector<8x96xf32>
    %1230 = arith.addf %1228, %1229 : vector<8x96xf32>
    %1231 = vector.extract_strided_slice %1227 {offsets = [0, 0], sizes = [8, 32], strides = [1, 1]} : vector<8x96xf32> to vector<8x32xf32>
    %1232 = vector.extract_strided_slice %1230 {offsets = [0, 0], sizes = [8, 32], strides = [1, 1]} : vector<8x96xf32> to vector<8x32xf32>
    %1233 = arith.addf %1231, %1232 : vector<8x32xf32>
    %1234 = arith.negf %1233 : vector<8x32xf32>
    %1235 = math.exp %1234 : vector<8x32xf32>
    %cst_245 = arith.constant 1.000000e+00 : f32
    %1236 = vector.broadcast %cst_245 : f32 to vector<8x32xf32>
    %1237 = arith.addf %1236, %1235 : vector<8x32xf32>
    %1238 = arith.divf %1236, %1237 : vector<8x32xf32>
    %1239 = vector.extract_strided_slice %1227 {offsets = [0, 32], sizes = [8, 32], strides = [1, 1]} : vector<8x96xf32> to vector<8x32xf32>
    %1240 = vector.extract_strided_slice %1230 {offsets = [0, 32], sizes = [8, 32], strides = [1, 1]} : vector<8x96xf32> to vector<8x32xf32>
    %1241 = arith.addf %1239, %1240 : vector<8x32xf32>
    %1242 = arith.negf %1241 : vector<8x32xf32>
    %1243 = math.exp %1242 : vector<8x32xf32>
    %cst_246 = arith.constant 1.000000e+00 : f32
    %1244 = vector.broadcast %cst_246 : f32 to vector<8x32xf32>
    %1245 = arith.addf %1244, %1243 : vector<8x32xf32>
    %1246 = arith.divf %1244, %1245 : vector<8x32xf32>
    %1247 = vector.extract_strided_slice %1227 {offsets = [0, 64], sizes = [8, 32], strides = [1, 1]} : vector<8x96xf32> to vector<8x32xf32>
    %1248 = vector.extract_strided_slice %1230 {offsets = [0, 64], sizes = [8, 32], strides = [1, 1]} : vector<8x96xf32> to vector<8x32xf32>
    %1249 = arith.mulf %1238, %1248 : vector<8x32xf32>
    %1250 = arith.addf %1247, %1249 : vector<8x32xf32>
    %1251 = math.tanh %1250 : vector<8x32xf32>
    %cst_247 = arith.constant 1.000000e+00 : f32
    %1252 = vector.broadcast %cst_247 : f32 to vector<8x32xf32>
    %1253 = arith.subf %1252, %1246 : vector<8x32xf32>
    %1254 = arith.mulf %1253, %1251 : vector<8x32xf32>
    %1255 = arith.mulf %1246, %1196 : vector<8x32xf32>
    %1256 = arith.addf %1254, %1255 : vector<8x32xf32>
    %1257 = vector.extract_strided_slice %980 {offsets = [24, 0], sizes = [8, 96], strides = [1, 1]} : vector<64x96xf32> to vector<8x96xf32>
    %cst_248 = arith.constant dense<0.000000e+00> : vector<8x96xf32>
    %1258 = tpu.matmul %1226, %983, %cst_248 {dimension_numbers = #tpu.dot_dimension_numbers<[1], [0], [0], [1], [0, 0, 1, 1], [], []>} : vector<8x32xf32>, vector<32x96xf32>, vector<8x96xf32> -> vector<8x96xf32>
    %1259 = vector.broadcast %984 : vector<1x96xf32> to vector<8x96xf32>
    %1260 = arith.addf %1258, %1259 : vector<8x96xf32>
    %1261 = vector.extract_strided_slice %1257 {offsets = [0, 0], sizes = [8, 32], strides = [1, 1]} : vector<8x96xf32> to vector<8x32xf32>
    %1262 = vector.extract_strided_slice %1260 {offsets = [0, 0], sizes = [8, 32], strides = [1, 1]} : vector<8x96xf32> to vector<8x32xf32>
    %1263 = arith.addf %1261, %1262 : vector<8x32xf32>
    %1264 = arith.negf %1263 : vector<8x32xf32>
    %1265 = math.exp %1264 : vector<8x32xf32>
    %cst_249 = arith.constant 1.000000e+00 : f32
    %1266 = vector.broadcast %cst_249 : f32 to vector<8x32xf32>
    %1267 = arith.addf %1266, %1265 : vector<8x32xf32>
    %1268 = arith.divf %1266, %1267 : vector<8x32xf32>
    %1269 = vector.extract_strided_slice %1257 {offsets = [0, 32], sizes = [8, 32], strides = [1, 1]} : vector<8x96xf32> to vector<8x32xf32>
    %1270 = vector.extract_strided_slice %1260 {offsets = [0, 32], sizes = [8, 32], strides = [1, 1]} : vector<8x96xf32> to vector<8x32xf32>
    %1271 = arith.addf %1269, %1270 : vector<8x32xf32>
    %1272 = arith.negf %1271 : vector<8x32xf32>
    %1273 = math.exp %1272 : vector<8x32xf32>
    %cst_250 = arith.constant 1.000000e+00 : f32
    %1274 = vector.broadcast %cst_250 : f32 to vector<8x32xf32>
    %1275 = arith.addf %1274, %1273 : vector<8x32xf32>
    %1276 = arith.divf %1274, %1275 : vector<8x32xf32>
    %1277 = vector.extract_strided_slice %1257 {offsets = [0, 64], sizes = [8, 32], strides = [1, 1]} : vector<8x96xf32> to vector<8x32xf32>
    %1278 = vector.extract_strided_slice %1260 {offsets = [0, 64], sizes = [8, 32], strides = [1, 1]} : vector<8x96xf32> to vector<8x32xf32>
    %1279 = arith.mulf %1268, %1278 : vector<8x32xf32>
    %1280 = arith.addf %1277, %1279 : vector<8x32xf32>
    %1281 = math.tanh %1280 : vector<8x32xf32>
    %cst_251 = arith.constant 1.000000e+00 : f32
    %1282 = vector.broadcast %cst_251 : f32 to vector<8x32xf32>
    %1283 = arith.subf %1282, %1276 : vector<8x32xf32>
    %1284 = arith.mulf %1283, %1281 : vector<8x32xf32>
    %1285 = arith.mulf %1276, %1226 : vector<8x32xf32>
    %1286 = arith.addf %1284, %1285 : vector<8x32xf32>
    %1287 = vector.extract_strided_slice %975 {offsets = [40, 0], sizes = [8, 96], strides = [1, 1]} : vector<64x96xf32> to vector<8x96xf32>
    %cst_252 = arith.constant dense<0.000000e+00> : vector<8x96xf32>
    %1288 = tpu.matmul %1256, %981, %cst_252 {dimension_numbers = #tpu.dot_dimension_numbers<[1], [0], [0], [1], [0, 0, 1, 1], [], []>} : vector<8x32xf32>, vector<32x96xf32>, vector<8x96xf32> -> vector<8x96xf32>
    %1289 = vector.broadcast %982 : vector<1x96xf32> to vector<8x96xf32>
    %1290 = arith.addf %1288, %1289 : vector<8x96xf32>
    %1291 = vector.extract_strided_slice %1287 {offsets = [0, 0], sizes = [8, 32], strides = [1, 1]} : vector<8x96xf32> to vector<8x32xf32>
    %1292 = vector.extract_strided_slice %1290 {offsets = [0, 0], sizes = [8, 32], strides = [1, 1]} : vector<8x96xf32> to vector<8x32xf32>
    %1293 = arith.addf %1291, %1292 : vector<8x32xf32>
    %1294 = arith.negf %1293 : vector<8x32xf32>
    %1295 = math.exp %1294 : vector<8x32xf32>
    %cst_253 = arith.constant 1.000000e+00 : f32
    %1296 = vector.broadcast %cst_253 : f32 to vector<8x32xf32>
    %1297 = arith.addf %1296, %1295 : vector<8x32xf32>
    %1298 = arith.divf %1296, %1297 : vector<8x32xf32>
    %1299 = vector.extract_strided_slice %1287 {offsets = [0, 32], sizes = [8, 32], strides = [1, 1]} : vector<8x96xf32> to vector<8x32xf32>
    %1300 = vector.extract_strided_slice %1290 {offsets = [0, 32], sizes = [8, 32], strides = [1, 1]} : vector<8x96xf32> to vector<8x32xf32>
    %1301 = arith.addf %1299, %1300 : vector<8x32xf32>
    %1302 = arith.negf %1301 : vector<8x32xf32>
    %1303 = math.exp %1302 : vector<8x32xf32>
    %cst_254 = arith.constant 1.000000e+00 : f32
    %1304 = vector.broadcast %cst_254 : f32 to vector<8x32xf32>
    %1305 = arith.addf %1304, %1303 : vector<8x32xf32>
    %1306 = arith.divf %1304, %1305 : vector<8x32xf32>
    %1307 = vector.extract_strided_slice %1287 {offsets = [0, 64], sizes = [8, 32], strides = [1, 1]} : vector<8x96xf32> to vector<8x32xf32>
    %1308 = vector.extract_strided_slice %1290 {offsets = [0, 64], sizes = [8, 32], strides = [1, 1]} : vector<8x96xf32> to vector<8x32xf32>
    %1309 = arith.mulf %1298, %1308 : vector<8x32xf32>
    %1310 = arith.addf %1307, %1309 : vector<8x32xf32>
    %1311 = math.tanh %1310 : vector<8x32xf32>
    %cst_255 = arith.constant 1.000000e+00 : f32
    %1312 = vector.broadcast %cst_255 : f32 to vector<8x32xf32>
    %1313 = arith.subf %1312, %1306 : vector<8x32xf32>
    %1314 = arith.mulf %1313, %1311 : vector<8x32xf32>
    %1315 = arith.mulf %1306, %1256 : vector<8x32xf32>
    %1316 = arith.addf %1314, %1315 : vector<8x32xf32>
    %1317 = vector.extract_strided_slice %980 {offsets = [16, 0], sizes = [8, 96], strides = [1, 1]} : vector<64x96xf32> to vector<8x96xf32>
    %cst_256 = arith.constant dense<0.000000e+00> : vector<8x96xf32>
    %1318 = tpu.matmul %1286, %983, %cst_256 {dimension_numbers = #tpu.dot_dimension_numbers<[1], [0], [0], [1], [0, 0, 1, 1], [], []>} : vector<8x32xf32>, vector<32x96xf32>, vector<8x96xf32> -> vector<8x96xf32>
    %1319 = vector.broadcast %984 : vector<1x96xf32> to vector<8x96xf32>
    %1320 = arith.addf %1318, %1319 : vector<8x96xf32>
    %1321 = vector.extract_strided_slice %1317 {offsets = [0, 0], sizes = [8, 32], strides = [1, 1]} : vector<8x96xf32> to vector<8x32xf32>
    %1322 = vector.extract_strided_slice %1320 {offsets = [0, 0], sizes = [8, 32], strides = [1, 1]} : vector<8x96xf32> to vector<8x32xf32>
    %1323 = arith.addf %1321, %1322 : vector<8x32xf32>
    %1324 = arith.negf %1323 : vector<8x32xf32>
    %1325 = math.exp %1324 : vector<8x32xf32>
    %cst_257 = arith.constant 1.000000e+00 : f32
    %1326 = vector.broadcast %cst_257 : f32 to vector<8x32xf32>
    %1327 = arith.addf %1326, %1325 : vector<8x32xf32>
    %1328 = arith.divf %1326, %1327 : vector<8x32xf32>
    %1329 = vector.extract_strided_slice %1317 {offsets = [0, 32], sizes = [8, 32], strides = [1, 1]} : vector<8x96xf32> to vector<8x32xf32>
    %1330 = vector.extract_strided_slice %1320 {offsets = [0, 32], sizes = [8, 32], strides = [1, 1]} : vector<8x96xf32> to vector<8x32xf32>
    %1331 = arith.addf %1329, %1330 : vector<8x32xf32>
    %1332 = arith.negf %1331 : vector<8x32xf32>
    %1333 = math.exp %1332 : vector<8x32xf32>
    %cst_258 = arith.constant 1.000000e+00 : f32
    %1334 = vector.broadcast %cst_258 : f32 to vector<8x32xf32>
    %1335 = arith.addf %1334, %1333 : vector<8x32xf32>
    %1336 = arith.divf %1334, %1335 : vector<8x32xf32>
    %1337 = vector.extract_strided_slice %1317 {offsets = [0, 64], sizes = [8, 32], strides = [1, 1]} : vector<8x96xf32> to vector<8x32xf32>
    %1338 = vector.extract_strided_slice %1320 {offsets = [0, 64], sizes = [8, 32], strides = [1, 1]} : vector<8x96xf32> to vector<8x32xf32>
    %1339 = arith.mulf %1328, %1338 : vector<8x32xf32>
    %1340 = arith.addf %1337, %1339 : vector<8x32xf32>
    %1341 = math.tanh %1340 : vector<8x32xf32>
    %cst_259 = arith.constant 1.000000e+00 : f32
    %1342 = vector.broadcast %cst_259 : f32 to vector<8x32xf32>
    %1343 = arith.subf %1342, %1336 : vector<8x32xf32>
    %1344 = arith.mulf %1343, %1341 : vector<8x32xf32>
    %1345 = arith.mulf %1336, %1286 : vector<8x32xf32>
    %1346 = arith.addf %1344, %1345 : vector<8x32xf32>
    %1347 = vector.extract_strided_slice %975 {offsets = [48, 0], sizes = [8, 96], strides = [1, 1]} : vector<64x96xf32> to vector<8x96xf32>
    %cst_260 = arith.constant dense<0.000000e+00> : vector<8x96xf32>
    %1348 = tpu.matmul %1316, %981, %cst_260 {dimension_numbers = #tpu.dot_dimension_numbers<[1], [0], [0], [1], [0, 0, 1, 1], [], []>} : vector<8x32xf32>, vector<32x96xf32>, vector<8x96xf32> -> vector<8x96xf32>
    %1349 = vector.broadcast %982 : vector<1x96xf32> to vector<8x96xf32>
    %1350 = arith.addf %1348, %1349 : vector<8x96xf32>
    %1351 = vector.extract_strided_slice %1347 {offsets = [0, 0], sizes = [8, 32], strides = [1, 1]} : vector<8x96xf32> to vector<8x32xf32>
    %1352 = vector.extract_strided_slice %1350 {offsets = [0, 0], sizes = [8, 32], strides = [1, 1]} : vector<8x96xf32> to vector<8x32xf32>
    %1353 = arith.addf %1351, %1352 : vector<8x32xf32>
    %1354 = arith.negf %1353 : vector<8x32xf32>
    %1355 = math.exp %1354 : vector<8x32xf32>
    %cst_261 = arith.constant 1.000000e+00 : f32
    %1356 = vector.broadcast %cst_261 : f32 to vector<8x32xf32>
    %1357 = arith.addf %1356, %1355 : vector<8x32xf32>
    %1358 = arith.divf %1356, %1357 : vector<8x32xf32>
    %1359 = vector.extract_strided_slice %1347 {offsets = [0, 32], sizes = [8, 32], strides = [1, 1]} : vector<8x96xf32> to vector<8x32xf32>
    %1360 = vector.extract_strided_slice %1350 {offsets = [0, 32], sizes = [8, 32], strides = [1, 1]} : vector<8x96xf32> to vector<8x32xf32>
    %1361 = arith.addf %1359, %1360 : vector<8x32xf32>
    %1362 = arith.negf %1361 : vector<8x32xf32>
    %1363 = math.exp %1362 : vector<8x32xf32>
    %cst_262 = arith.constant 1.000000e+00 : f32
    %1364 = vector.broadcast %cst_262 : f32 to vector<8x32xf32>
    %1365 = arith.addf %1364, %1363 : vector<8x32xf32>
    %1366 = arith.divf %1364, %1365 : vector<8x32xf32>
    %1367 = vector.extract_strided_slice %1347 {offsets = [0, 64], sizes = [8, 32], strides = [1, 1]} : vector<8x96xf32> to vector<8x32xf32>
    %1368 = vector.extract_strided_slice %1350 {offsets = [0, 64], sizes = [8, 32], strides = [1, 1]} : vector<8x96xf32> to vector<8x32xf32>
    %1369 = arith.mulf %1358, %1368 : vector<8x32xf32>
    %1370 = arith.addf %1367, %1369 : vector<8x32xf32>
    %1371 = math.tanh %1370 : vector<8x32xf32>
    %cst_263 = arith.constant 1.000000e+00 : f32
    %1372 = vector.broadcast %cst_263 : f32 to vector<8x32xf32>
    %1373 = arith.subf %1372, %1366 : vector<8x32xf32>
    %1374 = arith.mulf %1373, %1371 : vector<8x32xf32>
    %1375 = arith.mulf %1366, %1316 : vector<8x32xf32>
    %1376 = arith.addf %1374, %1375 : vector<8x32xf32>
    %1377 = vector.extract_strided_slice %980 {offsets = [8, 0], sizes = [8, 96], strides = [1, 1]} : vector<64x96xf32> to vector<8x96xf32>
    %cst_264 = arith.constant dense<0.000000e+00> : vector<8x96xf32>
    %1378 = tpu.matmul %1346, %983, %cst_264 {dimension_numbers = #tpu.dot_dimension_numbers<[1], [0], [0], [1], [0, 0, 1, 1], [], []>} : vector<8x32xf32>, vector<32x96xf32>, vector<8x96xf32> -> vector<8x96xf32>
    %1379 = vector.broadcast %984 : vector<1x96xf32> to vector<8x96xf32>
    %1380 = arith.addf %1378, %1379 : vector<8x96xf32>
    %1381 = vector.extract_strided_slice %1377 {offsets = [0, 0], sizes = [8, 32], strides = [1, 1]} : vector<8x96xf32> to vector<8x32xf32>
    %1382 = vector.extract_strided_slice %1380 {offsets = [0, 0], sizes = [8, 32], strides = [1, 1]} : vector<8x96xf32> to vector<8x32xf32>
    %1383 = arith.addf %1381, %1382 : vector<8x32xf32>
    %1384 = arith.negf %1383 : vector<8x32xf32>
    %1385 = math.exp %1384 : vector<8x32xf32>
    %cst_265 = arith.constant 1.000000e+00 : f32
    %1386 = vector.broadcast %cst_265 : f32 to vector<8x32xf32>
    %1387 = arith.addf %1386, %1385 : vector<8x32xf32>
    %1388 = arith.divf %1386, %1387 : vector<8x32xf32>
    %1389 = vector.extract_strided_slice %1377 {offsets = [0, 32], sizes = [8, 32], strides = [1, 1]} : vector<8x96xf32> to vector<8x32xf32>
    %1390 = vector.extract_strided_slice %1380 {offsets = [0, 32], sizes = [8, 32], strides = [1, 1]} : vector<8x96xf32> to vector<8x32xf32>
    %1391 = arith.addf %1389, %1390 : vector<8x32xf32>
    %1392 = arith.negf %1391 : vector<8x32xf32>
    %1393 = math.exp %1392 : vector<8x32xf32>
    %cst_266 = arith.constant 1.000000e+00 : f32
    %1394 = vector.broadcast %cst_266 : f32 to vector<8x32xf32>
    %1395 = arith.addf %1394, %1393 : vector<8x32xf32>
    %1396 = arith.divf %1394, %1395 : vector<8x32xf32>
    %1397 = vector.extract_strided_slice %1377 {offsets = [0, 64], sizes = [8, 32], strides = [1, 1]} : vector<8x96xf32> to vector<8x32xf32>
    %1398 = vector.extract_strided_slice %1380 {offsets = [0, 64], sizes = [8, 32], strides = [1, 1]} : vector<8x96xf32> to vector<8x32xf32>
    %1399 = arith.mulf %1388, %1398 : vector<8x32xf32>
    %1400 = arith.addf %1397, %1399 : vector<8x32xf32>
    %1401 = math.tanh %1400 : vector<8x32xf32>
    %cst_267 = arith.constant 1.000000e+00 : f32
    %1402 = vector.broadcast %cst_267 : f32 to vector<8x32xf32>
    %1403 = arith.subf %1402, %1396 : vector<8x32xf32>
    %1404 = arith.mulf %1403, %1401 : vector<8x32xf32>
    %1405 = arith.mulf %1396, %1346 : vector<8x32xf32>
    %1406 = arith.addf %1404, %1405 : vector<8x32xf32>
    %1407 = vector.extract_strided_slice %975 {offsets = [56, 0], sizes = [8, 96], strides = [1, 1]} : vector<64x96xf32> to vector<8x96xf32>
    %cst_268 = arith.constant dense<0.000000e+00> : vector<8x96xf32>
    %1408 = tpu.matmul %1376, %981, %cst_268 {dimension_numbers = #tpu.dot_dimension_numbers<[1], [0], [0], [1], [0, 0, 1, 1], [], []>} : vector<8x32xf32>, vector<32x96xf32>, vector<8x96xf32> -> vector<8x96xf32>
    %1409 = vector.broadcast %982 : vector<1x96xf32> to vector<8x96xf32>
    %1410 = arith.addf %1408, %1409 : vector<8x96xf32>
    %1411 = vector.extract_strided_slice %1407 {offsets = [0, 0], sizes = [8, 32], strides = [1, 1]} : vector<8x96xf32> to vector<8x32xf32>
    %1412 = vector.extract_strided_slice %1410 {offsets = [0, 0], sizes = [8, 32], strides = [1, 1]} : vector<8x96xf32> to vector<8x32xf32>
    %1413 = arith.addf %1411, %1412 : vector<8x32xf32>
    %1414 = arith.negf %1413 : vector<8x32xf32>
    %1415 = math.exp %1414 : vector<8x32xf32>
    %cst_269 = arith.constant 1.000000e+00 : f32
    %1416 = vector.broadcast %cst_269 : f32 to vector<8x32xf32>
    %1417 = arith.addf %1416, %1415 : vector<8x32xf32>
    %1418 = arith.divf %1416, %1417 : vector<8x32xf32>
    %1419 = vector.extract_strided_slice %1407 {offsets = [0, 32], sizes = [8, 32], strides = [1, 1]} : vector<8x96xf32> to vector<8x32xf32>
    %1420 = vector.extract_strided_slice %1410 {offsets = [0, 32], sizes = [8, 32], strides = [1, 1]} : vector<8x96xf32> to vector<8x32xf32>
    %1421 = arith.addf %1419, %1420 : vector<8x32xf32>
    %1422 = arith.negf %1421 : vector<8x32xf32>
    %1423 = math.exp %1422 : vector<8x32xf32>
    %cst_270 = arith.constant 1.000000e+00 : f32
    %1424 = vector.broadcast %cst_270 : f32 to vector<8x32xf32>
    %1425 = arith.addf %1424, %1423 : vector<8x32xf32>
    %1426 = arith.divf %1424, %1425 : vector<8x32xf32>
    %1427 = vector.extract_strided_slice %1407 {offsets = [0, 64], sizes = [8, 32], strides = [1, 1]} : vector<8x96xf32> to vector<8x32xf32>
    %1428 = vector.extract_strided_slice %1410 {offsets = [0, 64], sizes = [8, 32], strides = [1, 1]} : vector<8x96xf32> to vector<8x32xf32>
    %1429 = arith.mulf %1418, %1428 : vector<8x32xf32>
    %1430 = arith.addf %1427, %1429 : vector<8x32xf32>
    %1431 = math.tanh %1430 : vector<8x32xf32>
    %cst_271 = arith.constant 1.000000e+00 : f32
    %1432 = vector.broadcast %cst_271 : f32 to vector<8x32xf32>
    %1433 = arith.subf %1432, %1426 : vector<8x32xf32>
    %1434 = arith.mulf %1433, %1431 : vector<8x32xf32>
    %1435 = arith.mulf %1426, %1376 : vector<8x32xf32>
    %1436 = arith.addf %1434, %1435 : vector<8x32xf32>
    %1437 = vector.extract_strided_slice %980 {offsets = [0, 0], sizes = [8, 96], strides = [1, 1]} : vector<64x96xf32> to vector<8x96xf32>
    %cst_272 = arith.constant dense<0.000000e+00> : vector<8x96xf32>
    %1438 = tpu.matmul %1406, %983, %cst_272 {dimension_numbers = #tpu.dot_dimension_numbers<[1], [0], [0], [1], [0, 0, 1, 1], [], []>} : vector<8x32xf32>, vector<32x96xf32>, vector<8x96xf32> -> vector<8x96xf32>
    %1439 = vector.broadcast %984 : vector<1x96xf32> to vector<8x96xf32>
    %1440 = arith.addf %1438, %1439 : vector<8x96xf32>
    %1441 = vector.extract_strided_slice %1437 {offsets = [0, 0], sizes = [8, 32], strides = [1, 1]} : vector<8x96xf32> to vector<8x32xf32>
    %1442 = vector.extract_strided_slice %1440 {offsets = [0, 0], sizes = [8, 32], strides = [1, 1]} : vector<8x96xf32> to vector<8x32xf32>
    %1443 = arith.addf %1441, %1442 : vector<8x32xf32>
    %1444 = arith.negf %1443 : vector<8x32xf32>
    %1445 = math.exp %1444 : vector<8x32xf32>
    %cst_273 = arith.constant 1.000000e+00 : f32
    %1446 = vector.broadcast %cst_273 : f32 to vector<8x32xf32>
    %1447 = arith.addf %1446, %1445 : vector<8x32xf32>
    %1448 = arith.divf %1446, %1447 : vector<8x32xf32>
    %1449 = vector.extract_strided_slice %1437 {offsets = [0, 32], sizes = [8, 32], strides = [1, 1]} : vector<8x96xf32> to vector<8x32xf32>
    %1450 = vector.extract_strided_slice %1440 {offsets = [0, 32], sizes = [8, 32], strides = [1, 1]} : vector<8x96xf32> to vector<8x32xf32>
    %1451 = arith.addf %1449, %1450 : vector<8x32xf32>
    %1452 = arith.negf %1451 : vector<8x32xf32>
    %1453 = math.exp %1452 : vector<8x32xf32>
    %cst_274 = arith.constant 1.000000e+00 : f32
    %1454 = vector.broadcast %cst_274 : f32 to vector<8x32xf32>
    %1455 = arith.addf %1454, %1453 : vector<8x32xf32>
    %1456 = arith.divf %1454, %1455 : vector<8x32xf32>
    %1457 = vector.extract_strided_slice %1437 {offsets = [0, 64], sizes = [8, 32], strides = [1, 1]} : vector<8x96xf32> to vector<8x32xf32>
    %1458 = vector.extract_strided_slice %1440 {offsets = [0, 64], sizes = [8, 32], strides = [1, 1]} : vector<8x96xf32> to vector<8x32xf32>
    %1459 = arith.mulf %1448, %1458 : vector<8x32xf32>
    %1460 = arith.addf %1457, %1459 : vector<8x32xf32>
    %1461 = math.tanh %1460 : vector<8x32xf32>
    %cst_275 = arith.constant 1.000000e+00 : f32
    %1462 = vector.broadcast %cst_275 : f32 to vector<8x32xf32>
    %1463 = arith.subf %1462, %1456 : vector<8x32xf32>
    %1464 = arith.mulf %1463, %1461 : vector<8x32xf32>
    %1465 = arith.mulf %1456, %1406 : vector<8x32xf32>
    %1466 = arith.addf %1464, %1465 : vector<8x32xf32>
    %1467 = tpu.concatenate %1016, %1076, %1136, %1196, %1256, %1316, %1376, %1436 in 0 : vector<8x32xf32>, vector<8x32xf32>, vector<8x32xf32>, vector<8x32xf32>, vector<8x32xf32>, vector<8x32xf32>, vector<8x32xf32>, vector<8x32xf32> -> vector<64x32xf32>
    %1468 = tpu.concatenate %1466, %1406, %1346, %1286, %1226, %1166, %1106, %1046 in 0 : vector<8x32xf32>, vector<8x32xf32>, vector<8x32xf32>, vector<8x32xf32>, vector<8x32xf32>, vector<8x32xf32>, vector<8x32xf32>, vector<8x32xf32> -> vector<64x32xf32>
    %1469 = tpu.concatenate %1467, %1468 in 1 : vector<64x32xf32>, vector<64x32xf32> -> vector<64x64xf32>
    %c528 = arith.constant 528 : index
    %c0_276 = arith.constant 0 : index
    %1470 = vector.load %arg1[%c528, %c0_276] : memref<600x144xf32, #tpu.memory_space<vmem>>, vector<64x16xf32>
    %cst_277 = arith.constant dense<0.000000e+00> : vector<64x16xf32>
    %1471 = tpu.matmul %1469, %1470, %cst_277 {dimension_numbers = #tpu.dot_dimension_numbers<[1], [0], [0], [1], [0, 0, 1, 1], [], []>} : vector<64x64xf32>, vector<64x16xf32>, vector<64x16xf32> -> vector<64x16xf32>
    %c592 = arith.constant 592 : index
    %c0_278 = arith.constant 0 : index
    %1472 = vector.load %arg1[%c592, %c0_278] : memref<600x144xf32, #tpu.memory_space<vmem>>, vector<1x16xf32>
    %1473 = vector.broadcast %1472 : vector<1x16xf32> to vector<64x16xf32>
    %1474 = arith.addf %1471, %1473 : vector<64x16xf32>
    %cst_279 = arith.constant 0.000000e+00 : f32
    %1475 = vector.broadcast %cst_279 : f32 to vector<64x16xf32>
    %1476 = arith.maximumf %1474, %1475 : vector<64x16xf32>
    %1477 = arith.mulf %1474, %3 : vector<64x16xf32>
    %1478 = arith.subf %1476, %1477 : vector<64x16xf32>
    %1479 = math.absf %1474 : vector<64x16xf32>
    %cst_280 = arith.constant 0.000000e+00 : f32
    %1480 = vector.broadcast %cst_280 : f32 to vector<64x16xf32>
    %1481 = arith.subf %1480, %1479 : vector<64x16xf32>
    %1482 = math.exp %1481 : vector<64x16xf32>
    %cst_281 = arith.constant 1.000000e+00 : f32
    %1483 = vector.broadcast %cst_281 : f32 to vector<64x16xf32>
    %1484 = arith.addf %1483, %1482 : vector<64x16xf32>
    %1485 = math.log %1484 : vector<64x16xf32>
    %1486 = arith.addf %1478, %1485 : vector<64x16xf32>
    %1487 = vector.shape_cast %1486 : vector<64x16xf32> to vector<1x64x16xf32>
    %cst_282 = arith.constant dense<0.000000e+00> : vector<1xf32>
    %1488 = vector.multi_reduction <add>, %1487, %cst_282 [1, 2] : vector<1x64x16xf32> to vector<1xf32>
    %1489 = vector.shape_cast %1488 : vector<1xf32> to vector<1x1x1xf32>
    %1490 = vector.extract %1489[0, 0, 0] : f32 from vector<1x1x1xf32>
    %cst_283 = arith.constant 1.024000e+03 : f32
    %1491 = arith.divf %1490, %cst_283 : f32
    %cst_284 = arith.constant 1.000000e+00 : f32
    %1492 = vector.broadcast %cst_284 : f32 to vector<64x16xf32>
    %1493 = arith.subf %1492, %3 : vector<64x16xf32>
    %1494 = arith.mulf %1493, %1486 : vector<64x16xf32>
    %1495 = vector.shape_cast %1494 : vector<64x16xf32> to vector<1x64x16xf32>
    %cst_285 = arith.constant dense<0.000000e+00> : vector<1xf32>
    %1496 = vector.multi_reduction <add>, %1495, %cst_285 [1, 2] : vector<1x64x16xf32> to vector<1xf32>
    %1497 = vector.shape_cast %1496 : vector<1xf32> to vector<1x1x1xf32>
    %1498 = vector.extract %1497[0, 0, 0] : f32 from vector<1x1x1xf32>
    %cst_286 = arith.constant 0.000000e+00 : f32
    %1499 = arith.subf %cst_286, %1498 : f32
    %cst_287 = arith.constant 1.024000e+03 : f32
    %1500 = arith.divf %1499, %cst_287 : f32
    %1501 = arith.subf %1, %963 : vector<64x16xf32>
    %1502 = arith.mulf %1501, %1501 : vector<64x16xf32>
    %1503 = arith.mulf %1502, %3 : vector<64x16xf32>
    %1504 = vector.shape_cast %1503 : vector<64x16xf32> to vector<1x64x16xf32>
    %cst_288 = arith.constant dense<0.000000e+00> : vector<1xf32>
    %1505 = vector.multi_reduction <add>, %1504, %cst_288 [1, 2] : vector<1x64x16xf32> to vector<1xf32>
    %1506 = vector.shape_cast %1505 : vector<1xf32> to vector<1x1x1xf32>
    %1507 = vector.extract %1506[0, 0, 0] : f32 from vector<1x1x1xf32>
    %1508 = vector.shape_cast %3 : vector<64x16xf32> to vector<1x64x16xf32>
    %cst_289 = arith.constant dense<0.000000e+00> : vector<1xf32>
    %1509 = vector.multi_reduction <add>, %1508, %cst_289 [1, 2] : vector<1x64x16xf32> to vector<1xf32>
    %1510 = vector.shape_cast %1509 : vector<1xf32> to vector<1x1x1xf32>
    %1511 = vector.extract %1510[0, 0, 0] : f32 from vector<1x1x1xf32>
    %cst_290 = arith.constant 9.99999996E-13 : f32
    %1512 = arith.addf %1511, %cst_290 : f32
    %1513 = arith.divf %1507, %1512 : f32
    %1514 = arith.subf %954, %955 : vector<64x16xf32>
    %1515 = arith.mulf %1514, %1514 : vector<64x16xf32>
    %1516 = vector.shape_cast %1515 : vector<64x16xf32> to vector<1x64x16xf32>
    %cst_291 = arith.constant dense<0.000000e+00> : vector<1xf32>
    %1517 = vector.multi_reduction <add>, %1516, %cst_291 [1, 2] : vector<1x64x16xf32> to vector<1xf32>
    %1518 = vector.shape_cast %1517 : vector<1xf32> to vector<1x1x1xf32>
    %1519 = vector.extract %1518[0, 0, 0] : f32 from vector<1x1x1xf32>
    %cst_292 = arith.constant 1.024000e+03 : f32
    %1520 = arith.divf %1519, %cst_292 : f32
    %1521 = arith.subf %956, %957 : vector<64x16xf32>
    %1522 = math.absf %1521 : vector<64x16xf32>
    %1523 = vector.shape_cast %1522 : vector<64x16xf32> to vector<1x64x16xf32>
    %cst_293 = arith.constant dense<0.000000e+00> : vector<1xf32>
    %1524 = vector.multi_reduction <add>, %1523, %cst_293 [1, 2] : vector<1x64x16xf32> to vector<1xf32>
    %1525 = vector.shape_cast %1524 : vector<1xf32> to vector<1x1x1xf32>
    %1526 = vector.extract %1525[0, 0, 0] : f32 from vector<1x1x1xf32>
    %cst_294 = arith.constant 1.024000e+03 : f32
    %1527 = arith.divf %1526, %cst_294 : f32
    %cst_295 = arith.constant 1.000000e-01 : f32
    %1528 = arith.mulf %1527, %cst_295 : f32
    %cst_296 = arith.constant 1.000000e-01 : f32
    %1529 = arith.mulf %cst_296, %1520 : f32
    %1530 = arith.addf %1513, %1529 : f32
    %cst_297 = arith.constant 1.000000e+00 : f32
    %1531 = arith.mulf %cst_297, %1530 : f32
    %1532 = arith.addf %1500, %1531 : f32
    %c0_298 = arith.constant 0 : index
    %1533 = memref.load %arg7[%c0_298] : memref<8xf32, #tpu.memory_space<smem>>
    memref.store %1528, %arg7[%c0_298] : memref<8xf32, #tpu.memory_space<smem>>
    %c1_299 = arith.constant 1 : index
    %1534 = memref.load %arg7[%c1_299] : memref<8xf32, #tpu.memory_space<smem>>
    memref.store %1491, %arg7[%c1_299] : memref<8xf32, #tpu.memory_space<smem>>
    %c2_300 = arith.constant 2 : index
    %1535 = memref.load %arg7[%c2_300] : memref<8xf32, #tpu.memory_space<smem>>
    memref.store %1500, %arg7[%c2_300] : memref<8xf32, #tpu.memory_space<smem>>
    %c3_301 = arith.constant 3 : index
    %1536 = memref.load %arg7[%c3_301] : memref<8xf32, #tpu.memory_space<smem>>
    memref.store %1513, %arg7[%c3_301] : memref<8xf32, #tpu.memory_space<smem>>
    %c4_302 = arith.constant 4 : index
    %1537 = memref.load %arg7[%c4_302] : memref<8xf32, #tpu.memory_space<smem>>
    memref.store %1520, %arg7[%c4_302] : memref<8xf32, #tpu.memory_space<smem>>
    %c5 = arith.constant 5 : index
    %1538 = memref.load %arg7[%c5] : memref<8xf32, #tpu.memory_space<smem>>
    memref.store %1532, %arg7[%c5] : memref<8xf32, #tpu.memory_space<smem>>
    %cst_303 = arith.constant 0.000000e+00 : f32
    %c6 = arith.constant 6 : index
    %1539 = memref.load %arg7[%c6] : memref<8xf32, #tpu.memory_space<smem>>
    memref.store %cst_303, %arg7[%c6] : memref<8xf32, #tpu.memory_space<smem>>
    %cst_304 = arith.constant 0.000000e+00 : f32
    %c7 = arith.constant 7 : index
    %1540 = memref.load %arg7[%c7] : memref<8xf32, #tpu.memory_space<smem>>
    memref.store %cst_304, %arg7[%c7] : memref<8xf32, #tpu.memory_space<smem>>
    %c0_305 = arith.constant 0 : index
    %c0_306 = arith.constant 0 : index
    %1541 = vector.load %arg2[%c0_305, %c0_306] : memref<64x16xf32, #tpu.memory_space<vmem>>, vector<64x16xf32>
    tpu.vector_store %arg2[%c0_305, %c0_306], %960 {strides = array<i32>} : memref<64x16xf32, #tpu.memory_space<vmem>>, vector<64x16xf32>,
    %c0_307 = arith.constant 0 : index
    %c0_308 = arith.constant 0 : index
    %1542 = vector.load %arg3[%c0_307, %c0_308] : memref<64x16xf32, #tpu.memory_space<vmem>>, vector<64x16xf32>
    tpu.vector_store %arg3[%c0_307, %c0_308], %963 {strides = array<i32>} : memref<64x16xf32, #tpu.memory_space<vmem>>, vector<64x16xf32>,
    %c0_309 = arith.constant 0 : index
    %c0_310 = arith.constant 0 : index
    %1543 = vector.load %arg4[%c0_309, %c0_310] : memref<64x16xf32, #tpu.memory_space<vmem>>, vector<64x16xf32>
    tpu.vector_store %arg4[%c0_309, %c0_310], %954 {strides = array<i32>} : memref<64x16xf32, #tpu.memory_space<vmem>>, vector<64x16xf32>,
    %c0_311 = arith.constant 0 : index
    %c0_312 = arith.constant 0 : index
    %1544 = vector.load %arg5[%c0_311, %c0_312] : memref<64x16xf32, #tpu.memory_space<vmem>>, vector<64x16xf32>
    tpu.vector_store %arg5[%c0_311, %c0_312], %955 {strides = array<i32>} : memref<64x16xf32, #tpu.memory_space<vmem>>, vector<64x16xf32>,
    %c0_313 = arith.constant 0 : index
    %c0_314 = arith.constant 0 : index
    %1545 = vector.load %arg6[%c0_313, %c0_314] : memref<64x16xf32, #tpu.memory_space<vmem>>, vector<64x16xf32>
    tpu.vector_store %arg6[%c0_313, %c0_314], %1474 {strides = array<i32>} : memref<64x16xf32, #tpu.memory_space<vmem>>, vector<64x16xf32>,
    return
  }
}

</mosaic_0001>

<bundles_post_ra>
// kernel: usgan_forward.1
= control target key start
LH: loop header
LB: loop body
LE: loop exit
PB: predicated region body
PF: predicated region fallthrough
CT: control target
= control target key end

     0   :  { %vm65_vm0 = vcmask 130048   ;;  %s12249_s0 = inlined_call_operand.vmem [shape: f32[5,64,16], index: 0, kind: input, shape index: {}]   ;;  %s12250_s1 = inlined_call_operand.vmem [shape: f32[600,144], index: 1, kind: input, shape index: {}]   ;;  %s12251_s2 = inlined_call_operand.vmem [shape: f32[64,16], index: 2, kind: output, shape index: {0}]   ;;  %s12252_s3 = inlined_call_operand.vmem [shape: f32[64,16], index: 3, kind: output, shape index: {1}]   ;;  %s12253_s4 = inlined_call_operand.vmem [shape: f32[64,16], index: 4, kind: output, shape index: {2}]   ;;  %s12254_s5 = inlined_call_operand.vmem [shape: f32[64,16], index: 5, kind: output, shape index: {3}]   ;;  %s12255_s6 = inlined_call_operand.vmem [shape: f32[64,16], index: 6, kind: output, shape index: {4}]   ;;  %s12256_s7 = inlined_call_operand.vmem [shape: f32[8], index: 7, kind: output, shape index: {5}]  }
   0x1   :  { %v63_v0 = vld [vmem:[%s12250_s1 + $0x90] sm:$0xff]  ;;  %v62_v1 = vld [vmem:[%s12250_s1 + $0x80] sm:$0xff]  ;;  %v7873_v5 = vld [vmem:[%s12249_s0 + $0x88] sm:$0xff] }
   0x2   :  { %v7872_v2 = vld [vmem:[%s12249_s0 + $0x80] sm:$0xff]  ;;  %8380 = vmatprep.subr.mxu0 %v63_v0  ;;  %v227_v3 = vld [vmem:[%s12250_s1 + $0x110] ss:$0 sm:$0xff]  ;;  %v7875_v9 = vld [vmem:[%s12249_s0 + $0x98] sm:$0xff] }
   0x3   :  { %8384 = vmatprep.mubr.msk.f32.mxu0 %vm65_vm0, %v7872_v2  ;;  %v236_v4 = vld [vmem:[%s12250_s1 + $0x120] ss:$0 sm:$0xff]  ;;  %8381 = vmatpush3.msra.mxu0 %v63_v0  ;;  %v228_v6 = vmul.f32 %v7872_v2, %v227_v3  ;;  %v229_v7 = vmul.f32 %v7873_v5, %v227_v3  ;;  %v7874_v8 = vld [vmem:[%s12249_s0 + $0x90] sm:$0xff]  ;;  %v231_v12 = vmul.f32 %v7875_v9, %v227_v3  ;;  %v7877_v16 = vld [vmem:[%s12249_s0 + $0xa8] sm:$0xff] }
   0x4   :  { %v7876_v10 = vld [vmem:[%s12249_s0 + $0xa0] sm:$0xff]  ;;  %8382 = vmatprep.subr.mxu0 %v62_v1  ;;  %v230_v11 = vmul.f32 %v7874_v8, %v227_v3  ;;  %v280_v17 = vld [vmem:[%s12250_s1 + $0xd0] sm:$0xff]  ;;  %v233_v20 = vmul.f32 %v7877_v16, %v227_v3  ;;  %v7879_v29 = vld [vmem:[%s12249_s0 + $0xb8] sm:$0xff] }
   0x5   :  { %v232_v13 = vmul.f32 %v7876_v10, %v227_v3  ;;  %8383 = vmatpush3.msra.mxu0 %v62_v1  ;;  %v237_v14 = vadd.f32 %v236_v4, %v228_v6  ;;  %v238_v15 = vadd.f32 %v236_v4, %v229_v7  ;;  %v240_v19 = vadd.f32 %v236_v4, %v231_v12  ;;  %v7878_v21 = vld [vmem:[%s12249_s0 + $0xb0] sm:$0xff]  ;;  %v279_v22 = vld [vmem:[%s12250_s1 + $0xc0] sm:$0xff]  ;;  %v9567_v41 = vld [vmem:[%s12249_s0 + $0x78] sm:$0xff] }
   0x6   :  { %8385 = vmatmul.mubr.msk.f32.vlgmr.msra.gmra.mxu0 %vm65_vm0, %v7873_v5  ;;  %v239_v18 = vadd.f32 %v236_v4, %v230_v11  ;;  %v234_v26 = vmul.f32 %v7878_v21, %v227_v3  ;;  %8396 = vmatprep.subr.mxu0 %v280_v17  ;;  %v278_v30 = vld [vmem:[%s12250_s1 + $0xb0] sm:$0xff]  ;;  %v242_v33 = vadd.f32 %v236_v4, %v233_v20  ;;  %v596_v42 = vld [vmem:[%s12250_s1 + $0x60] sm:$0xff] }
   0x7   :  { %v245_v23 = vmax.f32 %v237_v14, 0.0  ;;  %v246_v24 = vmax.f32 %v238_v15, 0.0  ;;  %8387 = vmatprep.mubr.msk.f32.mxu0 %vm65_vm0, %v7874_v8  ;;  %v241_v25 = vadd.f32 %v236_v4, %v232_v13  ;;  %8397 = vmatpush3.msra.mxu0 %v280_v17  ;;  %v248_v32 = vmax.f32 %v240_v19, 0.0  ;;  %v9558_v35 = vld [vmem:[%s12249_s0 + $0x70] sm:$0xff]  ;;  %v9581_v50 = vld [vmem:[%s12249_s0 + $0x40] sm:$0xff] }
   0x8   :  { %v247_v27 = vmax.f32 %v239_v18, 0.0  ;;  %8962 = vmatprep.subr.mxu1 %v280_v17  ;;  %8398 = vmatprep.subr.mxu0 %v279_v22  ;;  %v235_v34 = vmul.f32 %v7879_v29, %v227_v3  ;;  %v597_v36 = vld [vmem:[%s12250_s1 + $0x70] sm:$0xff]  ;;  %v243_v40 = vadd.f32 %v236_v4, %v234_v26  ;;  %v250_v45 = vmax.f32 %v242_v33, 0.0 }
   0x9   :  { %v253_v28 = vsub.f32 0.0, %v245_v23  ;;  %8964 = vmatpush3.msra.mxu1 %v280_v17  ;;  %v254_v31 = vsub.f32 0.0, %v246_v24  ;;  %v249_v39 = vmax.f32 %v241_v25, 0.0  ;;  %8399 = vmatpush3.msra.mxu0 %v279_v22  ;;  %v256_v44 = vsub.f32 0.0, %v248_v32 }
   0xa   :  { %8388 = vmatmul.mubr.msk.f32.gmra.mxu0 %vm65_vm0, %v7875_v9  ;;  %8963 = vmatprep.subr.mxu1 %v279_v22  ;;  %v255_v38 = vsub.f32 0.0, %v247_v27  ;;  %v244_v46 = vadd.f32 %v236_v4, %v235_v34  ;;  %v251_v49 = vmax.f32 %v243_v40, 0.0 }
   0xb   :  { %v261_v37 = vmul.f32 1.442695, %v253_v28  ;;  %8390 = vmatprep.mubr.msk.f32.mxu0 %vm65_vm0, %v7876_v10  ;;  %8412 = vmatprep.subr.mxu0 %v278_v30  ;;  %v263_v43 = vmul.f32 1.442695, %v254_v31  ;;  %v257_v48 = vsub.f32 0.0, %v249_v39 }
   0xc   :  { %8965 = vmatpush3.msra.mxu1 %v279_v22  ;;  %8409 = vmatprep.mubr.msk.f32.mxu1 %vm65_vm0, %v9558_v35  ;;  %v265_v47 = vmul.f32 1.442695, %v255_v38 }
   0xd   :  { %8428 = vmatprep.subr.mxu1 %v597_v36  ;;  %8410 = vmatmul.mubr.msk.f32.vlgmr.msra.gmra.mxu1 %vm65_vm0, %v9567_v41  ;;  %8988 = vpow2.f32 %v261_v37 }
   0xe   :  { %8391 = vmatmul.mubr.msk.f32.gmra.mxu0 %vm65_vm0, %v7877_v16  ;;  %8429 = vmatpush3.msra.mxu1 %v597_v36 }
   0xf   :  { %8393 = vmatprep.mubr.msk.f32.mxu0 %vm65_vm0, %v7878_v21  ;;  %8430 = vmatprep.subr.mxu1 %v596_v42 }
  0x10   :  { %8432 = vmatprep.mubr.msk.f32.mxu1 %vm65_vm0, %v9581_v50 }
  0x11   :  { %13 = vsyncpa [#allocation3], 0  ;;  %v9588_v51 = vld [vmem:[%s12249_s0 + $0x48] sm:$0xff]  ;;  %8431 = vmatpush3.msra.mxu1 %v596_v42  ;;  %8990 = vpow2.f32 %v263_v43  ;;  %v267_v52 = vmul.f32 1.442695, %v256_v44  ;;  %v258_v53 = vsub.f32 0.0, %v250_v45 }
  0x12   :  { %8394 = vmatmul.mubr.msk.f32.gmra.mxu0 %vm65_vm0, %v7879_v29  ;;  %v252_v54 = vmax.f32 %v244_v46, 0.0  ;;  %v9594_v55 = vld [vmem:[%s12249_s0 + $0x50] sm:$0xff]  ;;  %8433 = vmatmul.mubr.msk.f32.vlgmr.msra.gmra.mxu1 %vm65_vm0, %v9588_v51  ;;  %8992 = vpow2.f32 %v265_v47  ;;  %v269_v56 = vmul.f32 1.442695, %v257_v48  ;;  %v259_v57 = vsub.f32 0.0, %v251_v49  ;;  %v9605_v58 = vld [vmem:[%s12249_s0 + $0x58] sm:$0xff] }
  0x13   :  { %8400 = vmatprep.mubr.msk.f32.mxu0 %vm65_vm0, %v9581_v50  ;;  %8435 = vmatprep.mubr.msk.f32.mxu1 %vm65_vm0, %v9594_v55  ;;  %v277_v59 = vld [vmem:[%s12250_s1 + $0xa0] sm:$0xff]  ;;  %8994 = vpow2.f32 %v267_v52  ;;  %v271_v60 = vmul.f32 1.442695, %v258_v53  ;;  %v9631_v2 = vld [vmem:[%s12249_s0 + $0x68] sm:$0xff]  ;;  %v703_v9 = vld [vmem:[%s12250_s1 + $0x1f0] sm:$0xff]  ;;  %vm1348_vm1 = vcmask 261120  }
  0x14   :  { %v260_v61 = vsub.f32 0.0, %v252_v54  ;;  %8996 = vpow2.f32 %v269_v56  ;;  %v273_v62 = vmul.f32 1.442695, %v259_v57  ;;  %v9619_v63 = vld [vmem:[%s12249_s0 + $0x60] sm:$0xff]  ;;  %v9661_v10 = vld [vmem:[%s12250_s1 + $0x290] ss:$0 sm:$0xff] }
  0x15   :  { %v704_v0 = vld [vmem:[%s12250_s1 + $0x200] sm:$0xff]  ;;  %8998 = vpow2.f32 %v271_v60  ;;  %v7881_v18 = vld [vmem:[%s12249_s0 + $0xc8] sm:$0xff]  ;;  %v7882_v19 = vld [vmem:[%s12249_s0 + $0xd0] sm:$0xff]  ;;  %vm9459_vm2 = vmmov 0   ;;  %s9460_s27 = smov 64   ;;  %s9461_s28 = smov 32  }
  0x16   :  { %8401 = vmatmul.mubr.msk.f32.vlgmr.msra.gmra.mxu0 %vm65_vm0, %v9588_v51  ;;  %8436 = vmatmul.mubr.msk.f32.gmra.mxu1 %vm65_vm0, %v9605_v58  ;;  %v275_v1 = vmul.f32 1.442695, %v260_v61  ;;  %9000 = vpow2.f32 %v273_v62  ;;  %v7880_v4 = vld [vmem:[%s12249_s0 + $0xc0] sm:$0xff]  ;;  %v7883_v24 = vld [vmem:[%s12249_s0 + $0xd8] sm:$0xff]  ;;  %v7885_v42 = vld [vmem:[%s12249_s0 + $0xe8] sm:$0xff]  ;;  %s9462_s29 = smov 96  }
  0x17   :  { %8403 = vmatprep.mubr.msk.f32.mxu0 %vm65_vm0, %v9594_v55  ;;  %8413 = vmatpush3.msra.mxu0 %v278_v30  ;;  %v9645_v5 = vld [vmem:[%s12250_s1 + $0x280] ss:$0 sm:$0xff]  ;;  %v7886_v48 = vld [vmem:[%s12249_s0 + $0xf0] sm:$0xff]  ;;  %v7887_v53 = vld [vmem:[%s12249_s0 + $0xf8] sm:$0xff]  ;;  %s9463_s9 = smov 16   ;;  %vm7325_vm3 = vcmask 523264  }
  0x18   :  { %8414 = vmatprep.subr.mxu0 %v277_v59  ;;  %8438 = vmatprep.mubr.msk.f32.mxu1 %vm65_vm0, %v9619_v63  ;;  %9002 = vpow2.f32 %v275_v1  ;;  %v868_v8 = vmul.f32 %v7880_v4, %v9645_v5  ;;  %v918_v12 = vld [vmem:[%s12250_s1 + $0x220] sm:$0xff]  ;;  %v869_v21 = vmul.f32 %v7881_v18, %v9645_v5  ;;  %v870_v23 = vmul.f32 %v7882_v19, %v9645_v5 }
  0x19   :  { %8415 = vmatpush3.msra.mxu0 %v277_v59  ;;  %v871_v26 = vmul.f32 %v7883_v24, %v9645_v5  ;;  %v7884_v39 = vld [vmem:[%s12249_s0 + $0xe0] sm:$0xff]  ;;  %v873_v44 = vmul.f32 %v7885_v42, %v9645_v5  ;;  %v874_v52 = vmul.f32 %v7886_v48, %v9645_v5  ;;  %v875_v56 = vmul.f32 %v7887_v53, %v9645_v5 }
  0x1a   :  { %8404 = vmatmul.mubr.msk.f32.gmra.mxu0 %vm65_vm0, %v9605_v58  ;;  %8444 = vmatprep.subr.mxu0 %v704_v0  ;;  %v8989_v3 = vpop.eup %8988  ;;  %v877_v14 = vadd.f32 %v9661_v10, %v868_v8  ;;  %v878_v25 = vadd.f32 %v9661_v10, %v869_v21  ;;  %v879_v28 = vadd.f32 %v9661_v10, %v870_v23  ;;  %v9766_v21 = vld [vmem:[%s12250_s1 + $0x20] sm:$0xff]  ;;  %v9782_v23 = vld [vmem:[%s12250_s1 + $0x10] sm:$0xff] }
  0x1b   :  { %8406 = vmatprep.mubr.msk.f32.mxu0 %vm65_vm0, %v9619_v63  ;;  %8439 = vmatmul.mubr.msk.f32.gmra.mxu1 %vm65_vm0, %v9631_v2  ;;  %v880_v30 = vadd.f32 %v9661_v10, %v871_v26  ;;  %v872_v40 = vmul.f32 %v7884_v39, %v9645_v5  ;;  %v882_v47 = vadd.f32 %v9661_v10, %v873_v44  ;;  %v920_v5 = vld [vmem:[%s12250_s1 + $0x240] sm:$0xff]  ;;  %v12257_v26 = vmov 0.0  }
  0x1c   :  { %8441 = vmatprep.mubr.msk.f32.mxu1 %vm65_vm0, %v9558_v35  ;;  %v885_v17 = vmax.f32 %v877_v14, 0.0  ;;  %v886_v29 = vmax.f32 %v878_v25, 0.0  ;;  %v887_v31 = vmax.f32 %v879_v28, 0.0  ;;  %v883_v59 = vadd.f32 %v9661_v10, %v874_v52  ;;  %8460 = vmatprep.subr.mxu1 %v920_v5  ;;  %v9795_v25 = vld [vmem:[%s12250_s1] sm:$0xff]  ;;  %v1212_v28 = vld [vmem:[%s12250_s1 + $0x1d0] sm:$0xff] }
  0x1d   :  { %v888_v33 = vmax.f32 %v880_v30, 0.0  ;;  %v881_v45 = vadd.f32 %v9661_v10, %v872_v40  ;;  %v890_v54 = vmax.f32 %v882_v47, 0.0  ;;  %v884_v61 = vadd.f32 %v9661_v10, %v875_v56  ;;  %v917_v10 = vld [vmem:[%s12250_s1 + $0x210] sm:$0xff]  ;;  %8461 = vmatpush3.msra.mxu1 %v920_v5 }
  0x1e   :  { %8407 = vmatmul.mubr.msk.f32.gmra.mxu0 %vm65_vm0, %v9631_v2  ;;  %v8991_v6 = vpop.eup %8990  ;;  %v893_v22 = vsub.f32 0.0, %v885_v17  ;;  %v894_v32 = vsub.f32 0.0, %v886_v29  ;;  %v895_v34 = vsub.f32 0.0, %v887_v31  ;;  %v9818_v29 = vld [vmem:[%s12250_s1 + $0xf0] sm:$0xff] }
  0x1f   :  { %8416 = vmatprep.mubr.msk.f32.mxu0 %vm65_vm0, %v8989_v3  ;;  %8442 = vmatmul.mubr.msk.f32.gmra.mxu1 %vm65_vm0, %v9567_v41  ;;  %v8993_v7 = vpop.eup %8992  ;;  %v896_v37 = vsub.f32 0.0, %v888_v33  ;;  %v889_v49 = vmax.f32 %v881_v45, 0.0  ;;  %v898_v60 = vsub.f32 0.0, %v890_v54  ;;  %v892_v3 = vmax.f32 %v884_v61, 0.0 }
  0x20   :  { %8464 = vmatprep.mubr.msk.f32.mxu1 %vm65_vm0, %v9581_v50  ;;  %v8995_v11 = vpop.eup %8994  ;;  %v901_v27 = vmul.f32 1.442695, %v893_v22  ;;  %v903_v36 = vmul.f32 1.442695, %v894_v32  ;;  %v905_v38 = vmul.f32 1.442695, %v895_v34 }
  0x21   :  { %v8997_v13 = vpop.eup %8996  ;;  %v907_v43 = vmul.f32 1.442695, %v896_v37  ;;  %v897_v57 = vsub.f32 0.0, %v889_v49  ;;  %v911_v1 = vmul.f32 1.442695, %v898_v60  ;;  %v9774_v22 = vld [vmem:[%s12250_s1 + $0x18] sm:$0xff] }
  0x22   :  { %8417 = vmatmul.mubr.msk.f32.vlgmr.msra.gmra.mxu0 %vm65_vm0, %v8991_v6  ;;  %v8999_v15 = vpop.eup %8998  ;;  %9004 = vpow2.f32 %v901_v27  ;;  %v900_v6 = vsub.f32 0.0, %v892_v3  ;;  %v1213_v27 = vld [vmem:[%s12250_s1 + $0x1e0] sm:$0xff] }
  0x23   :  { %8419 = vmatprep.mubr.msk.f32.mxu0 %vm65_vm0, %v8993_v7  ;;  %8445 = vmatpush3.msra.mxu0 %v704_v0  ;;  %v9001_v16 = vpop.eup %9000  ;;  %9006 = vpow2.f32 %v903_v36  ;;  %v909_v62 = vmul.f32 1.442695, %v897_v57  ;;  %v891_v0 = vmax.f32 %v883_v59, 0.0 }
  0x24   :  { %8446 = vmatprep.subr.mxu0 %v703_v9  ;;  %9008 = vpow2.f32 %v905_v38  ;;  %v915_v8 = vmul.f32 1.442695, %v900_v6 }
  0x25   :  { %8447 = vmatpush3.msra.mxu0 %v703_v9  ;;  %v9003_v20 = vpop.eup %9002  ;;  %9010 = vpow2.f32 %v907_v43 }
  0x26   :  { %8420 = vmatmul.mubr.msk.f32.gmra.mxu0 %vm65_vm0, %v8995_v11  ;;  %8476 = vmatprep.subr.mxu0 %v918_v12  ;;  %9012 = vpow2.f32 %v909_v62  ;;  %v919_v11 = vld [vmem:[%s12250_s1 + $0x230] sm:$0xff] }
  0x27   :  { %8422 = vmatprep.mubr.msk.f32.mxu0 %vm65_vm0, %v8997_v13  ;;  %9014 = vpow2.f32 %v911_v1  ;;  %8462 = vmatprep.subr.mxu1 %v919_v11 }
  0x28   :  { %8463 = vmatpush3.msra.mxu1 %v919_v11 }
  0x29   :  { %8465 = vmatmul.mubr.msk.f32.vlgmr.msra.gmra.mxu1 %vm65_vm0, %v9588_v51  ;;  %8492 = vmatprep.subr.mxu1 %v1213_v27 }
  0x2a   :  { %8423 = vmatmul.mubr.msk.f32.gmra.mxu0 %vm65_vm0, %v8999_v15  ;;  %8467 = vmatprep.mubr.msk.f32.mxu1 %vm65_vm0, %v9594_v55 }
  0x2b   :  { %8425 = vmatprep.mubr.msk.f32.mxu0 %vm65_vm0, %v9001_v16  ;;  %v9745_v16 = vld [vmem:[%s12250_s1 + $0x38] sm:$0xff]  ;;  %8493 = vmatpush3.msra.mxu1 %v1213_v27 }
  0x2c   :  { %8494 = vmatprep.subr.mxu1 %v1212_v28 }
  0x2d   :  { %8468 = vmatmul.mubr.msk.f32.gmra.mxu1 %vm65_vm0, %v9605_v58 }
  0x2e   :  { %8426 = vmatmul.mubr.msk.f32.gmra.mxu0 %vm65_vm0, %v9003_v20  ;;  %8470 = vmatprep.mubr.msk.f32.mxu1 %vm65_vm0, %v9619_v63  ;;  %v9759_v20 = vld [vmem:[%s12250_s1 + $0x28] sm:$0xff] }
  0x2f   :  { %8448 = vmatprep.mubr.msk.f32.mxu0 %vm65_vm0, %v7880_v4  ;;  %v9005_v46 = vpop.eup %9004  ;;  %v899_v4 = vsub.f32 0.0, %v891_v0  ;;  %8495 = vmatpush3.msra.mxu1 %v1212_v28 }
  0x30   :  { %v9007_v9 = vpop.eup %9006  ;;  %8508 = vmatprep.subr.mxu1 %v12257_v26 }
  0x31   :  { %v913_v7 = vmul.f32 1.442695, %v899_v4  ;;  %8471 = vmatmul.mubr.msk.f32.gmra.mxu1 %vm65_vm0, %v9631_v2 }
  0x32   :  { %8449 = vmatmul.mubr.msk.f32.vlgmr.msra.gmra.mxu0 %vm65_vm0, %v7881_v18  ;;  %8473 = vmatprep.mubr.msk.f32.mxu1 %vm65_vm0, %v9558_v35  ;;  %v9753_v18 = vld [vmem:[%s12250_s1 + $0x30] sm:$0xff] }
  0x33   :  { %8477 = vmatpush3.msra.mxu0 %v918_v12  ;;  %8451 = vmatprep.mubr.msk.f32.mxu0 %vm65_vm0, %v7882_v19  ;;  %9016 = vpow2.f32 %v913_v7  ;;  %v9009_v12 = vpop.eup %9008 }
  0x34   :  { %8478 = vmatprep.subr.mxu0 %v917_v10  ;;  %9018 = vpow2.f32 %v915_v8  ;;  %v9011_v13 = vpop.eup %9010 }
  0x35   :  { %8479 = vmatpush3.msra.mxu0 %v917_v10  ;;  %v9013_v14 = vpop.eup %9012  ;;  %8474 = vmatmul.mubr.msk.f32.gmra.mxu1 %vm65_vm0, %v9567_v41  ;;  %v9880_v10 = vld [vmem:[%s12250_s1 + $0x150] ss:$0 sm:$0xff] }
  0x36   :  { %8452 = vmatmul.mubr.msk.f32.gmra.mxu0 %vm65_vm0, %v7883_v24  ;;  %v9015_v15 = vpop.eup %9014  ;;  %1376 = vmatprep.subr.mxu0 %v9745_v16  ;;  %v9789_v24 = vld [vmem:[%s12250_s1 + $0x8] sm:$0xff] }
  0x37   :  { %8454 = vmatprep.mubr.msk.f32.mxu0 %vm65_vm0, %v7884_v39  ;;  %8496 = vmatprep.mubr.msk.f32.mxu1 %vm65_vm0, %v9581_v50 }
  0x39   :  { %8497 = vmatmul.mubr.msk.f32.vlgmr.msra.gmra.mxu1 %vm65_vm0, %v9588_v51  ;;  %v9831_v51 = vld [vmem:[%s12250_s1 + $0x100] ss:$0 sm:$0xff] }
  0x3a   :  { %8455 = vmatmul.mubr.msk.f32.gmra.mxu0 %vm65_vm0, %v7885_v42  ;;  %8499 = vmatprep.mubr.msk.f32.mxu1 %vm65_vm0, %v9594_v55  ;;  %v9850_v42 = vld [vmem:[%s12250_s1 + $0x160] ss:$0 sm:$0xff] }
  0x3b   :  { %8457 = vmatprep.mubr.msk.f32.mxu0 %vm65_vm0, %v7886_v48  ;;  %8509 = vmatpush3.msra.mxu1 %v9818_v29 }
  0x3c   :  { %8510 = vmatprep.subr.mxu1 %v12257_v26 }
  0x3d   :  { %8500 = vmatmul.mubr.msk.f32.gmra.mxu1 %vm65_vm0, %v9605_v58 }
  0x3e   :  { %8458 = vmatmul.mubr.msk.f32.gmra.mxu0 %vm65_vm0, %v7887_v53  ;;  %8502 = vmatprep.mubr.msk.f32.mxu1 %vm65_vm0, %v9619_v63 }
  0x3f   :  { %8480 = vmatprep.mubr.msk.f32.mxu0 %vm65_vm0, %v9005_v46 }
  0x40   :  { %v9017_v17 = vpop.eup %9016 }
  0x41   :  { %v9019_v19 = vpop.eup %9018  ;;  %8503 = vmatmul.mubr.msk.f32.gmra.mxu1 %vm65_vm0, %v9631_v2 }
  0x42   :  { %8481 = vmatmul.mubr.msk.f32.vlgmr.msra.gmra.mxu0 %vm65_vm0, %v9007_v9  ;;  %8505 = vmatprep.mubr.msk.f32.mxu1 %vm65_vm0, %v9558_v35 }
  0x43   :  { %8483 = vmatprep.mubr.msk.f32.mxu0 %vm65_vm0, %v9009_v12  ;;  %1377 = vmatpush1.msra.mxu0 %v9753_v18 }
  0x44   :  { %1378 = vmatprep.subr.mxu0 %v9759_v20 }
  0x45   :  { %1379 = vmatpush1.msra.mxu0 %v9766_v21  ;;  %8506 = vmatmul.mubr.msk.f32.gmra.mxu1 %vm65_vm0, %v9567_v41 }
  0x46   :  { %8484 = vmatmul.mubr.msk.f32.gmra.mxu0 %vm65_vm0, %v9011_v13  ;;  %1380 = vmatprep.subr.mxu0 %v9774_v22 }
  0x47   :  { %8486 = vmatprep.mubr.msk.f32.mxu0 %vm65_vm0, %v9013_v14  ;;  %1381 = vmatpush1.msra.mxu0 %v9782_v23 }
  0x48   :  { %1382 = vmatprep.subr.mxu0 %v9789_v24 }
  0x49   :  { %1383 = vmatpush1.msra.mxu0 %v9795_v25 }
  0x4a   :  { %8487 = vmatmul.mubr.msk.f32.gmra.mxu0 %vm65_vm0, %v9015_v15  ;;  %8515 = vmatprep.subr.mxu0 %v12257_v26 }
  0x4b   :  { %8489 = vmatprep.mubr.msk.f32.mxu0 %vm65_vm0, %v9017_v17 }
  0x4e   :  { %8490 = vmatmul.mubr.msk.f32.gmra.mxu0 %vm65_vm0, %v9019_v19 }
  0x4f   :  { %1416 = vmatprep.mubr.f32.mxu0 %v12257_v26 }
  0xc6   :  { %v8386_v55 = vpop.f32.mrf.mxu0 }
  0xc7   :  { %v9834_v58 = vadd.f32 %v8386_v55, %v9831_v51 }
  0xc8   :  { %v156_v63 = vpop.f32.mrf.mxu0 }
  0xc9   :  { %v157_v2 = vadd.f32 %v156_v63, %v9831_v51 }
  0xca   :  { %v8389_v30 = vpop.f32.mrf.mxu0 }
  0xcb   :  { %v195_v31 = vmax.f32 %v157_v2, 0.0  ;;  %v9838_v32 = vadd.f32 %v8389_v30, %v9831_v51 }
  0xcc   :  { %v9840_v35 = vpop.f32.mrf.mxu0 }
  0xcd   :  { %v203_v33 = vsub.f32 0.0, %v195_v31  ;;  %v8411_v36 = vpop.f32.mrf.mxu1 }
  0xce   :  { %v8392_v34 = vpop.f32.mrf.mxu0 }
  0xcf   :  { %v211_v37 = vmul.f32 1.442695, %v203_v33  ;;  %v9843_v38 = vadd.f32 %v8392_v34, %v9831_v51  ;;  %v401_v40 = vpop.f32.mrf.mxu1 }
  0xd0   :  { %v9845_v39 = vpop.f32.mrf.mxu0 }
  0xd1   :  { %12296 = vst [vmem:[#allocation5_spill] sm:$0xff] %v9843_v38  ;;  %12297 = vst [vmem:[#allocation6_spill] sm:$0xff] %v9845_v39  ;;  %9020 = vpow2.f32 %v211_v37  ;;  %v10100_v38 = vld [vmem:[%s12250_s1 + $0x140] ss:$0 sm:$0xff]  ;;  %v10175_v39 = vld [vmem:[%s12250_s1 + $0x2b0] ss:$0 sm:$0xff] }
  0xd2   :  { %v8395_v43 = vpop.f32.mrf.mxu0  ;;  %v8434_v44 = vpop.f32.mrf.mxu1 }
  0xd3   :  { %v9853_v45 = vadd.f32 %v8395_v43, %v9831_v51  ;;  %v9858_v47 = vadd.f32 %v8434_v44, %v9850_v42 }
  0xd4   :  { %v9855_v46 = vpop.f32.mrf.mxu0  ;;  %v9860_v48 = vpop.f32.mrf.mxu1 }
  0xd5   :  { %12298 = vst [vmem:[#allocation7_spill] sm:$0xff] %v9853_v45  ;;  %12299 = vst [vmem:[#allocation8_spill] sm:$0xff] %v9855_v46 }
  0xd6   :  { %v8402_v49 = vpop.f32.mrf.mxu0  ;;  %v8437_v52 = vpop.f32.mrf.mxu1 }
  0xd7   :  { %v9863_v53 = vadd.f32 %v8437_v52, %v9850_v42 }
  0xd8   :  { %v9865_v54 = vpop.f32.mrf.mxu0  ;;  %v675_v56 = vpop.f32.mrf.mxu1 }
  0xd9   :  { %12300 = vst [vmem:[#allocation9_spill] sm:$0xff] %v9863_v53  ;;  %v9868_v57 = vadd.f32 %v675_v56, %v9850_v42 }
  0xda   :  { %v8405_v59 = vpop.f32.mrf.mxu0 }
  0xdb   :  { %v8440_v60 = vpop.f32.mrf.mxu1 }
  0xdc   :  { %v381_v61 = vpop.f32.mrf.mxu0  ;;  %v9871_v62 = vadd.f32 %v8440_v60, %v9850_v42 }
  0xdd   :  { %v685_v0 = vpop.f32.mrf.mxu1 }
  0xde   :  { %12301 = vst [vmem:[#allocation10_spill] sm:$0xff] %v9871_v62  ;;  %v9021_v1 = vpop.eup %9020  ;;  %v8408_v3 = vpop.f32.mrf.mxu0  ;;  %v9874_v4 = vadd.f32 %v685_v0, %v9850_v42 }
  0xdf   :  { %v1347_v6 = vmul.f32 0.0, %v9021_v1  ;;  %v8443_v7 = vpop.f32.mrf.mxu1 }
  0xe0   :  { %12302 = vst [vmem:[#allocation11_spill] sm:$0xff] %v9874_v4  ;;  %v391_v5 = vpop.f32.mrf.mxu0 }
  0xe1   :  { %7976 = vmatmul.mubr.msk.f32.vlgmr.msra.gmra.mxu0 %vm1348_vm1, %v1347_v6  ;;  %v695_v8 = vpop.f32.mrf.mxu1 }
  0xe2   :  { %v8418_v9 = vpop.f32.mrf.mxu0  ;;  %v9883_v11 = vadd.f32 %v695_v8, %v9850_v42 }
  0xe3   :  { %v506_v12 = vadd.f32 %v8418_v9, %v8402_v49  ;;  %v9905_v49 = vld [vmem:[%s12250_s1 + $0x270] ss:$0 sm:$0xff] }
  0xe4   :  { %12303 = vst [vmem:[#allocation12_spill] sm:$0xff] %v9883_v11  ;;  %v9885_v13 = vpop.f32.mrf.mxu0 }
  0xe5   :  { %v9888_v14 = vadd.f32 %v9880_v10, %v506_v12  ;;  %v501_v45 = vadd.f32 %v9885_v13, %v9865_v54 }
  0xe6   :  { %v8421_v15 = vpop.f32.mrf.mxu0 }
  0xe7   :  { %v516_v17 = vadd.f32 %v8421_v15, %v8405_v59 }
  0xe8   :  { %v510_v19 = vpop.f32.mrf.mxu0 }
  0xe9   :  { %v9891_v27 = vadd.f32 %v9880_v10, %v516_v17  ;;  %v511_v28 = vadd.f32 %v510_v19, %v381_v61  ;;  %v8466_v19 = vpop.f32.mrf.mxu1 }
  0xea   :  { %v8424_v55 = vpop.f32.mrf.mxu0 }
  0xeb   :  { %12304 = vst [vmem:[#allocation13_spill] sm:$0xff] %v9891_v27  ;;  %v9894_v63 = vadd.f32 %v9880_v10, %v511_v28  ;;  %v526_v2 = vadd.f32 %v8424_v55, %v8408_v3  ;;  %v9937_v55 = vld [vmem:[%s12250_s1 + $0x2c0] ss:$0 sm:$0xff] }
  0xec   :  { %v520_v30 = vpop.f32.mrf.mxu0 }
  0xed   :  { %v9897_v31 = vadd.f32 %v9880_v10, %v526_v2  ;;  %v521_v33 = vadd.f32 %v520_v30, %v391_v5  ;;  %v987_v30 = vpop.f32.mrf.mxu1 }
  0xee   :  { %v8427_v34 = vpop.f32.mrf.mxu0 }
  0xef   :  { %12305 = vst [vmem:[#allocation14_spill] sm:$0xff] %v9897_v31  ;;  %v9900_v37 = vadd.f32 %v9880_v10, %v521_v33  ;;  %v536_v43 = vadd.f32 %v8427_v34, %v8411_v36 }
  0xf0   :  { %v530_v44 = vpop.f32.mrf.mxu0 }
  0xf1   :  { %12306 = vst [vmem:[#allocation15_spill] sm:$0xff] %v9900_v37  ;;  %v9908_v52 = vadd.f32 %v9880_v10, %v536_v43  ;;  %v531_v56 = vadd.f32 %v530_v44, %v401_v40  ;;  %v8469_v44 = vpop.f32.mrf.mxu1 }
  0xf2   :  { %v8450_v59 = vpop.f32.mrf.mxu0 }
  0xf3   :  { %12307 = vst [vmem:[#allocation16_spill] sm:$0xff] %v9908_v52  ;;  %v9911_v60 = vadd.f32 %v9880_v10, %v531_v56  ;;  %v9914_v61 = vadd.f32 %v8450_v59, %v9905_v49 }
  0xf4   :  { %v796_v0 = vpop.f32.mrf.mxu0 }
  0xf5   :  { %12308 = vst [vmem:[#allocation17_spill] sm:$0xff] %v9911_v60  ;;  %12309 = vst [vmem:[#allocation18_spill] sm:$0xff] %v9914_v61  ;;  %v9917_v36 = vadd.f32 %v796_v0, %v9905_v49 }
  0xf6   :  { %v8453_v1 = vpop.f32.mrf.mxu0 }
  0xf7   :  { %12310 = vst [vmem:[#allocation19_spill] sm:$0xff] %v9917_v36  ;;  %v9920_v3 = vadd.f32 %v8453_v1, %v9905_v49  ;;  %v997_v1 = vpop.f32.mrf.mxu1 }
  0xf8   :  { %v806_v6 = vpop.f32.mrf.mxu0 }
  0xf9   :  { %12311 = vst [vmem:[#allocation20_spill] sm:$0xff] %v9920_v3  ;;  %v9923_v7 = vadd.f32 %v806_v6, %v9905_v49 }
  0xfa   :  { %v8456_v40 = vpop.f32.mrf.mxu0 }
  0xfb   :  { %12312 = vst [vmem:[#allocation21_spill] sm:$0xff] %v9923_v7  ;;  %v9926_v5 = vadd.f32 %v8456_v40, %v9905_v49 }
  0xfc   :  { %v816_v8 = vpop.f32.mrf.mxu0 }
  0xfd   :  { %v9929_v9 = vadd.f32 %v816_v8, %v9905_v49 }
  0xfe   :  { %v8459_v12 = vpop.f32.mrf.mxu0 }
  0xff   :  { %12313 = vst [vmem:[#allocation22_spill] sm:$0xff] %v9929_v9 }
 0x100   :  { %v826_v15 = vpop.f32.mrf.mxu0 }
 0x101   :  { %v9932_v17 = vadd.f32 %v826_v15, %v9905_v49  ;;  %v8472_v15 = vpop.f32.mrf.mxu1 }
 0x102   :  { %v8482_v28 = vpop.f32.mrf.mxu0 }
 0x103   :  { %v1122_v2 = vadd.f32 %v8482_v28, %v8466_v19  ;;  %v1007_v26 = vpop.f32.mrf.mxu1 }
 0x104   :  { %v1116_v33 = vpop.f32.mrf.mxu0 }
 0x105   :  { %v9940_v34 = vadd.f32 %v9937_v55, %v1122_v2  ;;  %v1117_v43 = vadd.f32 %v1116_v33, %v987_v30 }
 0x106   :  { %v8485_v56 = vpop.f32.mrf.mxu0 }
 0x107   :  { %12314 = vst [vmem:[#allocation23_spill] sm:$0xff] %v9940_v34  ;;  %v9943_v59 = vadd.f32 %v9937_v55, %v1117_v43  ;;  %v1132_v0 = vadd.f32 %v8485_v56, %v8469_v44  ;;  %v8475_v56 = vpop.f32.mrf.mxu1 }
 0x108   :  { %v1126_v6 = vpop.f32.mrf.mxu0 }
 0x109   :  { %12315 = vst [vmem:[#allocation24_spill] sm:$0xff] %v9943_v59  ;;  %v9946_v40 = vadd.f32 %v9937_v55, %v1132_v0  ;;  %v1127_v8 = vadd.f32 %v1126_v6, %v997_v1  ;;  %v9962_v1 = vld [vmem:[%s12250_s1 + $0xe0] sm:$0xff]  ;;  %v9968_v6 = vld [vmem:[%s12250_s1 + $0x1a8] sm:$0xff] }
 0x10a   :  { %v8488_v19 = vpop.f32.mrf.mxu0  ;;  %8511 = vmatpush3.msra.mxu1 %v9962_v1 }
 0x10b   :  { %12316 = vst [vmem:[#allocation25_spill] sm:$0xff] %v9946_v40  ;;  %v9949_v28 = vadd.f32 %v9937_v55, %v1127_v8  ;;  %v1142_v2 = vadd.f32 %v8488_v19, %v8472_v15  ;;  %1633 = vmatprep.subr.mxu1 %v9968_v6  ;;  %v9980_v8 = vld [vmem:[%s12250_s1 + $0x2d0] ss:$0 sm:$0xff] }
 0x10c   :  { %v1136_v30 = vpop.f32.mrf.mxu0 }
 0x10d   :  { %12317 = vst [vmem:[#allocation26_spill] sm:$0xff] %v9949_v28  ;;  %v9952_v33 = vadd.f32 %v9937_v55, %v1142_v2  ;;  %v1137_v43 = vadd.f32 %v1136_v30, %v1007_v26  ;;  %v12319_v26 = vmov 0.0  }
 0x10e   :  { %v8491_v59 = vpop.f32.mrf.mxu0  ;;  %8512 = vmatprep.mubr.msk.f32.mxu1 %vm9459_vm2, %v12319_v26  ;;  %8519 = vmatprep.mubr.msk.f32.mxu0 %vm9459_vm2, %v12319_v26 }
 0x10f   :  { %v9955_v44 = vadd.f32 %v9937_v55, %v1137_v43  ;;  %v9957_v0 = vadd.f32 %v8491_v59, %v8475_v56  ;;  %v9975_v59 = vpop.f32.mrf.mxu1 }
 0x110   :  { %v10001_v54 = vpop.f32.mrf.mxu0 }
 0x111   :  { %12318 = vst [vmem:[#allocation27_spill] sm:$0xff] %v9955_v44  ;;  %v8498_v15 = vpop.f32.mrf.mxu1 }
 0x112   :  { %v9983_v19 = vadd.f32 %v8498_v15, %v9980_v8 }
 0x113   :  { %v1281_v2 = vpop.f32.mrf.mxu1 }
 0x114   :  { %12320 = vst [vmem:[#allocation28_spill] sm:$0xff] %v9983_v19  ;;  %v540_v2 = vadd.f32 %v9880_v10, %v501_v45  ;;  %v18_v45 = vld [vmem:[%s12249_s0] sm:$0xff]  ;;  %v10011_v10 = vld [vmem:[%s12250_s1 + $0x130] ss:$0 sm:$0xff] }
 0x115   :  { %v8501_v30 = vpop.f32.mrf.mxu1 }
 0x116   :  { %v9986_v43 = vadd.f32 %v8501_v30, %v9980_v8  ;;  %v7920_v19 = vmul.f32 -1.442695, %v540_v2  ;;  %v10025_v2 = vld [vmem:[%s12250_s1 + $0x1a0] sm:$0xff] }
 0x117   :  { %v1290_v56 = vpop.f32.mrf.mxu1 }
 0x118   :  { %12321 = vst [vmem:[#allocation29_spill] sm:$0xff] %v9986_v43  ;;  %v9989_v52 = vadd.f32 %v1290_v56, %v9980_v8  ;;  %9022 = vpow2.f32 %v7920_v19  ;;  %v832_v56 = vadd.f32 %v8459_v12, %v9905_v49  ;;  %v10014_v49 = vsub.f32 1.0, %v9581_v50 }
 0x119   :  { %v8504_v36 = vpop.f32.mrf.mxu1 }
 0x11a   :  { %12322 = vst [vmem:[#allocation30_spill] sm:$0xff] %v9989_v52  ;;  %v9994_v11 = vadd.f32 %v8504_v36, %v9980_v8  ;;  %v842_v61 = vmax.f32 %v832_v56, 0.0  ;;  %12325 = vst [vmem:[#allocation33_spill] sm:$0xff] %v10014_v49  ;;  %v10042_v56 = vld [vmem:[%s12250_s1 + $0x188] sm:$0xff] }
 0x11b   :  { %v1300_v34 = vpop.f32.mrf.mxu1 }
 0x11c   :  { %12323 = vst [vmem:[#allocation31_spill] sm:$0xff] %v9994_v11  ;;  %v9997_v15 = vadd.f32 %v1300_v34, %v9980_v8  ;;  %v850_v52 = vsub.f32 0.0, %v842_v61 }
 0x11d   :  { %v10093_v7 = vpop.f32.mrf.mxu1 }
 0x11e   :  { %12324 = vst [vmem:[#allocation32_spill] sm:$0xff] %v9997_v15  ;;  %v865_v46 = vmul.f32 1.442695, %v850_v52 }
 0x11f   :  { %v10095_v43 = vpop.f32.mrf.mxu1 }
 0x125   :  { %v9023_v30 = vpop.eup %9022 }
 0x126   :  { %v572_v60 = vadd.f32 1.0, %v9023_v30  ;;  %v10030_v30 = vld [vmem:[%s12250_s1 + $0x198] sm:$0xff] }
 0x128   :  { %9024 = vrcp.f32 %v572_v60 }
 0x129   :  { %9026 = vpow2.f32 %v865_v46  ;;  %v10018_v46 = vmul.f32 %v9581_v50, %v18_v45  ;;  %v10036_v50 = vld [vmem:[%s12250_s1 + $0x190] sm:$0xff]  ;;  %v10049_v45 = vld [vmem:[%s12250_s1 + $0x180] sm:$0xff] }
 0x12b   :  { %12326 = vst [vmem:[#allocation34_spill] sm:$0xff] %v10018_v46 }
 0x135   :  { %v9025_v13 = vpop.eup %9024 }
 0x136   :  { %v1502_v61 = vsub.f32 1.0, %v9025_v13 }
 0x1a1   :  { %v10003_v36 = vpop.f32.mrf.mxu0 }
 0x1a3   :  { %v1420_v60 = vpop.f32.mrf.mxu0 }
 0x1a4   :  { %v1423_v52 = vadd.f32 %v1420_v60, %v10011_v10  ;;  %v9027_v60 = vpop.eup %9026 }
 0x1a6   :  { %v1426_v12 = vmul.f32 %v10014_v49, %v1423_v52  ;;  %v1503_v34 = vmul.f32 %v1502_v61, %v1423_v52  ;;  %v10055_v52 = vld [vmem:[%s12250_s1 + $0x178] sm:$0xff]  ;;  %v10061_v61 = vld [vmem:[%s12250_s1 + $0x170] sm:$0xff] }
 0x1a8   :  { %v1427_v19 = vadd.f32 %v1426_v12, %v10018_v46  ;;  %v1605_v12 = vmul.f32 0.0, %v9027_v60  ;;  %v10086_v60 = vld [vmem:[%s12250_s1 + $0x40] sm:$0xff] }
 0x1aa   :  { %8513 = vmatmul.mubr.msk.f32.vlgmr.msra.gmra.mxu1 %vm65_vm0, %v1427_v19  ;;  %v10080_v19 = vld [vmem:[%s12250_s1 + $0x50] sm:$0xff] }
 0x1ab   :  { %1634 = vmatpush1.msra.mxu1 %v10025_v2  ;;  %1673 = vmatprep.mubr.f32.mxu1 %v12319_v26 }
 0x1ac   :  { %1635 = vmatprep.subr.mxu1 %v10030_v30  ;;  %8516 = vmatpush3.msra.mxu0 %v10080_v19 }
 0x1ad   :  { %1636 = vmatpush1.msra.mxu1 %v10036_v50  ;;  %8517 = vmatprep.subr.mxu0 %v12319_v26 }
 0x1ae   :  { %1637 = vmatprep.subr.mxu1 %v10042_v56  ;;  %8518 = vmatpush3.msra.mxu0 %v10086_v60 }
 0x1af   :  { %1638 = vmatpush1.msra.mxu1 %v10049_v45  ;;  %8522 = vmatprep.subr.mxu0 %v12319_v26 }
 0x1b0   :  { %1639 = vmatprep.subr.mxu1 %v10055_v52 }
 0x1b1   :  { %1640 = vmatpush1.msra.mxu1 %v10061_v61 }
 0x1b2   :  { %7980 = vmatmul.mubr.msk.f32.vlgmr.msra.gmra.mxu1 %vm1348_vm1, %v1605_v12  ;;  %1896 = vmatprep.subr.mxu1 %v9745_v16  ;;  %v1163_v12 = vadd.f32 %v9937_v55, %v9957_v0 }
 0x1b3   :  { %1897 = vmatpush1.msra.mxu1 %v9753_v18  ;;  %1936 = vmatprep.mubr.f32.mxu1 %v12319_v26 }
 0x1b4   :  { %1898 = vmatprep.subr.mxu1 %v9759_v20  ;;  %v7967_v62 = vmul.f32 -1.442695, %v1163_v12 }
 0x1b5   :  { %1899 = vmatpush1.msra.mxu1 %v9766_v21 }
 0x1b6   :  { %1900 = vmatprep.subr.mxu1 %v9774_v22  ;;  %9028 = vpow2.f32 %v7967_v62 }
 0x1b7   :  { %1901 = vmatpush1.msra.mxu1 %v9782_v23 }
 0x1b8   :  { %1902 = vmatprep.subr.mxu1 %v9789_v24 }
 0x1b9   :  { %1903 = vmatpush1.msra.mxu1 %v9795_v25 }
 0x1ba   :  { %2159 = vmatprep.subr.mxu1 %v9968_v6 }
 0x1c3   :  { %v9029_v28 = vpop.eup %9028 }
 0x1c4   :  { %v1195_v31 = vadd.f32 1.0, %v9029_v28 }
 0x1c6   :  { %9030 = vrcp.f32 %v1195_v31 }
 0x1d3   :  { %v9031_v31 = vpop.eup %9030 }
 0x26a   :  { %v1497_v4 = vpop.f32.mrf.mxu1 }
 0x26b   :  { %v1498_v40 = vadd.f32 %v1497_v4, %v10100_v38  ;;  %v25_v4 = vld [vmem:[%s12249_s0 + $0x38] sm:$0xff] }
 0x26c   :  { %v8514_v37 = vpop.f32.mrf.mxu1 }
 0x26d   :  { %v1501_v3 = vmul.f32 %v9025_v13, %v1498_v40  ;;  %v10120_v37 = vld [vmem:[%s12250_s1 + $0x2a0] ss:$0 sm:$0xff] }
 0x26e   :  { %v10131_v13 = vld [vmem:[%s12250_s1 + $0x260] sm:$0xff] }
 0x26f   :  { %v10103_v0 = vadd.f32 %v1503_v34, %v1501_v3  ;;  %v10123_v3 = vsub.f32 1.0, %v9567_v41 }
 0x271   :  { %12327 = vst [vmem:[#allocation35_spill] sm:$0xff] %v10103_v0  ;;  %v1505_v62 = vmul.f32 %v10103_v0, %v10014_v49  ;;  %7805 = vst.msk [vmem:[%s12253_s4] sm:$0xff] %vm65_vm0, %v10103_v0  ;;  %v10135_v0 = vmul.f32 %v9567_v41, %v25_v4  ;;  %v1759_v49 = vsub.f32 1.0, %v9031_v31  ;;  %v10158_v4 = vld [vmem:[%s12250_s1 + $0x1c0] sm:$0xff] }
 0x272   :  { %v10112_v28 = vpop.f32.mrf.mxu1  ;;  %12328 = vst [vmem:[#allocation36_spill] sm:$0xff] %v10123_v3 }
 0x273   :  { %v10126_v40 = vadd.f32 %v1505_v62, %v10018_v46  ;;  %12330 = vst [vmem:[#allocation38_spill] sm:$0xff] %v10135_v0  ;;  %v10142_v62 = vld [vmem:[%s12250_s1 + $0x250] sm:$0xff] }
 0x274   :  { %v1677_v34 = vpop.f32.mrf.mxu1 }
 0x275   :  { %12329 = vst [vmem:[#allocation37_spill] sm:$0xff] %v10126_v40  ;;  %v1680_v12 = vadd.f32 %v1677_v34, %v10120_v37  ;;  %8520 = vmatmul.mubr.msk.f32.vlgmr.msra.gmra.mxu0 %vm65_vm0, %v10126_v40 }
 0x276   :  { %8523 = vmatpush3.msra.mxu0 %v10131_v13  ;;  %8526 = vmatprep.mubr.msk.f32.mxu0 %vm9459_vm2, %v12319_v26 }
 0x277   :  { %v1683_v46 = vmul.f32 %v10123_v3, %v1680_v12  ;;  %v1760_v34 = vmul.f32 %v1759_v49, %v1680_v12  ;;  %8524 = vmatprep.subr.mxu0 %v12319_v26  ;;  %v10165_v49 = vld [vmem:[%s12250_s1 + $0x1b0] sm:$0xff]  ;;  %v666_v12 = vadd.f32 %v9860_v48, %v9850_v42 }
 0x278   :  { %8525 = vmatpush3.msra.mxu0 %v10142_v62 }
 0x279   :  { %v1684_v41 = vadd.f32 %v1683_v46, %v10135_v0  ;;  %8529 = vmatprep.subr.mxu0 %v12319_v26 }
 0x27b   :  { %8527 = vmatmul.mubr.msk.f32.vlgmr.msra.gmra.mxu0 %vm65_vm0, %v1684_v41 }
 0x27c   :  { %8533 = vmatprep.mubr.msk.f32.mxu0 %vm9459_vm2, %v12319_v26  ;;  %8530 = vmatpush3.msra.mxu0 %v10158_v4 }
 0x27d   :  { %8531 = vmatprep.subr.mxu0 %v12319_v26 }
 0x27e   :  { %8532 = vmatpush3.msra.mxu0 %v10165_v49 }
 0x27f   :  { %8536 = vmatprep.subr.mxu0 %v12319_v26 }
 0x335   :  { %v1576_v46 = vpop.f32.mrf.mxu0 }
 0x336   :  { %v1577_v41 = vadd.f32 %v1576_v46, %v10003_v36 }
 0x337   :  { %v8521_v40 = vpop.f32.mrf.mxu0 }
 0x338   :  { %v1580_v15 = vadd.f32 %v1577_v41, %v666_v12  ;;  %v196_v12 = vmax.f32 %v9834_v58, 0.0 }
 0x33a   :  { %9032 = vtanh.f32 %v1580_v15  ;;  %v204_v41 = vsub.f32 0.0, %v196_v12 }
 0x33b   :  { %v1754_v53 = vpop.f32.mrf.mxu0 }
 0x33c   :  { %v1755_v44 = vadd.f32 %v1754_v53, %v10175_v39 }
 0x33d   :  { %v8528_v27 = vpop.f32.mrf.mxu0 }
 0x33e   :  { %v1758_v9 = vmul.f32 %v9031_v31, %v1755_v44  ;;  %v7979_v27 = vmul.f32 -1.442695, %v1580_v15  ;;  %v213_v15 = vmul.f32 1.442695, %v204_v41 }
 0x340   :  { %v10178_v11 = vadd.f32 %v1760_v34, %v1758_v9  ;;  %9034 = vpow2.f32 %v7979_v27 }
 0x342   :  { %12331 = vst [vmem:[#allocation39_spill] sm:$0xff] %v10178_v11  ;;  %v1762_v42 = vmul.f32 %v10178_v11, %v10123_v3  ;;  %7820 = vst.msk [vmem:[%s12254_s5 + $0x38] sm:$0xff] %vm65_vm0, %v10178_v11 }
 0x344   :  { %v10188_v48 = vadd.f32 %v1762_v42, %v10135_v0  ;;  %v10842_v0 = vld [vmem:[%s12250_s1 + $0x2b0] ss:$0 sm:$0xff] }
 0x346   :  { %12332 = vst [vmem:[#allocation40_spill] sm:$0xff] %v10188_v48  ;;  %8534 = vmatmul.mubr.msk.f32.vlgmr.msra.gmra.mxu0 %vm65_vm0, %v10188_v48 }
 0x347   :  { %v9033_v53 = vpop.eup %9032  ;;  %8537 = vmatpush3.msra.mxu0 %v9818_v29  ;;  %8540 = vmatprep.mubr.msk.f32.mxu0 %vm9459_vm2, %v12319_v26 }
 0x348   :  { %1590 = vrot.lane.b32.xlu0 %v9033_v53, %s9460_s27  ;;  %8538 = vmatprep.subr.mxu0 %v12319_v26 }
 0x349   :  { %8539 = vmatpush3.msra.mxu0 %v9962_v1 }
 0x34a   :  { %8543 = vmatprep.subr.mxu0 %v12319_v26 }
 0x34d   :  { %v9035_v9 = vpop.eup %9034 }
 0x34e   :  { %v1584_v44 = vadd.f32 1.0, %v9035_v9  ;;  %v1316_v9 = vadd.f32 %v10093_v7, %v9980_v8 }
 0x350   :  { %9036 = vrcp.f32 %v1584_v44 }
 0x35d   :  { %v9037_v36 = vpop.eup %9036 }
 0x35e   :  { %v1588_v42 = vmul.f32 0.0, %v9037_v36 }
 0x3ba   :  { %v1591_v31 = vpop.permute.xlu0 %1590 }
 0x3bb   :  { %v1593_v40 = vmul.f32 %v9037_v36, %v1591_v31 }
 0x3bd   :  { %1595 = vrot.lane.b32.xlu0 %v1593_v40, %s9461_s28 }
 0x406   :  { %v1833_v34 = vpop.f32.mrf.mxu0 }
 0x407   :  { %v1834_v27 = vadd.f32 %v1833_v34, %v10112_v28  ;;  %v841_v34 = vmax.f32 %v9932_v17, 0.0 }
 0x408   :  { %v8535_v46 = vpop.f32.mrf.mxu0 }
 0x409   :  { %v1837_v44 = vadd.f32 %v1834_v27, %v1316_v9  ;;  %v849_v7 = vsub.f32 0.0, %v841_v34 }
 0x40b   :  { %v7983_v46 = vmul.f32 -1.442695, %v1837_v44  ;;  %v863_v41 = vmul.f32 1.442695, %v849_v7 }
 0x42f   :  { %v1596_v53 = vpop.permute.xlu0 %1595 }
 0x430   :  { %v10201_v48 = vadd.f32 %v1596_v53, %v1588_v42 }
 0x432   :  { %9038 = vtanh.f32 %v10201_v48 }
 0x433   :  { %9040 = vpow2.f32 %v213_v15 }
 0x434   :  { %9042 = vtanh.f32 %v1837_v44 }
 0x435   :  { %9044 = vpow2.f32 %v7983_v46 }
 0x43f   :  { %v9039_v31 = vpop.eup %9038 }
 0x440   :  { %1601 = vrot.lane.b32.xlu1 %v9039_v31, %s9460_s27  ;;  %v9041_v58 = vpop.eup %9040 }
 0x441   :  { %v9043_v40 = vpop.eup %9042 }
 0x442   :  { %v9045_v28 = vpop.eup %9044 }
 0x443   :  { %v1841_v12 = vadd.f32 1.0, %v9045_v28 }
 0x444   :  { %1863 = vrot.lane.b32.xlu1 %v9041_v58, %s9462_s29 }
 0x445   :  { %9046 = vrcp.f32 %v1841_v12 }
 0x446   :  { %9048 = vpow2.f32 %v863_v41 }
 0x448   :  { %1847 = vrot.lane.b32.xlu1 %v9043_v40, %s9460_s27 }
 0x452   :  { %v9047_v9 = vpop.eup %9046 }
 0x453   :  { %v9049_v44 = vpop.eup %9048 }
 0x4b2   :  { %v1602_v42 = vpop.permute.xlu1 %1601 }
 0x4b3   :  { %v1604_v53 = vmul.f32 %v9037_v36, %v1602_v42  ;;  %v1845_v36 = vmul.f32 0.0, %v9047_v9  ;;  %v7921_v42 = vmul.f32 -1.442695, %v9888_v14 }
 0x4b6   :  { %v1864_v15 = vpop.permute.xlu1 %1863 }
 0x4b7   :  { %v1866_v27 = vmul.f32 %v1864_v15, %v1604_v53 }
 0x4b9   :  { %1868 = vrot.lane.b32.xlu0 %v1866_v27, %s9461_s28 }
 0x4ba   :  { %v1848_v31 = vpop.permute.xlu1 %1847 }
 0x4bb   :  { %v1850_v58 = vmul.f32 %v9047_v9, %v1848_v31 }
 0x4bd   :  { %1852 = vrot.lane.b32.xlu0 %v1850_v58, %s9461_s28 }
 0x4c1   :  { %2126 = vrot.lane.b32.xlu0 %v9049_v44, %s9462_s29 }
 0x52b   :  { %v1869_v17 = vpop.permute.xlu0 %1868 }
 0x52c   :  { %7984 = vmatmul.mubr.msk.f32.vlgmr.msra.gmra.mxu1 %vm1348_vm1, %v1869_v17 }
 0x52d   :  { %2160 = vmatpush1.msra.mxu1 %v10025_v2  ;;  %2199 = vmatprep.mubr.f32.mxu1 %v12319_v26 }
 0x52e   :  { %2161 = vmatprep.subr.mxu1 %v10030_v30 }
 0x52f   :  { %v1853_v40 = vpop.permute.xlu0 %1852  ;;  %2162 = vmatpush1.msra.mxu1 %v10036_v50 }
 0x530   :  { %v10219_v46 = vadd.f32 %v1853_v40, %v1845_v36  ;;  %2163 = vmatprep.subr.mxu1 %v10042_v56 }
 0x531   :  { %2164 = vmatpush1.msra.mxu1 %v10049_v45 }
 0x532   :  { %9050 = vtanh.f32 %v10219_v46  ;;  %2165 = vmatprep.subr.mxu1 %v10055_v52 }
 0x533   :  { %2166 = vmatpush1.msra.mxu1 %v10061_v61  ;;  %v2127_v7 = vpop.permute.xlu0 %2126  ;;  %9052 = vpow2.f32 %v7921_v42 }
 0x534   :  { %2422 = vmatprep.subr.mxu1 %v9745_v16  ;;  %v19_v16 = vld [vmem:[%s12249_s0 + $0x8] sm:$0xff] }
 0x53f   :  { %v9051_v28 = vpop.eup %9050 }
 0x540   :  { %1858 = vrot.lane.b32.xlu1 %v9051_v28, %s9460_s27  ;;  %v9053_v53 = vpop.eup %9052 }
 0x541   :  { %v573_v15 = vadd.f32 1.0, %v9053_v53 }
 0x543   :  { %9054 = vrcp.f32 %v573_v15 }
 0x550   :  { %v9055_v27 = vpop.eup %9054 }
 0x551   :  { %v2022_v36 = vsub.f32 1.0, %v9055_v27 }
 0x5b2   :  { %v1859_v34 = vpop.permute.xlu1 %1858 }
 0x5b3   :  { %v1861_v12 = vmul.f32 %v9047_v9, %v1859_v34  ;;  %v9358_v9 = vld [vmem:[%s12249_s0 + $0x48] sm:$0xff] }
 0x5b4   :  { %v10238_v58 = vsub.f32 1.0, %v9358_v9  ;;  %v10241_v17 = vmul.f32 %v9358_v9, %v19_v16 }
 0x5b5   :  { %v2129_v41 = vmul.f32 %v2127_v7, %v1861_v12 }
 0x5b6   :  { %12333 = vst [vmem:[#allocation41_spill] sm:$0xff] %v10241_v17 }
 0x5b7   :  { %2131 = vrot.lane.b32.xlu1 %v2129_v41, %s9461_s28 }
 0x5ec   :  { %v10230_v31 = vpop.f32.mrf.mxu1 }
 0x5ee   :  { %v1940_v44 = vpop.f32.mrf.mxu1 }
 0x5ef   :  { %v1943_v14 = vadd.f32 %v1940_v44, %v10011_v10 }
 0x5f1   :  { %v1946_v40 = vmul.f32 %v10238_v58, %v1943_v14  ;;  %v2023_v28 = vmul.f32 %v2022_v36, %v1943_v14 }
 0x5f3   :  { %v1947_v34 = vadd.f32 %v1946_v40, %v10241_v17 }
 0x5f5   :  { %8541 = vmatmul.mubr.msk.f32.vlgmr.msra.gmra.mxu0 %vm65_vm0, %v1947_v34 }
 0x5f6   :  { %8544 = vmatpush3.msra.mxu0 %v10080_v19  ;;  %8547 = vmatprep.mubr.msk.f32.mxu0 %vm9459_vm2, %v12319_v26 }
 0x5f7   :  { %8545 = vmatprep.subr.mxu0 %v12319_v26 }
 0x5f8   :  { %8546 = vmatpush3.msra.mxu0 %v10086_v60 }
 0x5f9   :  { %8550 = vmatprep.subr.mxu0 %v12319_v26 }
 0x629   :  { %v2132_v12 = vpop.permute.xlu1 %2131 }
 0x62a   :  { %7988 = vmatmul.mubr.msk.f32.vlgmr.msra.gmra.mxu1 %vm1348_vm1, %v2132_v12 }
 0x62b   :  { %2423 = vmatpush1.msra.mxu1 %v9753_v18  ;;  %2462 = vmatprep.mubr.f32.mxu1 %v12319_v26 }
 0x62c   :  { %2424 = vmatprep.subr.mxu1 %v9759_v20 }
 0x62d   :  { %2425 = vmatpush1.msra.mxu1 %v9766_v21  ;;  %v1147_v21 = vadd.f32 %v10001_v54, %v9975_v59 }
 0x62e   :  { %2426 = vmatprep.subr.mxu1 %v9774_v22 }
 0x62f   :  { %2427 = vmatpush1.msra.mxu1 %v9782_v23  ;;  %v1162_v23 = vadd.f32 %v9937_v55, %v1147_v21  ;;  %v24_v55 = vld [vmem:[%s12249_s0 + $0x30] sm:$0xff] }
 0x630   :  { %2428 = vmatprep.subr.mxu1 %v9789_v24 }
 0x631   :  { %2429 = vmatpush1.msra.mxu1 %v9795_v25  ;;  %v7966_v24 = vmul.f32 -1.442695, %v1162_v23 }
 0x632   :  { %2685 = vmatprep.subr.mxu1 %v9968_v6 }
 0x633   :  { %9056 = vpow2.f32 %v7966_v24 }
 0x640   :  { %v9057_v25 = vpop.eup %9056 }
 0x641   :  { %v1194_v59 = vadd.f32 1.0, %v9057_v25 }
 0x643   :  { %9058 = vrcp.f32 %v1194_v59 }
 0x650   :  { %v9059_v54 = vpop.eup %9058 }
 0x651   :  { %v2285_v36 = vsub.f32 1.0, %v9059_v54 }
 0x6b5   :  { %v2017_v7 = vpop.f32.mrf.mxu0 }
 0x6b6   :  { %v2018_v41 = vadd.f32 %v2017_v7, %v10100_v38 }
 0x6b7   :  { %v8542_v18 = vpop.f32.mrf.mxu0 }
 0x6b8   :  { %v2021_v42 = vmul.f32 %v9055_v27, %v2018_v41  ;;  %v9359_v27 = vld [vmem:[%s12249_s0 + $0x70] sm:$0xff] }
 0x6b9   :  { %v10292_v16 = vsub.f32 1.0, %v9359_v27  ;;  %v10295_v14 = vmul.f32 %v9359_v27, %v24_v55 }
 0x6ba   :  { %v10263_v53 = vadd.f32 %v2023_v28, %v2021_v42 }
 0x6bb   :  { %12336 = vst [vmem:[#allocation44_spill] sm:$0xff] %v10292_v16 }
 0x6bc   :  { %12334 = vst [vmem:[#allocation42_spill] sm:$0xff] %v10263_v53  ;;  %v2025_v20 = vmul.f32 %v10263_v53, %v10238_v58  ;;  %7806 = vst.msk [vmem:[%s12253_s4 + $0x8] sm:$0xff] %vm65_vm0, %v10263_v53 }
 0x6be   :  { %v10275_v22 = vadd.f32 %v2025_v20, %v10241_v17 }
 0x6c0   :  { %12335 = vst [vmem:[#allocation43_spill] sm:$0xff] %v10275_v22  ;;  %8548 = vmatmul.mubr.msk.f32.vlgmr.msra.gmra.mxu0 %vm65_vm0, %v10275_v22 }
 0x6c1   :  { %8551 = vmatpush3.msra.mxu0 %v10131_v13  ;;  %8554 = vmatprep.mubr.msk.f32.mxu0 %vm9459_vm2, %v12319_v26 }
 0x6c2   :  { %8552 = vmatprep.subr.mxu0 %v12319_v26 }
 0x6c3   :  { %8553 = vmatpush3.msra.mxu0 %v10142_v62 }
 0x6c4   :  { %8557 = vmatprep.subr.mxu0 %v12319_v26 }
 0x6ea   :  { %v2201_v15 = vpop.f32.mrf.mxu1 }
 0x6ec   :  { %v2203_v9 = vpop.f32.mrf.mxu1 }
 0x6ed   :  { %v2206_v44 = vadd.f32 %v2203_v9, %v10120_v37 }
 0x6ef   :  { %v2209_v40 = vmul.f32 %v10292_v16, %v2206_v44  ;;  %v2286_v28 = vmul.f32 %v2285_v36, %v2206_v44 }
 0x6f1   :  { %v2210_v34 = vadd.f32 %v2209_v40, %v10295_v14 }
 0x6f3   :  { %8555 = vmatmul.mubr.msk.f32.vlgmr.msra.gmra.mxu0 %vm65_vm0, %v2210_v34 }
 0x6f4   :  { %8558 = vmatpush3.msra.mxu0 %v10158_v4  ;;  %8561 = vmatprep.mubr.msk.f32.mxu0 %vm9459_vm2, %v12319_v26 }
 0x6f5   :  { %8559 = vmatprep.subr.mxu0 %v12319_v26 }
 0x6f6   :  { %8560 = vmatpush3.msra.mxu0 %v10165_v49 }
 0x6f7   :  { %8564 = vmatprep.subr.mxu0 %v12319_v26 }
 0x780   :  { %v2096_v12 = vpop.f32.mrf.mxu0 }
 0x781   :  { %v2097_v7 = vadd.f32 %v2096_v12, %v10230_v31 }
 0x782   :  { %v8549_v41 = vpop.f32.mrf.mxu0 }
 0x783   :  { %v2100_v18 = vadd.f32 %v2097_v7, %v9858_v47 }
 0x785   :  { %9060 = vtanh.f32 %v2100_v18  ;;  %v7987_v31 = vmul.f32 -1.442695, %v2100_v18 }
 0x787   :  { %9062 = vpow2.f32 %v7987_v31 }
 0x792   :  { %v9061_v42 = vpop.eup %9060 }
 0x793   :  { %2110 = vrot.lane.b32.xlu0 %v9061_v42, %s9460_s27 }
 0x794   :  { %v9063_v55 = vpop.eup %9062 }
 0x795   :  { %v2104_v9 = vadd.f32 1.0, %v9063_v55 }
 0x797   :  { %9064 = vrcp.f32 %v2104_v9 }
 0x7a4   :  { %v9065_v36 = vpop.eup %9064 }
 0x7a5   :  { %v2108_v12 = vmul.f32 %v9065_v36, %v10201_v48 }
 0x7b3   :  { %v2280_v20 = vpop.f32.mrf.mxu0 }
 0x7b4   :  { %v2281_v21 = vadd.f32 %v2280_v20, %v10175_v39 }
 0x7b5   :  { %v8556_v23 = vpop.f32.mrf.mxu0 }
 0x7b6   :  { %v2284_v24 = vmul.f32 %v9059_v54, %v2281_v21  ;;  %v167_v54 = vadd.f32 %v9840_v35, %v9831_v51  ;;  %v1311_v35 = vadd.f32 %v10095_v43, %v9980_v8 }
 0x7b8   :  { %v10310_v25 = vadd.f32 %v2286_v28, %v2284_v24  ;;  %v197_v27 = vmax.f32 %v167_v54, 0.0 }
 0x7ba   :  { %v2288_v59 = vmul.f32 %v10310_v25, %v10292_v16  ;;  %7819 = vst.msk [vmem:[%s12254_s5 + $0x30] sm:$0xff] %vm65_vm0, %v10310_v25  ;;  %v205_v44 = vsub.f32 0.0, %v197_v27 }
 0x7bc   :  { %v10320_v47 = vadd.f32 %v2288_v59, %v10295_v14  ;;  %v840_v59 = vmax.f32 %v9926_v5, 0.0 }
 0x7be   :  { %8562 = vmatmul.mubr.msk.f32.vlgmr.msra.gmra.mxu0 %vm65_vm0, %v10320_v47  ;;  %v848_v54 = vsub.f32 0.0, %v840_v59  ;;  %v9361_v59 = vld [vmem:[%s12249_s0 + $0x50] sm:$0xff] }
 0x7bf   :  { %8565 = vmatpush3.msra.mxu0 %v9818_v29  ;;  %8568 = vmatprep.mubr.msk.f32.mxu0 %vm9459_vm2, %v12319_v26  ;;  %v215_v29 = vmul.f32 1.442695, %v205_v44 }
 0x7c0   :  { %8566 = vmatprep.subr.mxu0 %v12319_v26  ;;  %v861_v55 = vmul.f32 1.442695, %v848_v54 }
 0x7c1   :  { %8567 = vmatpush3.msra.mxu0 %v9962_v1  ;;  %9066 = vpow2.f32 %v215_v29 }
 0x7c2   :  { %8571 = vmatprep.subr.mxu0 %v12319_v26 }
 0x7ce   :  { %v9067_v34 = vpop.eup %9066 }
 0x805   :  { %v2111_v40 = vpop.permute.xlu0 %2110 }
 0x806   :  { %v2113_v28 = vmul.f32 %v9065_v36, %v2111_v40 }
 0x808   :  { %2115 = vrot.lane.b32.xlu1 %v2113_v28, %s9461_s28 }
 0x80c   :  { %2389 = vrot.lane.b32.xlu1 %v9067_v34, %s9462_s29 }
 0x87a   :  { %v2116_v7 = vpop.permute.xlu1 %2115 }
 0x87b   :  { %v10335_v41 = vadd.f32 %v2116_v7, %v2108_v12 }
 0x87d   :  { %9068 = vtanh.f32 %v10335_v41 }
 0x87e   :  { %v2359_v51 = vpop.f32.mrf.mxu0 }
 0x87f   :  { %v2360_v18 = vadd.f32 %v2359_v51, %v2201_v15  ;;  %v2390_v15 = vpop.permute.xlu1 %2389 }
 0x880   :  { %v8563_v42 = vpop.f32.mrf.mxu0 }
 0x881   :  { %v2363_v20 = vadd.f32 %v2360_v18, %v1311_v35  ;;  %v7922_v42 = vmul.f32 -1.442695, %v9894_v63 }
 0x883   :  { %9070 = vtanh.f32 %v2363_v20  ;;  %v7991_v48 = vmul.f32 -1.442695, %v2363_v20 }
 0x885   :  { %9072 = vpow2.f32 %v7991_v48 }
 0x88a   :  { %v9069_v21 = vpop.eup %9068 }
 0x88b   :  { %2121 = vrot.lane.b32.xlu0 %v9069_v21, %s9460_s27 }
 0x890   :  { %v9071_v23 = vpop.eup %9070 }
 0x891   :  { %2373 = vrot.lane.b32.xlu1 %v9071_v23, %s9460_s27 }
 0x892   :  { %v9073_v24 = vpop.eup %9072 }
 0x893   :  { %v2367_v31 = vadd.f32 1.0, %v9073_v24  ;;  %v20_v24 = vld [vmem:[%s12249_s0 + $0x10] sm:$0xff] }
 0x895   :  { %9074 = vrcp.f32 %v2367_v31  ;;  %v10376_v31 = vsub.f32 1.0, %v9361_v59 }
 0x896   :  { %9076 = vpow2.f32 %v861_v55  ;;  %v10379_v55 = vmul.f32 %v9361_v59, %v20_v24 }
 0x8a2   :  { %v9075_v9 = vpop.eup %9074 }
 0x8a3   :  { %v9077_v40 = vpop.eup %9076 }
 0x8fd   :  { %v2122_v8 = vpop.permute.xlu0 %2121 }
 0x8fe   :  { %v2124_v43 = vmul.f32 %v9065_v36, %v2122_v8  ;;  %v2371_v36 = vmul.f32 %v9075_v9, %v10219_v46  ;;  %v10362_v46 = vld [vmem:[%s12250_s1 + $0x38] sm:$0xff] }
 0x900   :  { %v2392_v27 = vmul.f32 %v2390_v15, %v2124_v43 }
 0x902   :  { %2394 = vrot.lane.b32.xlu0 %v2392_v27, %s9461_s28 }
 0x903   :  { %v2374_v44 = vpop.permute.xlu1 %2373 }
 0x904   :  { %v2376_v29 = vmul.f32 %v9075_v9, %v2374_v44  ;;  %v10401_v44 = vld [vmem:[%s12250_s1 + $0x28] sm:$0xff] }
 0x906   :  { %2378 = vrot.lane.b32.xlu0 %v2376_v29, %s9461_s28  ;;  %v10407_v29 = vld [vmem:[%s12250_s1 + $0x20] sm:$0xff] }
 0x90a   :  { %2652 = vrot.lane.b32.xlu0 %v9077_v40, %s9462_s29  ;;  %v10413_v40 = vld [vmem:[%s12250_s1 + $0x18] sm:$0xff] }
 0x974   :  { %v2395_v5 = vpop.permute.xlu0 %2394 }
 0x975   :  { %7992 = vmatmul.mubr.msk.f32.vlgmr.msra.gmra.mxu1 %vm1348_vm1, %v2395_v5  ;;  %v10419_v5 = vld [vmem:[%s12250_s1 + $0x10] sm:$0xff] }
 0x976   :  { %2686 = vmatpush1.msra.mxu1 %v10025_v2  ;;  %2725 = vmatprep.mubr.f32.mxu1 %v12319_v26 }
 0x977   :  { %2687 = vmatprep.subr.mxu1 %v10030_v30 }
 0x978   :  { %v2379_v28 = vpop.permute.xlu0 %2378  ;;  %2688 = vmatpush1.msra.mxu1 %v10036_v50 }
 0x979   :  { %v10352_v34 = vadd.f32 %v2379_v28, %v2371_v36  ;;  %2689 = vmatprep.subr.mxu1 %v10042_v56  ;;  %v10425_v36 = vld [vmem:[%s12250_s1 + $0x8] sm:$0xff]  ;;  %v10431_v28 = vld [vmem:[%s12250_s1] sm:$0xff] }
 0x97a   :  { %2690 = vmatpush1.msra.mxu1 %v10049_v45 }
 0x97b   :  { %9078 = vtanh.f32 %v10352_v34  ;;  %2691 = vmatprep.subr.mxu1 %v10055_v52 }
 0x97c   :  { %2692 = vmatpush1.msra.mxu1 %v10061_v61  ;;  %v2653_v35 = vpop.permute.xlu0 %2652  ;;  %9080 = vpow2.f32 %v7922_v42 }
 0x97d   :  { %2948 = vmatprep.subr.mxu1 %v10362_v46 }
 0x988   :  { %v9079_v12 = vpop.eup %9078 }
 0x989   :  { %2384 = vrot.lane.b32.xlu1 %v9079_v12, %s9460_s27  ;;  %v9081_v20 = vpop.eup %9080 }
 0x98a   :  { %v574_v21 = vadd.f32 1.0, %v9081_v20 }
 0x98c   :  { %9082 = vrcp.f32 %v574_v21 }
 0x999   :  { %v9083_v23 = vpop.eup %9082 }
 0x99a   :  { %v2548_v8 = vsub.f32 1.0, %v9083_v23 }
 0x9fb   :  { %v2385_v7 = vpop.permute.xlu1 %2384 }
 0x9fc   :  { %v2387_v51 = vmul.f32 %v9075_v9, %v2385_v7  ;;  %v10394_v9 = vld [vmem:[%s12250_s1 + $0x30] sm:$0xff] }
 0x9fe   :  { %v2655_v18 = vmul.f32 %v2653_v35, %v2387_v51 }
 0xa00   :  { %2657 = vrot.lane.b32.xlu1 %v2655_v18, %s9461_s28 }
 0xa35   :  { %v10368_v48 = vpop.f32.mrf.mxu1 }
 0xa37   :  { %v2466_v54 = vpop.f32.mrf.mxu1 }
 0xa38   :  { %v2469_v63 = vadd.f32 %v2466_v54, %v10011_v10  ;;  %v23_v54 = vld [vmem:[%s12249_s0 + $0x28] sm:$0xff] }
 0xa3a   :  { %v2472_v43 = vmul.f32 %v10376_v31, %v2469_v63  ;;  %v2549_v15 = vmul.f32 %v2548_v8, %v2469_v63  ;;  %v9369_v63 = vld [vmem:[%s12249_s0 + $0x68] sm:$0xff] }
 0xa3b   :  { %v10463_v8 = vsub.f32 1.0, %v9369_v63 }
 0xa3c   :  { %v2473_v27 = vadd.f32 %v2472_v43, %v10379_v55 }
 0xa3d   :  { %12337 = vst [vmem:[#allocation45_spill] sm:$0xff] %v10463_v8 }
 0xa3e   :  { %8569 = vmatmul.mubr.msk.f32.vlgmr.msra.gmra.mxu0 %vm65_vm0, %v2473_v27 }
 0xa3f   :  { %8572 = vmatpush3.msra.mxu0 %v10080_v19  ;;  %8575 = vmatprep.mubr.msk.f32.mxu0 %vm9459_vm2, %v12319_v26 }
 0xa40   :  { %8573 = vmatprep.subr.mxu0 %v12319_v26 }
 0xa41   :  { %8574 = vmatpush3.msra.mxu0 %v10086_v60 }
 0xa42   :  { %8578 = vmatprep.subr.mxu0 %v12319_v26 }
 0xa72   :  { %v2658_v10 = vpop.permute.xlu1 %2657 }
 0xa73   :  { %7996 = vmatmul.mubr.msk.f32.vlgmr.msra.gmra.mxu1 %vm1348_vm1, %v2658_v10 }
 0xa74   :  { %2949 = vmatpush1.msra.mxu1 %v10394_v9  ;;  %2988 = vmatprep.mubr.f32.mxu1 %v12319_v26 }
 0xa75   :  { %2950 = vmatprep.subr.mxu1 %v10401_v44 }
 0xa76   :  { %2951 = vmatpush1.msra.mxu1 %v10407_v29 }
 0xa77   :  { %2952 = vmatprep.subr.mxu1 %v10413_v40 }
 0xa78   :  { %2953 = vmatpush1.msra.mxu1 %v10419_v5 }
 0xa79   :  { %2954 = vmatprep.subr.mxu1 %v10425_v36 }
 0xa7a   :  { %2955 = vmatpush1.msra.mxu1 %v10431_v28 }
 0xa7b   :  { %3211 = vmatprep.subr.mxu1 %v9968_v6  ;;  %v7965_v6 = vmul.f32 -1.442695, %v9952_v33  ;;  %v10466_v33 = vmul.f32 %v9369_v63, %v23_v54 }
 0xa7d   :  { %9084 = vpow2.f32 %v7965_v6 }
 0xa8a   :  { %v9085_v21 = vpop.eup %9084 }
 0xafe   :  { %v2543_v12 = vpop.f32.mrf.mxu0 }
 0xaff   :  { %v2544_v7 = vadd.f32 %v2543_v12, %v10100_v38 }
 0xb00   :  { %v8570_v51 = vpop.f32.mrf.mxu0 }
 0xb01   :  { %v2547_v35 = vmul.f32 %v9083_v23, %v2544_v7  ;;  %v1193_v23 = vadd.f32 1.0, %v9085_v21 }
 0xb03   :  { %v10436_v18 = vadd.f32 %v2549_v15, %v2547_v35  ;;  %9086 = vrcp.f32 %v1193_v23 }
 0xb05   :  { %v2551_v42 = vmul.f32 %v10436_v18, %v10376_v31  ;;  %7807 = vst.msk [vmem:[%s12253_s4 + $0x10] sm:$0xff] %vm65_vm0, %v10436_v18 }
 0xb07   :  { %v10446_v20 = vadd.f32 %v2551_v42, %v10379_v55 }
 0xb09   :  { %8576 = vmatmul.mubr.msk.f32.vlgmr.msra.gmra.mxu0 %vm65_vm0, %v10446_v20 }
 0xb0a   :  { %8579 = vmatpush3.msra.mxu0 %v10131_v13  ;;  %8582 = vmatprep.mubr.msk.f32.mxu0 %vm9459_vm2, %v12319_v26 }
 0xb0b   :  { %8580 = vmatprep.subr.mxu0 %v12319_v26 }
 0xb0c   :  { %8581 = vmatpush3.msra.mxu0 %v10142_v62 }
 0xb0d   :  { %8585 = vmatprep.subr.mxu0 %v12319_v26 }
 0xb10   :  { %v9087_v24 = vpop.eup %9086 }
 0xb11   :  { %v2811_v27 = vsub.f32 1.0, %v9087_v24 }
 0xb33   :  { %v2727_v59 = vpop.f32.mrf.mxu1 }
 0xb35   :  { %v2729_v43 = vpop.f32.mrf.mxu1 }
 0xb36   :  { %v2732_v15 = vadd.f32 %v2729_v43, %v10120_v37 }
 0xb38   :  { %v2735_v10 = vmul.f32 %v10463_v8, %v2732_v15  ;;  %v2812_v12 = vmul.f32 %v2811_v27, %v2732_v15 }
 0xb3a   :  { %v2736_v7 = vadd.f32 %v2735_v10, %v10466_v33 }
 0xb3c   :  { %8583 = vmatmul.mubr.msk.f32.vlgmr.msra.gmra.mxu0 %vm65_vm0, %v2736_v7 }
 0xb3d   :  { %8586 = vmatpush3.msra.mxu0 %v10158_v4  ;;  %8589 = vmatprep.mubr.msk.f32.mxu0 %vm9459_vm2, %v12319_v26 }
 0xb3e   :  { %8587 = vmatprep.subr.mxu0 %v12319_v26 }
 0xb3f   :  { %8588 = vmatpush3.msra.mxu0 %v10165_v49 }
 0xb40   :  { %8592 = vmatprep.subr.mxu0 %v12319_v26 }
 0xbc9   :  { %v2622_v51 = vpop.f32.mrf.mxu0 }
 0xbca   :  { %v2623_v35 = vadd.f32 %v2622_v51, %v10368_v48  ;;  %v10498_v48 = vld [vmem:[%s12250_s1 + $0xf0] sm:$0xff] }
 0xbcb   :  { %v8577_v42 = vpop.f32.mrf.mxu0 }
 0xbcc   :  { %v2626_v6 = vadd.f32 %v2623_v35, %v9868_v57 }
 0xbce   :  { %9088 = vtanh.f32 %v2626_v6 }
 0xbdb   :  { %v9089_v21 = vpop.eup %9088 }
 0xbdc   :  { %2636 = vrot.lane.b32.xlu0 %v9089_v21, %s9460_s27 }
 0xbfc   :  { %v2806_v23 = vpop.f32.mrf.mxu0 }
 0xbfd   :  { %v2807_v54 = vadd.f32 %v2806_v23, %v10175_v39 }
 0xbfe   :  { %v8584_v63 = vpop.f32.mrf.mxu0 }
 0xbff   :  { %v2810_v43 = vmul.f32 %v9087_v24, %v2807_v54  ;;  %v7995_v24 = vmul.f32 -1.442695, %v2626_v6 }
 0xc01   :  { %v10481_v15 = vadd.f32 %v2812_v12, %v2810_v43  ;;  %9090 = vpow2.f32 %v7995_v24  ;;  %v198_v12 = vmax.f32 %v9838_v32, 0.0  ;;  %v12338_v24 = vld [vmem:[#allocation31_spill] sm:$0xff] }
 0xc03   :  { %v2814_v27 = vmul.f32 %v10481_v15, %v10463_v8  ;;  %7818 = vst.msk [vmem:[%s12254_s5 + $0x28] sm:$0xff] %vm65_vm0, %v10481_v15  ;;  %v206_v51 = vsub.f32 0.0, %v198_v12 }
 0xc05   :  { %v10491_v57 = vadd.f32 %v2814_v27, %v10466_v33  ;;  %v217_v35 = vmul.f32 1.442695, %v206_v51 }
 0xc07   :  { %8590 = vmatmul.mubr.msk.f32.vlgmr.msra.gmra.mxu0 %vm65_vm0, %v10491_v57 }
 0xc08   :  { %8593 = vmatpush3.msra.mxu0 %v10498_v48  ;;  %8596 = vmatprep.mubr.msk.f32.mxu0 %vm9459_vm2, %v12319_v26 }
 0xc09   :  { %8594 = vmatprep.subr.mxu0 %v12319_v26 }
 0xc0a   :  { %8595 = vmatpush3.msra.mxu0 %v9962_v1 }
 0xc0b   :  { %8599 = vmatprep.subr.mxu0 %v12319_v26 }
 0xc0e   :  { %v9091_v10 = vpop.eup %9090 }
 0xc0f   :  { %v2630_v7 = vadd.f32 1.0, %v9091_v10 }
 0xc11   :  { %9092 = vrcp.f32 %v2630_v7 }
 0xc12   :  { %9094 = vpow2.f32 %v217_v35  ;;  %v12339_v35 = vld [vmem:[#allocation22_spill] sm:$0xff] }
 0xc1e   :  { %v9093_v42 = vpop.eup %9092 }
 0xc1f   :  { %v9095_v54 = vpop.eup %9094  ;;  %v2634_v1 = vmul.f32 %v9093_v42, %v10335_v41 }
 0xc4e   :  { %v2637_v21 = vpop.permute.xlu0 %2636 }
 0xc4f   :  { %v2639_v23 = vmul.f32 %v9093_v42, %v2637_v21  ;;  %v839_v21 = vmax.f32 %v12339_v35, 0.0 }
 0xc51   :  { %2641 = vrot.lane.b32.xlu1 %v2639_v23, %s9461_s28 }
 0xc55   :  { %2915 = vrot.lane.b32.xlu1 %v9095_v54, %s9462_s29  ;;  %v847_v54 = vsub.f32 0.0, %v839_v21 }
 0xcc3   :  { %v2642_v6 = vpop.permute.xlu1 %2641 }
 0xcc4   :  { %v10510_v63 = vadd.f32 %v2642_v6, %v2634_v1  ;;  %v859_v1 = vmul.f32 1.442695, %v847_v54 }
 0xcc6   :  { %9096 = vtanh.f32 %v10510_v63 }
 0xcc7   :  { %v2885_v32 = vpop.f32.mrf.mxu0 }
 0xcc8   :  { %v2886_v43 = vadd.f32 %v2885_v32, %v2727_v59  ;;  %v2916_v32 = vpop.permute.xlu1 %2915 }
 0xcc9   :  { %v8591_v27 = vpop.f32.mrf.mxu0 }
 0xcca   :  { %v2889_v10 = vadd.f32 %v2886_v43, %v12338_v24 }
 0xccc   :  { %9098 = vtanh.f32 %v2889_v10  ;;  %v7999_v51 = vmul.f32 -1.442695, %v2889_v10 }
 0xcce   :  { %9100 = vpow2.f32 %v7999_v51 }
 0xcd3   :  { %v9097_v12 = vpop.eup %9096 }
 0xcd4   :  { %2647 = vrot.lane.b32.xlu0 %v9097_v12, %s9460_s27 }
 0xcd9   :  { %v9099_v7 = vpop.eup %9098 }
 0xcda   :  { %2899 = vrot.lane.b32.xlu1 %v9099_v7, %s9460_s27 }
 0xcdb   :  { %v9101_v41 = vpop.eup %9100 }
 0xcdc   :  { %v2893_v23 = vadd.f32 1.0, %v9101_v41 }
 0xcde   :  { %9102 = vrcp.f32 %v2893_v23 }
 0xcdf   :  { %9104 = vpow2.f32 %v859_v1  ;;  %v9371_v1 = vld [vmem:[%s12249_s0 + $0x58] sm:$0xff] }
 0xceb   :  { %v9103_v27 = vpop.eup %9102 }
 0xcec   :  { %v9105_v10 = vpop.eup %9104 }
 0xd46   :  { %v2648_v59 = vpop.permute.xlu0 %2647 }
 0xd47   :  { %v2650_v6 = vmul.f32 %v9093_v42, %v2648_v59  ;;  %v2897_v42 = vmul.f32 %v9103_v27, %v10352_v34  ;;  %v10545_v59 = vsub.f32 1.0, %v9371_v1 }
 0xd49   :  { %v2918_v43 = vmul.f32 %v2916_v32, %v2650_v6  ;;  %12341 = vst [vmem:[#allocation31_spill] sm:$0xff] %v10545_v59  ;;  %v10550_v32 = vld [vmem:[%s12250_s1 + $0x130] ss:$0 sm:$0xff] }
 0xd4b   :  { %2920 = vrot.lane.b32.xlu0 %v2918_v43, %s9461_s28 }
 0xd4c   :  { %v2900_v24 = vpop.permute.xlu1 %2899 }
 0xd4d   :  { %v2902_v12 = vmul.f32 %v9103_v27, %v2900_v24 }
 0xd4f   :  { %2904 = vrot.lane.b32.xlu0 %v2902_v12, %s9461_s28 }
 0xd53   :  { %3178 = vrot.lane.b32.xlu0 %v9105_v10, %s9462_s29 }
 0xdbd   :  { %v2921_v7 = vpop.permute.xlu0 %2920 }
 0xdbe   :  { %8000 = vmatmul.mubr.msk.f32.vlgmr.msra.gmra.mxu1 %vm1348_vm1, %v2921_v7 }
 0xdbf   :  { %3212 = vmatpush1.msra.mxu1 %v10025_v2  ;;  %3251 = vmatprep.mubr.f32.mxu1 %v12319_v26 }
 0xdc0   :  { %3213 = vmatprep.subr.mxu1 %v10030_v30 }
 0xdc1   :  { %v2905_v51 = vpop.permute.xlu0 %2904  ;;  %3214 = vmatpush1.msra.mxu1 %v10036_v50 }
 0xdc2   :  { %v10526_v41 = vadd.f32 %v2905_v51, %v2897_v42  ;;  %3215 = vmatprep.subr.mxu1 %v10042_v56  ;;  %v12340_v56 = vld [vmem:[#allocation13_spill] sm:$0xff] }
 0xdc3   :  { %3216 = vmatpush1.msra.mxu1 %v10049_v45  ;;  %v7923_v21 = vmul.f32 -1.442695, %v12340_v56 }
 0xdc4   :  { %9106 = vtanh.f32 %v10526_v41  ;;  %3217 = vmatprep.subr.mxu1 %v10055_v52 }
 0xdc5   :  { %3218 = vmatpush1.msra.mxu1 %v10061_v61  ;;  %v3179_v50 = vpop.permute.xlu0 %3178  ;;  %9108 = vpow2.f32 %v7923_v21  ;;  %v21_v61 = vld [vmem:[%s12249_s0 + $0x18] sm:$0xff] }
 0xdc6   :  { %3474 = vmatprep.subr.mxu1 %v10362_v46 }
 0xdd1   :  { %v9107_v2 = vpop.eup %9106 }
 0xdd2   :  { %2910 = vrot.lane.b32.xlu1 %v9107_v2, %s9460_s27  ;;  %v9109_v45 = vpop.eup %9108 }
 0xdd3   :  { %v575_v23 = vadd.f32 1.0, %v9109_v45 }
 0xdd5   :  { %9110 = vrcp.f32 %v575_v23 }
 0xde2   :  { %v9111_v52 = vpop.eup %9110 }
 0xde3   :  { %v3074_v24 = vsub.f32 1.0, %v9111_v52 }
 0xe44   :  { %v2911_v30 = vpop.permute.xlu1 %2910 }
 0xe45   :  { %v2913_v34 = vmul.f32 %v9103_v27, %v2911_v30  ;;  %v10553_v27 = vmul.f32 %v9371_v1, %v21_v61  ;;  %v9374_v61 = vld [vmem:[%s12249_s0 + $0x60] sm:$0xff] }
 0xe46   :  { %v10607_v1 = vsub.f32 1.0, %v9374_v61 }
 0xe47   :  { %v3181_v35 = vmul.f32 %v3179_v50, %v2913_v34 }
 0xe48   :  { %12344 = vst [vmem:[#allocation13_spill] sm:$0xff] %v10607_v1 }
 0xe49   :  { %3183 = vrot.lane.b32.xlu1 %v3181_v35, %s9461_s28 }
 0xe7e   :  { %v10537_v54 = vpop.f32.mrf.mxu1 }
 0xe80   :  { %v2992_v6 = vpop.f32.mrf.mxu1 }
 0xe81   :  { %v2995_v43 = vadd.f32 %v10550_v32, %v2992_v6 }
 0xe83   :  { %v2998_v12 = vmul.f32 %v10545_v59, %v2995_v43  ;;  %v3075_v10 = vmul.f32 %v3074_v24, %v2995_v43 }
 0xe85   :  { %v2999_v7 = vadd.f32 %v2998_v12, %v10553_v27 }
 0xe87   :  { %8597 = vmatmul.mubr.msk.f32.vlgmr.msra.gmra.mxu0 %vm65_vm0, %v2999_v7 }
 0xe88   :  { %8600 = vmatpush3.msra.mxu0 %v10080_v19  ;;  %8603 = vmatprep.mubr.msk.f32.mxu0 %vm9459_vm2, %v12319_v26  ;;  %v10576_v19 = vld [vmem:[%s12250_s1 + $0x1a8] sm:$0xff] }
 0xe89   :  { %8601 = vmatprep.subr.mxu0 %v12319_v26 }
 0xe8a   :  { %8602 = vmatpush3.msra.mxu0 %v10086_v60 }
 0xe8b   :  { %8606 = vmatprep.subr.mxu0 %v12319_v26 }
 0xebb   :  { %v3184_v42 = vpop.permute.xlu1 %3183 }
 0xebc   :  { %8004 = vmatmul.mubr.msk.f32.vlgmr.msra.gmra.mxu1 %vm1348_vm1, %v3184_v42 }
 0xebd   :  { %3475 = vmatpush1.msra.mxu1 %v10394_v9  ;;  %3514 = vmatprep.mubr.f32.mxu1 %v12319_v26 }
 0xebe   :  { %3476 = vmatprep.subr.mxu1 %v10401_v44 }
 0xebf   :  { %3477 = vmatpush1.msra.mxu1 %v10407_v29 }
 0xec0   :  { %3478 = vmatprep.subr.mxu1 %v10413_v40 }
 0xec1   :  { %3479 = vmatpush1.msra.mxu1 %v10419_v5 }
 0xec2   :  { %3480 = vmatprep.subr.mxu1 %v10425_v36 }
 0xec3   :  { %3481 = vmatpush1.msra.mxu1 %v10431_v28 }
 0xec4   :  { %3735 = vmatprep.subr.mxu1 %v10576_v19 }
 0xf47   :  { %v3069_v60 = vpop.f32.mrf.mxu0 }
 0xf48   :  { %v3070_v51 = vadd.f32 %v3069_v60, %v10100_v38  ;;  %v12343_v38 = vld [vmem:[#allocation27_spill] sm:$0xff] }
 0xf49   :  { %v8598_v2 = vpop.f32.mrf.mxu0  ;;  %v7964_v56 = vmul.f32 -1.442695, %v12343_v38 }
 0xf4a   :  { %v3073_v30 = vmul.f32 %v9111_v52, %v3070_v51  ;;  %v12345_v51 = vld [vmem:[#allocation9_spill] sm:$0xff] }
 0xf4b   :  { %9112 = vpow2.f32 %v7964_v56 }
 0xf4c   :  { %v10580_v34 = vadd.f32 %v3075_v10, %v3073_v30 }
 0xf4e   :  { %v3077_v50 = vmul.f32 %v10580_v34, %v10545_v59  ;;  %7808 = vst.msk [vmem:[%s12253_s4 + $0x18] sm:$0xff] %vm65_vm0, %v10580_v34 }
 0xf50   :  { %v10590_v35 = vadd.f32 %v3077_v50, %v10553_v27 }
 0xf52   :  { %12342 = vst [vmem:[#allocation22_spill] sm:$0xff] %v10590_v35  ;;  %8604 = vmatmul.mubr.msk.f32.vlgmr.msra.gmra.mxu0 %vm65_vm0, %v10590_v35 }
 0xf53   :  { %8607 = vmatpush3.msra.mxu0 %v10131_v13  ;;  %8610 = vmatprep.mubr.msk.f32.mxu0 %vm9459_vm2, %v12319_v26  ;;  %v22_v13 = vld [vmem:[%s12249_s0 + $0x20] sm:$0xff] }
 0xf54   :  { %8608 = vmatprep.subr.mxu0 %v12319_v26  ;;  %v10610_v43 = vmul.f32 %v9374_v61, %v22_v13  ;;  %v12348_v13 = vld [vmem:[#allocation6_spill] sm:$0xff] }
 0xf55   :  { %8609 = vmatpush3.msra.mxu0 %v10142_v62 }
 0xf56   :  { %8613 = vmatprep.subr.mxu0 %v12319_v26 }
 0xf58   :  { %v9113_v21 = vpop.eup %9112 }
 0xf59   :  { %v1192_v45 = vadd.f32 1.0, %v9113_v21 }
 0xf5b   :  { %9114 = vrcp.f32 %v1192_v45 }
 0xf68   :  { %v9115_v23 = vpop.eup %9114 }
 0xf69   :  { %v3337_v24 = vsub.f32 1.0, %v9115_v23 }
 0xf7c   :  { %v3253_v52 = vpop.f32.mrf.mxu1 }
 0xf7e   :  { %v3255_v62 = vpop.f32.mrf.mxu1 }
 0xf7f   :  { %v3258_v6 = vadd.f32 %v3255_v62, %v10120_v37 }
 0xf81   :  { %v3261_v12 = vmul.f32 %v10607_v1, %v3258_v6  ;;  %v3338_v10 = vmul.f32 %v3337_v24, %v3258_v6 }
 0xf83   :  { %v3262_v7 = vadd.f32 %v3261_v12, %v10610_v43 }
 0xf85   :  { %8611 = vmatmul.mubr.msk.f32.vlgmr.msra.gmra.mxu0 %vm65_vm0, %v3262_v7 }
 0xf86   :  { %8614 = vmatpush3.msra.mxu0 %v10158_v4  ;;  %8617 = vmatprep.mubr.msk.f32.mxu0 %vm9459_vm2, %v12319_v26 }
 0xf87   :  { %8615 = vmatprep.subr.mxu0 %v12319_v26 }
 0xf88   :  { %8616 = vmatpush3.msra.mxu0 %v10165_v49 }
 0xf89   :  { %8620 = vmatprep.subr.mxu0 %v12319_v26 }
0x1012   :  { %v3148_v37 = vpop.f32.mrf.mxu0 }
0x1013   :  { %v3149_v42 = vadd.f32 %v3148_v37, %v10537_v54 }
0x1014   :  { %v8605_v60 = vpop.f32.mrf.mxu0 }
0x1015   :  { %v3152_v2 = vadd.f32 %v3149_v42, %v12345_v51 }
0x1017   :  { %9116 = vtanh.f32 %v3152_v2  ;;  %v8003_v45 = vmul.f32 -1.442695, %v3152_v2 }
0x1019   :  { %9118 = vpow2.f32 %v8003_v45 }
0x1024   :  { %v9117_v30 = vpop.eup %9116 }
0x1025   :  { %3162 = vrot.lane.b32.xlu0 %v9117_v30, %s9460_s27 }
0x1026   :  { %v9119_v62 = vpop.eup %9118 }
0x1027   :  { %v3156_v24 = vadd.f32 1.0, %v9119_v62  ;;  %v12350_v62 = vld [vmem:[#allocation20_spill] sm:$0xff] }
0x1029   :  { %9120 = vrcp.f32 %v3156_v24 }
0x1036   :  { %v9121_v7 = vpop.eup %9120 }
0x1037   :  { %v3160_v51 = vmul.f32 %v9121_v7, %v10510_v63 }
0x1045   :  { %v3332_v4 = vpop.f32.mrf.mxu0 }
0x1046   :  { %v3333_v50 = vadd.f32 %v3332_v4, %v10175_v39  ;;  %v10646_v39 = vld [vmem:[%s12250_s1 + $0xe0] sm:$0xff] }
0x1047   :  { %v8612_v38 = vpop.f32.mrf.mxu0 }
0x1048   :  { %v3336_v56 = vmul.f32 %v9115_v23, %v3333_v50  ;;  %v10653_v23 = vld [vmem:[%s12250_s1 + $0x100] ss:$0 sm:$0xff] }
0x1049   :  { %v177_v61 = vadd.f32 %v10653_v23, %v12348_v13 }
0x104a   :  { %v10625_v21 = vadd.f32 %v3338_v10, %v3336_v56  ;;  %v12349_v56 = vld [vmem:[#allocation32_spill] sm:$0xff] }
0x104b   :  { %v199_v6 = vmax.f32 %v177_v61, 0.0 }
0x104c   :  { %12346 = vst [vmem:[#allocation27_spill] sm:$0xff] %v10625_v21  ;;  %v3340_v49 = vmul.f32 %v10625_v21, %v10607_v1  ;;  %7817 = vst.msk [vmem:[%s12254_s5 + $0x20] sm:$0xff] %vm65_vm0, %v10625_v21 }
0x104d   :  { %v207_v12 = vsub.f32 0.0, %v199_v6  ;;  %v838_v6 = vmax.f32 %v12350_v62, 0.0  ;;  %v10709_v62 = vld [vmem:[%s12250_s1 + $0x178] sm:$0xff] }
0x104e   :  { %v10635_v54 = vadd.f32 %v3340_v49, %v10610_v43 }
0x104f   :  { %v219_v10 = vmul.f32 1.442695, %v207_v12  ;;  %v846_v12 = vsub.f32 0.0, %v838_v6  ;;  %v10715_v6 = vld [vmem:[%s12250_s1 + $0x170] sm:$0xff] }
0x1050   :  { %12347 = vst [vmem:[#allocation9_spill] sm:$0xff] %v10635_v54  ;;  %8618 = vmatmul.mubr.msk.f32.vlgmr.msra.gmra.mxu0 %vm65_vm0, %v10635_v54 }
0x1051   :  { %8621 = vmatpush3.msra.mxu0 %v10498_v48  ;;  %8624 = vmatprep.mubr.msk.f32.mxu0 %vm9459_vm2, %v12319_v26  ;;  %9122 = vpow2.f32 %v219_v10  ;;  %v857_v10 = vmul.f32 1.442695, %v846_v12 }
0x1052   :  { %8622 = vmatprep.subr.mxu0 %v12319_v26 }
0x1053   :  { %8623 = vmatpush3.msra.mxu0 %v10646_v39 }
0x1054   :  { %8627 = vmatprep.subr.mxu0 %v12319_v26 }
0x105e   :  { %v9123_v60 = vpop.eup %9122 }
0x1097   :  { %v3163_v37 = vpop.permute.xlu0 %3162 }
0x1098   :  { %v3165_v42 = vmul.f32 %v9121_v7, %v3163_v37 }
0x109a   :  { %3167 = vrot.lane.b32.xlu1 %v3165_v42, %s9461_s28 }
0x109e   :  { %3441 = vrot.lane.b32.xlu1 %v9123_v60, %s9462_s29 }
0x110c   :  { %v3168_v2 = vpop.permute.xlu1 %3167 }
0x110d   :  { %v10660_v30 = vadd.f32 %v3168_v2, %v3160_v51 }
0x110f   :  { %9124 = vtanh.f32 %v10660_v30 }
0x1110   :  { %v3411_v4 = vpop.f32.mrf.mxu0  ;;  %v3442_v42 = vpop.permute.xlu1 %3441 }
0x1111   :  { %v3412_v50 = vadd.f32 %v3411_v4, %v3253_v52 }
0x1112   :  { %v8619_v38 = vpop.f32.mrf.mxu0 }
0x1113   :  { %v3415_v49 = vadd.f32 %v3412_v50, %v12349_v56  ;;  %v10674_v56 = vld [vmem:[%s12250_s1 + $0x1a0] sm:$0xff] }
0x1115   :  { %9126 = vtanh.f32 %v3415_v49  ;;  %v8007_v61 = vmul.f32 -1.442695, %v3415_v49  ;;  %v10682_v49 = vld [vmem:[%s12250_s1 + $0x198] sm:$0xff] }
0x1117   :  { %9128 = vpow2.f32 %v8007_v61 }
0x111c   :  { %v9125_v45 = vpop.eup %9124 }
0x111d   :  { %3173 = vrot.lane.b32.xlu0 %v9125_v45, %s9460_s27 }
0x1122   :  { %v9127_v13 = vpop.eup %9126 }
0x1123   :  { %3425 = vrot.lane.b32.xlu1 %v9127_v13, %s9460_s27  ;;  %v10688_v13 = vld [vmem:[%s12250_s1 + $0x190] sm:$0xff] }
0x1124   :  { %v9129_v63 = vpop.eup %9128 }
0x1125   :  { %v3419_v24 = vadd.f32 1.0, %v9129_v63  ;;  %v10702_v63 = vld [vmem:[%s12250_s1 + $0x180] sm:$0xff] }
0x1127   :  { %9130 = vrcp.f32 %v3419_v24 }
0x1128   :  { %9132 = vpow2.f32 %v857_v10 }
0x1134   :  { %v9131_v51 = vpop.eup %9130 }
0x1135   :  { %v9133_v50 = vpop.eup %9132 }
0x118f   :  { %v3174_v52 = vpop.permute.xlu0 %3173 }
0x1190   :  { %v3176_v37 = vmul.f32 %v9121_v7, %v3174_v52  ;;  %v3423_v7 = vmul.f32 %v9131_v51, %v10526_v41  ;;  %v10696_v41 = vld [vmem:[%s12250_s1 + $0x188] sm:$0xff] }
0x1192   :  { %v3444_v60 = vmul.f32 %v3442_v42, %v3176_v37  ;;  %v12351_v42 = vld [vmem:[#allocation15_spill] sm:$0xff] }
0x1194   :  { %3446 = vrot.lane.b32.xlu0 %v3444_v60, %s9461_s28  ;;  %v7924_v60 = vmul.f32 -1.442695, %v12351_v42  ;;  %v10757_v42 = vld [vmem:[%s12250_s1 + $0x140] ss:$0 sm:$0xff] }
0x1195   :  { %v3426_v2 = vpop.permute.xlu1 %3425 }
0x1196   :  { %v3428_v4 = vmul.f32 %v9131_v51, %v3426_v2 }
0x1198   :  { %3430 = vrot.lane.b32.xlu0 %v3428_v4, %s9461_s28 }
0x119c   :  { %3702 = vrot.lane.b32.xlu0 %v9133_v50, %s9462_s29 }
0x1206   :  { %v3447_v38 = vpop.permute.xlu0 %3446 }
0x1207   :  { %8008 = vmatmul.mubr.msk.f32.vlgmr.msra.gmra.mxu1 %vm1348_vm1, %v3447_v38 }
0x1208   :  { %3736 = vmatpush1.msra.mxu1 %v10674_v56  ;;  %3775 = vmatprep.mubr.f32.mxu1 %v12319_v26 }
0x1209   :  { %3737 = vmatprep.subr.mxu1 %v10682_v49 }
0x120a   :  { %v3431_v45 = vpop.permute.xlu0 %3430  ;;  %3738 = vmatpush1.msra.mxu1 %v10688_v13 }
0x120b   :  { %v10691_v61 = vadd.f32 %v3431_v45, %v3423_v7  ;;  %3739 = vmatprep.subr.mxu1 %v10696_v41 }
0x120c   :  { %3740 = vmatpush1.msra.mxu1 %v10702_v63 }
0x120d   :  { %9134 = vtanh.f32 %v10691_v61  ;;  %3741 = vmatprep.subr.mxu1 %v10709_v62 }
0x120e   :  { %3742 = vmatpush1.msra.mxu1 %v10715_v6  ;;  %v3703_v52 = vpop.permute.xlu0 %3702  ;;  %9136 = vpow2.f32 %v7924_v60 }
0x120f   :  { %3996 = vmatprep.subr.mxu1 %v10362_v46 }
0x121a   :  { %v9135_v24 = vpop.eup %9134 }
0x121b   :  { %3436 = vrot.lane.b32.xlu1 %v9135_v24, %s9460_s27  ;;  %v9137_v2 = vpop.eup %9136 }
0x121c   :  { %v576_v4 = vadd.f32 1.0, %v9137_v2 }
0x121e   :  { %9138 = vrcp.f32 %v576_v4 }
0x122b   :  { %v9139_v50 = vpop.eup %9138 }
0x122c   :  { %v3598_v11 = vsub.f32 1.0, %v9139_v50 }
0x128d   :  { %v3437_v12 = vpop.permute.xlu1 %3436 }
0x128e   :  { %v3439_v10 = vmul.f32 %v9131_v51, %v3437_v12 }
0x1290   :  { %v3705_v37 = vmul.f32 %v3703_v52, %v3439_v10  ;;  %v10731_v10 = vld [vmem:[%s12250_s1 + $0x50] sm:$0xff] }
0x1292   :  { %3707 = vrot.lane.b32.xlu1 %v3705_v37, %s9461_s28 }
0x12c7   :  { %v10722_v38 = vpop.f32.mrf.mxu1 }
0x12c9   :  { %v3518_v7 = vpop.f32.mrf.mxu1 }
0x12ca   :  { %v3521_v45 = vadd.f32 %v10550_v32, %v3518_v7 }
0x12cc   :  { %v3522_v24 = vmul.f32 %v3521_v45, %v10607_v1  ;;  %v3599_v51 = vmul.f32 %v3598_v11, %v3521_v45  ;;  %v10740_v11 = vld [vmem:[%s12250_s1 + $0x40] sm:$0xff] }
0x12ce   :  { %v3523_v12 = vadd.f32 %v3522_v24, %v10610_v43 }
0x12d0   :  { %8625 = vmatmul.mubr.msk.f32.vlgmr.msra.gmra.mxu0 %vm65_vm0, %v3523_v12 }
0x12d1   :  { %8628 = vmatpush3.msra.mxu0 %v10731_v10  ;;  %8631 = vmatprep.mubr.msk.f32.mxu0 %vm9459_vm2, %v12319_v26 }
0x12d2   :  { %8629 = vmatprep.subr.mxu0 %v12319_v26 }
0x12d3   :  { %8630 = vmatpush3.msra.mxu0 %v10740_v11 }
0x12d4   :  { %8634 = vmatprep.subr.mxu0 %v12319_v26 }
0x1304   :  { %v3708_v52 = vpop.permute.xlu1 %3707 }
0x1305   :  { %8012 = vmatmul.mubr.msk.f32.vlgmr.msra.gmra.mxu1 %vm1348_vm1, %v3708_v52 }
0x1306   :  { %3997 = vmatpush1.msra.mxu1 %v10394_v9  ;;  %4036 = vmatprep.mubr.f32.mxu1 %v12319_v26 }
0x1307   :  { %3998 = vmatprep.subr.mxu1 %v10401_v44 }
0x1308   :  { %3999 = vmatpush1.msra.mxu1 %v10407_v29 }
0x1309   :  { %4000 = vmatprep.subr.mxu1 %v10413_v40 }
0x130a   :  { %4001 = vmatpush1.msra.mxu1 %v10419_v5 }
0x130b   :  { %4002 = vmatprep.subr.mxu1 %v10425_v36 }
0x130c   :  { %4003 = vmatpush1.msra.mxu1 %v10431_v28 }
0x130d   :  { %4257 = vmatprep.subr.mxu1 %v10576_v19 }
0x1390   :  { %v3593_v37 = vpop.f32.mrf.mxu0 }
0x1391   :  { %v3594_v60 = vadd.f32 %v10757_v42, %v3593_v37  ;;  %v10799_v37 = vld [vmem:[%s12250_s1 + $0x250] sm:$0xff] }
0x1392   :  { %v8626_v2 = vpop.f32.mrf.mxu0 }
0x1393   :  { %v3597_v4 = vmul.f32 %v9139_v50, %v3594_v60  ;;  %v12356_v60 = vld [vmem:[#allocation25_spill] sm:$0xff] }
0x1394   :  { %v7963_v2 = vmul.f32 -1.442695, %v12356_v60 }
0x1395   :  { %v10760_v7 = vadd.f32 %v3599_v51, %v3597_v4  ;;  %v10788_v51 = vld [vmem:[%s12250_s1 + $0x260] sm:$0xff] }
0x1396   :  { %9140 = vpow2.f32 %v7963_v2  ;;  %v10823_v2 = vld [vmem:[%s12250_s1 + $0x1c0] sm:$0xff] }
0x1397   :  { %12352 = vst [vmem:[#allocation6_spill] sm:$0xff] %v10760_v7  ;;  %v3601_v45 = vmul.f32 %v10760_v7, %v10607_v1  ;;  %v5350_v24 = vadd.f32 %v10760_v7, %v10625_v21  ;;  %7809 = vst.msk [vmem:[%s12253_s4 + $0x20] sm:$0xff] %vm65_vm0, %v10760_v7 }
0x1399   :  { %v10771_v12 = vmul.f32 0.5, %v5350_v24  ;;  %v10774_v52 = vadd.f32 %v3601_v45, %v10610_v43 }
0x139b   :  { %12353 = vst [vmem:[#allocation32_spill] sm:$0xff] %v10771_v12  ;;  %12354 = vst [vmem:[#allocation20_spill] sm:$0xff] %v10774_v52  ;;  %8632 = vmatmul.mubr.msk.f32.vlgmr.msra.gmra.mxu0 %vm65_vm0, %v10774_v52  ;;  %v5334_v50 = vadd.f32 %v10774_v52, %v10635_v54  ;;  %v10814_v52 = vld [vmem:[%s12250_s1 + $0x2a0] ss:$0 sm:$0xff] }
0x139c   :  { %7801 = vst.msk [vmem:[%s12252_s3 + $0x20] sm:$0xff] %vm65_vm0, %v10771_v12  ;;  %8635 = vmatpush3.msra.mxu0 %v10788_v51  ;;  %8638 = vmatprep.mubr.msk.f32.mxu0 %vm9459_vm2, %v12319_v26 }
0x139d   :  { %8636 = vmatprep.subr.mxu0 %v12319_v26  ;;  %v10794_v43 = vmul.f32 0.5, %v5334_v50 }
0x139e   :  { %8637 = vmatpush3.msra.mxu0 %v10799_v37 }
0x139f   :  { %12355 = vst [vmem:[#allocation15_spill] sm:$0xff] %v10794_v43  ;;  %8641 = vmatprep.subr.mxu0 %v12319_v26  ;;  %7793 = vst.msk [vmem:[%s12251_s2 + $0x20] sm:$0xff] %vm65_vm0, %v10794_v43 }
0x13a3   :  { %v9141_v4 = vpop.eup %9140 }
0x13a4   :  { %v1191_v45 = vadd.f32 1.0, %v9141_v4  ;;  %v12357_v4 = vld [vmem:[#allocation11_spill] sm:$0xff] }
0x13a6   :  { %9142 = vrcp.f32 %v1191_v45 }
0x13b3   :  { %v9143_v24 = vpop.eup %9142 }
0x13b4   :  { %v3859_v7 = vsub.f32 1.0, %v9143_v24 }
0x13c5   :  { %v10809_v50 = vpop.f32.mrf.mxu1 }
0x13c7   :  { %v3779_v1 = vpop.f32.mrf.mxu1 }
0x13c8   :  { %v3782_v54 = vadd.f32 %v10814_v52, %v3779_v1  ;;  %v10832_v1 = vld [vmem:[%s12250_s1 + $0x1b0] sm:$0xff] }
0x13ca   :  { %v3783_v43 = vmul.f32 %v3782_v54, %v10545_v59  ;;  %v3860_v21 = vmul.f32 %v3859_v7, %v3782_v54 }
0x13cc   :  { %v3784_v60 = vadd.f32 %v3783_v43, %v10553_v27 }
0x13ce   :  { %8639 = vmatmul.mubr.msk.f32.vlgmr.msra.gmra.mxu0 %vm65_vm0, %v3784_v60 }
0x13cf   :  { %8642 = vmatpush3.msra.mxu0 %v10823_v2  ;;  %8645 = vmatprep.mubr.msk.f32.mxu0 %vm9459_vm2, %v12319_v26 }
0x13d0   :  { %8643 = vmatprep.subr.mxu0 %v12319_v26 }
0x13d1   :  { %8644 = vmatpush3.msra.mxu0 %v10832_v1 }
0x13d2   :  { %8648 = vmatprep.subr.mxu0 %v12319_v26 }
0x145b   :  { %v3672_v54 = vpop.f32.mrf.mxu0 }
0x145c   :  { %v3673_v7 = vadd.f32 %v3672_v54, %v10722_v38 }
0x145d   :  { %v8633_v43 = vpop.f32.mrf.mxu0 }
0x145e   :  { %v3676_v45 = vadd.f32 %v3673_v7, %v12357_v4 }
0x1460   :  { %9144 = vtanh.f32 %v3676_v45 }
0x146d   :  { %v9145_v60 = vpop.eup %9144 }
0x146e   :  { %3686 = vrot.lane.b32.xlu0 %v9145_v60, %s9460_s27 }
0x148e   :  { %v3854_v12 = vpop.f32.mrf.mxu0 }
0x148f   :  { %v3855_v3 = vadd.f32 %v10842_v0, %v3854_v12 }
0x1490   :  { %v8640_v22 = vpop.f32.mrf.mxu0 }
0x1491   :  { %v3858_v53 = vmul.f32 %v9143_v24, %v3855_v3  ;;  %v8011_v22 = vmul.f32 -1.442695, %v3676_v45 }
0x1493   :  { %v10845_v17 = vadd.f32 %v3860_v21, %v3858_v53  ;;  %9146 = vpow2.f32 %v8011_v22  ;;  %v12361_v21 = vld [vmem:[#allocation5_spill] sm:$0xff] }
0x1494   :  { %v200_v24 = vmax.f32 %v12361_v21, 0.0 }
0x1495   :  { %v3862_v38 = vmul.f32 %v10845_v17, %v10545_v59  ;;  %v5349_v54 = vadd.f32 %v10845_v17, %v10580_v34  ;;  %7816 = vst.msk [vmem:[%s12254_s5 + $0x18] sm:$0xff] %vm65_vm0, %v10845_v17 }
0x1496   :  { %v208_v4 = vsub.f32 0.0, %v200_v24 }
0x1497   :  { %v10856_v7 = vmul.f32 0.5, %v5349_v54  ;;  %v10859_v12 = vadd.f32 %v3862_v38, %v10553_v27 }
0x1498   :  { %v221_v60 = vmul.f32 1.442695, %v208_v4 }
0x1499   :  { %12358 = vst [vmem:[#allocation25_spill] sm:$0xff] %v10856_v7  ;;  %12359 = vst [vmem:[#allocation11_spill] sm:$0xff] %v10859_v12  ;;  %8646 = vmatmul.mubr.msk.f32.vlgmr.msra.gmra.mxu0 %vm65_vm0, %v10859_v12  ;;  %v5333_v3 = vadd.f32 %v10859_v12, %v10590_v35 }
0x149a   :  { %7800 = vst.msk [vmem:[%s12252_s3 + $0x18] sm:$0xff] %vm65_vm0, %v10856_v7  ;;  %8649 = vmatpush3.msra.mxu0 %v10498_v48  ;;  %8652 = vmatprep.mubr.msk.f32.mxu0 %vm9459_vm2, %v12319_v26 }
0x149b   :  { %8650 = vmatprep.subr.mxu0 %v12319_v26  ;;  %v10874_v53 = vmul.f32 0.5, %v5333_v3 }
0x149c   :  { %8651 = vmatpush3.msra.mxu0 %v10646_v39 }
0x149d   :  { %12360 = vst [vmem:[#allocation46_spill] sm:$0xff] %v10874_v53  ;;  %8655 = vmatprep.subr.mxu0 %v12319_v26  ;;  %7792 = vst.msk [vmem:[%s12251_s2 + $0x18] sm:$0xff] %vm65_vm0, %v10874_v53 }
0x14a0   :  { %v9147_v27 = vpop.eup %9146 }
0x14a1   :  { %v3680_v43 = vadd.f32 1.0, %v9147_v27 }
0x14a3   :  { %9148 = vrcp.f32 %v3680_v43  ;;  %v12362_v43 = vld [vmem:[#allocation29_spill] sm:$0xff] }
0x14a4   :  { %9150 = vpow2.f32 %v221_v60 }
0x14b0   :  { %v9149_v38 = vpop.eup %9148 }
0x14b1   :  { %v9151_v59 = vpop.eup %9150  ;;  %v3684_v53 = vmul.f32 %v9149_v38, %v10660_v30 }
0x14e0   :  { %v3687_v54 = vpop.permute.xlu0 %3686 }
0x14e1   :  { %v3689_v3 = vmul.f32 %v9149_v38, %v3687_v54 }
0x14e3   :  { %3691 = vrot.lane.b32.xlu1 %v3689_v3, %s9461_s28 }
0x14e7   :  { %3963 = vrot.lane.b32.xlu1 %v9151_v59, %s9462_s29 }
0x1555   :  { %v3692_v45 = vpop.permute.xlu1 %3691 }
0x1556   :  { %v10887_v22 = vadd.f32 %v3692_v45, %v3684_v53  ;;  %v12363_v53 = vld [vmem:[#allocation21_spill] sm:$0xff] }
0x1557   :  { %v837_v3 = vmax.f32 %v12363_v53, 0.0 }
0x1558   :  { %9152 = vtanh.f32 %v10887_v22 }
0x1559   :  { %v3933_v27 = vpop.f32.mrf.mxu0  ;;  %v845_v35 = vsub.f32 0.0, %v837_v3  ;;  %v12364_v3 = vld [vmem:[#allocation14_spill] sm:$0xff] }
0x155a   :  { %v3934_v21 = vadd.f32 %v3933_v27, %v10809_v50 }
0x155b   :  { %v8647_v24 = vpop.f32.mrf.mxu0  ;;  %v855_v12 = vmul.f32 1.442695, %v845_v35 }
0x155c   :  { %v3937_v4 = vadd.f32 %v3934_v21, %v12362_v43  ;;  %v3964_v21 = vpop.permute.xlu1 %3963 }
0x155e   :  { %9154 = vtanh.f32 %v3937_v4  ;;  %v8015_v59 = vmul.f32 -1.442695, %v3937_v4 }
0x1560   :  { %9156 = vpow2.f32 %v8015_v59 }
0x1565   :  { %v9153_v60 = vpop.eup %9152 }
0x1566   :  { %3697 = vrot.lane.b32.xlu0 %v9153_v60, %s9460_s27 }
0x156b   :  { %v9155_v54 = vpop.eup %9154 }
0x156c   :  { %3947 = vrot.lane.b32.xlu1 %v9155_v54, %s9460_s27 }
0x156d   :  { %v9157_v30 = vpop.eup %9156 }
0x156e   :  { %v3941_v45 = vadd.f32 1.0, %v9157_v30 }
0x1570   :  { %9158 = vrcp.f32 %v3941_v45  ;;  %v7925_v45 = vmul.f32 -1.442695, %v12364_v3 }
0x1571   :  { %9160 = vpow2.f32 %v855_v12 }
0x157d   :  { %v9159_v43 = vpop.eup %9158 }
0x157e   :  { %v9161_v4 = vpop.eup %9160  ;;  %v3945_v35 = vmul.f32 %v9159_v43, %v10691_v61 }
0x15d8   :  { %v3698_v50 = vpop.permute.xlu0 %3697 }
0x15d9   :  { %v3700_v27 = vmul.f32 %v9149_v38, %v3698_v50 }
0x15db   :  { %v3966_v24 = vmul.f32 %v3964_v21, %v3700_v27 }
0x15dd   :  { %3968 = vrot.lane.b32.xlu0 %v3966_v24, %s9461_s28 }
0x15de   :  { %v3948_v60 = vpop.permute.xlu1 %3947 }
0x15df   :  { %v3950_v7 = vmul.f32 %v9159_v43, %v3948_v60 }
0x15e1   :  { %3952 = vrot.lane.b32.xlu0 %v3950_v7, %s9461_s28 }
0x15e5   :  { %4224 = vrot.lane.b32.xlu0 %v9161_v4, %s9462_s29 }
0x164f   :  { %v3969_v54 = vpop.permute.xlu0 %3968 }
0x1650   :  { %8016 = vmatmul.mubr.msk.f32.vlgmr.msra.gmra.mxu1 %vm1348_vm1, %v3969_v54 }
0x1651   :  { %4258 = vmatpush1.msra.mxu1 %v10674_v56  ;;  %4297 = vmatprep.mubr.f32.mxu1 %v12319_v26 }
0x1652   :  { %4259 = vmatprep.subr.mxu1 %v10682_v49 }
0x1653   :  { %v3953_v12 = vpop.permute.xlu0 %3952  ;;  %4260 = vmatpush1.msra.mxu1 %v10688_v13 }
0x1654   :  { %v10904_v38 = vadd.f32 %v3953_v12, %v3945_v35  ;;  %4261 = vmatprep.subr.mxu1 %v10696_v41 }
0x1655   :  { %4262 = vmatpush1.msra.mxu1 %v10702_v63 }
0x1656   :  { %9162 = vtanh.f32 %v10904_v38  ;;  %4263 = vmatprep.subr.mxu1 %v10709_v62 }
0x1657   :  { %4264 = vmatpush1.msra.mxu1 %v10715_v6  ;;  %v4225_v30 = vpop.permute.xlu0 %4224  ;;  %9164 = vpow2.f32 %v7925_v45 }
0x1658   :  { %4518 = vmatprep.subr.mxu1 %v10362_v46 }
0x1663   :  { %v9163_v61 = vpop.eup %9162 }
0x1664   :  { %3958 = vrot.lane.b32.xlu1 %v9163_v61, %s9460_s27  ;;  %v9165_v50 = vpop.eup %9164 }
0x1665   :  { %v577_v27 = vadd.f32 1.0, %v9165_v50 }
0x1667   :  { %9166 = vrcp.f32 %v577_v27 }
0x1674   :  { %v9167_v21 = vpop.eup %9166 }
0x1675   :  { %v4120_v4 = vsub.f32 1.0, %v9167_v21 }
0x16d6   :  { %v3959_v7 = vpop.permute.xlu1 %3958 }
0x16d7   :  { %v3961_v59 = vmul.f32 %v9159_v43, %v3959_v7 }
0x16d9   :  { %v4227_v53 = vmul.f32 %v4225_v30, %v3961_v59 }
0x16db   :  { %4229 = vrot.lane.b32.xlu1 %v4227_v53, %s9461_s28 }
0x1710   :  { %v10915_v24 = vpop.f32.mrf.mxu1 }
0x1712   :  { %v4040_v60 = vpop.f32.mrf.mxu1 }
0x1713   :  { %v4043_v46 = vadd.f32 %v10550_v32, %v4040_v60 }
0x1715   :  { %v4044_v54 = vmul.f32 %v4043_v46, %v10463_v8  ;;  %v4121_v43 = vmul.f32 %v4120_v4, %v4043_v46 }
0x1717   :  { %v4045_v35 = vadd.f32 %v4044_v54, %v10466_v33 }
0x1719   :  { %8653 = vmatmul.mubr.msk.f32.vlgmr.msra.gmra.mxu0 %vm65_vm0, %v4045_v35 }
0x171a   :  { %8656 = vmatpush3.msra.mxu0 %v10731_v10  ;;  %8659 = vmatprep.mubr.msk.f32.mxu0 %vm9459_vm2, %v12319_v26 }
0x171b   :  { %8657 = vmatprep.subr.mxu0 %v12319_v26 }
0x171c   :  { %8658 = vmatpush3.msra.mxu0 %v10740_v11 }
0x171d   :  { %8662 = vmatprep.subr.mxu0 %v12319_v26 }
0x174d   :  { %v4230_v12 = vpop.permute.xlu1 %4229 }
0x174e   :  { %8020 = vmatmul.mubr.msk.f32.vlgmr.msra.gmra.mxu1 %vm1348_vm1, %v4230_v12 }
0x174f   :  { %4519 = vmatpush1.msra.mxu1 %v10394_v9  ;;  %4558 = vmatprep.mubr.f32.mxu1 %v12319_v26 }
0x1750   :  { %4520 = vmatprep.subr.mxu1 %v10401_v44 }
0x1751   :  { %4521 = vmatpush1.msra.mxu1 %v10407_v29 }
0x1752   :  { %4522 = vmatprep.subr.mxu1 %v10413_v40 }
0x1753   :  { %4523 = vmatpush1.msra.mxu1 %v10419_v5 }
0x1754   :  { %4524 = vmatprep.subr.mxu1 %v10425_v36 }
0x1755   :  { %4525 = vmatpush1.msra.mxu1 %v10431_v28 }
0x1756   :  { %4779 = vmatprep.subr.mxu1 %v10576_v19 }
0x17d9   :  { %v4115_v61 = vpop.f32.mrf.mxu0 }
0x17da   :  { %v4116_v7 = vadd.f32 %v10757_v42, %v4115_v61  ;;  %v12366_v61 = vld [vmem:[#allocation10_spill] sm:$0xff] }
0x17db   :  { %v8654_v9 = vpop.f32.mrf.mxu0 }
0x17dc   :  { %v4119_v59 = vmul.f32 %v9167_v21, %v4116_v7 }
0x17de   :  { %v10938_v30 = vadd.f32 %v4121_v43, %v4119_v59 }
0x17e0   :  { %v4123_v44 = vmul.f32 %v10938_v30, %v10463_v8  ;;  %v5351_v29 = vadd.f32 %v10938_v30, %v10481_v15  ;;  %7810 = vst.msk [vmem:[%s12253_s4 + $0x28] sm:$0xff] %vm65_vm0, %v10938_v30 }
0x17e2   :  { %v10949_v40 = vmul.f32 0.5, %v5351_v29  ;;  %v10952_v5 = vadd.f32 %v4123_v44, %v10466_v33  ;;  %v12365_v33 = vld [vmem:[#allocation26_spill] sm:$0xff] }
0x17e3   :  { %v7962_v19 = vmul.f32 -1.442695, %v12365_v33 }
0x17e4   :  { %7802 = vst.msk [vmem:[%s12252_s3 + $0x28] sm:$0xff] %vm65_vm0, %v10949_v40  ;;  %8660 = vmatmul.mubr.msk.f32.vlgmr.msra.gmra.mxu0 %vm65_vm0, %v10952_v5  ;;  %v5335_v36 = vadd.f32 %v10952_v5, %v10491_v57 }
0x17e5   :  { %8663 = vmatpush3.msra.mxu0 %v10788_v51  ;;  %8666 = vmatprep.mubr.msk.f32.mxu0 %vm9459_vm2, %v12319_v26  ;;  %9168 = vpow2.f32 %v7962_v19 }
0x17e6   :  { %8664 = vmatprep.subr.mxu0 %v12319_v26  ;;  %v10967_v28 = vmul.f32 0.5, %v5335_v36 }
0x17e7   :  { %8665 = vmatpush3.msra.mxu0 %v10799_v37 }
0x17e8   :  { %8669 = vmatprep.subr.mxu0 %v12319_v26  ;;  %7794 = vst.msk [vmem:[%s12251_s2 + $0x28] sm:$0xff] %vm65_vm0, %v10967_v28 }
0x17f2   :  { %v9169_v53 = vpop.eup %9168 }
0x17f3   :  { %v1190_v3 = vadd.f32 1.0, %v9169_v53 }
0x17f5   :  { %9170 = vrcp.f32 %v1190_v3 }
0x1802   :  { %v9171_v45 = vpop.eup %9170 }
0x1803   :  { %v4381_v60 = vsub.f32 1.0, %v9171_v45 }
0x180e   :  { %v4299_v50 = vpop.f32.mrf.mxu1 }
0x1810   :  { %v4301_v27 = vpop.f32.mrf.mxu1 }
0x1811   :  { %v4304_v21 = vadd.f32 %v10814_v52, %v4301_v27 }
0x1813   :  { %v4305_v46 = vmul.f32 %v4304_v21, %v10376_v31  ;;  %v4382_v4 = vmul.f32 %v4381_v60, %v4304_v21 }
0x1815   :  { %v4306_v54 = vadd.f32 %v4305_v46, %v10379_v55 }
0x1817   :  { %8667 = vmatmul.mubr.msk.f32.vlgmr.msra.gmra.mxu0 %vm65_vm0, %v4306_v54 }
0x1818   :  { %8670 = vmatpush3.msra.mxu0 %v10823_v2  ;;  %8673 = vmatprep.mubr.msk.f32.mxu0 %vm9459_vm2, %v12319_v26 }
0x1819   :  { %8671 = vmatprep.subr.mxu0 %v12319_v26 }
0x181a   :  { %8672 = vmatpush3.msra.mxu0 %v10832_v1 }
0x181b   :  { %8676 = vmatprep.subr.mxu0 %v12319_v26 }
0x18a4   :  { %v4194_v43 = vpop.f32.mrf.mxu0 }
0x18a5   :  { %v4195_v35 = vadd.f32 %v4194_v43, %v10915_v24 }
0x18a6   :  { %v8661_v12 = vpop.f32.mrf.mxu0 }
0x18a7   :  { %v4198_v7 = vadd.f32 %v4195_v35, %v12366_v61 }
0x18a9   :  { %9172 = vtanh.f32 %v4198_v7  ;;  %v8019_v27 = vmul.f32 -1.442695, %v4198_v7 }
0x18ab   :  { %9174 = vpow2.f32 %v8019_v27 }
0x18b6   :  { %v9173_v9 = vpop.eup %9172 }
0x18b7   :  { %4208 = vrot.lane.b32.xlu0 %v9173_v9, %s9460_s27 }
0x18b8   :  { %v9175_v60 = vpop.eup %9174 }
0x18d7   :  { %v4376_v59 = vpop.f32.mrf.mxu0 }
0x18d8   :  { %v4377_v44 = vadd.f32 %v10842_v0, %v4376_v59 }
0x18d9   :  { %v8668_v29 = vpop.f32.mrf.mxu0 }
0x18da   :  { %v4380_v36 = vmul.f32 %v9171_v45, %v4377_v44 }
0x18dc   :  { %v10991_v33 = vadd.f32 %v4382_v4, %v4380_v36  ;;  %v4202_v4 = vadd.f32 1.0, %v9175_v60 }
0x18de   :  { %v4384_v19 = vmul.f32 %v10991_v33, %v10376_v31  ;;  %v5348_v24 = vadd.f32 %v10991_v33, %v10436_v18  ;;  %7815 = vst.msk [vmem:[%s12254_s5 + $0x10] sm:$0xff] %vm65_vm0, %v10991_v33  ;;  %9176 = vrcp.f32 %v4202_v4 }
0x18e0   :  { %v11002_v53 = vmul.f32 0.5, %v5348_v24  ;;  %v11005_v3 = vadd.f32 %v4384_v19, %v10379_v55  ;;  %v12368_v19 = vld [vmem:[#allocation30_spill] sm:$0xff] }
0x18e2   :  { %7799 = vst.msk [vmem:[%s12252_s3 + $0x10] sm:$0xff] %vm65_vm0, %v11002_v53  ;;  %8674 = vmatmul.mubr.msk.f32.vlgmr.msra.gmra.mxu0 %vm65_vm0, %v11005_v3  ;;  %v5332_v45 = vadd.f32 %v11005_v3, %v10446_v20 }
0x18e3   :  { %8677 = vmatpush3.msra.mxu0 %v10498_v48  ;;  %8680 = vmatprep.mubr.msk.f32.mxu0 %vm9459_vm2, %v12319_v26  ;;  %v12367_v48 = vld [vmem:[#allocation8_spill] sm:$0xff] }
0x18e4   :  { %8678 = vmatprep.subr.mxu0 %v12319_v26  ;;  %v11020_v55 = vmul.f32 0.5, %v5332_v45  ;;  %v187_v21 = vadd.f32 %v10653_v23, %v12367_v48 }
0x18e5   :  { %8679 = vmatpush3.msra.mxu0 %v10646_v39 }
0x18e6   :  { %8683 = vmatprep.subr.mxu0 %v12319_v26  ;;  %7791 = vst.msk [vmem:[%s12251_s2 + $0x10] sm:$0xff] %vm65_vm0, %v11020_v55  ;;  %v201_v46 = vmax.f32 %v187_v21, 0.0  ;;  %v12369_v21 = vld [vmem:[#allocation18_spill] sm:$0xff] }
0x18e7   :  { %v836_v60 = vmax.f32 %v12369_v21, 0.0 }
0x18e8   :  { %v209_v54 = vsub.f32 0.0, %v201_v46 }
0x18e9   :  { %v844_v4 = vsub.f32 0.0, %v836_v60 }
0x18ea   :  { %v223_v43 = vmul.f32 1.442695, %v209_v54 }
0x18eb   :  { %v9177_v35 = vpop.eup %9176  ;;  %v853_v54 = vmul.f32 1.442695, %v844_v4 }
0x18ec   :  { %9178 = vpow2.f32 %v223_v43  ;;  %v4206_v7 = vmul.f32 %v9177_v35, %v10887_v22 }
0x18f9   :  { %v9179_v9 = vpop.eup %9178 }
0x1929   :  { %v4209_v12 = vpop.permute.xlu0 %4208 }
0x192a   :  { %v4211_v61 = vmul.f32 %v9177_v35, %v4209_v12 }
0x192c   :  { %4213 = vrot.lane.b32.xlu1 %v4211_v61, %s9461_s28 }
0x1930   :  { %4485 = vrot.lane.b32.xlu1 %v9179_v9, %s9462_s29 }
0x199e   :  { %v4214_v59 = vpop.permute.xlu1 %4213 }
0x199f   :  { %v11034_v44 = vadd.f32 %v4214_v59, %v4206_v7 }
0x19a1   :  { %9180 = vtanh.f32 %v11034_v44 }
0x19a2   :  { %v4455_v23 = vpop.f32.mrf.mxu0  ;;  %v4486_v12 = vpop.permute.xlu1 %4485 }
0x19a3   :  { %v4456_v29 = vadd.f32 %v4455_v23, %v4299_v50 }
0x19a4   :  { %v8675_v36 = vpop.f32.mrf.mxu0 }
0x19a5   :  { %v4459_v24 = vadd.f32 %v4456_v29, %v12368_v19 }
0x19a7   :  { %9182 = vtanh.f32 %v4459_v24  ;;  %v8023_v48 = vmul.f32 -1.442695, %v4459_v24 }
0x19a9   :  { %9184 = vpow2.f32 %v8023_v48 }
0x19ae   :  { %v9181_v45 = vpop.eup %9180 }
0x19af   :  { %4219 = vrot.lane.b32.xlu0 %v9181_v45, %s9460_s27 }
0x19b4   :  { %v9183_v27 = vpop.eup %9182 }
0x19b5   :  { %4469 = vrot.lane.b32.xlu1 %v9183_v27, %s9460_s27 }
0x19b6   :  { %v9185_v22 = vpop.eup %9184 }
0x19b7   :  { %v4463_v46 = vadd.f32 1.0, %v9185_v22 }
0x19b9   :  { %9186 = vrcp.f32 %v4463_v46 }
0x19ba   :  { %9188 = vpow2.f32 %v853_v54 }
0x19c6   :  { %v9187_v9 = vpop.eup %9186 }
0x19c7   :  { %v9189_v23 = vpop.eup %9188 }
0x1a21   :  { %v4220_v50 = vpop.permute.xlu0 %4219 }
0x1a22   :  { %v4222_v43 = vmul.f32 %v9177_v35, %v4220_v50  ;;  %v4467_v35 = vmul.f32 %v9187_v9, %v10904_v38  ;;  %v9394_v50 = vld [vmem:[%s12250_s1 + $0x30] sm:$0xff] }
0x1a24   :  { %v4488_v61 = vmul.f32 %v4486_v12, %v4222_v43  ;;  %v9397_v43 = vld [vmem:[%s12250_s1 + $0x18] sm:$0xff]  ;;  %v9398_v12 = vld [vmem:[%s12250_s1 + $0x10] sm:$0xff] }
0x1a26   :  { %4490 = vrot.lane.b32.xlu0 %v4488_v61, %s9461_s28  ;;  %v9399_v61 = vld [vmem:[%s12250_s1 + $0x8] sm:$0xff] }
0x1a27   :  { %v4470_v7 = vpop.permute.xlu1 %4469 }
0x1a28   :  { %v4472_v59 = vmul.f32 %v9187_v9, %v4470_v7 }
0x1a2a   :  { %4474 = vrot.lane.b32.xlu0 %v4472_v59, %s9461_s28 }
0x1a2e   :  { %4746 = vrot.lane.b32.xlu0 %v9189_v23, %s9462_s29 }
0x1a98   :  { %v4491_v29 = vpop.permute.xlu0 %4490 }
0x1a99   :  { %8024 = vmatmul.mubr.msk.f32.vlgmr.msra.gmra.mxu1 %vm1348_vm1, %v4491_v29 }
0x1a9a   :  { %4780 = vmatpush1.msra.mxu1 %v10674_v56  ;;  %4819 = vmatprep.mubr.f32.mxu1 %v12319_v26  ;;  %v9393_v56 = vld [vmem:[%s12250_s1 + $0x38] sm:$0xff] }
0x1a9b   :  { %4781 = vmatprep.subr.mxu1 %v10682_v49 }
0x1a9c   :  { %v4475_v36 = vpop.permute.xlu0 %4474  ;;  %4782 = vmatpush1.msra.mxu1 %v10688_v13 }
0x1a9d   :  { %v11050_v19 = vadd.f32 %v4475_v36, %v4467_v35  ;;  %4783 = vmatprep.subr.mxu1 %v10696_v41 }
0x1a9e   :  { %4784 = vmatpush1.msra.mxu1 %v10702_v63  ;;  %v12370_v63 = vld [vmem:[#allocation17_spill] sm:$0xff] }
0x1a9f   :  { %9190 = vtanh.f32 %v11050_v19  ;;  %4785 = vmatprep.subr.mxu1 %v10709_v62  ;;  %v7926_v45 = vmul.f32 -1.442695, %v12370_v63 }
0x1aa0   :  { %4786 = vmatpush1.msra.mxu1 %v10715_v6  ;;  %v4747_v24 = vpop.permute.xlu0 %4746 }
0x1aa1   :  { %5040 = vmatprep.subr.mxu1 %v9393_v56  ;;  %9192 = vpow2.f32 %v7926_v45 }
0x1aac   :  { %v9191_v49 = vpop.eup %9190 }
0x1aad   :  { %4480 = vrot.lane.b32.xlu1 %v9191_v49, %s9460_s27 }
0x1aae   :  { %v9193_v62 = vpop.eup %9192 }
0x1aaf   :  { %v578_v27 = vadd.f32 1.0, %v9193_v62 }
0x1ab1   :  { %9194 = vrcp.f32 %v578_v27 }
0x1abe   :  { %v9195_v6 = vpop.eup %9194 }
0x1abf   :  { %v4642_v60 = vsub.f32 1.0, %v9195_v6 }
0x1b1f   :  { %v4481_v13 = vpop.permute.xlu1 %4480 }
0x1b20   :  { %v4483_v38 = vmul.f32 %v9187_v9, %v4481_v13  ;;  %v9400_v9 = vld [vmem:[%s12250_s1] sm:$0xff] }
0x1b22   :  { %v4749_v41 = vmul.f32 %v4747_v24, %v4483_v38  ;;  %v12371_v38 = vld [vmem:[#allocation23_spill] sm:$0xff] }
0x1b23   :  { %v7961_v24 = vmul.f32 -1.442695, %v12371_v38 }
0x1b24   :  { %4751 = vrot.lane.b32.xlu1 %v4749_v41, %s9461_s28 }
0x1b25   :  { %9196 = vpow2.f32 %v7961_v24 }
0x1b32   :  { %v9197_v41 = vpop.eup %9196 }
0x1b33   :  { %v1189_v63 = vadd.f32 1.0, %v9197_v41  ;;  %v12376_v41 = vld [vmem:[#allocation7_spill] sm:$0xff] }
0x1b35   :  { %9198 = vrcp.f32 %v1189_v63  ;;  %v202_v63 = vmax.f32 %v12376_v41, 0.0 }
0x1b42   :  { %v9199_v45 = vpop.eup %9198 }
0x1b59   :  { %v11063_v48 = vpop.f32.mrf.mxu1 }
0x1b5b   :  { %v4562_v22 = vpop.f32.mrf.mxu1 }
0x1b5c   :  { %v4565_v21 = vadd.f32 %v10550_v32, %v4562_v22  ;;  %v4903_v22 = vsub.f32 1.0, %v9199_v45 }
0x1b5e   :  { %v4566_v46 = vmul.f32 %v4565_v21, %v10292_v16  ;;  %v4643_v4 = vmul.f32 %v4642_v60, %v4565_v21 }
0x1b60   :  { %v4567_v54 = vadd.f32 %v4566_v46, %v10295_v14  ;;  %v12372_v46 = vld [vmem:[#allocation41_spill] sm:$0xff] }
0x1b62   :  { %8681 = vmatmul.mubr.msk.f32.vlgmr.msra.gmra.mxu0 %vm65_vm0, %v4567_v54 }
0x1b63   :  { %8684 = vmatpush3.msra.mxu0 %v10731_v10  ;;  %8687 = vmatprep.mubr.msk.f32.mxu0 %vm9459_vm2, %v12319_v26  ;;  %v9395_v10 = vld [vmem:[%s12250_s1 + $0x28] sm:$0xff] }
0x1b64   :  { %8685 = vmatprep.subr.mxu0 %v12319_v26 }
0x1b65   :  { %8686 = vmatpush3.msra.mxu0 %v10740_v11  ;;  %v9396_v11 = vld [vmem:[%s12250_s1 + $0x20] sm:$0xff] }
0x1b66   :  { %8690 = vmatprep.subr.mxu0 %v12319_v26 }
0x1b96   :  { %v4752_v32 = vpop.permute.xlu1 %4751 }
0x1b97   :  { %8028 = vmatmul.mubr.msk.f32.vlgmr.msra.gmra.mxu1 %vm1348_vm1, %v4752_v32 }
0x1b98   :  { %5041 = vmatpush1.msra.mxu1 %v9394_v50  ;;  %5080 = vmatprep.mubr.f32.mxu1 %v12319_v26  ;;  %v12373_v50 = vld [vmem:[#allocation12_spill] sm:$0xff] }
0x1b99   :  { %5042 = vmatprep.subr.mxu1 %v9395_v10 }
0x1b9a   :  { %5043 = vmatpush1.msra.mxu1 %v9396_v11 }
0x1b9b   :  { %5044 = vmatprep.subr.mxu1 %v9397_v43 }
0x1b9c   :  { %5045 = vmatpush1.msra.mxu1 %v9398_v12 }
0x1b9d   :  { %5046 = vmatprep.subr.mxu1 %v9399_v61 }
0x1b9e   :  { %5047 = vmatpush1.msra.mxu1 %v9400_v9 }
0x1b9f   :  { %8711 = vmatprep.subr.mxu1 %v12319_v26 }
0x1c22   :  { %v4637_v7 = vpop.f32.mrf.mxu0 }
0x1c23   :  { %v4638_v59 = vadd.f32 %v10757_v42, %v4637_v7  ;;  %v12374_v7 = vld [vmem:[#allocation42_spill] sm:$0xff] }
0x1c24   :  { %v8682_v23 = vpop.f32.mrf.mxu0 }
0x1c25   :  { %v4641_v29 = vmul.f32 %v9195_v6, %v4638_v59  ;;  %v12375_v23 = vld [vmem:[#allocation43_spill] sm:$0xff] }
0x1c27   :  { %v11100_v35 = vadd.f32 %v4643_v4, %v4641_v29 }
0x1c29   :  { %v4645_v36 = vmul.f32 %v11100_v35, %v10292_v16  ;;  %v5352_v56 = vadd.f32 %v11100_v35, %v10310_v25  ;;  %7811 = vst.msk [vmem:[%s12253_s4 + $0x30] sm:$0xff] %vm65_vm0, %v11100_v35  ;;  %v12394_v16 = vld [vmem:[#allocation22_spill] sm:$0xff] }
0x1c2b   :  { %v11111_v49 = vmul.f32 0.5, %v5352_v56  ;;  %v11114_v42 = vadd.f32 %v4645_v36, %v10295_v14  ;;  %v9401_v36 = vld [vmem:[%s12250_s1 + $0xf0] sm:$0xff] }
0x1c2d   :  { %7803 = vst.msk [vmem:[%s12252_s3 + $0x30] sm:$0xff] %vm65_vm0, %v11111_v49  ;;  %8688 = vmatmul.mubr.msk.f32.vlgmr.msra.gmra.mxu0 %vm65_vm0, %v11114_v42  ;;  %v5336_v13 = vadd.f32 %v11114_v42, %v10320_v47 }
0x1c2e   :  { %8691 = vmatpush3.msra.mxu0 %v10788_v51  ;;  %8694 = vmatprep.mubr.msk.f32.mxu0 %vm9459_vm2, %v12319_v26 }
0x1c2f   :  { %8692 = vmatprep.subr.mxu0 %v12319_v26  ;;  %v11129_v14 = vmul.f32 0.5, %v5336_v13  ;;  %v9402_v13 = vld [vmem:[%s12250_s1 + $0x1a8] sm:$0xff] }
0x1c30   :  { %8693 = vmatpush3.msra.mxu0 %v10799_v37 }
0x1c31   :  { %8697 = vmatprep.subr.mxu0 %v12319_v26  ;;  %7795 = vst.msk [vmem:[%s12251_s2 + $0x30] sm:$0xff] %vm65_vm0, %v11129_v14 }
0x1c57   :  { %v4821_v62 = vpop.f32.mrf.mxu1 }
0x1c59   :  { %v4823_v27 = vpop.f32.mrf.mxu1 }
0x1c5a   :  { %v4826_v6 = vadd.f32 %v10814_v52, %v4823_v27  ;;  %v210_v27 = vsub.f32 0.0, %v202_v63 }
0x1c5c   :  { %v4827_v21 = vmul.f32 %v4826_v6, %v10238_v58  ;;  %v4904_v60 = vmul.f32 %v4903_v22, %v4826_v6 }
0x1c5e   :  { %v4828_v4 = vadd.f32 %v4827_v21, %v12372_v46 }
0x1c60   :  { %8695 = vmatmul.mubr.msk.f32.vlgmr.msra.gmra.mxu0 %vm65_vm0, %v4828_v4 }
0x1c61   :  { %8698 = vmatpush3.msra.mxu0 %v10823_v2  ;;  %8701 = vmatprep.mubr.msk.f32.mxu0 %vm9459_vm2, %v12319_v26 }
0x1c62   :  { %8699 = vmatprep.subr.mxu0 %v12319_v26 }
0x1c63   :  { %8700 = vmatpush3.msra.mxu0 %v10832_v1 }
0x1c64   :  { %8704 = vmatprep.subr.mxu0 %v12319_v26 }
0x1ced   :  { %v4716_v52 = vpop.f32.mrf.mxu0 }
0x1cee   :  { %v4717_v54 = vadd.f32 %v4716_v52, %v11063_v48 }
0x1cef   :  { %v8689_v32 = vpop.f32.mrf.mxu0 }
0x1cf0   :  { %v4720_v10 = vadd.f32 %v4717_v54, %v12373_v50 }
0x1cf2   :  { %9200 = vtanh.f32 %v4720_v10  ;;  %v8027_v38 = vmul.f32 -1.442695, %v4720_v10  ;;  %v12377_v10 = vld [vmem:[#allocation28_spill] sm:$0xff] }
0x1cf4   :  { %9202 = vpow2.f32 %v8027_v38 }
0x1cff   :  { %v9201_v11 = vpop.eup %9200 }
0x1d00   :  { %4730 = vrot.lane.b32.xlu0 %v9201_v11, %s9460_s27 }
0x1d01   :  { %v9203_v24 = vpop.eup %9202 }
0x1d20   :  { %v4898_v2 = vpop.f32.mrf.mxu0 }
0x1d21   :  { %v4899_v43 = vadd.f32 %v10842_v0, %v4898_v2 }
0x1d22   :  { %v8696_v12 = vpop.f32.mrf.mxu0 }
0x1d23   :  { %v4902_v61 = vmul.f32 %v9199_v45, %v4899_v43  ;;  %v4724_v45 = vadd.f32 1.0, %v9203_v24  ;;  %v7888_v24 = vld [vmem:[%s12249_s0 + $0x100] sm:$0xff] }
0x1d24   :  { %v5370_v63 = vsub.f32 1.0, %v7888_v24 }
0x1d25   :  { %v11153_v9 = vadd.f32 %v4904_v60, %v4902_v61  ;;  %9204 = vrcp.f32 %v4724_v45 }
0x1d27   :  { %v4906_v1 = vmul.f32 %v11153_v9, %v10238_v58  ;;  %v5347_v48 = vadd.f32 %v11153_v9, %v12374_v7  ;;  %7814 = vst.msk [vmem:[%s12254_s5 + $0x8] sm:$0xff] %vm65_vm0, %v11153_v9 }
0x1d29   :  { %v11164_v59 = vmul.f32 0.5, %v5347_v48  ;;  %v11167_v0 = vadd.f32 %v4906_v1, %v12372_v46  ;;  %v12378_v1 = vld [vmem:[#allocation19_spill] sm:$0xff] }
0x1d2b   :  { %7798 = vst.msk [vmem:[%s12252_s3 + $0x8] sm:$0xff] %vm65_vm0, %v11164_v59  ;;  %8702 = vmatmul.mubr.msk.f32.vlgmr.msra.gmra.mxu0 %vm65_vm0, %v11167_v0  ;;  %v5331_v29 = vadd.f32 %v11167_v0, %v12375_v23 }
0x1d2c   :  { %8705 = vmatpush3.msra.mxu0 %v9401_v36  ;;  %8708 = vmatprep.mubr.msk.f32.mxu0 %vm9459_vm2, %v12319_v26 }
0x1d2d   :  { %8706 = vmatprep.subr.mxu0 %v12319_v26  ;;  %v11184_v56 = vmul.f32 0.5, %v5331_v29 }
0x1d2e   :  { %8707 = vmatpush3.msra.mxu0 %v10646_v39  ;;  %v225_v39 = vmul.f32 1.442695, %v210_v27 }
0x1d2f   :  { %5202 = vmatprep.subr.mxu0 %v9402_v13  ;;  %7790 = vst.msk [vmem:[%s12251_s2 + $0x8] sm:$0xff] %vm65_vm0, %v11184_v56 }
0x1d30   :  { %9206 = vpow2.f32 %v225_v39  ;;  %v7890_v39 = vld [vmem:[%s12249_s0 + $0x110] sm:$0xff] }
0x1d32   :  { %v9205_v6 = vpop.eup %9204 }
0x1d33   :  { %v4728_v46 = vmul.f32 %v9205_v6, %v11034_v44  ;;  %v835_v44 = vmax.f32 %v12378_v1, 0.0 }
0x1d35   :  { %v843_v29 = vsub.f32 0.0, %v835_v44 }
0x1d37   :  { %v851_v36 = vmul.f32 1.442695, %v843_v29  ;;  %v11241_v29 = vld [vmem:[%s12249_s0 + $0x70] sm:$0xff] }
0x1d3d   :  { %v9207_v60 = vpop.eup %9206 }
0x1d72   :  { %v4731_v22 = vpop.permute.xlu0 %4730 }
0x1d73   :  { %v4733_v21 = vmul.f32 %v9205_v6, %v4731_v22 }
0x1d75   :  { %4735 = vrot.lane.b32.xlu1 %v4733_v21, %s9461_s28 }
0x1d79   :  { %5007 = vrot.lane.b32.xlu1 %v9207_v60, %s9462_s29  ;;  %v5378_v60 = vmul.f32 0.5, %v5370_v63 }
0x1de7   :  { %v4736_v4 = vpop.permute.xlu1 %4735 }
0x1de8   :  { %v4738_v52 = vadd.f32 %v4736_v4, %v4728_v46  ;;  %v5372_v46 = vsub.f32 1.0, %v7890_v39  ;;  %v7892_v4 = vld [vmem:[%s12249_s0 + $0x120] sm:$0xff] }
0x1dea   :  { %9208 = vtanh.f32 %v4738_v52 }
0x1deb   :  { %v4977_v54 = vpop.f32.mrf.mxu0  ;;  %v5008_v38 = vpop.permute.xlu1 %5007 }
0x1dec   :  { %v4978_v32 = vadd.f32 %v4977_v54, %v4821_v62 }
0x1ded   :  { %v8703_v50 = vpop.f32.mrf.mxu0 }
0x1dee   :  { %v4981_v11 = vadd.f32 %v4978_v32, %v12377_v10  ;;  %v11224_v32 = vld [vmem:[%s12249_s0 + $0x50] sm:$0xff]  ;;  %v5380_v10 = vmul.f32 0.5, %v5372_v46 }
0x1def   :  { %v5364_v50 = vmul.f32 %v11224_v32, %v7890_v39  ;;  %v7889_v39 = vld [vmem:[%s12249_s0 + $0x108] sm:$0xff] }
0x1df0   :  { %9210 = vtanh.f32 %v4981_v11  ;;  %v8031_v12 = vmul.f32 -1.442695, %v4981_v11  ;;  %v5374_v11 = vsub.f32 1.0, %v7892_v4 }
0x1df2   :  { %9212 = vpow2.f32 %v8031_v12  ;;  %v11234_v12 = vld [vmem:[%s12249_s0 + $0x60] sm:$0xff]  ;;  %v5382_v1 = vmul.f32 0.5, %v5374_v11 }
0x1df7   :  { %v9209_v2 = vpop.eup %9208 }
0x1df8   :  { %4741 = vrot.lane.b32.xlu0 %v9209_v2, %s9460_s27  ;;  %v7894_v2 = vld [vmem:[%s12249_s0 + $0x130] sm:$0xff] }
0x1df9   :  { %v5376_v44 = vsub.f32 1.0, %v7894_v2 }
0x1dfd   :  { %v9211_v43 = vpop.eup %9210 }
0x1dfe   :  { %4991 = vrot.lane.b32.xlu1 %v9211_v43, %s9460_s27  ;;  %v5388_v43 = vadd.f32 %v5380_v10, %v5364_v50 }
0x1dff   :  { %v9213_v61 = vpop.eup %9212 }
0x1e00   :  { %v4985_v48 = vadd.f32 1.0, %v9213_v61  ;;  %v5366_v61 = vmul.f32 %v11234_v12, %v7892_v4 }
0x1e02   :  { %9214 = vrcp.f32 %v4985_v48  ;;  %v5390_v48 = vadd.f32 %v5382_v1, %v5366_v61  ;;  %v7895_v61 = vld [vmem:[%s12249_s0 + $0x138] sm:$0xff] }
0x1e03   :  { %9216 = vpow2.f32 %v851_v36  ;;  %v5368_v36 = vmul.f32 %v11241_v29, %v7894_v2 }
0x1e0f   :  { %v9215_v45 = vpop.eup %9214 }
0x1e10   :  { %v9217_v52 = vpop.eup %9216 }
0x1e6a   :  { %v4742_v62 = vpop.permute.xlu0 %4741 }
0x1e6b   :  { %v4744_v13 = vmul.f32 %v9205_v6, %v4742_v62  ;;  %v11214_v6 = vld [vmem:[%s12249_s0 + $0x40] sm:$0xff]  ;;  %v5384_v62 = vmul.f32 0.5, %v5376_v44  ;;  %v11283_v44 = vld [vmem:[%s12249_s0 + $0x68] sm:$0xff] }
0x1e6c   :  { %v5362_v21 = vmul.f32 %v11214_v6, %v7888_v24  ;;  %v4989_v24 = vmul.f32 %v9215_v45, %v11050_v19 }
0x1e6d   :  { %v5010_v41 = vmul.f32 %v5008_v38, %v4744_v13  ;;  %v5392_v13 = vadd.f32 %v5384_v62, %v5368_v36  ;;  %v5377_v62 = vsub.f32 1.0, %v7895_v61 }
0x1e6e   :  { %v5386_v54 = vadd.f32 %v5378_v60, %v5362_v21 }
0x1e6f   :  { %5012 = vrot.lane.b32.xlu0 %v5010_v41, %s9461_s28 }
0x1e70   :  { %v4992_v27 = vpop.permute.xlu1 %4991 }
0x1e71   :  { %v4994_v22 = vmul.f32 %v9215_v45, %v4992_v27 }
0x1e73   :  { %4996 = vrot.lane.b32.xlu0 %v4994_v22, %s9461_s28  ;;  %v7891_v22 = vld [vmem:[%s12249_s0 + $0x118] sm:$0xff] }
0x1e74   :  { %v5373_v4 = vsub.f32 1.0, %v7891_v22 }
0x1e76   :  { %v5381_v2 = vmul.f32 0.5, %v5373_v4 }
0x1e77   :  { %5169 = vrot.lane.b32.xlu0 %v9217_v52, %s9462_s29 }
0x1e7b   :  { %5402 = vrot.lane.b32.xlu0 %v5386_v54, %s9463_s9  ;;  %v7893_v54 = vld [vmem:[%s12249_s0 + $0x128] sm:$0xff] }
0x1e7f   :  { %5406 = vrot.lane.b32.xlu0 %v5388_v43, %s9463_s9  ;;  %v5375_v43 = vsub.f32 1.0, %v7893_v54 }
0x1e81   :  { %v5383_v36 = vmul.f32 0.5, %v5375_v43  ;;  %v9412_v43 = vld [vmem:[%s12250_s1 + $0x1a0] sm:$0xff] }
0x1e83   :  { %5410 = vrot.lane.b32.xlu0 %v5390_v48, %s9463_s9  ;;  %v5367_v48 = vmul.f32 %v11283_v44, %v7893_v54  ;;  %v12380_v54 = vld [vmem:[#allocation36_spill] sm:$0xff] }
0x1e87   :  { %5414 = vrot.lane.b32.xlu0 %v5392_v13, %s9463_s9  ;;  %v5391_v13 = vadd.f32 %v5383_v36, %v5367_v48  ;;  %v9415_v48 = vld [vmem:[%s12250_s1 + $0x188] sm:$0xff]  ;;  %v9416_v36 = vld [vmem:[%s12250_s1 + $0x180] sm:$0xff] }
0x1ee1   :  { %v5013_v38 = vpop.permute.xlu0 %5012 }
0x1ee2   :  { %8032 = vmatmul.mubr.msk.f32.vlgmr.msra.gmra.mxu1 %vm1348_vm1, %v5013_v38  ;;  %v11290_v38 = vld [vmem:[%s12249_s0 + $0x78] sm:$0xff] }
0x1ee3   :  { %8712 = vmatpush3.msra.mxu1 %v10788_v51  ;;  %8715 = vmatprep.mubr.msk.f32.mxu1 %vm9459_vm2, %v12319_v26  ;;  %v5371_v51 = vsub.f32 1.0, %v7889_v39 }
0x1ee4   :  { %8713 = vmatprep.subr.mxu1 %v12319_v26 }
0x1ee5   :  { %v4997_v41 = vpop.permute.xlu0 %4996  ;;  %8714 = vmatpush3.msra.mxu1 %v10799_v37  ;;  %v11263_v37 = vld [vmem:[%s12249_s0 + $0x48] sm:$0xff]  ;;  %v5379_v46 = vmul.f32 0.5, %v5371_v51 }
0x1ee6   :  { %v4999_v63 = vadd.f32 %v4997_v41, %v4989_v24  ;;  %v5363_v60 = vmul.f32 %v11263_v37, %v7889_v39  ;;  %v5369_v24 = vmul.f32 %v11290_v38, %v7895_v61  ;;  %v5385_v41 = vmul.f32 0.5, %v5377_v62  ;;  %v9413_v61 = vld [vmem:[%s12250_s1 + $0x198] sm:$0xff] }
0x1ee7   :  { %v9417_v62 = vld [vmem:[%s12250_s1 + $0x178] sm:$0xff] }
0x1ee8   :  { %9218 = vtanh.f32 %v4999_v63  ;;  %v5387_v10 = vadd.f32 %v5379_v46, %v5363_v60  ;;  %v5393_v63 = vadd.f32 %v5385_v41, %v5369_v24  ;;  %v9411_v46 = vld [vmem:[%s12250_s1 + $0x130] ss:$0 sm:$0xff] }
0x1ee9   :  { %v5170_v52 = vpop.permute.xlu0 %5169 }
0x1ef5   :  { %v9219_v27 = vpop.eup %9218 }
0x1ef6   :  { %5002 = vrot.lane.b32.xlu1 %v9219_v27, %s9460_s27  ;;  %v12379_v27 = vld [vmem:[#allocation16_spill] sm:$0xff] }
0x1ef7   :  { %v7927_v39 = vmul.f32 -1.442695, %v12379_v27 }
0x1ef9   :  { %9220 = vpow2.f32 %v7927_v39 }
0x1f06   :  { %v9221_v51 = vpop.eup %9220 }
0x1f68   :  { %v5003_v19 = vpop.permute.xlu1 %5002 }
0x1f69   :  { %v5005_v21 = vmul.f32 %v9215_v45, %v5003_v19  ;;  %v11273_v45 = vld [vmem:[%s12249_s0 + $0x58] sm:$0xff] }
0x1f6a   :  { %v5365_v11 = vmul.f32 %v11273_v45, %v7891_v22  ;;  %v579_v22 = vadd.f32 1.0, %v9221_v51 }
0x1f6b   :  { %v5172_v50 = vmul.f32 %v5170_v52, %v5005_v21 }
0x1f6c   :  { %v5389_v1 = vadd.f32 %v5381_v2, %v5365_v11  ;;  %9222 = vrcp.f32 %v579_v22  ;;  %v12381_v11 = vld [vmem:[#allocation38_spill] sm:$0xff] }
0x1f6d   :  { %5174 = vrot.lane.b32.xlu1 %v5172_v50, %s9461_s28 }
0x1f71   :  { %5404 = vrot.lane.b32.xlu1 %v5387_v10, %s9463_s9 }
0x1f75   :  { %5408 = vrot.lane.b32.xlu1 %v5389_v1, %s9463_s9  ;;  %v9414_v1 = vld [vmem:[%s12250_s1 + $0x190] sm:$0xff] }
0x1f79   :  { %5412 = vrot.lane.b32.xlu1 %v5391_v13, %s9463_s9  ;;  %v9223_v19 = vpop.eup %9222  ;;  %v9418_v13 = vld [vmem:[%s12250_s1 + $0x170] sm:$0xff] }
0x1f7a   :  { %v5163_v52 = vsub.f32 1.0, %v9223_v19 }
0x1f7d   :  { %5416 = vrot.lane.b32.xlu1 %v5393_v63, %s9463_s9  ;;  %v9419_v63 = vld [vmem:[%s12250_s1 + $0x140] ss:$0 sm:$0xff] }
0x1fa2   :  { %v5082_v21 = vpop.f32.mrf.mxu1 }
0x1fa4   :  { %v5083_v60 = vpop.f32.mrf.mxu1 }
0x1fa5   :  { %v5086_v4 = vadd.f32 %v9411_v46, %v5083_v60  ;;  %v12382_v60 = vld [vmem:[#allocation39_spill] sm:$0xff] }
0x1fa7   :  { %v5087_v50 = vmul.f32 %v5086_v4, %v12380_v54  ;;  %v5164_v10 = vmul.f32 %v5163_v52, %v5086_v4 }
0x1fa9   :  { %v5088_v2 = vadd.f32 %v5087_v50, %v12381_v11 }
0x1fab   :  { %8709 = vmatmul.mubr.msk.f32.vlgmr.msra.gmra.mxu0 %vm65_vm0, %v5088_v2 }
0x1fac   :  { %5203 = vmatpush1.msra.mxu0 %v9412_v43  ;;  %5242 = vmatprep.mubr.f32.mxu0 %v12319_v26 }
0x1fad   :  { %5204 = vmatprep.subr.mxu0 %v9413_v61 }
0x1fae   :  { %5205 = vmatpush1.msra.mxu0 %v9414_v1 }
0x1faf   :  { %5206 = vmatprep.subr.mxu0 %v9415_v48 }
0x1fb0   :  { %5207 = vmatpush1.msra.mxu0 %v9416_v36 }
0x1fb1   :  { %5208 = vmatprep.subr.mxu0 %v9417_v62  ;;  %v9420_v62 = vld [vmem:[%s12250_s1 + $0x2a0] ss:$0 sm:$0xff] }
0x1fb2   :  { %5209 = vmatpush1.msra.mxu0 %v9418_v13 }
0x1fdf   :  { %v5175_v24 = vpop.permute.xlu1 %5174 }
0x1fe0   :  { %8034 = vmatmul.mubr.msk.f32.vlgmr.msra.gmra.mxu0 %vm1348_vm1, %v5175_v24 }
0x206b   :  { %v5158_v41 = vpop.f32.mrf.mxu0 }
0x206c   :  { %v5159_v27 = vadd.f32 %v9419_v63, %v5158_v41  ;;  %v12385_v41 = vld [vmem:[#allocation33_spill] sm:$0xff] }
0x206d   :  { %v8710_v39 = vpop.f32.mrf.mxu0 }
0x206e   :  { %v5162_v51 = vmul.f32 %v9223_v19, %v5159_v27  ;;  %v12383_v19 = vld [vmem:[#allocation40_spill] sm:$0xff]  ;;  %v12386_v39 = vld [vmem:[#allocation34_spill] sm:$0xff] }
0x2070   :  { %v11328_v22 = vadd.f32 %v5164_v10, %v5162_v51 }
0x2072   :  { %7812 = vst.msk [vmem:[%s12253_s4 + $0x38] sm:$0xff] %vm65_vm0, %v11328_v22  ;;  %v5166_v21 = vmul.f32 %v11328_v22, %v12380_v54  ;;  %v5353_v46 = vadd.f32 %v11328_v22, %v12382_v60  ;;  %v12393_v54 = vld [vmem:[#allocation11_spill] sm:$0xff] }
0x2073   :  { %v7729_v8 = vsub.f32 %v12394_v16, %v12393_v54  ;;  %v9424_v16 = vld [vmem:[%s12250_s1 + $0x2b0] ss:$0 sm:$0xff] }
0x2074   :  { %v11340_v4 = vadd.f32 %v5166_v21, %v12381_v11  ;;  %v11342_v52 = vmul.f32 0.5, %v5353_v46  ;;  %v12384_v11 = vld [vmem:[#allocation24_spill] sm:$0xff]  ;;  %v5437_v21 = vld [vmem:[%s12250_s1 + $0x310] sm:$0xff] }
0x2075   :  { %v7960_v2 = vmul.f32 -1.442695, %v12384_v11  ;;  %v5571_v46 = vld [vmem:[%s12250_s1 + $0x3b0] sm:$0xff]  ;;  %8718 = vmatprep.subr.mxu1 %v5437_v21  ;;  %v5570_v11 = vld [vmem:[%s12250_s1 + $0x3a0] sm:$0xff] }
0x2076   :  { %v5337_v50 = vadd.f32 %v11340_v4, %v12383_v19  ;;  %7804 = vst.msk [vmem:[%s12252_s3 + $0x38] sm:$0xff] %vm65_vm0, %v11342_v52  ;;  %8738 = vmatprep.subr.mxu0 %v5571_v46 }
0x2077   :  { %9224 = vpow2.f32 %v7960_v2  ;;  %8739 = vmatpush3.msra.mxu0 %v5571_v46  ;;  %v5435_v2 = vld [vmem:[%s12250_s1 + $0x2f0] sm:$0xff]  ;;  %v12391_v46 = vld [vmem:[#allocation20_spill] sm:$0xff] }
0x2078   :  { %v11351_v10 = vmul.f32 0.5, %v5337_v50  ;;  %v5436_v50 = vld [vmem:[%s12250_s1 + $0x300] sm:$0xff]  ;;  %8740 = vmatprep.subr.mxu0 %v5570_v11 }
0x2079   :  { %8741 = vmatpush3.msra.mxu0 %v5570_v11  ;;  %v7686_v11 = vsub.f32 %v10580_v34, %v10845_v17  ;;  %v9423_v17 = vld [vmem:[%s12249_s0 + $0x28] sm:$0xff] }
0x207a   :  { %7796 = vst.msk [vmem:[%s12251_s2 + $0x38] sm:$0xff] %vm65_vm0, %v11351_v10  ;;  %v7611_v34 = vsub.f32 %v9423_v17, %v10949_v40  ;;  %v12395_v17 = vld [vmem:[#allocation35_spill] sm:$0xff] }
0x2084   :  { %v9225_v43 = vpop.eup %9224 }
0x2085   :  { %v1188_v61 = vadd.f32 1.0, %v9225_v43  ;;  %v5569_v43 = vld [vmem:[%s12250_s1 + $0x390] sm:$0xff] }
0x2086   :  { %8742 = vmatprep.subr.mxu0 %v5569_v43 }
0x2087   :  { %9226 = vrcp.f32 %v1188_v61  ;;  %v5434_v61 = vld [vmem:[%s12250_s1 + $0x2e0] sm:$0xff]  ;;  %8743 = vmatpush3.msra.mxu0 %v5569_v43  ;;  %v9422_v43 = vld [vmem:[%s12249_s0 + $0x18] sm:$0xff] }
0x2094   :  { %v9227_v1 = vpop.eup %9226 }
0x2095   :  { %v5325_v24 = vsub.f32 1.0, %v9227_v1 }
0x20a0   :  { %v5244_v48 = vpop.f32.mrf.mxu0 }
0x20a1   :  { %v5568_v48 = vld [vmem:[%s12250_s1 + $0x380] sm:$0xff] }
0x20a2   :  { %v5245_v36 = vpop.f32.mrf.mxu0  ;;  %8744 = vmatprep.subr.mxu0 %v5568_v48 }
0x20a3   :  { %v5248_v13 = vadd.f32 %v9420_v62, %v5245_v36  ;;  %8745 = vmatpush3.msra.mxu0 %v5568_v48  ;;  %v9421_v36 = vld [vmem:[%s12249_s0 + $0x20] sm:$0xff]  ;;  %v12387_v62 = vld [vmem:[#allocation32_spill] sm:$0xff] }
0x20a4   :  { %8769 = vmatprep.subr.mxu0 %v12319_v26 }
0x20a5   :  { %v5249_v63 = vmul.f32 %v5248_v13, %v12385_v41  ;;  %v11363_v27 = vmul.f32 %v5325_v24, %v5248_v13  ;;  %v7610_v13 = vsub.f32 %v9421_v36, %v12387_v62  ;;  %v12388_v24 = vld [vmem:[#allocation27_spill] sm:$0xff]  ;;  %v7688_v62 = vsub.f32 %v10938_v30, %v10481_v15 }
0x20a6   :  { %v7685_v15 = vsub.f32 %v10436_v18, %v10991_v33  ;;  %v7684_v30 = vsub.f32 %v12374_v7, %v11153_v9  ;;  %v7619_v18 = vmul.f32 %v7611_v34, %v7611_v34  ;;  %v9426_v7 = vld [vmem:[%s12249_s0 + $0x8] sm:$0xff] }
0x20a7   :  { %v5250_v51 = vadd.f32 %v5249_v63, %v12386_v39  ;;  %v12389_v63 = vld [vmem:[#allocation6_spill] sm:$0xff]  ;;  %v7696_v40 = vmul.f32 %v7688_v62, %v7688_v62 }
0x20a8   :  { %v7693_v62 = vmul.f32 %v7685_v15, %v7685_v15 }
0x20a9   :  { %8716 = vmatmul.mubr.msk.f32.vlgmr.msra.gmra.mxu1 %vm65_vm0, %v5250_v51  ;;  %v7687_v51 = vsub.f32 %v12389_v63, %v12388_v24  ;;  %v7694_v63 = vmul.f32 %v7686_v11, %v7686_v11 }
0x20aa   :  { %8719 = vmatpush3.msra.mxu1 %v5437_v21  ;;  %v12390_v21 = vld [vmem:[#allocation9_spill] sm:$0xff] }
0x20ab   :  { %8720 = vmatprep.subr.mxu1 %v5436_v50  ;;  %v7695_v24 = vmul.f32 %v7687_v51, %v7687_v51  ;;  %v7704_v9 = vsel %vm65_vm0, %v7694_v63, 0.0  ;;  %v7731_v63 = vsub.f32 %v10952_v5, %v10491_v57 }
0x20ac   :  { %8721 = vmatpush3.msra.mxu1 %v5436_v50  ;;  %v7730_v50 = vsub.f32 %v12391_v46, %v12390_v21 }
0x20ad   :  { %8722 = vmatprep.subr.mxu1 %v5435_v2 }
0x20ae   :  { %8723 = vmatpush3.msra.mxu1 %v5435_v2  ;;  %v7618_v2 = vmul.f32 %v7610_v13, %v7610_v13  ;;  %v7738_v36 = vand.u32 2147483647, %v7730_v50  ;;  %v7737_v50 = vand.u32 2147483647, %v7729_v8 }
0x20af   :  { %8724 = vmatprep.subr.mxu1 %v5434_v61 }
0x20b0   :  { %8725 = vmatpush3.msra.mxu1 %v5434_v61  ;;  %v12392_v61 = vld [vmem:[#allocation25_spill] sm:$0xff]  ;;  %v7626_v13 = vmul.f32 %v11234_v12, %v7618_v2  ;;  %v11427_v12 = vsel %vm65_vm0, %v7695_v24, 0.0  ;;  %v9425_v2 = vld [vmem:[%s12249_s0 + $0x10] sm:$0xff]  ;;  %v7692_v24 = vmul.f32 %v7684_v30, %v7684_v30 }
0x20b1   :  { %8758 = vmatprep.subr.mxu1 %v12319_v26  ;;  %v7609_v48 = vsub.f32 %v9422_v43, %v12392_v61  ;;  %v11424_v43 = vsel %vm65_vm0, %v7738_v36, 0.0  ;;  %v7608_v8 = vsub.f32 %v9425_v2, %v11002_v53  ;;  %v5403_v61 = vpop.permute.xlu0 %5402  ;;  %v11446_v53 = vsel %vm65_vm0, %v7737_v50, 0.0 }
0x20b2   :  { %v11434_v33 = vsel %vm65_vm0, %v7626_v13, 0.0 }
0x20b3   :  { %v7617_v46 = vmul.f32 %v7609_v48, %v7609_v48  ;;  %v7616_v13 = vmul.f32 %v7608_v8, %v7608_v8 }
0x20b5   :  { %v11443_v36 = vmul.f32 %v11273_v45, %v7617_v46  ;;  %v11465_v46 = vmul.f32 %v11283_v44, %v7619_v18  ;;  %v7702_v44 = vsel %vm65_vm0, %v7693_v62, 0.0 }
0x20b7   :  { %v7635_v5 = vsel %vm65_vm0, %v11443_v36, 0.0 }
0x2169   :  { %v5320_v21 = vpop.f32.mrf.mxu1 }
0x216a   :  { %v5321_v54 = vadd.f32 %v9424_v16, %v5320_v21  ;;  %v7727_v21 = vsub.f32 %v12375_v23, %v11167_v0  ;;  %v7728_v0 = vsub.f32 %v10446_v20, %v11005_v3  ;;  %v5405_v23 = vpop.permute.xlu1 %5404  ;;  %v7689_v16 = vsub.f32 %v11100_v35, %v10310_v25  ;;  %v9427_v20 = vld [vmem:[%s12249_s0 + $0x30] sm:$0xff]  ;;  %v9428_v25 = vld [vmem:[%s12249_s0] sm:$0xff] }
0x216b   :  { %v8717_v51 = vpop.f32.mrf.mxu1  ;;  %v7612_v3 = vsub.f32 %v9427_v20, %v11111_v49  ;;  %v7624_v49 = vmul.f32 %v11224_v32, %v7616_v13 }
0x216c   :  { %v5324_v11 = vmul.f32 %v9227_v1, %v5321_v54  ;;  %v7607_v1 = vsub.f32 %v9426_v7, %v11164_v59  ;;  %v7700_v51 = vsel %vm65_vm0, %v7692_v24, 0.0  ;;  %v7736_v7 = vand.u32 2147483647, %v7728_v0 }
0x216e   :  { %v5327_v48 = vadd.f32 %v11363_v27, %v5324_v11  ;;  %v11460_v27 = vsel %vm65_vm0, %v7696_v40, 0.0  ;;  %v7615_v54 = vmul.f32 %v7607_v1, %v7607_v1  ;;  %v7735_v11 = vand.u32 2147483647, %v7727_v21  ;;  %v5407_v40 = vpop.permute.xlu0 %5406 }
0x216f   :  { %v7697_v1 = vmul.f32 %v7689_v16, %v7689_v16  ;;  %v7745_v0 = vsel %vm65_vm0, %v7736_v7, 0.0 }
0x2170   :  { %v5346_v34 = vadd.f32 %v5327_v48, %v12395_v17  ;;  %v7683_v59 = vsub.f32 %v12395_v17, %v5327_v48  ;;  %7813 = vst.msk [vmem:[%s12254_s5] sm:$0xff] %vm65_vm0, %v5327_v48  ;;  %v5328_v45 = vmul.f32 %v5327_v48, %v12385_v41  ;;  %v7623_v62 = vmul.f32 %v11263_v37, %v7615_v54  ;;  %v11503_v37 = vld [vmem:[%s12250_s1 + $0x350] sm:$0xff]  ;;  %s7845_s5 = sshll.u32 %s12256_s7, 4  ;;  %s7846_s5 = int_to_ptr.vmem [resolvable:$true] %s7845_s5 }
0x2171   :  { %v5428_v54 = vsel %vm65_vm0, %v11020_v55, %v5407_v40  ;;  %s9444_s28 = scalar_lea.vmem %s7846_s5, 16  ;;  %p9449_p1 = scmp.lt.s32.totalorder %s7846_s5, %s7846_s5 }
0x2172   :  { %v5354_v50 = vmul.f32 0.5, %v5346_v34  ;;  %v7691_v15 = vmul.f32 %v7683_v59, %v7683_v59  ;;  %v5329_v30 = vadd.f32 %v5328_v45, %v12386_v39  ;;  %v12396_v39 = vld [vmem:[#allocation37_spill] sm:$0xff]  ;;  %v5409_v34 = vpop.permute.xlu1 %5408  ;;  %v11488_v59 = vmul.f32 %v7612_v3, %v7612_v3  ;;  %v12397_v3 = vld [vmem:[#allocation46_spill] sm:$0xff]  ;;  %p9445_p0 = scmp.ne.s32.totalorder %s7846_s5, %s9444_s28  ;;  %p9450_p2 = scmp.lt.s32.totalorder %s9444_s28, %s9444_s28 }
0x2173   :  { %v7732_v45 = vsub.f32 %v11114_v42, %v10320_v47  ;;  %v7690_v47 = vsub.f32 %v11328_v22, %v12382_v60  ;;  %v5411_v42 = vpop.permute.xlu0 %5410  ;;  %v11519_v22 = vld [vmem:[%s12250_s1 + $0x340] sm:$0xff]  ;;  %v9429_v60 = vld [vmem:[%s12249_s0 + $0x38] sm:$0xff] }
0x2174   :  { %v7606_v35 = vsub.f32 %v9428_v25, %v5354_v50  ;;  %v7699_v2 = vsel %vm65_vm0, %v7691_v15, 0.0  ;;  %7797 = vst.msk [vmem:[%s12252_s3] sm:$0xff] %vm65_vm0, %v5354_v50  ;;  %v5330_v8 = vadd.f32 %v5329_v30, %v12396_v39  ;;  %v7726_v18 = vsub.f32 %v12396_v39, %v5329_v30  ;;  %v12398_v39 = vld [vmem:[#allocation15_spill] sm:$0xff]  ;;  %p9451_p3 = por %p9450_p2, %p9449_p1 }
0x2175   :  { %v7701_v48 = vadd.f32 %v7700_v51, %v7699_v2  ;;  %v7743_v50 = vsel %vm65_vm0, %v7735_v11, 0.0  ;;  %v7613_v55 = vsub.f32 %v9429_v60, %v11342_v52  ;;  %v7739_v11 = vand.u32 2147483647, %v7731_v63 }
0x2176   :  { %v7614_v24 = vmul.f32 %v7606_v35, %v7606_v35  ;;  %v5338_v21 = vmul.f32 0.5, %v5330_v8  ;;  %v7734_v17 = vand.u32 2147483647, %v7726_v18  ;;  %v7633_v52 = vsel %vm65_vm0, %v7624_v49, 0.0  ;;  %v5413_v2 = vpop.permute.xlu1 %5412  ;;  %p9452_p4 = pnand %p9451_p3, %p9445_p0 }
0x2177   :  { %v7703_v15 = vadd.f32 %v7702_v44, %v7701_v48  ;;  %v5429_v44 = vsel %vm65_vm0, %v12397_v3, %v5409_v34  ;;  %v7733_v25 = vsub.f32 %v11340_v4, %v12383_v19  ;;  %v7698_v35 = vmul.f32 %v7690_v47, %v7690_v47  ;;  %v11558_v4 = vld [vmem:[%s12250_s1 + $0x330] sm:$0xff]  ;;  %v11563_v19 = vld [vmem:[%s12250_s1 + $0x3e0] sm:$0xff]  ;;  %v5415_v18 = vpop.permute.xlu0 %5414 }
0x2178   :  { %v7622_v30 = vmul.f32 %v11214_v6, %v7614_v24  ;;  %v5426_v32 = vsel %vm65_vm0, %v5338_v21, %v5403_v61  ;;  %v7742_v13 = vsel %vm65_vm0, %v7734_v17, 0.0  ;;  %7789 = vst.msk [vmem:[%s12251_s2] sm:$0xff] %vm65_vm0, %v5338_v21  ;;  %v5427_v6 = vsel %vm65_vm0, %v11184_v56, %v5405_v23  ;;  %v11524_v56 = vld [vmem:[%s12250_s1 + $0x3f0] sm:$0xff] }
0x2179   :  { %8726 = vmatprep.mubr.msk.f32.mxu1 %vm1348_vm1, %v5426_v32  ;;  %8746 = vmatprep.mubr.msk.f32.mxu0 %vm1348_vm1, %v5426_v32  ;;  %v7744_v61 = vadd.f32 %v7743_v50, %v7742_v13  ;;  %v7705_v16 = vadd.f32 %v7704_v9, %v7703_v15  ;;  %v7631_v23 = vsel %vm65_vm0, %v7623_v62, 0.0  ;;  %v5430_v8 = vsel %vm65_vm0, %v12398_v39, %v5411_v42 }
0x217a   :  { %8727 = vmatmul.mubr.msk.f32.vlgmr.msra.gmra.mxu1 %vm1348_vm1, %v5427_v6  ;;  %8747 = vmatmul.mubr.msk.f32.vlgmr.msra.gmra.mxu0 %vm1348_vm1, %v5427_v6  ;;  %v7630_v9 = vsel %vm65_vm0, %v7622_v30, 0.0  ;;  %v7621_v36 = vmul.f32 %v7613_v55, %v7613_v55  ;;  %v7751_v48 = vsel %vm65_vm0, %v7739_v11, 0.0  ;;  %v5431_v24 = vsel %vm65_vm0, %v10967_v28, %v5413_v2  ;;  %v5417_v50 = vpop.permute.xlu1 %5416 }
0x217b   :  { %8759 = vmatpush3.msra.mxu1 %v11503_v37  ;;  %8729 = vmatprep.mubr.msk.f32.mxu1 %vm1348_vm1, %v5428_v54  ;;  %v7632_v51 = vadd.f32 %v7631_v23, %v7630_v9  ;;  %v7746_v40 = vadd.f32 %v7745_v0, %v7744_v61  ;;  %v7707_v20 = vadd.f32 %v11427_v12, %v7705_v16  ;;  %v7741_v21 = vand.u32 2147483647, %v7733_v25  ;;  %v5438_v0 = vld [vmem:[%s12250_s1 + $0x360] ss:$0 sm:$0xff] }
0x217c   :  { %8749 = vmatprep.mubr.msk.f32.mxu0 %vm1348_vm1, %v5428_v54  ;;  %8760 = vmatprep.subr.mxu1 %v12319_v26  ;;  %v7712_v17 = vsel %vm65_vm0, %v7698_v35, 0.0  ;;  %v5432_v28 = vsel %vm65_vm0, %v11129_v14, %v5415_v18  ;;  %v7639_v14 = vsel %vm65_vm0, %v11465_v46, 0.0  ;;  %v11613_v46 = vld [vmem:[%s12250_s1 + $0x3c0] sm:$0xff] }
0x217d   :  { %8761 = vmatpush3.msra.mxu1 %v11519_v22  ;;  %8770 = vmatpush3.msra.mxu0 %v11524_v56  ;;  %v7634_v57 = vadd.f32 %v7633_v52, %v7632_v51  ;;  %v7748_v12 = vadd.f32 %v11446_v53, %v7746_v40  ;;  %v7709_v63 = vadd.f32 %v11460_v27, %v7707_v20  ;;  %v7740_v53 = vand.u32 2147483647, %v7732_v45  ;;  %v5572_v16 = vld [vmem:[%s12250_s1 + $0x400] ss:$0 sm:$0xff] }
0x217e   :  { %8730 = vmatmul.mubr.msk.f32.gmra.mxu1 %vm1348_vm1, %v5429_v44  ;;  %8750 = vmatmul.mubr.msk.f32.gmra.mxu0 %vm1348_vm1, %v5429_v44  ;;  %v7710_v27 = vsel %vm65_vm0, %v7697_v1, 0.0  ;;  %v7628_v1 = vmul.f32 %v11241_v29, %v11488_v59  ;;  %v11589_v29 = vld [vmem:[%s12250_s1 + $0x320] sm:$0xff]  ;;  %v7629_v59 = vmul.f32 %v11290_v38, %v7621_v36  ;;  %v7755_v47 = vsel %vm65_vm0, %v7741_v21, 0.0 }
0x217f   :  { %8732 = vmatprep.mubr.msk.f32.mxu1 %vm1348_vm1, %v5430_v8  ;;  %8752 = vmatprep.mubr.msk.f32.mxu0 %vm1348_vm1, %v5430_v8  ;;  %v7636_v49 = vadd.f32 %v7635_v5, %v7634_v57  ;;  %v7750_v7 = vadd.f32 %v11424_v43, %v7748_v12  ;;  %v7711_v62 = vadd.f32 %v7710_v27, %v7709_v63  ;;  %v7753_v15 = vsel %vm65_vm0, %v7740_v53, 0.0 }
0x2180   :  { %8762 = vmatprep.subr.mxu1 %v12319_v26  ;;  %8771 = vmatprep.subr.mxu0 %v12319_v26  ;;  %v7641_v13 = vsel %vm65_vm0, %v7628_v1, 0.0  ;;  %v5433_v38 = vsel %vm65_vm0, %v11351_v10, %v5417_v50  ;;  %v7643_v61 = vsel %vm65_vm0, %v7629_v59, 0.0 }
0x2181   :  { %8763 = vmatpush3.msra.mxu1 %v11558_v4  ;;  %8772 = vmatpush3.msra.mxu0 %v11563_v19  ;;  %v7638_v43 = vadd.f32 %v11434_v33, %v7636_v49  ;;  %v7752_v34 = vadd.f32 %v7751_v48, %v7750_v7  ;;  %v11580_v45 = vadd.f32 %v7712_v17, %v7711_v62  ;;  %v11594_v33 = vld [vmem:[%s12250_s1 + $0x3d0] sm:$0xff] }
0x2182   :  { %8733 = vmatmul.mubr.msk.f32.gmra.mxu1 %vm1348_vm1, %v5431_v24  ;;  %8753 = vmatmul.mubr.msk.f32.gmra.mxu0 %vm1348_vm1, %v5431_v24  ;;  %v11685_v62 = vld [vmem:[%s12250_s1 + $0x370] ss:$0 sm:$0xff] }
0x2183   :  { %8735 = vmatprep.mubr.msk.f32.mxu1 %vm1348_vm1, %v5432_v28  ;;  %8755 = vmatprep.mubr.msk.f32.mxu0 %vm1348_vm1, %v5432_v28  ;;  %v7640_v30 = vadd.f32 %v7639_v14, %v7638_v43  ;;  %v7754_v32 = vadd.f32 %v7753_v15, %v7752_v34  ;;  %v11690_v24 = vld [vmem:[%s12250_s1 + $0x410] ss:$0 sm:$0xff] }
0x2184   :  { %8764 = vmatprep.subr.mxu1 %v12319_v26  ;;  %8773 = vmatprep.subr.mxu0 %v12319_v26 }
0x2185   :  { %8765 = vmatpush3.msra.mxu1 %v11589_v29  ;;  %8774 = vmatpush3.msra.mxu0 %v11594_v33  ;;  %v7642_v42 = vadd.f32 %v7641_v13, %v7640_v30  ;;  %v11615_v6 = vadd.f32 %v7755_v47, %v7754_v32 }
0x2186   :  { %8736 = vmatmul.mubr.msk.f32.gmra.mxu1 %vm1348_vm1, %v5433_v38  ;;  %8756 = vmatmul.mubr.msk.f32.gmra.mxu0 %vm1348_vm1, %v5433_v38 }
0x2187   :  { %8775 = vmatprep.subr.mxu0 %v12319_v26  ;;  %8766 = vmatprep.mubr.msk.f32.mxu1 %vm9459_vm2, %v12319_v26  ;;  %v11623_v10 = vadd.f32 %v7643_v61, %v7642_v42 }
0x2188   :  { %8776 = vmatpush3.msra.mxu0 %v11613_v46  ;;  %8777 = vmatprep.mubr.msk.f32.mxu0 %vm9459_vm2, %v12319_v26 }
0x2189   :  { %8780 = vmatprep.subr.mxu1 %v12319_v26  ;;  %8791 = vmatprep.subr.mxu0 %v12319_v26 }
0x218a   :  { %8767 = vmatmul.mubr.f32.vlgmr.msra.gmra.mxu1 %v12319_v26  ;;  %8778 = vmatmul.mubr.f32.vlgmr.msra.gmra.mxu0 %v12319_v26 }
0x218b   :  { %8781 = vmatpush3.msra.mxu1 %v11503_v37  ;;  %8792 = vmatpush3.msra.mxu0 %v11524_v56 }
0x218c   :  { %8782 = vmatprep.subr.mxu1 %v12319_v26  ;;  %8793 = vmatprep.subr.mxu0 %v12319_v26 }
0x218d   :  { %8783 = vmatpush3.msra.mxu1 %v11519_v22  ;;  %8794 = vmatpush3.msra.mxu0 %v11563_v19 }
0x218e   :  { %8784 = vmatprep.subr.mxu1 %v12319_v26  ;;  %8795 = vmatprep.subr.mxu0 %v12319_v26 }
0x218f   :  { %8785 = vmatpush3.msra.mxu1 %v11558_v4  ;;  %8796 = vmatpush3.msra.mxu0 %v11594_v33 }
0x2190   :  { %8786 = vmatprep.subr.mxu1 %v12319_v26  ;;  %8797 = vmatprep.subr.mxu0 %v12319_v26 }
0x2191   :  { %8798 = vmatpush3.msra.mxu0 %v11613_v46  ;;  %8799 = vmatprep.mubr.msk.f32.mxu0 %vm9459_vm2, %v12319_v26 }
0x2192   :  { %8787 = vmatpush3.msra.mxu1 %v11589_v29  ;;  %8788 = vmatprep.mubr.msk.f32.mxu1 %vm9459_vm2, %v12319_v26 }
0x2193   :  { %8802 = vmatprep.subr.mxu1 %v12319_v26  ;;  %8813 = vmatprep.subr.mxu0 %v12319_v26 }
0x223a   :  { %v8728_v54 = vpop.f32.mrf.mxu1  ;;  %v8748_v60 = vpop.f32.mrf.mxu0 }
0x223b   :  { %v11658_v55 = vadd.f32 %v8728_v54, %v5438_v0  ;;  %v11660_v9 = vadd.f32 %v8748_v60, %v5572_v16 }
0x223c   :  { %v5529_v23 = vpop.f32.mrf.mxu1  ;;  %v5639_v51 = vpop.f32.mrf.mxu0 }
0x223d   :  { %v11662_v11 = vadd.f32 %v5639_v51, %v5572_v16  ;;  %v5530_v14 = vadd.f32 %v5529_v23, %v5438_v0 }
0x223e   :  { %v8731_v40 = vpop.f32.mrf.mxu1  ;;  %v8751_v20 = vpop.f32.mrf.mxu0 }
0x223f   :  { %v11664_v3 = vadd.f32 %v8731_v40, %v5438_v0  ;;  %v11666_v44 = vadd.f32 %v8751_v20, %v5572_v16 }
0x2240   :  { %v5539_v52 = vpop.f32.mrf.mxu1  ;;  %v5649_v25 = vpop.f32.mrf.mxu0 }
0x2241   :  { %v11668_v35 = vadd.f32 %v5539_v52, %v5438_v0  ;;  %v11670_v2 = vadd.f32 %v5649_v25, %v5572_v16 }
0x2242   :  { %v8734_v57 = vpop.f32.mrf.mxu1  ;;  %v8754_v5 = vpop.f32.mrf.mxu0 }
0x2243   :  { %v11672_v12 = vadd.f32 %v8734_v57, %v5438_v0  ;;  %v11674_v63 = vadd.f32 %v8754_v5, %v5572_v16 }
0x2244   :  { %v5549_v39 = vpop.f32.mrf.mxu1  ;;  %v5659_v8 = vpop.f32.mrf.mxu0 }
0x2245   :  { %v11676_v36 = vadd.f32 %v5549_v39, %v5438_v0  ;;  %v11678_v53 = vadd.f32 %v5659_v8, %v5572_v16 }
0x2246   :  { %v8737_v27 = vpop.f32.mrf.mxu1  ;;  %v8757_v18 = vpop.f32.mrf.mxu0 }
0x2247   :  { %v11680_v49 = vadd.f32 %v8737_v27, %v5438_v0  ;;  %v5675_v15 = vadd.f32 %v8757_v18, %v5572_v16 }
0x2248   :  { %v5559_v7 = vpop.f32.mrf.mxu1  ;;  %v5669_v48 = vpop.f32.mrf.mxu0 }
0x2249   :  { %v11692_v1 = vadd.f32 %v5559_v7, %v5438_v0  ;;  %v11694_v21 = vadd.f32 %v5669_v48, %v5572_v16 }
0x224a   :  { %v5757_v17 = vpop.f32.mrf.mxu1  ;;  %v5853_v43 = vpop.f32.mrf.mxu0 }
0x224b   :  { %v5758_v34 = vadd.f32 %v5757_v17, %v11685_v62  ;;  %v5854_v28 = vadd.f32 %v5853_v43, %v11690_v24 }
0x224c   :  { %v8768_v50 = vpop.f32.mrf.mxu1  ;;  %v8779_v59 = vpop.f32.mrf.mxu0 }
0x224d   :  { %5865 = vrot.lane.b32.xlu1 %v5854_v28, %s9460_s27  ;;  %5769 = vrot.lane.b32.xlu0 %v5758_v34, %s9460_s27  ;;  %v5761_v30 = vadd.f32 %v5758_v34, %v5530_v14  ;;  %v5857_v32 = vadd.f32 %v5854_v28, %v5675_v15 }
0x224f   :  { %v8052_v13 = vmul.f32 -1.442695, %v5761_v30  ;;  %v8053_v47 = vmul.f32 -1.442695, %v5857_v32 }
0x2251   :  { %9228 = vpow2.f32 %v8052_v13 }
0x2252   :  { %9230 = vpow2.f32 %v8053_v47 }
0x225e   :  { %v9229_v38 = vpop.eup %9228 }
0x225f   :  { %v9231_v42 = vpop.eup %9230  ;;  %v5765_v61 = vadd.f32 1.0, %v9229_v38 }
0x2260   :  { %v5861_v54 = vadd.f32 1.0, %v9231_v42 }
0x2261   :  { %9232 = vrcp.f32 %v5765_v61 }
0x2262   :  { %9234 = vrcp.f32 %v5861_v54 }
0x226e   :  { %v9233_v60 = vpop.eup %9232 }
0x226f   :  { %v9235_v51 = vpop.eup %9234  ;;  %v5779_v18 = vsub.f32 1.0, %v9233_v60  ;;  %v5785_v43 = vmul.f32 0.0, %v9233_v60 }
0x2270   :  { %v5875_v8 = vsub.f32 1.0, %v9235_v51  ;;  %v5881_v7 = vmul.f32 0.0, %v9235_v51 }
0x22bf   :  { %v5866_v40 = vpop.permute.xlu1 %5865  ;;  %v5770_v20 = vpop.permute.xlu0 %5769 }
0x22c0   :  { %v5868_v52 = vmul.f32 %v9235_v51, %v5866_v40  ;;  %v5772_v25 = vmul.f32 %v9233_v60, %v5770_v20 }
0x22c2   :  { %5870 = vrot.lane.b32.xlu1 %v5868_v52, %s9460_s27  ;;  %5774 = vrot.lane.b32.xlu0 %v5772_v25, %s9460_s27 }
0x2334   :  { %v5871_v0 = vpop.permute.xlu1 %5870  ;;  %v5775_v16 = vpop.permute.xlu0 %5774 }
0x2335   :  { %v5873_v23 = vadd.f32 %v5871_v0, %v5675_v15  ;;  %v5777_v57 = vadd.f32 %v5775_v16, %v5530_v14 }
0x2337   :  { %9236 = vtanh.f32 %v5873_v23 }
0x2338   :  { %9238 = vtanh.f32 %v5777_v57 }
0x2344   :  { %v9237_v5 = vpop.eup %9236 }
0x2345   :  { %v9239_v39 = vpop.eup %9238  ;;  %5877 = vrot.lane.b32.xlu1 %v9237_v5, %s9462_s29 }
0x2346   :  { %5781 = vrot.lane.b32.xlu0 %v9239_v39, %s9462_s29 }
0x23b7   :  { %v5878_v27 = vpop.permute.xlu1 %5877 }
0x23b8   :  { %v5880_v48 = vmul.f32 %v5878_v27, %v5875_v8  ;;  %v5782_v17 = vpop.permute.xlu0 %5781 }
0x23b9   :  { %v5784_v34 = vmul.f32 %v5782_v17, %v5779_v18 }
0x23ba   :  { %v11704_v28 = vadd.f32 %v5881_v7, %v5880_v48 }
0x23bb   :  { %v11706_v50 = vadd.f32 %v5785_v43, %v5784_v34 }
0x23bc   :  { %5985 = vrot.lane.b32.xlu1 %v11704_v28, %s9462_s29 }
0x23bd   :  { %5884 = vrot.lane.b32.xlu0 %v11706_v50, %s9462_s29 }
0x242e   :  { %v5986_v59 = vpop.permute.xlu1 %5985 }
0x242f   :  { %v11712_v14 = vpop.permute.xlu0 %5884  ;;  %8800 = vmatmul.mubr.msk.f32.vlgmr.msra.gmra.mxu0 %vm1348_vm1, %v5986_v59 }
0x2430   :  { %8789 = vmatmul.mubr.msk.f32.vlgmr.msra.gmra.mxu1 %vm1348_vm1, %v11712_v14  ;;  %8814 = vmatpush3.msra.mxu0 %v11524_v56 }
0x2431   :  { %8803 = vmatpush3.msra.mxu1 %v11503_v37  ;;  %8815 = vmatprep.subr.mxu0 %v12319_v26 }
0x2432   :  { %8804 = vmatprep.subr.mxu1 %v12319_v26  ;;  %8816 = vmatpush3.msra.mxu0 %v11563_v19 }
0x2433   :  { %8805 = vmatpush3.msra.mxu1 %v11519_v22  ;;  %8817 = vmatprep.subr.mxu0 %v12319_v26 }
0x2434   :  { %8806 = vmatprep.subr.mxu1 %v12319_v26  ;;  %8818 = vmatpush3.msra.mxu0 %v11594_v33 }
0x2435   :  { %8807 = vmatpush3.msra.mxu1 %v11558_v4  ;;  %8819 = vmatprep.subr.mxu0 %v12319_v26 }
0x2436   :  { %8808 = vmatprep.subr.mxu1 %v12319_v26  ;;  %8820 = vmatpush3.msra.mxu0 %v11613_v46 }
0x2437   :  { %8821 = vmatprep.mubr.msk.f32.mxu0 %vm9459_vm2, %v12319_v26  ;;  %8809 = vmatpush3.msra.mxu1 %v11589_v29 }
0x2438   :  { %8810 = vmatprep.mubr.msk.f32.mxu1 %vm9459_vm2, %v12319_v26  ;;  %8824 = vmatprep.subr.mxu1 %v12319_v26 }
0x2439   :  { %8835 = vmatprep.subr.mxu0 %v12319_v26 }
0x24ef   :  { %v6055_v15 = vpop.f32.mrf.mxu0 }
0x24f0   :  { %v5954_v30 = vpop.f32.mrf.mxu1  ;;  %v6056_v32 = vadd.f32 %v6055_v15, %v11690_v24 }
0x24f1   :  { %v5955_v13 = vadd.f32 %v5954_v30, %v11685_v62  ;;  %v8801_v47 = vpop.f32.mrf.mxu0 }
0x24f2   :  { %v8790_v38 = vpop.f32.mrf.mxu1  ;;  %6067 = vrot.lane.b32.xlu1 %v6056_v32, %s9460_s27  ;;  %v6059_v42 = vadd.f32 %v6056_v32, %v11694_v21 }
0x24f3   :  { %5966 = vrot.lane.b32.xlu0 %v5955_v13, %s9460_s27  ;;  %v5958_v61 = vadd.f32 %v5955_v13, %v11658_v55 }
0x24f4   :  { %v8057_v54 = vmul.f32 -1.442695, %v6059_v42 }
0x24f5   :  { %v8055_v60 = vmul.f32 -1.442695, %v5958_v61 }
0x24f6   :  { %9240 = vpow2.f32 %v8057_v54 }
0x24f7   :  { %9242 = vpow2.f32 %v8055_v60 }
0x2503   :  { %v9241_v51 = vpop.eup %9240 }
0x2504   :  { %v9243_v40 = vpop.eup %9242  ;;  %v6063_v20 = vadd.f32 1.0, %v9241_v51 }
0x2505   :  { %v5962_v52 = vadd.f32 1.0, %v9243_v40 }
0x2506   :  { %9244 = vrcp.f32 %v6063_v20 }
0x2507   :  { %9246 = vrcp.f32 %v5962_v52 }
0x2513   :  { %v9245_v25 = vpop.eup %9244 }
0x2514   :  { %v9247_v16 = vpop.eup %9246  ;;  %v6077_v17 = vsub.f32 1.0, %v9245_v25  ;;  %v6083_v59 = vmul.f32 %v9245_v25, %v11704_v28 }
0x2515   :  { %v5976_v34 = vsub.f32 1.0, %v9247_v16 }
0x2564   :  { %v6068_v0 = vpop.permute.xlu1 %6067 }
0x2565   :  { %v6070_v23 = vmul.f32 %v9245_v25, %v6068_v0  ;;  %v5967_v57 = vpop.permute.xlu0 %5966 }
0x2566   :  { %v5969_v5 = vmul.f32 %v9247_v16, %v5967_v57 }
0x2567   :  { %6072 = vrot.lane.b32.xlu1 %v6070_v23, %s9460_s27 }
0x2568   :  { %5971 = vrot.lane.b32.xlu0 %v5969_v5, %s9460_s27 }
0x25d9   :  { %v6073_v39 = vpop.permute.xlu1 %6072 }
0x25da   :  { %v6075_v8 = vadd.f32 %v6073_v39, %v11694_v21  ;;  %v5972_v27 = vpop.permute.xlu0 %5971  ;;  %v5982_v21 = vmul.f32 %v9247_v16, %v11706_v50 }
0x25db   :  { %v5974_v18 = vadd.f32 %v5972_v27, %v11658_v55 }
0x25dc   :  { %9248 = vtanh.f32 %v6075_v8 }
0x25dd   :  { %9250 = vtanh.f32 %v5974_v18 }
0x25e9   :  { %v9249_v7 = vpop.eup %9248 }
0x25ea   :  { %v9251_v48 = vpop.eup %9250  ;;  %6079 = vrot.lane.b32.xlu1 %v9249_v7, %s9462_s29 }
0x25eb   :  { %5978 = vrot.lane.b32.xlu0 %v9251_v48, %s9462_s29 }
0x265c   :  { %v6080_v43 = vpop.permute.xlu1 %6079 }
0x265d   :  { %v6082_v15 = vmul.f32 %v6080_v43, %v6077_v17  ;;  %v5979_v30 = vpop.permute.xlu0 %5978 }
0x265e   :  { %v5981_v32 = vmul.f32 %v5979_v30, %v5976_v34 }
0x265f   :  { %v11751_v13 = vadd.f32 %v6083_v59, %v6082_v15 }
0x2660   :  { %v11753_v55 = vadd.f32 %v5982_v21, %v5981_v32 }
0x2661   :  { %6187 = vrot.lane.b32.xlu1 %v11751_v13, %s9462_s29 }
0x2662   :  { %6086 = vrot.lane.b32.xlu0 %v11753_v55, %s9462_s29 }
0x26d3   :  { %v6188_v47 = vpop.permute.xlu1 %6187 }
0x26d4   :  { %v11759_v38 = vpop.permute.xlu0 %6086  ;;  %8822 = vmatmul.mubr.msk.f32.vlgmr.msra.gmra.mxu0 %vm1348_vm1, %v6188_v47 }
0x26d5   :  { %8811 = vmatmul.mubr.msk.f32.vlgmr.msra.gmra.mxu1 %vm1348_vm1, %v11759_v38  ;;  %8836 = vmatpush3.msra.mxu0 %v11524_v56 }
0x26d6   :  { %8825 = vmatpush3.msra.mxu1 %v11503_v37  ;;  %8837 = vmatprep.subr.mxu0 %v12319_v26 }
0x26d7   :  { %8826 = vmatprep.subr.mxu1 %v12319_v26  ;;  %8838 = vmatpush3.msra.mxu0 %v11563_v19 }
0x26d8   :  { %8827 = vmatpush3.msra.mxu1 %v11519_v22  ;;  %8839 = vmatprep.subr.mxu0 %v12319_v26 }
0x26d9   :  { %8828 = vmatprep.subr.mxu1 %v12319_v26  ;;  %8840 = vmatpush3.msra.mxu0 %v11594_v33 }
0x26da   :  { %8829 = vmatpush3.msra.mxu1 %v11558_v4  ;;  %8841 = vmatprep.subr.mxu0 %v12319_v26 }
0x26db   :  { %8830 = vmatprep.subr.mxu1 %v12319_v26  ;;  %8842 = vmatpush3.msra.mxu0 %v11613_v46 }
0x26dc   :  { %8843 = vmatprep.mubr.msk.f32.mxu0 %vm9459_vm2, %v12319_v26  ;;  %8831 = vmatpush3.msra.mxu1 %v11589_v29 }
0x26dd   :  { %8832 = vmatprep.mubr.msk.f32.mxu1 %vm9459_vm2, %v12319_v26  ;;  %8846 = vmatprep.subr.mxu1 %v12319_v26 }
0x26de   :  { %8857 = vmatprep.subr.mxu0 %v12319_v26 }
0x2794   :  { %v6257_v50 = vpop.f32.mrf.mxu0 }
0x2795   :  { %v6156_v42 = vpop.f32.mrf.mxu1  ;;  %v6258_v61 = vadd.f32 %v6257_v50, %v11690_v24 }
0x2796   :  { %v6157_v54 = vadd.f32 %v6156_v42, %v11685_v62  ;;  %v8823_v60 = vpop.f32.mrf.mxu0 }
0x2797   :  { %v8812_v51 = vpop.f32.mrf.mxu1  ;;  %6269 = vrot.lane.b32.xlu1 %v6258_v61, %s9460_s27  ;;  %v6261_v40 = vadd.f32 %v6258_v61, %v11674_v63 }
0x2798   :  { %6168 = vrot.lane.b32.xlu0 %v6157_v54, %s9460_s27  ;;  %v6160_v20 = vadd.f32 %v6157_v54, %v11668_v35 }
0x2799   :  { %v8061_v52 = vmul.f32 -1.442695, %v6261_v40 }
0x279a   :  { %v8059_v25 = vmul.f32 -1.442695, %v6160_v20 }
0x279b   :  { %9252 = vpow2.f32 %v8061_v52 }
0x279c   :  { %9254 = vpow2.f32 %v8059_v25 }
0x27a8   :  { %v9253_v0 = vpop.eup %9252 }
0x27a9   :  { %v9255_v16 = vpop.eup %9254  ;;  %v6265_v23 = vadd.f32 1.0, %v9253_v0 }
0x27aa   :  { %v6164_v57 = vadd.f32 1.0, %v9255_v16 }
0x27ab   :  { %9256 = vrcp.f32 %v6265_v23 }
0x27ac   :  { %9258 = vrcp.f32 %v6164_v57 }
0x27b8   :  { %v9257_v5 = vpop.eup %9256 }
0x27b9   :  { %v9259_v8 = vpop.eup %9258  ;;  %v6279_v30 = vsub.f32 1.0, %v9257_v5  ;;  %v6285_v47 = vmul.f32 %v9257_v5, %v11751_v13 }
0x27ba   :  { %v6178_v32 = vsub.f32 1.0, %v9259_v8 }
0x2809   :  { %v6270_v39 = vpop.permute.xlu1 %6269 }
0x280a   :  { %v6272_v27 = vmul.f32 %v9257_v5, %v6270_v39  ;;  %v6169_v18 = vpop.permute.xlu0 %6168 }
0x280b   :  { %v6171_v7 = vmul.f32 %v9259_v8, %v6169_v18 }
0x280c   :  { %6274 = vrot.lane.b32.xlu1 %v6272_v27, %s9460_s27 }
0x280d   :  { %6173 = vrot.lane.b32.xlu0 %v6171_v7, %s9460_s27 }
0x287e   :  { %v6275_v48 = vpop.permute.xlu1 %6274 }
0x287f   :  { %v6277_v17 = vadd.f32 %v6275_v48, %v11674_v63  ;;  %v6174_v43 = vpop.permute.xlu0 %6173  ;;  %v6184_v63 = vmul.f32 %v9259_v8, %v11753_v55 }
0x2880   :  { %v6176_v34 = vadd.f32 %v6174_v43, %v11668_v35 }
0x2881   :  { %9260 = vtanh.f32 %v6277_v17 }
0x2882   :  { %9262 = vtanh.f32 %v6176_v34 }
0x288e   :  { %v9261_v59 = vpop.eup %9260 }
0x288f   :  { %v9263_v15 = vpop.eup %9262  ;;  %6281 = vrot.lane.b32.xlu1 %v9261_v59, %s9462_s29 }
0x2890   :  { %6180 = vrot.lane.b32.xlu0 %v9263_v15, %s9462_s29 }
0x2901   :  { %v6282_v21 = vpop.permute.xlu1 %6281 }
0x2902   :  { %v6284_v50 = vmul.f32 %v6282_v21, %v6279_v30  ;;  %v6181_v42 = vpop.permute.xlu0 %6180 }
0x2903   :  { %v6183_v61 = vmul.f32 %v6181_v42, %v6178_v32 }
0x2904   :  { %v11798_v54 = vadd.f32 %v6285_v47, %v6284_v50 }
0x2905   :  { %v11800_v35 = vadd.f32 %v6184_v63, %v6183_v61 }
0x2906   :  { %6389 = vrot.lane.b32.xlu1 %v11798_v54, %s9462_s29 }
0x2907   :  { %6288 = vrot.lane.b32.xlu0 %v11800_v35, %s9462_s29 }
0x2978   :  { %v6390_v60 = vpop.permute.xlu1 %6389 }
0x2979   :  { %v11806_v51 = vpop.permute.xlu0 %6288  ;;  %8844 = vmatmul.mubr.msk.f32.vlgmr.msra.gmra.mxu0 %vm1348_vm1, %v6390_v60 }
0x297a   :  { %8833 = vmatmul.mubr.msk.f32.vlgmr.msra.gmra.mxu1 %vm1348_vm1, %v11806_v51  ;;  %8858 = vmatpush3.msra.mxu0 %v11524_v56 }
0x297b   :  { %8847 = vmatpush3.msra.mxu1 %v11503_v37  ;;  %8859 = vmatprep.subr.mxu0 %v12319_v26 }
0x297c   :  { %8848 = vmatprep.subr.mxu1 %v12319_v26  ;;  %8860 = vmatpush3.msra.mxu0 %v11563_v19 }
0x297d   :  { %8849 = vmatpush3.msra.mxu1 %v11519_v22  ;;  %8861 = vmatprep.subr.mxu0 %v12319_v26 }
0x297e   :  { %8850 = vmatprep.subr.mxu1 %v12319_v26  ;;  %8862 = vmatpush3.msra.mxu0 %v11594_v33 }
0x297f   :  { %8851 = vmatpush3.msra.mxu1 %v11558_v4  ;;  %8863 = vmatprep.subr.mxu0 %v12319_v26 }
0x2980   :  { %8852 = vmatprep.subr.mxu1 %v12319_v26  ;;  %8864 = vmatpush3.msra.mxu0 %v11613_v46 }
0x2981   :  { %8865 = vmatprep.mubr.msk.f32.mxu0 %vm9459_vm2, %v12319_v26  ;;  %8853 = vmatpush3.msra.mxu1 %v11589_v29 }
0x2982   :  { %8854 = vmatprep.mubr.msk.f32.mxu1 %vm9459_vm2, %v12319_v26  ;;  %8868 = vmatprep.subr.mxu1 %v12319_v26 }
0x2983   :  { %8879 = vmatprep.subr.mxu0 %v12319_v26 }
0x2a39   :  { %v6459_v55 = vpop.f32.mrf.mxu0 }
0x2a3a   :  { %v6358_v40 = vpop.f32.mrf.mxu1  ;;  %v6460_v20 = vadd.f32 %v6459_v55, %v11690_v24 }
0x2a3b   :  { %v6359_v52 = vadd.f32 %v6358_v40, %v11685_v62  ;;  %v8845_v25 = vpop.f32.mrf.mxu0 }
0x2a3c   :  { %v8834_v0 = vpop.f32.mrf.mxu1  ;;  %6471 = vrot.lane.b32.xlu1 %v6460_v20, %s9460_s27  ;;  %v6463_v16 = vadd.f32 %v6460_v20, %v11678_v53 }
0x2a3d   :  { %6370 = vrot.lane.b32.xlu0 %v6359_v52, %s9460_s27  ;;  %v6362_v23 = vadd.f32 %v6359_v52, %v11664_v3 }
0x2a3e   :  { %v8065_v57 = vmul.f32 -1.442695, %v6463_v16 }
0x2a3f   :  { %v8063_v5 = vmul.f32 -1.442695, %v6362_v23 }
0x2a40   :  { %9264 = vpow2.f32 %v8065_v57 }
0x2a41   :  { %9266 = vpow2.f32 %v8063_v5 }
0x2a4d   :  { %v9265_v39 = vpop.eup %9264 }
0x2a4e   :  { %v9267_v8 = vpop.eup %9266  ;;  %v6467_v27 = vadd.f32 1.0, %v9265_v39 }
0x2a4f   :  { %v6366_v18 = vadd.f32 1.0, %v9267_v8 }
0x2a50   :  { %9268 = vrcp.f32 %v6467_v27 }
0x2a51   :  { %9270 = vrcp.f32 %v6366_v18 }
0x2a5d   :  { %v9269_v7 = vpop.eup %9268 }
0x2a5e   :  { %v9271_v17 = vpop.eup %9270  ;;  %v6481_v42 = vsub.f32 1.0, %v9269_v7  ;;  %v6487_v60 = vmul.f32 %v9269_v7, %v11798_v54 }
0x2a5f   :  { %v6380_v61 = vsub.f32 1.0, %v9271_v17 }
0x2aae   :  { %v6472_v48 = vpop.permute.xlu1 %6471 }
0x2aaf   :  { %v6474_v43 = vmul.f32 %v9269_v7, %v6472_v48  ;;  %v6371_v34 = vpop.permute.xlu0 %6370 }
0x2ab0   :  { %v6373_v59 = vmul.f32 %v9271_v17, %v6371_v34 }
0x2ab1   :  { %6476 = vrot.lane.b32.xlu1 %v6474_v43, %s9460_s27 }
0x2ab2   :  { %6375 = vrot.lane.b32.xlu0 %v6373_v59, %s9460_s27 }
0x2b23   :  { %v6477_v15 = vpop.permute.xlu1 %6476 }
0x2b24   :  { %v6479_v30 = vadd.f32 %v6477_v15, %v11678_v53  ;;  %v6376_v21 = vpop.permute.xlu0 %6375  ;;  %v6386_v53 = vmul.f32 %v9271_v17, %v11800_v35 }
0x2b25   :  { %v6378_v32 = vadd.f32 %v6376_v21, %v11664_v3 }
0x2b26   :  { %9272 = vtanh.f32 %v6479_v30 }
0x2b27   :  { %9274 = vtanh.f32 %v6378_v32 }
0x2b33   :  { %v9273_v47 = vpop.eup %9272 }
0x2b34   :  { %v9275_v50 = vpop.eup %9274  ;;  %6483 = vrot.lane.b32.xlu1 %v9273_v47, %s9462_s29 }
0x2b35   :  { %6382 = vrot.lane.b32.xlu0 %v9275_v50, %s9462_s29 }
0x2ba6   :  { %v6484_v63 = vpop.permute.xlu1 %6483 }
0x2ba7   :  { %v6486_v55 = vmul.f32 %v6484_v63, %v6481_v42  ;;  %v6383_v40 = vpop.permute.xlu0 %6382 }
0x2ba8   :  { %v6385_v20 = vmul.f32 %v6383_v40, %v6380_v61 }
0x2ba9   :  { %v11845_v52 = vadd.f32 %v6487_v60, %v6486_v55 }
0x2baa   :  { %v11847_v3 = vadd.f32 %v6386_v53, %v6385_v20 }
0x2bab   :  { %6591 = vrot.lane.b32.xlu1 %v11845_v52, %s9462_s29 }
0x2bac   :  { %6490 = vrot.lane.b32.xlu0 %v11847_v3, %s9462_s29 }
0x2c1d   :  { %v6592_v25 = vpop.permute.xlu1 %6591 }
0x2c1e   :  { %v11853_v0 = vpop.permute.xlu0 %6490  ;;  %8866 = vmatmul.mubr.msk.f32.vlgmr.msra.gmra.mxu0 %vm1348_vm1, %v6592_v25 }
0x2c1f   :  { %8855 = vmatmul.mubr.msk.f32.vlgmr.msra.gmra.mxu1 %vm1348_vm1, %v11853_v0  ;;  %8880 = vmatpush3.msra.mxu0 %v11524_v56 }
0x2c20   :  { %8869 = vmatpush3.msra.mxu1 %v11503_v37  ;;  %8881 = vmatprep.subr.mxu0 %v12319_v26 }
0x2c21   :  { %8870 = vmatprep.subr.mxu1 %v12319_v26  ;;  %8882 = vmatpush3.msra.mxu0 %v11563_v19 }
0x2c22   :  { %8871 = vmatpush3.msra.mxu1 %v11519_v22  ;;  %8883 = vmatprep.subr.mxu0 %v12319_v26 }
0x2c23   :  { %8872 = vmatprep.subr.mxu1 %v12319_v26  ;;  %8884 = vmatpush3.msra.mxu0 %v11594_v33 }
0x2c24   :  { %8873 = vmatpush3.msra.mxu1 %v11558_v4  ;;  %8885 = vmatprep.subr.mxu0 %v12319_v26 }
0x2c25   :  { %8874 = vmatprep.subr.mxu1 %v12319_v26  ;;  %8886 = vmatpush3.msra.mxu0 %v11613_v46 }
0x2c26   :  { %8887 = vmatprep.mubr.msk.f32.mxu0 %vm9459_vm2, %v12319_v26  ;;  %8875 = vmatpush3.msra.mxu1 %v11589_v29 }
0x2c27   :  { %8876 = vmatprep.mubr.msk.f32.mxu1 %vm9459_vm2, %v12319_v26  ;;  %8890 = vmatprep.subr.mxu1 %v12319_v26 }
0x2c28   :  { %8901 = vmatprep.subr.mxu0 %v12319_v26 }
0x2cde   :  { %v6661_v35 = vpop.f32.mrf.mxu0 }
0x2cdf   :  { %v6560_v16 = vpop.f32.mrf.mxu1  ;;  %v6662_v23 = vadd.f32 %v6661_v35, %v11690_v24 }
0x2ce0   :  { %v6561_v57 = vadd.f32 %v6560_v16, %v11685_v62  ;;  %v8867_v5 = vpop.f32.mrf.mxu0 }
0x2ce1   :  { %v8856_v39 = vpop.f32.mrf.mxu1  ;;  %6673 = vrot.lane.b32.xlu1 %v6662_v23, %s9460_s27  ;;  %v6665_v8 = vadd.f32 %v6662_v23, %v11666_v44 }
0x2ce2   :  { %6572 = vrot.lane.b32.xlu0 %v6561_v57, %s9460_s27  ;;  %v6564_v27 = vadd.f32 %v6561_v57, %v11676_v36 }
0x2ce3   :  { %v8069_v18 = vmul.f32 -1.442695, %v6665_v8 }
0x2ce4   :  { %v8067_v7 = vmul.f32 -1.442695, %v6564_v27 }
0x2ce5   :  { %9276 = vpow2.f32 %v8069_v18 }
0x2ce6   :  { %9278 = vpow2.f32 %v8067_v7 }
0x2cf2   :  { %v9277_v48 = vpop.eup %9276 }
0x2cf3   :  { %v9279_v17 = vpop.eup %9278  ;;  %v6669_v43 = vadd.f32 1.0, %v9277_v48 }
0x2cf4   :  { %v6568_v34 = vadd.f32 1.0, %v9279_v17 }
0x2cf5   :  { %9280 = vrcp.f32 %v6669_v43 }
0x2cf6   :  { %9282 = vrcp.f32 %v6568_v34 }
0x2d02   :  { %v9281_v59 = vpop.eup %9280 }
0x2d03   :  { %v9283_v30 = vpop.eup %9282  ;;  %v6683_v40 = vsub.f32 1.0, %v9281_v59  ;;  %v6689_v25 = vmul.f32 %v9281_v59, %v11845_v52 }
0x2d04   :  { %v6582_v20 = vsub.f32 1.0, %v9283_v30 }
0x2d53   :  { %v6674_v15 = vpop.permute.xlu1 %6673 }
0x2d54   :  { %v6676_v21 = vmul.f32 %v9281_v59, %v6674_v15  ;;  %v6573_v32 = vpop.permute.xlu0 %6572 }
0x2d55   :  { %v6575_v47 = vmul.f32 %v9283_v30, %v6573_v32 }
0x2d56   :  { %6678 = vrot.lane.b32.xlu1 %v6676_v21, %s9460_s27 }
0x2d57   :  { %6577 = vrot.lane.b32.xlu0 %v6575_v47, %s9460_s27 }
0x2dc8   :  { %v6679_v50 = vpop.permute.xlu1 %6678 }
0x2dc9   :  { %v6681_v42 = vadd.f32 %v6679_v50, %v11666_v44  ;;  %v6578_v63 = vpop.permute.xlu0 %6577  ;;  %v6588_v44 = vmul.f32 %v9283_v30, %v11847_v3 }
0x2dca   :  { %v6580_v61 = vadd.f32 %v6578_v63, %v11676_v36 }
0x2dcb   :  { %9284 = vtanh.f32 %v6681_v42 }
0x2dcc   :  { %9286 = vtanh.f32 %v6580_v61 }
0x2dd8   :  { %v9285_v60 = vpop.eup %9284 }
0x2dd9   :  { %v9287_v55 = vpop.eup %9286  ;;  %6685 = vrot.lane.b32.xlu1 %v9285_v60, %s9462_s29 }
0x2dda   :  { %6584 = vrot.lane.b32.xlu0 %v9287_v55, %s9462_s29 }
0x2e4b   :  { %v6686_v53 = vpop.permute.xlu1 %6685 }
0x2e4c   :  { %v6688_v35 = vmul.f32 %v6686_v53, %v6683_v40  ;;  %v6585_v16 = vpop.permute.xlu0 %6584 }
0x2e4d   :  { %v6587_v23 = vmul.f32 %v6585_v16, %v6582_v20 }
0x2e4e   :  { %v11892_v57 = vadd.f32 %v6689_v25, %v6688_v35 }
0x2e4f   :  { %v11894_v36 = vadd.f32 %v6588_v44, %v6587_v23 }
0x2e50   :  { %6793 = vrot.lane.b32.xlu1 %v11892_v57, %s9462_s29 }
0x2e51   :  { %6692 = vrot.lane.b32.xlu0 %v11894_v36, %s9462_s29 }
0x2ec2   :  { %v6794_v5 = vpop.permute.xlu1 %6793 }
0x2ec3   :  { %v11900_v39 = vpop.permute.xlu0 %6692  ;;  %8888 = vmatmul.mubr.msk.f32.vlgmr.msra.gmra.mxu0 %vm1348_vm1, %v6794_v5 }
0x2ec4   :  { %8877 = vmatmul.mubr.msk.f32.vlgmr.msra.gmra.mxu1 %vm1348_vm1, %v11900_v39  ;;  %8902 = vmatpush3.msra.mxu0 %v11524_v56 }
0x2ec5   :  { %8891 = vmatpush3.msra.mxu1 %v11503_v37  ;;  %8903 = vmatprep.subr.mxu0 %v12319_v26 }
0x2ec6   :  { %8892 = vmatprep.subr.mxu1 %v12319_v26  ;;  %8904 = vmatpush3.msra.mxu0 %v11563_v19 }
0x2ec7   :  { %8893 = vmatpush3.msra.mxu1 %v11519_v22  ;;  %8905 = vmatprep.subr.mxu0 %v12319_v26 }
0x2ec8   :  { %8894 = vmatprep.subr.mxu1 %v12319_v26  ;;  %8906 = vmatpush3.msra.mxu0 %v11594_v33 }
0x2ec9   :  { %8895 = vmatpush3.msra.mxu1 %v11558_v4  ;;  %8907 = vmatprep.subr.mxu0 %v12319_v26 }
0x2eca   :  { %8896 = vmatprep.subr.mxu1 %v12319_v26  ;;  %8908 = vmatpush3.msra.mxu0 %v11613_v46 }
0x2ecb   :  { %8909 = vmatprep.mubr.msk.f32.mxu0 %vm9459_vm2, %v12319_v26  ;;  %8897 = vmatpush3.msra.mxu1 %v11589_v29 }
0x2ecc   :  { %8898 = vmatprep.mubr.msk.f32.mxu1 %vm9459_vm2, %v12319_v26  ;;  %8912 = vmatprep.subr.mxu1 %v12319_v26 }
0x2ecd   :  { %8923 = vmatprep.subr.mxu0 %v12319_v26 }
0x2f83   :  { %v6863_v37 = vpop.f32.mrf.mxu0 }
0x2f84   :  { %v6762_v22 = vpop.f32.mrf.mxu1  ;;  %v6864_v56 = vadd.f32 %v6863_v37, %v11690_v24  ;;  %v9431_v37 = vld [vmem:[%s12250_s1 + $0x350] sm:$0xff] }
0x2f85   :  { %v6763_v4 = vadd.f32 %v6762_v22, %v11685_v62  ;;  %v8889_v19 = vpop.f32.mrf.mxu0  ;;  %v9432_v22 = vld [vmem:[%s12250_s1 + $0x3e0] sm:$0xff] }
0x2f86   :  { %v8878_v3 = vpop.f32.mrf.mxu1  ;;  %6875 = vrot.lane.b32.xlu1 %v6864_v56, %s9460_s27  ;;  %v6867_v29 = vadd.f32 %v6864_v56, %v11670_v2  ;;  %v9433_v56 = vld [vmem:[%s12250_s1 + $0x340] sm:$0xff] }
0x2f87   :  { %6774 = vrot.lane.b32.xlu0 %v6763_v4, %s9460_s27  ;;  %v6766_v8 = vadd.f32 %v6763_v4, %v11672_v12  ;;  %v9434_v4 = vld [vmem:[%s12250_s1 + $0x330] sm:$0xff]  ;;  %v9435_v19 = vld [vmem:[%s12250_s1 + $0x320] sm:$0xff] }
0x2f88   :  { %v8073_v27 = vmul.f32 -1.442695, %v6867_v29 }
0x2f89   :  { %v8071_v18 = vmul.f32 -1.442695, %v6766_v8 }
0x2f8a   :  { %9288 = vpow2.f32 %v8073_v27 }
0x2f8b   :  { %9290 = vpow2.f32 %v8071_v18 }
0x2f97   :  { %v9289_v7 = vpop.eup %9288 }
0x2f98   :  { %v9291_v48 = vpop.eup %9290  ;;  %v6871_v17 = vadd.f32 1.0, %v9289_v7 }
0x2f99   :  { %v6770_v43 = vadd.f32 1.0, %v9291_v48 }
0x2f9a   :  { %9292 = vrcp.f32 %v6871_v17 }
0x2f9b   :  { %9294 = vrcp.f32 %v6770_v43 }
0x2fa7   :  { %v9293_v34 = vpop.eup %9292 }
0x2fa8   :  { %v9295_v15 = vpop.eup %9294  ;;  %v6885_v55 = vsub.f32 1.0, %v9293_v34  ;;  %v6891_v20 = vmul.f32 %v9293_v34, %v11892_v57 }
0x2fa9   :  { %v6784_v53 = vsub.f32 1.0, %v9295_v15 }
0x2ff8   :  { %v6876_v59 = vpop.permute.xlu1 %6875 }
0x2ff9   :  { %v6878_v30 = vmul.f32 %v9293_v34, %v6876_v59  ;;  %v6775_v21 = vpop.permute.xlu0 %6774 }
0x2ffa   :  { %v6777_v32 = vmul.f32 %v9295_v15, %v6775_v21 }
0x2ffb   :  { %6880 = vrot.lane.b32.xlu1 %v6878_v30, %s9460_s27 }
0x2ffc   :  { %6779 = vrot.lane.b32.xlu0 %v6777_v32, %s9460_s27 }
0x306d   :  { %v6881_v47 = vpop.permute.xlu1 %6880 }
0x306e   :  { %v6883_v50 = vadd.f32 %v6881_v47, %v11670_v2  ;;  %v6780_v42 = vpop.permute.xlu0 %6779  ;;  %v6790_v2 = vmul.f32 %v9295_v15, %v11894_v36  ;;  %v9430_v36 = vld [vmem:[%s12250_s1 + $0x3f0] sm:$0xff] }
0x306f   :  { %v6782_v63 = vadd.f32 %v6780_v42, %v11672_v12 }
0x3070   :  { %9296 = vtanh.f32 %v6883_v50 }
0x3071   :  { %9298 = vtanh.f32 %v6782_v63 }
0x307d   :  { %v9297_v61 = vpop.eup %9296 }
0x307e   :  { %v9299_v60 = vpop.eup %9298  ;;  %6887 = vrot.lane.b32.xlu1 %v9297_v61, %s9462_s29 }
0x307f   :  { %6786 = vrot.lane.b32.xlu0 %v9299_v60, %s9462_s29 }
0x30f0   :  { %v6888_v40 = vpop.permute.xlu1 %6887 }
0x30f1   :  { %v6890_v25 = vmul.f32 %v6888_v40, %v6885_v55  ;;  %v6787_v35 = vpop.permute.xlu0 %6786 }
0x30f2   :  { %v6789_v16 = vmul.f32 %v6787_v35, %v6784_v53 }
0x30f3   :  { %v11939_v44 = vadd.f32 %v6891_v20, %v6890_v25 }
0x30f4   :  { %v11941_v12 = vadd.f32 %v6790_v2, %v6789_v16 }
0x30f5   :  { %6995 = vrot.lane.b32.xlu1 %v11939_v44, %s9462_s29 }
0x30f6   :  { %6894 = vrot.lane.b32.xlu0 %v11941_v12, %s9462_s29 }
0x3167   :  { %v6996_v23 = vpop.permute.xlu1 %6995 }
0x3168   :  { %v11947_v5 = vpop.permute.xlu0 %6894  ;;  %8910 = vmatmul.mubr.msk.f32.vlgmr.msra.gmra.mxu0 %vm1348_vm1, %v6996_v23 }
0x3169   :  { %8899 = vmatmul.mubr.msk.f32.vlgmr.msra.gmra.mxu1 %vm1348_vm1, %v11947_v5  ;;  %8924 = vmatpush3.msra.mxu0 %v9430_v36 }
0x316a   :  { %8913 = vmatpush3.msra.mxu1 %v9431_v37  ;;  %8925 = vmatprep.subr.mxu0 %v12319_v26 }
0x316b   :  { %8914 = vmatprep.subr.mxu1 %v12319_v26  ;;  %8926 = vmatpush3.msra.mxu0 %v9432_v22 }
0x316c   :  { %8915 = vmatpush3.msra.mxu1 %v9433_v56  ;;  %8927 = vmatprep.subr.mxu0 %v12319_v26 }
0x316d   :  { %8916 = vmatprep.subr.mxu1 %v12319_v26  ;;  %8928 = vmatpush3.msra.mxu0 %v11594_v33 }
0x316e   :  { %8917 = vmatpush3.msra.mxu1 %v9434_v4  ;;  %8929 = vmatprep.subr.mxu0 %v12319_v26 }
0x316f   :  { %8918 = vmatprep.subr.mxu1 %v12319_v26  ;;  %8930 = vmatpush3.msra.mxu0 %v11613_v46 }
0x3170   :  { %8931 = vmatprep.mubr.msk.f32.mxu0 %vm9459_vm2, %v12319_v26  ;;  %8919 = vmatpush3.msra.mxu1 %v9435_v19 }
0x3171   :  { %8920 = vmatprep.mubr.msk.f32.mxu1 %vm9459_vm2, %v12319_v26 }
0x3228   :  { %v7065_v33 = vpop.f32.mrf.mxu0 }
0x3229   :  { %v6964_v3 = vpop.f32.mrf.mxu1  ;;  %v7066_v29 = vadd.f32 %v7065_v33, %v11690_v24 }
0x322a   :  { %v6965_v8 = vadd.f32 %v6964_v3, %v11685_v62  ;;  %v8911_v27 = vpop.f32.mrf.mxu0 }
0x322b   :  { %v8900_v18 = vpop.f32.mrf.mxu1  ;;  %7077 = vrot.lane.b32.xlu1 %v7066_v29, %s9460_s27  ;;  %v7069_v46 = vadd.f32 %v7066_v29, %v11660_v9 }
0x322c   :  { %6976 = vrot.lane.b32.xlu0 %v6965_v8, %s9460_s27  ;;  %v6968_v7 = vadd.f32 %v6965_v8, %v11692_v1 }
0x322d   :  { %v8077_v48 = vmul.f32 -1.442695, %v7069_v46 }
0x322e   :  { %v8075_v17 = vmul.f32 -1.442695, %v6968_v7 }
0x322f   :  { %9300 = vpow2.f32 %v8077_v48 }
0x3230   :  { %9302 = vpow2.f32 %v8075_v17 }
0x323c   :  { %v9301_v26 = vpop.eup %9300 }
0x323d   :  { %v9303_v43 = vpop.eup %9302  ;;  %v7073_v34 = vadd.f32 1.0, %v9301_v26 }
0x323e   :  { %v6972_v59 = vadd.f32 1.0, %v9303_v43 }
0x323f   :  { %9304 = vrcp.f32 %v7073_v34 }
0x3240   :  { %9306 = vrcp.f32 %v6972_v59 }
0x324c   :  { %v9305_v15 = vpop.eup %9304 }
0x324d   :  { %v9307_v21 = vpop.eup %9306  ;;  %v7087_v53 = vsub.f32 1.0, %v9305_v15  ;;  %v7093_v35 = vmul.f32 %v9305_v15, %v11939_v44 }
0x324e   :  { %v6986_v25 = vsub.f32 1.0, %v9307_v21 }
0x329d   :  { %v7078_v30 = vpop.permute.xlu1 %7077 }
0x329e   :  { %v7080_v32 = vmul.f32 %v9305_v15, %v7078_v30  ;;  %v6977_v47 = vpop.permute.xlu0 %6976  ;;  %v7323_v15 = vld [vmem:[%s12250_s1 + $0x490] sm:$0xff]  ;;  %v7322_v30 = vld [vmem:[%s12250_s1 + $0x480] sm:$0xff] }
0x329f   :  { %v6979_v50 = vmul.f32 %v9307_v21, %v6977_v47  ;;  %8934 = vmatprep.subr.mxu1 %v7323_v15  ;;  %v7319_v47 = vld [vmem:[%s12250_s1 + $0x450] sm:$0xff] }
0x32a0   :  { %7082 = vrot.lane.b32.xlu1 %v7080_v32, %s9460_s27  ;;  %v7320_v32 = vld [vmem:[%s12250_s1 + $0x460] sm:$0xff] }
0x32a1   :  { %6981 = vrot.lane.b32.xlu0 %v6979_v50, %s9460_s27 }
0x3312   :  { %v7083_v42 = vpop.permute.xlu1 %7082 }
0x3313   :  { %v7085_v63 = vadd.f32 %v7083_v42, %v11660_v9  ;;  %v6982_v61 = vpop.permute.xlu0 %6981  ;;  %v6992_v9 = vmul.f32 %v9307_v21, %v11941_v12  ;;  %v7321_v21 = vld [vmem:[%s12250_s1 + $0x470] sm:$0xff] }
0x3314   :  { %v6984_v60 = vadd.f32 %v6982_v61, %v11692_v1 }
0x3315   :  { %9308 = vtanh.f32 %v7085_v63 }
0x3316   :  { %9310 = vtanh.f32 %v6984_v60  ;;  %v7318_v60 = vld [vmem:[%s12250_s1 + $0x440] sm:$0xff] }
0x3322   :  { %v9309_v55 = vpop.eup %9308 }
0x3323   :  { %v9311_v40 = vpop.eup %9310  ;;  %7089 = vrot.lane.b32.xlu1 %v9309_v55, %s9462_s29  ;;  %v7317_v55 = vld [vmem:[%s12250_s1 + $0x430] sm:$0xff] }
0x3324   :  { %6988 = vrot.lane.b32.xlu0 %v9311_v40, %s9462_s29 }
0x3395   :  { %v7090_v20 = vpop.permute.xlu1 %7089 }
0x3396   :  { %v7092_v2 = vmul.f32 %v7090_v20, %v7087_v53  ;;  %v6989_v16 = vpop.permute.xlu0 %6988 }
0x3397   :  { %v6991_v23 = vmul.f32 %v6989_v16, %v6986_v25 }
0x3398   :  { %v11996_v36 = vadd.f32 %v7093_v35, %v7092_v2 }
0x3399   :  { %v11998_v1 = vadd.f32 %v6992_v9, %v6991_v23 }
0x339a   :  { %7197 = vrot.lane.b32.xlu1 %v11996_v36, %s9462_s29 }
0x339b   :  { %7096 = vrot.lane.b32.xlu0 %v11998_v1, %s9462_s29 }
0x340c   :  { %v7198_v37 = vpop.permute.xlu1 %7197 }
0x340d   :  { %v12004_v22 = vpop.permute.xlu0 %7096  ;;  %8932 = vmatmul.mubr.msk.f32.vlgmr.msra.gmra.mxu0 %vm1348_vm1, %v7198_v37 }
0x340e   :  { %8921 = vmatmul.mubr.msk.f32.vlgmr.msra.gmra.mxu1 %vm1348_vm1, %v12004_v22 }
0x340f   :  { %8935 = vmatpush3.msra.mxu1 %v7323_v15 }
0x3410   :  { %8936 = vmatprep.subr.mxu1 %v7322_v30 }
0x3411   :  { %8937 = vmatpush3.msra.mxu1 %v7322_v30 }
0x3412   :  { %8938 = vmatprep.subr.mxu1 %v7321_v21 }
0x3413   :  { %8939 = vmatpush3.msra.mxu1 %v7321_v21 }
0x3414   :  { %8940 = vmatprep.subr.mxu1 %v7320_v32 }
0x3415   :  { %8941 = vmatpush3.msra.mxu1 %v7320_v32 }
0x3416   :  { %8942 = vmatprep.subr.mxu1 %v7319_v47 }
0x3417   :  { %8943 = vmatpush3.msra.mxu1 %v7319_v47 }
0x3418   :  { %8944 = vmatprep.subr.mxu1 %v7318_v60 }
0x3419   :  { %8945 = vmatpush3.msra.mxu1 %v7318_v60 }
0x341a   :  { %8946 = vmatprep.subr.mxu1 %v7317_v55 }
0x341b   :  { %8947 = vmatpush3.msra.mxu1 %v7317_v55 }
0x34cd   :  { %v7267_v12 = vpop.f32.mrf.mxu0 }
0x34ce   :  { %v7166_v56 = vpop.f32.mrf.mxu1  ;;  %v7268_v4 = vadd.f32 %v7267_v12, %v11690_v24 }
0x34cf   :  { %v7167_v19 = vadd.f32 %v7166_v56, %v11685_v62  ;;  %v8933_v33 = vpop.f32.mrf.mxu0 }
0x34d0   :  { %v8922_v3 = vpop.f32.mrf.mxu1  ;;  %7279 = vrot.lane.b32.xlu1 %v7268_v4, %s9460_s27  ;;  %v7271_v29 = vadd.f32 %v7268_v4, %v11662_v11  ;;  %v7309_v4 = vsel %vm1348_vm1, %v11759_v38, %v11996_v36  ;;  %v7313_v38 = vsel %vm1348_vm1, %v11947_v5, %v11798_v54 }
0x34d1   :  { %7178 = vrot.lane.b32.xlu0 %v7167_v19, %s9460_s27  ;;  %v7170_v8 = vadd.f32 %v7167_v19, %v11680_v49  ;;  %v7312_v19 = vsel %vm1348_vm1, %v11900_v39, %v11845_v52 }
0x34d2   :  { %v8081_v27 = vmul.f32 -1.442695, %v7271_v29 }
0x34d3   :  { %v8079_v18 = vmul.f32 -1.442695, %v7170_v8 }
0x34d4   :  { %9312 = vpow2.f32 %v8081_v27 }
0x34d5   :  { %9314 = vpow2.f32 %v8079_v18 }
0x34e1   :  { %v9313_v46 = vpop.eup %9312 }
0x34e2   :  { %v9315_v7 = vpop.eup %9314  ;;  %v7275_v48 = vadd.f32 1.0, %v9313_v46 }
0x34e3   :  { %v7174_v24 = vadd.f32 1.0, %v9315_v7 }
0x34e4   :  { %9316 = vrcp.f32 %v7275_v48 }
0x34e5   :  { %9318 = vrcp.f32 %v7174_v24 }
0x34f1   :  { %v9317_v62 = vpop.eup %9316 }
0x34f2   :  { %v9319_v26 = vpop.eup %9318  ;;  %v7289_v53 = vsub.f32 1.0, %v9317_v62  ;;  %v7295_v35 = vmul.f32 %v9317_v62, %v11996_v36 }
0x34f3   :  { %v7188_v25 = vsub.f32 1.0, %v9319_v26  ;;  %v7194_v9 = vmul.f32 %v9319_v26, %v11998_v1  ;;  %v7310_v1 = vsel %vm1348_vm1, %v11806_v51, %v11939_v44  ;;  %v7314_v51 = vsel %vm1348_vm1, %v12004_v22, %v11751_v13 }
0x3542   :  { %v7280_v17 = vpop.permute.xlu1 %7279 }
0x3543   :  { %v7282_v43 = vmul.f32 %v9317_v62, %v7280_v17  ;;  %v7179_v34 = vpop.permute.xlu0 %7178 }
0x3544   :  { %v7181_v59 = vmul.f32 %v9319_v26, %v7179_v34 }
0x3545   :  { %7284 = vrot.lane.b32.xlu1 %v7282_v43, %s9460_s27 }
0x3546   :  { %7183 = vrot.lane.b32.xlu0 %v7181_v59, %s9460_s27 }
0x35b7   :  { %v7285_v50 = vpop.permute.xlu1 %7284 }
0x35b8   :  { %v7287_v42 = vadd.f32 %v7285_v50, %v11662_v11  ;;  %v7184_v63 = vpop.permute.xlu0 %7183  ;;  %v7316_v11 = vld [vmem:[%s12250_s1 + $0x420] sm:$0xff] }
0x35b9   :  { %v7186_v61 = vadd.f32 %v7184_v63, %v11680_v49  ;;  %8948 = vmatprep.subr.mxu1 %v7316_v11 }
0x35ba   :  { %9320 = vtanh.f32 %v7287_v42  ;;  %8949 = vmatpush3.msra.mxu1 %v7316_v11 }
0x35bb   :  { %9322 = vtanh.f32 %v7186_v61 }
0x35c7   :  { %v9321_v49 = vpop.eup %9320 }
0x35c8   :  { %v9323_v40 = vpop.eup %9322  ;;  %7291 = vrot.lane.b32.xlu1 %v9321_v49, %s9462_s29 }
0x35c9   :  { %7190 = vrot.lane.b32.xlu0 %v9323_v40, %s9462_s29 }
0x363a   :  { %v7292_v20 = vpop.permute.xlu1 %7291 }
0x363b   :  { %v7294_v2 = vmul.f32 %v7292_v20, %v7289_v53  ;;  %v7191_v16 = vpop.permute.xlu0 %7190 }
0x363c   :  { %v7193_v23 = vmul.f32 %v7191_v16, %v7188_v25  ;;  %v12141_v16 = vld [vmem:[%s12249_s0 + $0x48] sm:$0xff] }
0x363d   :  { %v7296_v37 = vadd.f32 %v7295_v35, %v7294_v2 }
0x363e   :  { %v7195_v12 = vadd.f32 %v7194_v9, %v7193_v23 }
0x363f   :  { %v7308_v56 = vsel %vm1348_vm1, %v11712_v14, %v7296_v37  ;;  %v7311_v14 = vsel %vm1348_vm1, %v11853_v0, %v11892_v57  ;;  %v12081_v57 = vld [vmem:[%s12250_s1 + $0x4a0] ss:$0 sm:$0xff] }
0x3640   :  { %7298 = vrot.lane.b32.xlu0 %v7195_v12, %s9462_s29  ;;  %8950 = vmatprep.mubr.msk.f32.mxu1 %vm7325_vm3, %v7308_v56  ;;  %v12149_v12 = vld [vmem:[%s12249_s0 + $0x40] sm:$0xff] }
0x3641   :  { %8951 = vmatmul.mubr.msk.f32.vlgmr.msra.gmra.mxu1 %vm7325_vm3, %v7309_v4 }
0x3642   :  { %8953 = vmatprep.mubr.msk.f32.mxu1 %vm7325_vm3, %v7310_v1 }
0x3645   :  { %8954 = vmatmul.mubr.msk.f32.gmra.mxu1 %vm7325_vm3, %v7311_v14 }
0x3646   :  { %8956 = vmatprep.mubr.msk.f32.mxu1 %vm7325_vm3, %v7312_v19  ;;  %v12157_v19 = vld [vmem:[%s12249_s0 + $0x58] sm:$0xff] }
0x3649   :  { %8957 = vmatmul.mubr.msk.f32.gmra.mxu1 %vm7325_vm3, %v7313_v38 }
0x364a   :  { %8959 = vmatprep.mubr.msk.f32.mxu1 %vm7325_vm3, %v7314_v51 }
0x36b2   :  { %v7299_v0 = vpop.permute.xlu0 %7298 }
0x36b3   :  { %v7315_v52 = vsel %vm1348_vm1, %v7299_v0, %v11704_v28 }
0x36b4   :  { %8960 = vmatmul.mubr.msk.f32.gmra.mxu1 %vm7325_vm3, %v7315_v52 }
0x3701   :  { %v8952_v54 = vpop.f32.mrf.mxu1 }
0x3702   :  { %v12084_v39 = vadd.f32 %v8952_v54, %v12081_v57  ;;  %v12165_v54 = vld [vmem:[%s12249_s0 + $0x50] sm:$0xff] }
0x3703   :  { %v7416_v13 = vpop.f32.mrf.mxu1 }
0x3704   :  { %v7480_v44 = vand.u32 2147483647, %v12084_v39  ;;  %7822 = vst.msk [vmem:[%s12255_s6 + $0x8] sm:$0xff] %vm65_vm0, %v12084_v39  ;;  %v12093_v28 = vadd.f32 %v7416_v13, %v12081_v57  ;;  %v7456_v2 = vmax.f32 %v12084_v39, 0.0  ;;  %v7464_v9 = vmul.f32 %v12141_v16, %v12084_v39 }
0x3705   :  { %v8955_v5 = vpop.f32.mrf.mxu1 }
0x3706   :  { %v7488_v36 = vsub.f32 0.0, %v7480_v44  ;;  %7821 = vst.msk [vmem:[%s12255_s6] sm:$0xff] %vm65_vm0, %v12093_v28  ;;  %v7479_v22 = vand.u32 2147483647, %v12093_v28  ;;  %v12102_v33 = vadd.f32 %v8955_v5, %v12081_v57  ;;  %v7455_v37 = vmax.f32 %v12093_v28, 0.0 }
0x3707   :  { %v7426_v3 = vpop.f32.mrf.mxu1  ;;  %v7463_v56 = vmul.f32 %v12149_v12, %v12093_v28  ;;  %v7472_v4 = vsub.f32 %v7456_v2, %v7464_v9 }
0x3708   :  { %v7497_v29 = vmul.f32 1.442695, %v7488_v36  ;;  %v12105_v8 = vadd.f32 %v7426_v3, %v12081_v57  ;;  %v7487_v27 = vsub.f32 0.0, %v7479_v22  ;;  %v7482_v18 = vand.u32 2147483647, %v12102_v33  ;;  %7824 = vst.msk [vmem:[%s12255_s6 + $0x18] sm:$0xff] %vm65_vm0, %v12102_v33 }
0x3709   :  { %v8958_v46 = vpop.f32.mrf.mxu1  ;;  %v7458_v14 = vmax.f32 %v12102_v33, 0.0  ;;  %v7466_v38 = vmul.f32 %v12157_v19, %v12102_v33  ;;  %v7471_v13 = vsub.f32 %v7455_v37, %v7463_v56 }
0x370a   :  { %9324 = vpow2.f32 %v7497_v29  ;;  %v7481_v7 = vand.u32 2147483647, %v12105_v8  ;;  %7823 = vst.msk [vmem:[%s12255_s6 + $0x10] sm:$0xff] %vm65_vm0, %v12105_v8  ;;  %v7495_v48 = vmul.f32 1.442695, %v7487_v27  ;;  %v7490_v24 = vsub.f32 0.0, %v7482_v18 }
0x370b   :  { %v12120_v62 = vadd.f32 %v8958_v46, %v12081_v57  ;;  %v7436_v17 = vpop.f32.mrf.mxu1  ;;  %v7457_v52 = vmax.f32 %v12105_v8, 0.0  ;;  %v7465_v39 = vmul.f32 %v12165_v54, %v12105_v8  ;;  %v7474_v5 = vsub.f32 %v7458_v14, %v7466_v38  ;;  %v12174_v27 = vld [vmem:[%s12249_s0 + $0x68] sm:$0xff] }
0x370c   :  { %v7489_v26 = vsub.f32 0.0, %v7481_v7  ;;  %v12123_v43 = vadd.f32 %v7436_v17, %v12081_v57  ;;  %9326 = vpow2.f32 %v7495_v48  ;;  %v7501_v34 = vmul.f32 1.442695, %v7490_v24  ;;  %v12182_v48 = vld [vmem:[%s12249_s0 + $0x60] sm:$0xff] }
0x370d   :  { %7826 = vst.msk [vmem:[%s12255_s6 + $0x28] sm:$0xff] %vm65_vm0, %v12120_v62  ;;  %v7484_v15 = vand.u32 2147483647, %v12120_v62  ;;  %v7460_v36 = vmax.f32 %v12120_v62, 0.0  ;;  %v7468_v18 = vmul.f32 %v12174_v27, %v12120_v62  ;;  %v7473_v8 = vsub.f32 %v7457_v52, %v7465_v39 }
0x370e   :  { %v7499_v59 = vmul.f32 1.442695, %v7489_v26  ;;  %7825 = vst.msk [vmem:[%s12255_s6 + $0x20] sm:$0xff] %vm65_vm0, %v12123_v43  ;;  %9328 = vpow2.f32 %v7501_v34  ;;  %v7483_v30 = vand.u32 2147483647, %v12123_v43  ;;  %v7459_v7 = vmax.f32 %v12123_v43, 0.0 }
0x370f   :  { %v7492_v21 = vsub.f32 0.0, %v7484_v15 }
0x3710   :  { %9330 = vpow2.f32 %v7499_v59  ;;  %v7491_v32 = vsub.f32 0.0, %v7483_v30 }
0x3711   :  { %v7505_v47 = vmul.f32 1.442695, %v7492_v21 }
0x3712   :  { %v7503_v50 = vmul.f32 1.442695, %v7491_v32  ;;  %v12399_v32 = vld [vmem:[#allocation31_spill] sm:$0xff] }
0x3713   :  { %9332 = vpow2.f32 %v7505_v47 }
0x3714   :  { %9334 = vpow2.f32 %v7503_v50  ;;  %v7476_v50 = vsub.f32 %v7460_v36, %v7468_v18 }
0x3717   :  { %v9325_v42 = vpop.eup %9324 }
0x3718   :  { %v7512_v63 = vadd.f32 1.0, %v9325_v42 }
0x3719   :  { %v9327_v61 = vpop.eup %9326 }
0x371a   :  { %9336 = vlog2.f32 %v7512_v63  ;;  %v7511_v60 = vadd.f32 1.0, %v9327_v61 }
0x371b   :  { %v9329_v55 = vpop.eup %9328 }
0x371c   :  { %9338 = vlog2.f32 %v7511_v60  ;;  %v7514_v49 = vadd.f32 1.0, %v9329_v55 }
0x371d   :  { %v9331_v11 = vpop.eup %9330 }
0x371e   :  { %v7513_v40 = vadd.f32 1.0, %v9331_v11  ;;  %9340 = vlog2.f32 %v7514_v49 }
0x3720   :  { %9342 = vlog2.f32 %v7513_v40  ;;  %v9333_v53 = vpop.eup %9332 }
0x3721   :  { %v9335_v20 = vpop.eup %9334  ;;  %v7516_v25 = vadd.f32 1.0, %v9333_v53 }
0x3722   :  { %v7515_v35 = vadd.f32 1.0, %v9335_v20 }
0x3723   :  { %9344 = vlog2.f32 %v7516_v25 }
0x3724   :  { %9346 = vlog2.f32 %v7515_v35 }
0x3727   :  { %v9337_v23 = vpop.eup %9336 }
0x3728   :  { %v7522_v1 = vmul.f32 0.6931472, %v9337_v23  ;;  %v12400_v23 = vld [vmem:[#allocation13_spill] sm:$0xff] }
0x3729   :  { %v9339_v51 = vpop.eup %9338 }
0x372a   :  { %v7536_v0 = vadd.f32 %v7522_v1, %v7472_v4  ;;  %v7520_v44 = vmul.f32 0.6931472, %v9339_v51 }
0x372b   :  { %v9341_v28 = vpop.eup %9340 }
0x372c   :  { %v7571_v33 = vmul.f32 %v7536_v0, %v10238_v58  ;;  %v7535_v3 = vadd.f32 %v7520_v44, %v7471_v13  ;;  %v7526_v29 = vmul.f32 0.6931472, %v9341_v28  ;;  %v7467_v58 = vmul.f32 %v12182_v48, %v12123_v43 }
0x372d   :  { %v9343_v22 = vpop.eup %9342  ;;  %v7544_v24 = vsel %vm65_vm0, %v7536_v0, 0.0 }
0x372e   :  { %v7524_v46 = vmul.f32 0.6931472, %v9343_v22  ;;  %v7543_v17 = vsel %vm65_vm0, %v7535_v3, 0.0  ;;  %v7570_v26 = vmul.f32 %v7535_v3, %v12385_v41  ;;  %v7538_v34 = vadd.f32 %v7526_v29, %v7474_v5 }
0x372f   :  { %v7545_v62 = vadd.f32 %v7544_v24, %v7543_v17  ;;  %v7579_v30 = vsel %vm65_vm0, %v7571_v33, 0.0  ;;  %v7475_v55 = vsub.f32 %v7459_v7, %v7467_v58  ;;  %v7654_v7 = vsel %vm65_vm0, %v12149_v12, 0.0  ;;  %v9442_v12 = vld [vmem:[%s12249_s0 + $0x78] sm:$0xff] }
0x3730   :  { %v7537_v59 = vadd.f32 %v7524_v46, %v7473_v8  ;;  %v9345_v15 = vpop.eup %9344  ;;  %v7578_v21 = vsel %vm65_vm0, %v7570_v26, 0.0  ;;  %v7573_v47 = vmul.f32 %v7538_v34, %v12399_v32  ;;  %v7548_v40 = vsel %vm65_vm0, %v7538_v34, 0.0  ;;  %v9443_v32 = vld [vmem:[%s12249_s0 + $0x70] sm:$0xff]  ;;  %s9464_s0 = smov 0.0  }
0x3731   :  { %v9347_v42 = vpop.eup %9346  ;;  %v7530_v61 = vmul.f32 0.6931472, %v9345_v15  ;;  %v7580_v60 = vadd.f32 %v7579_v30, %v7578_v21  ;;  %v7657_v26 = vsel %vm65_vm0, %v12165_v54, 0.0  ;;  %7786 = sst [smem:[#allocation2 + $0x6]] %s9464_s0 }
0x3732   :  { %v7546_v43 = vsel %vm65_vm0, %v7537_v59, 0.0  ;;  %v7572_v63 = vmul.f32 %v7537_v59, %v10376_v31  ;;  %v7528_v41 = vmul.f32 0.6931472, %v9347_v42  ;;  %v7583_v2 = vsel %vm65_vm0, %v7573_v47, 0.0  ;;  %v12401_v31 = vld [vmem:[#allocation45_spill] sm:$0xff]  ;;  %7788 = sst [smem:[#allocation2 + $0x7]] %s9464_s0 }
0x3733   :  { %v7547_v11 = vadd.f32 %v7546_v43, %v7545_v62  ;;  %v7540_v49 = vadd.f32 %v7530_v61, %v7476_v50  ;;  %v7659_v62 = vsel %vm65_vm0, %v12157_v19, 0.0  ;;  %v7663_v43 = vsel %vm65_vm0, %v12174_v27, 0.0 }
0x3734   :  { %v7581_v53 = vsel %vm65_vm0, %v7572_v63, 0.0  ;;  %v7539_v20 = vadd.f32 %v7528_v41, %v7475_v55 }
0x3735   :  { %v7549_v25 = vadd.f32 %v7548_v40, %v7547_v11  ;;  %v7582_v35 = vadd.f32 %v7581_v53, %v7580_v60  ;;  %v7575_v56 = vmul.f32 %v7540_v49, %v12401_v31  ;;  %v7552_v14 = vsel %vm65_vm0, %v7540_v49, 0.0  ;;  %v12402_v40 = vld [vmem:[#allocation44_spill] sm:$0xff] }
0x3736   :  { %v7550_v9 = vsel %vm65_vm0, %v7539_v20, 0.0  ;;  %v7574_v37 = vmul.f32 %v7539_v20, %v12400_v23  ;;  %v12403_v20 = vld [vmem:[#allocation36_spill] sm:$0xff]  ;;  %v7667_v23 = vsel %vm65_vm0, %v9442_v12, 0.0 }
0x3737   :  { %v7584_v4 = vadd.f32 %v7583_v2, %v7582_v35  ;;  %v7551_v1 = vadd.f32 %v7550_v9, %v7549_v25  ;;  %v7587_v52 = vsel %vm65_vm0, %v7575_v56, 0.0 }
0x3738   :  { %v7585_v38 = vsel %vm65_vm0, %v7574_v37, 0.0 }
0x3739   :  { %v7553_v51 = vadd.f32 %v7552_v14, %v7551_v1  ;;  %v7586_v0 = vadd.f32 %v7585_v38, %v7584_v4 }
0x373b   :  { %v7588_v39 = vadd.f32 %v7587_v52, %v7586_v0 }
0x3774   :  { %v8961_v13 = vpop.f32.mrf.mxu1 }
0x3775   :  { %v7452_v44 = vadd.f32 %v8961_v13, %v12081_v57 }
0x3776   :  { %v7446_v28 = vpop.f32.mrf.mxu1 }
0x3777   :  { %v7486_v5 = vand.u32 2147483647, %v7452_v44  ;;  %7828 = vst.msk [vmem:[%s12255_s6 + $0x38] sm:$0xff] %vm65_vm0, %v7452_v44  ;;  %v7447_v36 = vadd.f32 %v7446_v28, %v12081_v57  ;;  %v7655_v57 = vsel %vm65_vm0, %v12141_v16, 0.0  ;;  %v7462_v15 = vmax.f32 %v7452_v44, 0.0 }
0x3778   :  { %v7656_v17 = vadd.f32 %v7655_v57, %v7654_v7  ;;  %v7470_v30 = vmul.f32 %v9442_v12, %v7452_v44  ;;  %v7661_v16 = vsel %vm65_vm0, %v12182_v48, 0.0  ;;  %v7665_v48 = vsel %vm65_vm0, %v9443_v32, 0.0 }
0x3779   :  { %v7494_v22 = vsub.f32 0.0, %v7486_v5  ;;  %v7485_v33 = vand.u32 2147483647, %v7447_v36  ;;  %7827 = vst.msk [vmem:[%s12255_s6 + $0x30] sm:$0xff] %vm65_vm0, %v7447_v36  ;;  %v7461_v21 = vmax.f32 %v7447_v36, 0.0  ;;  %v7469_v54 = vmul.f32 %v9443_v32, %v7447_v36 }
0x377a   :  { %v7658_v34 = vadd.f32 %v7657_v26, %v7656_v17  ;;  %v7478_v42 = vsub.f32 %v7462_v15, %v7470_v30 }
0x377b   :  { %v7509_v3 = vmul.f32 1.442695, %v7494_v22  ;;  %v7493_v29 = vsub.f32 0.0, %v7485_v33  ;;  %v7477_v61 = vsub.f32 %v7461_v21, %v7469_v54 }
0x377c   :  { %v7660_v59 = vadd.f32 %v7659_v62, %v7658_v34 }
0x377d   :  { %9348 = vpow2.f32 %v7509_v3  ;;  %v7507_v18 = vmul.f32 1.442695, %v7493_v29 }
0x377e   :  { %v7662_v50 = vadd.f32 %v7661_v16, %v7660_v59 }
0x377f   :  { %9350 = vpow2.f32 %v7507_v18 }
0x3780   :  { %v7664_v41 = vadd.f32 %v7663_v43, %v7662_v50 }
0x3782   :  { %v7666_v2 = vadd.f32 %v7665_v48, %v7664_v41 }
0x3784   :  { %v7668_v1 = vadd.f32 %v7667_v23, %v7666_v2 }
0x378a   :  { %v9349_v8 = vpop.eup %9348 }
0x378b   :  { %v7518_v46 = vadd.f32 1.0, %v9349_v8 }
0x378c   :  { %v9351_v58 = vpop.eup %9350 }
0x378d   :  { %v7517_v24 = vadd.f32 1.0, %v9351_v58  ;;  %9352 = vlog2.f32 %v7518_v46 }
0x378f   :  { %9354 = vlog2.f32 %v7517_v24 }
0x379a   :  { %v9353_v47 = vpop.eup %9352 }
0x379b   :  { %v7534_v19 = vmul.f32 0.6931472, %v9353_v47 }
0x379c   :  { %v9355_v63 = vpop.eup %9354 }
0x379d   :  { %v7532_v60 = vmul.f32 0.6931472, %v9355_v63  ;;  %v7542_v55 = vadd.f32 %v7534_v19, %v7478_v42 }
0x379f   :  { %v7541_v11 = vadd.f32 %v7532_v60, %v7477_v61  ;;  %v7577_v25 = vmul.f32 %v7542_v55, %v12403_v20  ;;  %v7556_v9 = vsel %vm65_vm0, %v7542_v55, 0.0 }
0x37a1   :  { %v7554_v49 = vsel %vm65_vm0, %v7541_v11, 0.0  ;;  %v7576_v53 = vmul.f32 %v7541_v11, %v12402_v40  ;;  %v7591_v56 = vsel %vm65_vm0, %v7577_v25, 0.0 }
0x37a2   :  { %v7555_v35 = vadd.f32 %v7554_v49, %v7553_v51 }
0x37a3   :  { %v7589_v27 = vsel %vm65_vm0, %v7576_v53, 0.0 }
0x37a4   :  { %v7557_v37 = vadd.f32 %v7556_v9, %v7555_v35  ;;  %v7590_v31 = vadd.f32 %v7589_v27, %v7588_v39 }
0x37a6   :  { %7558 = vadd.xlane.f32.xlu1 %v7557_v37  ;;  %v7592_v4 = vadd.f32 %v7591_v56, %v7590_v31 }
0x37a8   :  { %7593 = vadd.xlane.f32.xlu0 %v7592_v4 }
0x37aa   :  { %7669 = vadd.xlane.f32.xlu1 %v7668_v1 }
0x37ac   :  { %7645 = vadd.xlane.f32.xlu0 %v11623_v10 }
0x37ae   :  { %7757 = vadd.xlane.f32.xlu1 %v11615_v6 }
0x37b0   :  { %7714 = vadd.xlane.f32.xlu0 %v11580_v45 }
0x382f   :  { %v7559_v14 = vpop.xlane.xlu1 %7558 }
0x3830   :  { %v7560_v38 = vrot.slane %v7559_v14, 4 }
0x3831   :  { %v7594_v51 = vpop.xlane.xlu0 %7593 }
0x3832   :  { %v7561_v0 = vadd.f32 %v7560_v38, %v7559_v14  ;;  %v7595_v52 = vrot.slane %v7594_v51, 4 }
0x3833   :  { %v7670_v13 = vpop.xlane.xlu1 %7669 }
0x3834   :  { %v7562_v39 = vrot.slane %v7561_v0, 2  ;;  %v7596_v44 = vadd.f32 %v7595_v52, %v7594_v51  ;;  %v7671_v28 = vrot.slane %v7670_v13, 4 }
0x3835   :  { %v7646_v5 = vpop.xlane.xlu0 %7645 }
0x3836   :  { %v7597_v36 = vrot.slane %v7596_v44, 2  ;;  %v7672_v22 = vadd.f32 %v7671_v28, %v7670_v13  ;;  %v7647_v33 = vrot.slane %v7646_v5, 4  ;;  %v7563_v3 = vadd.f32 %v7562_v39, %v7561_v0 }
0x3837   :  { %v7758_v59 = vpop.xlane.xlu1 %7757 }
0x3838   :  { %v7673_v29 = vrot.slane %v7672_v22, 2  ;;  %v7648_v10 = vadd.f32 %v7647_v33, %v7646_v5  ;;  %v7564_v18 = vrot.slane %v7563_v3, 1  ;;  %v7598_v6 = vadd.f32 %v7597_v36, %v7596_v44 }
0x3839   :  { %v7715_v62 = vpop.xlane.xlu0 %7714  ;;  %v7759_v12 = vrot.slane %v7758_v59, 4 }
0x383a   :  { %v7649_v8 = vrot.slane %v7648_v10, 2  ;;  %v7565_v45 = vadd.f32 %v7564_v18, %v7563_v3  ;;  %v7599_v46 = vrot.slane %v7598_v6, 1  ;;  %v7674_v7 = vadd.f32 %v7673_v29, %v7672_v22 }
0x383b   :  { %v7716_v15 = vrot.slane %v7715_v62, 4  ;;  %v7760_v16 = vadd.f32 %v7759_v12, %v7758_v59 }
0x383c   :  { %8966 = vpush %v7565_v45  ;;  %v7650_v57 = vadd.f32 %v7649_v8, %v7648_v10  ;;  %v7600_v58 = vadd.f32 %v7599_v46, %v7598_v6  ;;  %v7675_v24 = vrot.slane %v7674_v7, 1 }
0x383d   :  { %v7717_v30 = vadd.f32 %v7716_v15, %v7715_v62  ;;  %v7761_v54 = vrot.slane %v7760_v16, 2 }
0x383e   :  { %v7651_v17 = vrot.slane %v7650_v57, 1  ;;  %8968 = vpush %v7600_v58  ;;  %v7676_v34 = vadd.f32 %v7675_v24, %v7674_v7 }
0x383f   :  { %v7718_v32 = vrot.slane %v7717_v30, 2  ;;  %v7762_v50 = vadd.f32 %v7761_v54, %v7760_v16 }
0x3840   :  { %v7652_v26 = vadd.f32 %v7651_v17, %v7650_v57 }
0x3841   :  { %v7719_v47 = vadd.f32 %v7718_v32, %v7717_v30  ;;  %v7763_v19 = vrot.slane %v7762_v50, 1 }
0x3842   :  { %8970 = vpush %v7652_v26 }
0x3843   :  { %8972 = vpush %v7676_v34  ;;  %v7720_v42 = vrot.slane %v7719_v47, 1  ;;  %v7764_v61 = vadd.f32 %v7763_v19, %v7762_v50 }
0x3845   :  { %v7721_v63 = vadd.f32 %v7720_v42, %v7719_v47 }
0x386d   :  { %s8967_s11 = spop %8966 }
0x386e   :  { %s7569_s9 = smul.f32 0.0009765625, %s8967_s11 }
0x386f   :  { %s8969_s12 = spop %8968 }
0x3870   :  { %7776 = sst [smem:[#allocation2 + $0x1]] %s7569_s9 }
0x3871   :  { %s7602_s13 = ssub.f32 0.0, %s8969_s12 }
0x3873   :  { %s12242_s14 = smul.f32 0.0009765625, %s7602_s13  ;;  %s8971_s15 = spop %8970 }
0x3874   :  { %s8973_s16 = spop %8972 }
0x3875   :  { %7778 = sst [smem:[#allocation2 + $0x2]] %s12242_s14 }
0x3876   :  { %s7678_s17 = sadd.f32 1e-12, %s8973_s16 }
0x3878   :  { %v7679_v21 = vstv %s7678_s17 }
0x3879   :  { %9356 = vrcp.f32 %v7679_v21 }
0x3886   :  { %v9357_v43 = vpop.eup %9356 }
0x3887   :  { %8974 = vpush %v9357_v43 }
0x3888   :  { %8976 = vpush %v7721_v63 }
0x3889   :  { %8978 = vpush %v7764_v61 }
0x38b8   :  { %s8975_s18 = spop %8974 }
0x38b9   :  { %s7682_s21 = smul.f32 %s8975_s18, %s8971_s15  ;;  %s8977_s22 = spop %8976 }
0x38ba   :  { %s7725_s23 = smul.f32 0.0009765625, %s8977_s22  ;;  %s8979_s27 = spop %8978 }
0x38bb   :  { %7780 = sst [smem:[#allocation2 + $0x3]] %s7682_s21  ;;  %s7768_s24 = smul.f32 0.0009765625, %s8979_s27 }
0x38bc   :  { %s7770_s25 = smul.f32 0.1, %s7725_s23  ;;  %7782 = sst [smem:[#allocation2 + $0x4]] %s7725_s23 }
0x38bd   :  { %s7769_s3 = smul.f32 0.1, %s7768_s24 }
0x38be   :  { %s7771_s26 = sadd.f32 %s7770_s25, %s7682_s21 }
0x38bf   :  { %7774 = sst [smem:[#allocation2]] %s7769_s3 }
0x38c0   :  { %s7772_s30 = sadd.f32 %s7771_s26, %s12242_s14 }
0x38c2   :  { %7784 = sst [smem:[#allocation2 + $0x5]] %s7772_s30 }
0x38c3   :  { %9455 = shalt.err (!%p9452_p4)
}
0x38c4   :  { %s9465_s7 = smov [#allocation2]  }
0x38c5   :  { %7848 = dma.smem_to_vmem %s9465_s7, 16, %s7846_s5, [#allocation3]  }
0x38c6   :  { %9456 = dma.done.wait [#allocation3], 16  }
0x38c7   :  { %9457 = vsyncadd [#allocation3], 4294967280 }
0x38c8   :  { %7862 = sfence }
0x38c9   :  { %7863 = vsyncpa [#allocation3], 1 }

</bundles_post_ra>
